<compile_context>
chip_gen: v5e
topology: v5e:2x2
jax: 0.10.0
libtpu: 0.0.40
codegen_flags: <defaults>
</compile_context>

<pallas_src>
import numpy as np

import jax
import jax.numpy as jnp
from jax.experimental import pallas as pl
from jax.experimental.pallas import tpu as pltpu

_EPS = 1e-5        # PyTorch GroupNorm default eps
_NPARAM = 8        # [b1, gn_w, gn_b, c/s-weight, c/s-bias, gn1_w, gn1_b, is_chan]


def _mm(a, b):
    """MXU dot with full-f32 accumulation (accuracy of the constant pool/expand)."""
    return jnp.dot(a, b, precision=jax.lax.Precision.HIGHEST,
                   preferred_element_type=jnp.float32)


def _ema_kernel(gx_ref, mats_ref, rowp_ref, pool_ref, exp_ref, out_ref):
    gx = gx_ref[...].astype(jnp.float32)            # (R, HW) lane+sublane dense

    w_blk = mats_ref[0].astype(jnp.float32)         # kron(I_TB, conv1x1 weight)
    p_shuf = mats_ref[1].astype(jnp.float32)        # channel_shuffle permutation
    p_shuf_t = mats_ref[2].astype(jnp.float32)      # its inverse (transpose)
    g_sum = mats_ref[3].astype(jnp.float32)         # block-diagonal group-sum

    rowp = rowp_ref[...].astype(jnp.float32)        # (R, 8) per-row parameters
    b1 = rowp[:, 0:1]
    gn_w, gn_b = rowp[:, 1:2], rowp[:, 2:3]
    a_bb, b_bb = rowp[:, 3:4], rowp[:, 4:5]         # cweight/sweight, cbias/sbias
    g1w, g1b = rowp[:, 5:6], rowp[:, 6:7]           # gn1 affine (spatial half)
    is_chan = rowp[:, 7:8]                          # 1.0 on the x_0 (channel) half

    # ---------- branch A: pooled 1x1-conv gates + per-channel GroupNorm -----
    pooled = _mm(gx, pool_ref[...].astype(jnp.float32))        # (R, H+W) row/col means
    gates = jax.nn.sigmoid(_mm(w_blk, pooled) + b1)            # hoisted 1x1 channel mix
    gh = _mm(gates, exp_ref[0].astype(jnp.float32))            # (R, HW) row gate -> W
    gw = _mm(gates, exp_ref[1].astype(jnp.float32))            # (R, HW) col gate -> H
    gated = gx * gh * gw

    mu = jnp.mean(gated, axis=-1, keepdims=True)
    var = jnp.mean(jnp.square(gated - mu), axis=-1, keepdims=True)
    x1 = (gated - mu) * jax.lax.rsqrt(var + _EPS) * gn_w + gn_b

    # ---------- branch B: channel / spatial gates (per-row, no x2 tensor) ---
    m = jnp.mean(gx, axis=-1, keepdims=True)
    v = jnp.mean(jnp.square(gx - m), axis=-1, keepdims=True)
    z_sp = (gx - m) * jax.lax.rsqrt(v + _EPS) * g1w + g1b      # GroupNorm(gn1) path
    z = jnp.where(is_chan > 0.5, m, z_sp)                      # avg-pool path for x_0
    y2 = gx * jax.nn.sigmoid(a_bb * z + b_bb)                  # [x_channel ; x_spatial]

    # ---------- cross-branch channel-softmax weights -------------------------
    def group_softmax(col):        # softmax within each CG-row group (shift-invariant)
        e = jnp.exp(col - jnp.max(col, keepdims=True))
        return e / _mm(g_sum, e)

    x11 = group_softmax(jnp.mean(x1, axis=-1, keepdims=True))      # natural order
    m2 = _mm(p_shuf, jnp.mean(y2, axis=-1, keepdims=True))         # shuffled means
    x21 = group_softmax(m2)                                        # coeffs for x1 rows
    c1 = _mm(p_shuf_t, x11)                                        # coeffs for y2 rows

    # per-group weights, summed over channels and broadcast back to every row
    wsum = _mm(g_sum, c1 * y2 + x21 * x1)                          # (R, HW)
    out_ref[...] = (gx * jax.nn.sigmoid(wsum)).astype(out_ref.dtype)


def _build_constants(tb, cg, h, w):
    """Constant pooling / expansion / permutation / group-sum matrices."""
    hw = h * w
    cgh = cg // 2
    pos = np.arange(hw)
    row, col = pos // w, pos % w

    pool = np.zeros((hw, h + w), np.float32)        # flat position -> row & col means
    pool[pos, row] = 1.0 / w
    pool[pos, h + col] = 1.0 / h

    expand = np.zeros((2, h + w, hw), np.float32)   # one-hot gate expansion back to HW
    expand[0, row, pos] = 1.0                       # H (row) gates
    expand[1, h + col, pos] = 1.0                   # W (col) gates

    shuf = np.zeros((cg, cg), np.float32)           # channel_shuffle(cat([c, s]), 2)
    for i in range(cgh):
        shuf[2 * i, i] = 1.0
        shuf[2 * i + 1, cgh + i] = 1.0

    eye = np.eye(tb, dtype=np.float32)
    p_shuf = np.kron(eye, shuf)
    g_sum = np.kron(eye, np.ones((cg, cg), np.float32))
    return pool, expand, p_shuf, g_sum


def _choose_group_batch(bg, cg, hw, in_itemsize):
    """How many (CG, HW) groups each grid step processes."""
    # double-buffered in/out tiles + ~10 live f32 full-tile intermediates per group
    per_group = 4 * cg * hw * in_itemsize + 10 * cg * hw * 4
    kind = ""
    try:
        kind = jax.devices()[0].device_kind.lower()
    except Exception:
        pass
    if "v5" in kind:
        budget, min_steps = 10 << 20, 1    # 16 MiB default scoped VMEM, single TC
    elif "v7" in kind:
        budget, min_steps = 16 << 20, 2    # 64 MiB physical VMEM, 2 TCs per chip
    else:
        budget, min_steps = 20 << 20, 1    # v6e: 32 MiB default scoped VMEM

    best = None
    for tb in range(1, bg + 1):
        if bg % tb:
            continue
        if (tb * cg) % 8 and tb != bg:     # keep sublane-dense (8,128)-legal blocks
            continue
        if tb * per_group > budget:
            continue
        steps = bg // tb
        good = steps >= min_steps and (steps == 1 or steps % 2 == 0)
        key = (good, tb)
        if best is None or key > best[0]:
            best = (key, tb)
    if best is not None:
        return best[1]
    for tb in range(1, bg + 1):            # fallback: smallest legal block
        if bg % tb == 0 and ((tb * cg) % 8 == 0 or tb == bg):
            return tb
    return bg


def ema_pallas(x, params, factor=8):
    b, c, h, w = x.shape
    g = factor
    assert c % g == 0, "channels must be divisible by factor"
    cg = c // g
    assert cg >= 2 and cg % 2 == 0, "channels // factor must be a positive even number"
    cgh = cg // 2
    bg = b * g
    hw = h * w
    assert hw % 128 == 0, "H*W must be a multiple of 128 (see padding TODO)"

    gx = x.reshape(bg * cg, hw)            # rows = (group, channel), lane-dense HW

    tb = _choose_group_batch(bg, cg, hw, x.dtype.itemsize)
    r = tb * cg
    grid = (bg // tb,)

    pool, expand, p_shuf, g_sum = _build_constants(tb, cg, h, w)
    w1 = params["conv1x1_w"].reshape(cg, cg).astype(jnp.float32)
    w_blk = jnp.kron(jnp.eye(tb, dtype=jnp.float32), w1)
    mats = jnp.stack([w_blk, jnp.asarray(p_shuf), jnp.asarray(p_shuf.T),
                      jnp.asarray(g_sum)], axis=0)                 # (4, R, R)

    def vec(name, n):
        return params[name].reshape(n).astype(jnp.float32)

    ones_h = jnp.ones((cgh,), jnp.float32)
    zeros_h = jnp.zeros((cgh,), jnp.float32)
    chan_params = jnp.stack(
        [vec("conv1x1_b", cg),
         vec("gn_w", cg), vec("gn_b", cg),
         jnp.concatenate([vec("cweight", cgh), vec("sweight", cgh)]),
         jnp.concatenate([vec("cbias", cgh), vec("sbias", cgh)]),
         jnp.concatenate([ones_h, vec("gn1_w", cgh)]),
         jnp.concatenate([zeros_h, vec("gn1_b", cgh)]),
         jnp.concatenate([ones_h, zeros_h])],
        axis=1)                                                    # (CG, 8)
    rowp = jnp.tile(chan_params, (tb, 1))                          # (R, 8)

    out = pl.pallas_call(
        _ema_kernel,
        grid=grid,
        in_specs=[
            pl.BlockSpec((r, hw), lambda i: (i, 0)),               # group_x rows
            pl.BlockSpec((4, r, r), lambda i: (0, 0, 0)),          # block-diag matrices
            pl.BlockSpec((r, _NPARAM), lambda i: (0, 0)),          # per-row parameters
            pl.BlockSpec((hw, h + w), lambda i: (0, 0)),           # pooling matrix
            pl.BlockSpec((2, h + w, hw), lambda i: (0, 0, 0)),     # expansion matrices
        ],
        out_specs=pl.BlockSpec((r, hw), lambda i: (i, 0)),
        out_shape=jax.ShapeDtypeStruct((bg * cg, hw), x.dtype),
        compiler_params=pltpu.CompilerParams(dimension_semantics=("parallel",)),
    )(gx, mats, rowp, jnp.asarray(pool), jnp.asarray(expand))
    return out.reshape(b, c, h, w)


# ---------------------- pure-JAX reference (for checking) -------------------
def ema_reference(x, params, factor=8):
    b, c, h, w = x.shape
    g = factor
    cg = c // g
    cgh = cg // 2
    bg = b * g
    gx = x.reshape(bg, cg, h, w)

    w1 = params["conv1x1_w"][:, :, 0, 0]
    b1 = params["conv1x1_b"]

    def gn(t, gamma, beta):
        mu = t.mean(axis=(2, 3), keepdims=True)
        var = ((t - mu) ** 2).mean(axis=(2, 3), keepdims=True)
        t = (t - mu) / jnp.sqrt(var + _EPS)
        return t * gamma[None, :, None, None] + beta[None, :, None, None]

    x_h = gx.mean(axis=3, keepdims=True)                          # (BG,cg,h,1)
    x_w = gx.mean(axis=2, keepdims=True).transpose(0, 1, 3, 2)    # (BG,cg,w,1)
    cat = jnp.concatenate([x_h, x_w], axis=2)                     # (BG,cg,h+w,1)
    hw = jnp.einsum("oi,bisz->bosz", w1, cat) + b1[None, :, None, None]
    xh2, xw2 = hw[:, :, :h], hw[:, :, h:]
    gated = gx * jax.nn.sigmoid(xh2) * jax.nn.sigmoid(xw2.transpose(0, 1, 3, 2))
    x1 = gn(gated, params["gn_w"], params["gn_b"])

    x0a, x1b = gx[:, :cgh], gx[:, cgh:]
    xc = x0a.mean(axis=(2, 3), keepdims=True)
    xc = params["cweight"] * xc + params["cbias"]
    x_channel = x0a * jax.nn.sigmoid(xc)
    xs = gn(x1b, params["gn1_w"], params["gn1_b"])
    xs = params["sweight"] * xs + params["sbias"]
    x_spatial = x1b * jax.nn.sigmoid(xs)
    out_cat = jnp.concatenate([x_channel, x_spatial], axis=1)
    x2 = out_cat.reshape(bg, 2, cgh, h, w).transpose(0, 2, 1, 3, 4).reshape(bg, cg, h, w)

    x11 = jax.nn.softmax(x1.mean(axis=(2, 3)).reshape(bg, 1, cg), axis=-1)
    x12 = x2.reshape(bg, cg, h * w)
    x21 = jax.nn.softmax(x2.mean(axis=(2, 3)).reshape(bg, 1, cg), axis=-1)
    x22 = x1.reshape(bg, cg, h * w)
    weights = (jnp.matmul(x11, x12) + jnp.matmul(x21, x22)).reshape(bg, 1, h, w)
    return (gx * jax.nn.sigmoid(weights)).reshape(b, c, h, w)


def init_ema_params(key, channels, factor=8):
    cg = channels // factor
    cgh = channels // (2 * factor)
    ks = jax.random.split(key, 10)
    s = 1.0 / float(cg) ** 0.5
    return dict(
        conv1x1_w=jax.random.uniform(ks[0], (cg, cg, 1, 1), jnp.float32, -s, s),
        conv1x1_b=jax.random.uniform(ks[1], (cg,), jnp.float32, -s, s),
        gn_w=1.0 + 0.1 * jax.random.normal(ks[2], (cg,), jnp.float32),
        gn_b=0.1 * jax.random.normal(ks[3], (cg,), jnp.float32),
        gn1_w=1.0 + 0.1 * jax.random.normal(ks[4], (cgh,), jnp.float32),
        gn1_b=0.1 * jax.random.normal(ks[5], (cgh,), jnp.float32),
        # module init is cweight=0, cbias=1, sweight=0, sbias=1; small random
        # perturbations (deterministic) are used so every gate path is exercised.
        cweight=0.1 * jax.random.normal(ks[6], (1, cgh, 1, 1), jnp.float32),
        cbias=1.0 + 0.1 * jax.random.normal(ks[7], (1, cgh, 1, 1), jnp.float32),
        sweight=0.1 * jax.random.normal(ks[8], (1, cgh, 1, 1), jnp.float32),
        sbias=1.0 + 0.1 * jax.random.normal(ks[9], (1, cgh, 1, 1), jnp.float32),
    )


if __name__ == "__main__":
    B, C, H, W = 2, 32, 16, 16
    FACTOR = 8

    key = jax.random.PRNGKey(0)
    kx, kp = jax.random.split(key)
    x = jax.random.normal(kx, (B, C, H, W), jnp.float32)
    params = init_ema_params(kp, C, FACTOR)

    y = jax.block_until_ready(ema_pallas(x, params, FACTOR))
    y_ref = jax.block_until_ready(ema_reference(x, params, FACTOR))

    assert y.shape == (B, C, H, W) and y.dtype == jnp.float32
    max_err = float(jnp.max(jnp.abs(y - y_ref)))
    assert max_err < 5e-4, f"mismatch vs reference, max abs err = {max_err}"
    print("KERNEL_OK")
</pallas_src>

<mosaic_0001>
module attributes {stable_mosaic.version = 11 : i64} {
  func.func @_ema_kernel(%arg0: i32, %arg1: memref<64x256xf32, #tpu.memory_space<vmem>>, %arg2: memref<4x64x64xf32, #tpu.memory_space<vmem>>, %arg3: memref<64x8xf32, #tpu.memory_space<vmem>>, %arg4: memref<256x32xf32, #tpu.memory_space<vmem>>, %arg5: memref<2x32x256xf32, #tpu.memory_space<vmem>>, %arg6: memref<64x256xf32, #tpu.memory_space<vmem>>) attributes {dimension_semantics = [#tpu.dimension_semantics<parallel>], iteration_bounds = array<i64: 1>, scalar_prefetch = 0 : i64, scratch_operands = 0 : i64, tpu.core_type = #tpu.core_type<tc>, window_params = [{transform_indices = @transform_0, window_bounds = array<i64: 64, 256>}, {pipeline_mode = #tpu.pipeline_mode<synchronous>, transform_indices = @transform_1, window_bounds = array<i64: 4, 64, 64>}, {pipeline_mode = #tpu.pipeline_mode<synchronous>, transform_indices = @transform_2, window_bounds = array<i64: 64, 8>}, {pipeline_mode = #tpu.pipeline_mode<synchronous>, transform_indices = @transform_3, window_bounds = array<i64: 256, 32>}, {pipeline_mode = #tpu.pipeline_mode<synchronous>, transform_indices = @transform_4, window_bounds = array<i64: 2, 32, 256>}, {transform_indices = @transform_5, window_bounds = array<i64: 64, 256>}]} {
    %c0 = arith.constant 0 : index
    %c0_0 = arith.constant 0 : index
    %0 = vector.load %arg1[%c0, %c0_0] : memref<64x256xf32, #tpu.memory_space<vmem>>, vector<64x256xf32>
    %c0_1 = arith.constant 0 : index
    %c0_2 = arith.constant 0 : index
    %c0_3 = arith.constant 0 : index
    %1 = vector.load %arg2[%c0_1, %c0_2, %c0_3] : memref<4x64x64xf32, #tpu.memory_space<vmem>>, vector<1x64x64xf32>
    %2 = vector.shape_cast %1 : vector<1x64x64xf32> to vector<64x64xf32>
    %c1 = arith.constant 1 : index
    %c0_4 = arith.constant 0 : index
    %c0_5 = arith.constant 0 : index
    %3 = vector.load %arg2[%c1, %c0_4, %c0_5] : memref<4x64x64xf32, #tpu.memory_space<vmem>>, vector<1x64x64xf32>
    %4 = vector.shape_cast %3 : vector<1x64x64xf32> to vector<64x64xf32>
    %c2 = arith.constant 2 : index
    %c0_6 = arith.constant 0 : index
    %c0_7 = arith.constant 0 : index
    %5 = vector.load %arg2[%c2, %c0_6, %c0_7] : memref<4x64x64xf32, #tpu.memory_space<vmem>>, vector<1x64x64xf32>
    %6 = vector.shape_cast %5 : vector<1x64x64xf32> to vector<64x64xf32>
    %c3 = arith.constant 3 : index
    %c0_8 = arith.constant 0 : index
    %c0_9 = arith.constant 0 : index
    %7 = vector.load %arg2[%c3, %c0_8, %c0_9] : memref<4x64x64xf32, #tpu.memory_space<vmem>>, vector<1x64x64xf32>
    %8 = vector.shape_cast %7 : vector<1x64x64xf32> to vector<64x64xf32>
    %c0_10 = arith.constant 0 : index
    %c0_11 = arith.constant 0 : index
    %9 = vector.load %arg3[%c0_10, %c0_11] : memref<64x8xf32, #tpu.memory_space<vmem>>, vector<64x8xf32>
    %10 = vector.extract_strided_slice %9 {offsets = [0, 0], sizes = [64, 1], strides = [1, 1]} : vector<64x8xf32> to vector<64x1xf32>
    %11 = vector.extract_strided_slice %9 {offsets = [0, 1], sizes = [64, 1], strides = [1, 1]} : vector<64x8xf32> to vector<64x1xf32>
    %12 = vector.extract_strided_slice %9 {offsets = [0, 2], sizes = [64, 1], strides = [1, 1]} : vector<64x8xf32> to vector<64x1xf32>
    %13 = vector.extract_strided_slice %9 {offsets = [0, 3], sizes = [64, 1], strides = [1, 1]} : vector<64x8xf32> to vector<64x1xf32>
    %14 = vector.extract_strided_slice %9 {offsets = [0, 4], sizes = [64, 1], strides = [1, 1]} : vector<64x8xf32> to vector<64x1xf32>
    %15 = vector.extract_strided_slice %9 {offsets = [0, 5], sizes = [64, 1], strides = [1, 1]} : vector<64x8xf32> to vector<64x1xf32>
    %16 = vector.extract_strided_slice %9 {offsets = [0, 6], sizes = [64, 1], strides = [1, 1]} : vector<64x8xf32> to vector<64x1xf32>
    %17 = vector.extract_strided_slice %9 {offsets = [0, 7], sizes = [64, 1], strides = [1, 1]} : vector<64x8xf32> to vector<64x1xf32>
    %c0_12 = arith.constant 0 : index
    %c0_13 = arith.constant 0 : index
    %18 = vector.load %arg4[%c0_12, %c0_13] : memref<256x32xf32, #tpu.memory_space<vmem>>, vector<256x32xf32>
    %cst = arith.constant dense<0.000000e+00> : vector<64x32xf32>
    %19 = tpu.matmul %0, %18, %cst {dimension_numbers = #tpu.dot_dimension_numbers<[1], [0], [0], [1], [0, 0, 1, 1], [], []>, precision = #tpu.contract_precision<fp32>} : vector<64x256xf32>, vector<256x32xf32>, vector<64x32xf32> -> vector<64x32xf32>
    %cst_14 = arith.constant dense<0.000000e+00> : vector<64x32xf32>
    %20 = tpu.matmul %2, %19, %cst_14 {dimension_numbers = #tpu.dot_dimension_numbers<[1], [0], [0], [1], [0, 0, 1, 1], [], []>, precision = #tpu.contract_precision<fp32>} : vector<64x64xf32>, vector<64x32xf32>, vector<64x32xf32> -> vector<64x32xf32>
    %21 = vector.broadcast %10 : vector<64x1xf32> to vector<64x32xf32>
    %22 = arith.addf %20, %21 : vector<64x32xf32>
    %23 = arith.negf %22 : vector<64x32xf32>
    %24 = math.exp %23 : vector<64x32xf32>
    %cst_15 = arith.constant 1.000000e+00 : f32
    %25 = vector.broadcast %cst_15 : f32 to vector<64x32xf32>
    %26 = arith.addf %25, %24 : vector<64x32xf32>
    %27 = arith.divf %25, %26 : vector<64x32xf32>
    %c0_16 = arith.constant 0 : index
    %c0_17 = arith.constant 0 : index
    %c0_18 = arith.constant 0 : index
    %28 = vector.load %arg5[%c0_16, %c0_17, %c0_18] : memref<2x32x256xf32, #tpu.memory_space<vmem>>, vector<1x32x256xf32>
    %29 = vector.shape_cast %28 : vector<1x32x256xf32> to vector<32x256xf32>
    %cst_19 = arith.constant dense<0.000000e+00> : vector<64x256xf32>
    %30 = tpu.matmul %27, %29, %cst_19 {dimension_numbers = #tpu.dot_dimension_numbers<[1], [0], [0], [1], [0, 0, 1, 1], [], []>, precision = #tpu.contract_precision<fp32>} : vector<64x32xf32>, vector<32x256xf32>, vector<64x256xf32> -> vector<64x256xf32>
    %c1_20 = arith.constant 1 : index
    %c0_21 = arith.constant 0 : index
    %c0_22 = arith.constant 0 : index
    %31 = vector.load %arg5[%c1_20, %c0_21, %c0_22] : memref<2x32x256xf32, #tpu.memory_space<vmem>>, vector<1x32x256xf32>
    %32 = vector.shape_cast %31 : vector<1x32x256xf32> to vector<32x256xf32>
    %cst_23 = arith.constant dense<0.000000e+00> : vector<64x256xf32>
    %33 = tpu.matmul %27, %32, %cst_23 {dimension_numbers = #tpu.dot_dimension_numbers<[1], [0], [0], [1], [0, 0, 1, 1], [], []>, precision = #tpu.contract_precision<fp32>} : vector<64x32xf32>, vector<32x256xf32>, vector<64x256xf32> -> vector<64x256xf32>
    %34 = arith.mulf %0, %30 : vector<64x256xf32>
    %35 = arith.mulf %34, %33 : vector<64x256xf32>
    %cst_24 = arith.constant dense<0.000000e+00> : vector<64xf32>
    %36 = vector.multi_reduction <add>, %35, %cst_24 [1] : vector<64x256xf32> to vector<64xf32>
    %37 = vector.shape_cast %36 : vector<64xf32> to vector<64x1xf32>
    %cst_25 = arith.constant 2.560000e+02 : f32
    %38 = vector.broadcast %cst_25 : f32 to vector<64x1xf32>
    %39 = arith.divf %37, %38 : vector<64x1xf32>
    %40 = vector.broadcast %39 : vector<64x1xf32> to vector<64x256xf32>
    %41 = arith.subf %35, %40 : vector<64x256xf32>
    %42 = arith.mulf %41, %41 : vector<64x256xf32>
    %cst_26 = arith.constant dense<0.000000e+00> : vector<64xf32>
    %43 = vector.multi_reduction <add>, %42, %cst_26 [1] : vector<64x256xf32> to vector<64xf32>
    %44 = vector.shape_cast %43 : vector<64xf32> to vector<64x1xf32>
    %cst_27 = arith.constant 2.560000e+02 : f32
    %45 = vector.broadcast %cst_27 : f32 to vector<64x1xf32>
    %46 = arith.divf %44, %45 : vector<64x1xf32>
    %47 = vector.broadcast %39 : vector<64x1xf32> to vector<64x256xf32>
    %48 = arith.subf %35, %47 : vector<64x256xf32>
    %cst_28 = arith.constant 9.99999974E-6 : f32
    %49 = vector.broadcast %cst_28 : f32 to vector<64x1xf32>
    %50 = arith.addf %46, %49 : vector<64x1xf32>
    %51 = math.rsqrt %50 : vector<64x1xf32>
    %52 = vector.broadcast %51 : vector<64x1xf32> to vector<64x256xf32>
    %53 = arith.mulf %48, %52 : vector<64x256xf32>
    %54 = vector.broadcast %11 : vector<64x1xf32> to vector<64x256xf32>
    %55 = arith.mulf %53, %54 : vector<64x256xf32>
    %56 = vector.broadcast %12 : vector<64x1xf32> to vector<64x256xf32>
    %57 = arith.addf %55, %56 : vector<64x256xf32>
    %cst_29 = arith.constant dense<0.000000e+00> : vector<64xf32>
    %58 = vector.multi_reduction <add>, %0, %cst_29 [1] : vector<64x256xf32> to vector<64xf32>
    %59 = vector.shape_cast %58 : vector<64xf32> to vector<64x1xf32>
    %cst_30 = arith.constant 2.560000e+02 : f32
    %60 = vector.broadcast %cst_30 : f32 to vector<64x1xf32>
    %61 = arith.divf %59, %60 : vector<64x1xf32>
    %62 = vector.broadcast %61 : vector<64x1xf32> to vector<64x256xf32>
    %63 = arith.subf %0, %62 : vector<64x256xf32>
    %64 = arith.mulf %63, %63 : vector<64x256xf32>
    %cst_31 = arith.constant dense<0.000000e+00> : vector<64xf32>
    %65 = vector.multi_reduction <add>, %64, %cst_31 [1] : vector<64x256xf32> to vector<64xf32>
    %66 = vector.shape_cast %65 : vector<64xf32> to vector<64x1xf32>
    %cst_32 = arith.constant 2.560000e+02 : f32
    %67 = vector.broadcast %cst_32 : f32 to vector<64x1xf32>
    %68 = arith.divf %66, %67 : vector<64x1xf32>
    %69 = vector.broadcast %61 : vector<64x1xf32> to vector<64x256xf32>
    %70 = arith.subf %0, %69 : vector<64x256xf32>
    %cst_33 = arith.constant 9.99999974E-6 : f32
    %71 = vector.broadcast %cst_33 : f32 to vector<64x1xf32>
    %72 = arith.addf %68, %71 : vector<64x1xf32>
    %73 = math.rsqrt %72 : vector<64x1xf32>
    %74 = vector.broadcast %73 : vector<64x1xf32> to vector<64x256xf32>
    %75 = arith.mulf %70, %74 : vector<64x256xf32>
    %76 = vector.broadcast %15 : vector<64x1xf32> to vector<64x256xf32>
    %77 = arith.mulf %75, %76 : vector<64x256xf32>
    %78 = vector.broadcast %16 : vector<64x1xf32> to vector<64x256xf32>
    %79 = arith.addf %77, %78 : vector<64x256xf32>
    %cst_34 = arith.constant 5.000000e-01 : f32
    %80 = vector.broadcast %cst_34 : f32 to vector<64x1xf32>
    %81 = arith.cmpf ogt, %17, %80 : vector<64x1xf32>
    %82 = vector.shape_cast %81 : vector<64x1xi1> to vector<64x1xi1>
    %83 = vector.broadcast %82 : vector<64x1xi1> to vector<64x256xi1>
    %84 = vector.shape_cast %61 : vector<64x1xf32> to vector<64x1xf32>
    %85 = vector.broadcast %84 : vector<64x1xf32> to vector<64x256xf32>
    %86 = arith.select %83, %85, %79 : vector<64x256xi1>, vector<64x256xf32>
    %87 = vector.broadcast %13 : vector<64x1xf32> to vector<64x256xf32>
    %88 = arith.mulf %87, %86 : vector<64x256xf32>
    %89 = vector.broadcast %14 : vector<64x1xf32> to vector<64x256xf32>
    %90 = arith.addf %88, %89 : vector<64x256xf32>
    %91 = arith.negf %90 : vector<64x256xf32>
    %92 = math.exp %91 : vector<64x256xf32>
    %cst_35 = arith.constant 1.000000e+00 : f32
    %93 = vector.broadcast %cst_35 : f32 to vector<64x256xf32>
    %94 = arith.addf %93, %92 : vector<64x256xf32>
    %95 = arith.divf %93, %94 : vector<64x256xf32>
    %96 = arith.mulf %0, %95 : vector<64x256xf32>
    %cst_36 = arith.constant dense<0.000000e+00> : vector<64xf32>
    %97 = vector.multi_reduction <add>, %57, %cst_36 [1] : vector<64x256xf32> to vector<64xf32>
    %98 = vector.shape_cast %97 : vector<64xf32> to vector<64x1xf32>
    %cst_37 = arith.constant 2.560000e+02 : f32
    %99 = vector.broadcast %cst_37 : f32 to vector<64x1xf32>
    %100 = arith.divf %98, %99 : vector<64x1xf32>
    %101 = vector.shape_cast %100 : vector<64x1xf32> to vector<1x64x1xf32>
    %cst_38 = arith.constant dense<0xFF800000> : vector<1xf32>
    %102 = vector.multi_reduction <maximumf>, %101, %cst_38 [1, 2] : vector<1x64x1xf32> to vector<1xf32>
    %103 = vector.shape_cast %102 : vector<1xf32> to vector<1x1x1xf32>
    %104 = vector.extract %103[0, 0, 0] : f32 from vector<1x1x1xf32>
    %105 = vector.broadcast %104 : f32 to vector<1x1xf32>
    %106 = vector.broadcast %105 : vector<1x1xf32> to vector<64x1xf32>
    %107 = arith.subf %100, %106 : vector<64x1xf32>
    %108 = math.exp %107 : vector<64x1xf32>
    %cst_39 = arith.constant dense<0.000000e+00> : vector<64x1xf32>
    %109 = tpu.matmul %8, %108, %cst_39 {dimension_numbers = #tpu.dot_dimension_numbers<[1], [0], [0], [1], [0, 0, 1, 1], [], []>, precision = #tpu.contract_precision<fp32>} : vector<64x64xf32>, vector<64x1xf32>, vector<64x1xf32> -> vector<64x1xf32>
    %110 = arith.divf %108, %109 : vector<64x1xf32>
    %cst_40 = arith.constant dense<0.000000e+00> : vector<64xf32>
    %111 = vector.multi_reduction <add>, %96, %cst_40 [1] : vector<64x256xf32> to vector<64xf32>
    %112 = vector.shape_cast %111 : vector<64xf32> to vector<64x1xf32>
    %cst_41 = arith.constant 2.560000e+02 : f32
    %113 = vector.broadcast %cst_41 : f32 to vector<64x1xf32>
    %114 = arith.divf %112, %113 : vector<64x1xf32>
    %cst_42 = arith.constant dense<0.000000e+00> : vector<64x1xf32>
    %115 = tpu.matmul %4, %114, %cst_42 {dimension_numbers = #tpu.dot_dimension_numbers<[1], [0], [0], [1], [0, 0, 1, 1], [], []>, precision = #tpu.contract_precision<fp32>} : vector<64x64xf32>, vector<64x1xf32>, vector<64x1xf32> -> vector<64x1xf32>
    %116 = vector.shape_cast %115 : vector<64x1xf32> to vector<1x64x1xf32>
    %cst_43 = arith.constant dense<0xFF800000> : vector<1xf32>
    %117 = vector.multi_reduction <maximumf>, %116, %cst_43 [1, 2] : vector<1x64x1xf32> to vector<1xf32>
    %118 = vector.shape_cast %117 : vector<1xf32> to vector<1x1x1xf32>
    %119 = vector.extract %118[0, 0, 0] : f32 from vector<1x1x1xf32>
    %120 = vector.broadcast %119 : f32 to vector<1x1xf32>
    %121 = vector.broadcast %120 : vector<1x1xf32> to vector<64x1xf32>
    %122 = arith.subf %115, %121 : vector<64x1xf32>
    %123 = math.exp %122 : vector<64x1xf32>
    %cst_44 = arith.constant dense<0.000000e+00> : vector<64x1xf32>
    %124 = tpu.matmul %8, %123, %cst_44 {dimension_numbers = #tpu.dot_dimension_numbers<[1], [0], [0], [1], [0, 0, 1, 1], [], []>, precision = #tpu.contract_precision<fp32>} : vector<64x64xf32>, vector<64x1xf32>, vector<64x1xf32> -> vector<64x1xf32>
    %125 = arith.divf %123, %124 : vector<64x1xf32>
    %cst_45 = arith.constant dense<0.000000e+00> : vector<64x1xf32>
    %126 = tpu.matmul %6, %110, %cst_45 {dimension_numbers = #tpu.dot_dimension_numbers<[1], [0], [0], [1], [0, 0, 1, 1], [], []>, precision = #tpu.contract_precision<fp32>} : vector<64x64xf32>, vector<64x1xf32>, vector<64x1xf32> -> vector<64x1xf32>
    %127 = vector.broadcast %126 : vector<64x1xf32> to vector<64x256xf32>
    %128 = arith.mulf %127, %96 : vector<64x256xf32>
    %129 = vector.broadcast %125 : vector<64x1xf32> to vector<64x256xf32>
    %130 = arith.mulf %129, %57 : vector<64x256xf32>
    %131 = arith.addf %128, %130 : vector<64x256xf32>
    %cst_46 = arith.constant dense<0.000000e+00> : vector<64x256xf32>
    %132 = tpu.matmul %8, %131, %cst_46 {dimension_numbers = #tpu.dot_dimension_numbers<[1], [0], [0], [1], [0, 0, 1, 1], [], []>, precision = #tpu.contract_precision<fp32>} : vector<64x64xf32>, vector<64x256xf32>, vector<64x256xf32> -> vector<64x256xf32>
    %133 = arith.negf %132 : vector<64x256xf32>
    %134 = math.exp %133 : vector<64x256xf32>
    %cst_47 = arith.constant 1.000000e+00 : f32
    %135 = vector.broadcast %cst_47 : f32 to vector<64x256xf32>
    %136 = arith.addf %135, %134 : vector<64x256xf32>
    %137 = arith.divf %135, %136 : vector<64x256xf32>
    %138 = arith.mulf %0, %137 : vector<64x256xf32>
    %c0_48 = arith.constant 0 : index
    %c0_49 = arith.constant 0 : index
    %139 = vector.load %arg6[%c0_48, %c0_49] : memref<64x256xf32, #tpu.memory_space<vmem>>, vector<64x256xf32>
    tpu.vector_store %arg6[%c0_48, %c0_49], %138 {strides = array<i32>} : memref<64x256xf32, #tpu.memory_space<vmem>>, vector<64x256xf32>,
    return
  }
  func.func @transform_0(%arg0: i32) -> (i32, i32) {
    %c0_i32 = arith.constant 0 : i32
    %c0_i32_0 = arith.constant 0 : i32
    return %arg0, %c0_i32 : i32, i32
  }
  func.func @transform_1(%arg0: i32) -> (i32, i32, i32) {
    %c0_i32 = arith.constant 0 : i32
    %c0_i32_0 = arith.constant 0 : i32
    %c0_i32_1 = arith.constant 0 : i32
    %c0_i32_2 = arith.constant 0 : i32
    return %c0_i32, %c0_i32_0, %c0_i32_1 : i32, i32, i32
  }
  func.func @transform_2(%arg0: i32) -> (i32, i32) {
    %c0_i32 = arith.constant 0 : i32
    %c0_i32_0 = arith.constant 0 : i32
    %c0_i32_1 = arith.constant 0 : i32
    return %c0_i32, %c0_i32_0 : i32, i32
  }
  func.func @transform_3(%arg0: i32) -> (i32, i32) {
    %c0_i32 = arith.constant 0 : i32
    %c0_i32_0 = arith.constant 0 : i32
    %c0_i32_1 = arith.constant 0 : i32
    return %c0_i32, %c0_i32_0 : i32, i32
  }
  func.func @transform_4(%arg0: i32) -> (i32, i32, i32) {
    %c0_i32 = arith.constant 0 : i32
    %c0_i32_0 = arith.constant 0 : i32
    %c0_i32_1 = arith.constant 0 : i32
    %c0_i32_2 = arith.constant 0 : i32
    return %c0_i32, %c0_i32_0, %c0_i32_1 : i32, i32, i32
  }
  func.func @transform_5(%arg0: i32) -> (i32, i32) {
    %c0_i32 = arith.constant 0 : i32
    %c0_i32_0 = arith.constant 0 : i32
    return %arg0, %c0_i32 : i32, i32
  }
}

</mosaic_0001>

<bundles_post_ra>
// kernel: tpu_custom_call.1
= control target key start
LH: loop header
LB: loop body
LE: loop exit
PB: predicated region body
PF: predicated region fallthrough
CT: control target
= control target key end

     0   :  { %10 = vsyncpa [#allocation3], 0  ;;  %s14390_s0 = inlined_call_operand.hbm [shape: f32[64,256], index: 0, kind: input, shape index: {}]   ;;  %s14391_s1 = inlined_call_operand.vmem [shape: f32[4,64,64], index: 1, kind: input, shape index: {}]   ;;  %s14392_s2 = inlined_call_operand.vmem [shape: f32[64,8], index: 2, kind: input, shape index: {}]   ;;  %s14393_s3 = inlined_call_operand.vmem [shape: f32[256,32], index: 3, kind: input, shape index: {}]   ;;  %s14394_s4 = inlined_call_operand.hbm [shape: f32[2,32,256], index: 4, kind: input, shape index: {}]   ;;  %s14395_s5 = inlined_call_operand.hbm [shape: f32[64,256], index: 5, kind: output, shape index: {}]  }
   0x1   :  { %11 = vsyncpa [#allocation6], 0 }
   0x2   :  { %12 = vsyncpa [#allocation4], 0  ;;  %s17_s20 = sshll.u32 %s14390_s0, 4  ;;  %s8935_s21 = smov [#allocation2]   ;;  %s18_s20 = int_to_ptr.hbm [resolvable:$true] %s17_s20 }
   0x3   :  { %s19_s22 = sshll.u32 %s8935_s21, 4  ;;  %s36_s25 = sshll.u32 %s14394_s4, 4  ;;  %s20_s22 = int_to_ptr.vmem [resolvable:$true] %s19_s22  ;;  %s37_s25 = int_to_ptr.hbm [resolvable:$true] %s36_s25 }
   0x4   :  { %s8936_s26 = smov 256   ;;  %s8937_s27 = smov 16  }
   0x5   :  { %25 = dma.hbm_to_vmem [thread:$0]  %s18_s20, 2048, %s20_s22, [#allocation3], %s8936_s26, %s8936_s26, %s8937_s27  }
   0x6   :  { %s8938_s28 = smov [#allocation5]  }
   0x7   :  { %s38_s29 = sshll.u32 %s8938_s28, 4  ;;  %s39_s29 = int_to_ptr.vmem [resolvable:$true] %s38_s29 }
   0x8   :  { %44 = dma.hbm_to_vmem [thread:$0]  %s37_s25, 2048, %s39_s29, [#allocation6], %s8936_s26, %s8936_s26, %s8937_s27  }
   0x9   :  { %8929 = dma.done.wait [#allocation3], 2048  }
   0xa   :  { %8930 = vsyncadd [#allocation3], 4294965248 }
   0xb   :  { %8931 = dma.done.wait [#allocation6], 2048  }
   0xc   :  { %8932 = vsyncadd [#allocation6], 4294965248  ;;  %v127_v0 = vld [vmem:[%s14393_s3 + $0x78] sm:$0xff]  ;;  %v126_v1 = vld [vmem:[%s14393_s3 + $0x70] sm:$0xff]  ;;  %vm1300_vm0 = vcmask 523264   ;;  %vm1939_vm4 = vcmask 261120  }
   0xd   :  { %v125_v2 = vld [vmem:[%s14393_s3 + $0x68] sm:$0xff]  ;;  %v9000_v3 = vand.u32 4294901760, %v127_v0  ;;  %v9002_v4 = vand.u32 4294901760, %v126_v1  ;;  %v124_v6 = vld [vmem:[%s14393_s3 + $0x60] sm:$0xff]  ;;  %v123_v7 = vld [vmem:[%s14393_s3 + $0x58] sm:$0xff]  ;;  %s8351_s21 = sshll.u32 %s14395_s5, 4  ;;  %s8352_s21 = int_to_ptr.hbm [resolvable:$true] %s8351_s21 }
   0xe   :  { %v9004_v5 = vand.u32 4294901760, %v125_v2  ;;  %v122_v8 = vld [vmem:[%s14393_s3 + $0x50] sm:$0xff]  ;;  %v9015_v9 = vand.u32 4294901760, %v124_v6  ;;  %v9017_v10 = vand.u32 4294901760, %v123_v7  ;;  %v121_v12 = vld [vmem:[%s14393_s3 + $0x48] sm:$0xff]  ;;  %v120_v13 = vld [vmem:[%s14393_s3 + $0x40] sm:$0xff] }
   0xf   :  { %v9019_v11 = vand.u32 4294901760, %v122_v8  ;;  %8429 = vmatpush.msra.mxu2 %v9000_v3  ;;  %v9029_v14 = vsub.f32 %v127_v0, %v9000_v3  ;;  %v9032_v15 = vsub.f32 %v126_v1, %v9002_v4  ;;  %145 = vmatpush.msra.mxu0 %v9000_v3  ;;  %v119_v17 = vld [vmem:[%s14393_s3 + $0x38] sm:$0xff]  ;;  %v9041_v18 = vand.u32 4294901760, %v121_v12  ;;  %v118_v25 = vld [vmem:[%s14393_s3 + $0x30] sm:$0xff]  ;;  %v117_v33 = vld [vmem:[%s14393_s3 + $0x28] sm:$0xff] }
  0x10   :  { %v9035_v16 = vsub.f32 %v125_v2, %v9004_v5  ;;  %v9044_v19 = vsub.f32 %v124_v6, %v9015_v9  ;;  %v9047_v20 = vsub.f32 %v123_v7, %v9017_v10  ;;  %v9053_v24 = vand.u32 4294901760, %v120_v13  ;;  %v116_v42 = vld [vmem:[%s14393_s3 + $0x20] sm:$0xff]  ;;  %v115_v49 = vld [vmem:[%s14393_s3 + $0x18] sm:$0xff]  ;;  %v114_v55 = vld [vmem:[%s14393_s3 + $0x10] sm:$0xff] }
  0x11   :  { %8430 = vmatpush.msra.mxu2 %v9002_v4  ;;  %v243_v21 = vand.u32 4294901760, %v9029_v14  ;;  %v249_v22 = vand.u32 4294901760, %v9032_v15  ;;  %147 = vmatpush.msra.mxu0 %v9002_v4  ;;  %v9060_v27 = vand.u32 4294901760, %v119_v17  ;;  %v9063_v28 = vsub.f32 %v122_v8, %v9019_v11  ;;  %v61_v47 = vld [vmem:[#allocation2 + $0x40] sm:$0xff]  ;;  %v113_v62 = vld [vmem:[%s14393_s3 + $0x8] sm:$0xff] }
  0x12   :  { %v255_v23 = vand.u32 4294901760, %v9035_v16  ;;  %v261_v26 = vand.u32 4294901760, %v9044_v19  ;;  %v267_v32 = vand.u32 4294901760, %v9047_v20  ;;  %v9083_v35 = vand.u32 4294901760, %v118_v25  ;;  %v112_v2 = vld [vmem:[%s14393_s3] sm:$0xff] }
  0x13   :  { %8431 = vmatpush.msra.mxu2 %v9004_v5  ;;  %v244_v29 = vsub.f32 %v9029_v14, %v243_v21  ;;  %v250_v30 = vsub.f32 %v9032_v15, %v249_v22  ;;  %149 = vmatpush.msra.mxu0 %v9004_v5  ;;  %v9086_v36 = vsub.f32 %v121_v12, %v9041_v18  ;;  %v273_v39 = vand.u32 4294901760, %v9063_v28  ;;  %v53_v12 = vld [vmem:[#allocation2] sm:$0xff] }
  0x14   :  { %v256_v31 = vsub.f32 %v9035_v16, %v255_v23  ;;  %v262_v34 = vsub.f32 %v9044_v19, %v261_v26  ;;  %v9092_v40 = vsub.f32 %v120_v13, %v9053_v24  ;;  %v9094_v41 = vand.u32 4294901760, %v117_v33 }
  0x15   :  { %8432 = vmatpush.msra.mxu2 %v9015_v9  ;;  %v245_v37 = vand.u32 4294901760, %v244_v29  ;;  %v251_v38 = vand.u32 4294901760, %v250_v30  ;;  %151 = vmatpush.msra.mxu0 %v9015_v9  ;;  %v268_v44 = vsub.f32 %v9047_v20, %v267_v32  ;;  %v279_v45 = vand.u32 4294901760, %v9086_v36  ;;  %v63_v30 = vld [vmem:[#allocation2 + $0x50] sm:$0xff] }
  0x16   :  { %v257_v43 = vand.u32 4294901760, %v256_v31  ;;  %v9105_v46 = vsub.f32 %v119_v17, %v9060_v27  ;;  %v14405_v48 = vand.u32 4294901760, %v9092_v40  ;;  %v263_v50 = vand.u32 4294901760, %v262_v34 }
  0x17   :  { %8433 = vmatpush.msra.mxu2 %v9017_v10  ;;  %8445 = vmatpush.msra.mxu3 %v245_v37  ;;  %v274_v51 = vsub.f32 %v9063_v28, %v273_v39  ;;  %v9116_v52 = vand.u32 4294901760, %v116_v42  ;;  %v9119_v53 = vsub.f32 %v118_v25, %v9083_v35  ;;  %v9126_v56 = vand.u32 4294901760, %v61_v47 }
  0x18   :  { %246 = vmatpush.msra.mxu1 %v245_v37  ;;  %153 = vmatpush.msra.mxu0 %v9017_v10  ;;  %v14404_v54 = vand.u32 4294901760, %v9105_v46  ;;  %v269_v57 = vand.u32 4294901760, %v268_v44  ;;  %v280_v58 = vsub.f32 %v9086_v36, %v279_v45  ;;  %v9132_v59 = vand.u32 4294901760, %v115_v49 }
  0x19   :  { %8434 = vmatpush.msra.mxu2 %v9019_v11  ;;  %8446 = vmatpush.msra.mxu3 %v251_v38  ;;  %v9135_v60 = vsub.f32 %v117_v33, %v9094_v41  ;;  %v286_v61 = vsub.f32 %v9092_v40, %v14405_v48  ;;  %v275_v63 = vand.u32 4294901760, %v274_v51  ;;  %v9145_v0 = vand.u32 4294901760, %v114_v55  ;;  %v67_v48 = vld [vmem:[#allocation2 + $0x70] sm:$0xff] }
  0x1a   :  { %252 = vmatpush.msra.mxu1 %v251_v38  ;;  %155 = vmatpush.msra.mxu0 %v9019_v11  ;;  %v14400_v1 = vand.u32 4294901760, %v9119_v53  ;;  %v9152_v6 = vsub.f32 %v116_v42, %v9116_v52  ;;  %v292_v7 = vsub.f32 %v9105_v46, %v14404_v54  ;;  %v9159_v8 = vsub.f32 %v61_v47, %v9126_v56 }
  0x1b   :  { %8435 = vmatpush.msra.mxu2 %v9041_v18  ;;  %8447 = vmatpush.msra.mxu3 %v257_v43  ;;  %v281_v13 = vand.u32 4294901760, %v280_v58  ;;  %v9162_v17 = vand.u32 4294901760, %v113_v62  ;;  %v14398_v25 = vand.u32 4294901760, %v9135_v60  ;;  %v9166_v29 = vsub.f32 %v115_v49, %v9132_v59 }
  0x1c   :  { %258 = vmatpush.msra.mxu1 %v257_v43  ;;  %157 = vmatpush.msra.mxu0 %v9041_v18  ;;  %v287_v31 = vand.u32 4294901760, %v286_v61  ;;  %v9168_v33 = vand.u32 4294901760, %v112_v2  ;;  %v298_v34 = vsub.f32 %v9119_v53, %v14400_v1  ;;  %v14396_v37 = vand.u32 4294901760, %v9152_v6 }
  0x1d   :  { %8436 = vmatpush.msra.mxu2 %v9053_v24  ;;  %8448 = vmatpush.msra.mxu3 %v263_v50  ;;  %v9177_v38 = vsub.f32 %v114_v55, %v9145_v0  ;;  %v9179_v42 = vand.u32 4294901760, %v53_v12  ;;  %v293_v43 = vand.u32 4294901760, %v292_v7  ;;  %v14397_v44 = vand.u32 4294901760, %v9159_v8 }
  0x1e   :  { %264 = vmatpush.msra.mxu1 %v263_v50  ;;  %159 = vmatpush.msra.mxu0 %v9053_v24  ;;  %v9183_v47 = vand.u32 4294901760, %v63_v30  ;;  %v304_v49 = vsub.f32 %v9135_v60, %v14398_v25  ;;  %v14399_v50 = vand.u32 4294901760, %v9166_v29  ;;  %v9191_v51 = vsub.f32 %v113_v62, %v9162_v17 }
  0x1f   :  { %8437 = vmatpush.msra.mxu2 %v9060_v27  ;;  %8449 = vmatpush.msra.mxu3 %v269_v57  ;;  %v9194_v55 = vsub.f32 %v53_v12, %v9179_v42  ;;  %v310_v58 = vsub.f32 %v9152_v6, %v14396_v37  ;;  %v14401_v61 = vand.u32 4294901760, %v9177_v38  ;;  %v211_v62 = vsub.f32 %v9159_v8, %v14397_v44  ;;  %v65_v37 = vld [vmem:[#allocation2 + $0x60] sm:$0xff]  ;;  %v55_v44 = vld [vmem:[#allocation2 + $0x10] sm:$0xff] }
  0x20   :  { %270 = vmatpush.msra.mxu1 %v269_v57  ;;  %161 = vmatpush.msra.mxu0 %v9060_v27  ;;  %v299_v57 = vand.u32 4294901760, %v298_v34  ;;  %v9210_v7 = vsub.f32 %v63_v30, %v9183_v47  ;;  %v14403_v34 = vand.u32 4294901760, %v9191_v51  ;;  %v9229_v1 = vand.u32 4294901760, %v65_v37 }
  0x21   :  { %8438 = vmatpush.msra.mxu2 %v9083_v35  ;;  %8450 = vmatpush.msra.mxu3 %v275_v63  ;;  %v14402_v12 = vand.u32 4294901760, %v9194_v55  ;;  %v311_v30 = vand.u32 4294901760, %v310_v58  ;;  %v212_v25 = vand.u32 4294901760, %v211_v62 }
  0x22   :  { %276 = vmatpush.msra.mxu1 %v275_v63  ;;  %163 = vmatpush.msra.mxu0 %v9083_v35  ;;  %v9203_v63 = vsub.f32 %v112_v2, %v9168_v33  ;;  %v316_v2 = vsub.f32 %v9166_v29, %v14399_v50  ;;  %v218_v50 = vand.u32 4294901760, %v9210_v7 }
  0x23   :  { %8439 = vmatpush.msra.mxu2 %v9094_v41  ;;  %8451 = vmatpush.msra.mxu3 %v281_v13 }
  0x24   :  { %282 = vmatpush.msra.mxu1 %v281_v13  ;;  %165 = vmatpush.msra.mxu0 %v9094_v41  ;;  %v305_v13 = vand.u32 4294901760, %v304_v49  ;;  %v333_v49 = vand.u32 4294901760, %v9203_v63  ;;  %v317_v58 = vand.u32 4294901760, %v316_v2  ;;  %v219_v2 = vsub.f32 %v9210_v7, %v218_v50 }
  0x25   :  { %8440 = vmatpush.msra.mxu2 %v9116_v52  ;;  %8452 = vmatpush.msra.mxu3 %v287_v31 }
  0x26   :  { %288 = vmatpush.msra.mxu1 %v287_v31  ;;  %167 = vmatpush.msra.mxu0 %v9116_v52  ;;  %v322_v31 = vsub.f32 %v9177_v38, %v14401_v61  ;;  %v328_v61 = vsub.f32 %v9191_v51, %v14403_v34 }
  0x27   :  { %8441 = vmatpush.msra.mxu2 %v9132_v59  ;;  %8453 = vmatpush.msra.mxu3 %v293_v43 }
  0x28   :  { %294 = vmatpush.msra.mxu1 %v293_v43  ;;  %169 = vmatpush.msra.mxu0 %v9132_v59  ;;  %v179_v43 = vsub.f32 %v9194_v55, %v14402_v12  ;;  %v323_v62 = vand.u32 4294901760, %v322_v31  ;;  %v334_v12 = vsub.f32 %v9203_v63, %v333_v49  ;;  %v329_v54 = vand.u32 4294901760, %v328_v61  ;;  %v57_v61 = vld [vmem:[#allocation2 + $0x20] sm:$0xff] }
  0x29   :  { %8442 = vmatpush.msra.mxu2 %v9145_v0  ;;  %8454 = vmatpush.msra.mxu3 %v299_v57 }
  0x2a   :  { %300 = vmatpush.msra.mxu1 %v299_v57  ;;  %171 = vmatpush.msra.mxu0 %v9145_v0  ;;  %v9236_v57 = vand.u32 4294901760, %v55_v44  ;;  %v180_v34 = vand.u32 4294901760, %v179_v43  ;;  %v9255_v43 = vand.u32 4294901760, %v67_v48 }
  0x2b   :  { %8443 = vmatpush.msra.mxu2 %v9162_v17  ;;  %8455 = vmatpush.msra.mxu3 %v305_v13 }
  0x2c   :  { %306 = vmatpush.msra.mxu1 %v305_v13  ;;  %173 = vmatpush.msra.mxu0 %v9162_v17  ;;  %v9246_v13 = vsub.f32 %v65_v37, %v9229_v1  ;;  %v9251_v31 = vsub.f32 %v55_v44, %v9236_v57 }
  0x2d   :  { %8444 = vmatpush.msra.mxu2 %v9168_v33  ;;  %8456 = vmatpush.msra.mxu3 %v311_v30 }
  0x2e   :  { %213 = vmatmul.f32.vlgmr.msra.gmra.mxu2 %v212_v25  ;;  %312 = vmatpush.msra.mxu1 %v311_v30  ;;  %v335_v25 = vand.u32 4294901760, %v334_v12  ;;  %v220_v30 = vand.u32 4294901760, %v219_v2  ;;  %v226_v37 = vand.u32 4294901760, %v9246_v13  ;;  %v186_v44 = vand.u32 4294901760, %v9251_v31 }
  0x2f   :  { %8457 = vmatpush.msra.mxu3 %v317_v58  ;;  %372 = vmatpush.msrb.mxu2 %v9029_v14 }
  0x30   :  { %318 = vmatpush.msra.mxu1 %v317_v58  ;;  %175 = vmatpush.msra.mxu0 %v9168_v33  ;;  %v227_v12 = vsub.f32 %v9246_v13, %v226_v37  ;;  %v187_v14 = vsub.f32 %v9251_v31, %v186_v44  ;;  %v14630_v58 = vand.u32 4294901760, %v9119_v53 }
  0x31   :  { %8458 = vmatpush.msra.mxu3 %v323_v62  ;;  %375 = vmatpush.msrb.mxu2 %v9032_v15 }
  0x32   :  { %324 = vmatpush.msra.mxu1 %v323_v62  ;;  %181 = vmatmul.f32.vlgmr.msra.gmra.mxu0 %v180_v34  ;;  %v9267_v34 = vsub.f32 %v67_v48, %v9255_v43  ;;  %v228_v48 = vand.u32 4294901760, %v227_v12  ;;  %v188_v15 = vand.u32 4294901760, %v187_v14  ;;  %v14632_v14 = vand.u32 4294901760, %v9152_v6 }
  0x33   :  { %8459 = vmatpush.msra.mxu3 %v329_v54  ;;  %378 = vmatpush.msrb.mxu2 %v9035_v16 }
  0x34   :  { %330 = vmatpush.msra.mxu1 %v329_v54  ;;  %543 = vmatpush.msrb.mxu0 %v243_v21  ;;  %v9276_v21 = vand.u32 4294901760, %v57_v61  ;;  %v234_v54 = vand.u32 4294901760, %v9267_v34 }
  0x35   :  { %8460 = vmatpush.msra.mxu3 %v335_v25  ;;  %381 = vmatpush.msrb.mxu2 %v9044_v19 }
  0x36   :  { %221 = vmatmul.f32.gmra.mxu2 %v220_v30  ;;  %354 = vmatmul.f32.vlgmr.msra.gmra.mxu3 %v9126_v56  ;;  %v235_v16 = vsub.f32 %v9267_v34, %v234_v54  ;;  %v14631_v30 = vand.u32 4294901760, %v9135_v60 }
  0x37   :  { %384 = vmatpush.msrb.mxu2 %v9047_v20  ;;  %460 = vmatpush.msrb.mxu3 %v9000_v3 }
  0x38   :  { %336 = vmatpush.msra.mxu1 %v335_v25  ;;  %547 = vmatpush.msrb.mxu0 %v249_v22  ;;  %v9290_v22 = vsub.f32 %v57_v61, %v9276_v21 }
  0x39   :  { %387 = vmatpush.msrb.mxu2 %v9063_v28  ;;  %462 = vmatpush.msrb.mxu3 %v9002_v4  ;;  %v14628_v28 = vand.u32 4294901760, %v9092_v40 }
  0x3a   :  { %338 = vmatmul.f32.vlgmr.msra.gmra.mxu1 %v9179_v42  ;;  %551 = vmatpush.msrb.mxu0 %v255_v23  ;;  %v59_v23 = vld [vmem:[#allocation2 + $0x30] sm:$0xff] }
  0x3b   :  { %390 = vmatpush.msrb.mxu2 %v9086_v36  ;;  %464 = vmatpush.msrb.mxu3 %v9004_v5  ;;  %v9304_v19 = vand.u32 4294901760, %v59_v23  ;;  %v14629_v36 = vand.u32 4294901760, %v9105_v46 }
  0x3c   :  { %638 = vmatpush.msrb.mxu1 %v9000_v3  ;;  %555 = vmatpush.msrb.mxu0 %v261_v26  ;;  %v194_v3 = vand.u32 4294901760, %v9290_v22  ;;  %v236_v26 = vand.u32 4294901760, %v235_v16 }
  0x3d   :  { %393 = vmatpush.msrb.mxu2 %v9092_v40  ;;  %466 = vmatpush.msrb.mxu3 %v9015_v9 }
  0x3e   :  { %229 = vmatmul.f32.gmra.mxu2 %v228_v48  ;;  %358 = vmatmul.f32.gmra.mxu3 %v9183_v47 }
  0x3f   :  { %396 = vmatpush.msrb.mxu2 %v9105_v46  ;;  %468 = vmatpush.msrb.mxu3 %v9017_v10  ;;  %v141_v46 = vld [vmem:[%s14393_s3 + $0xe8] sm:$0xff] }
  0x40   :  { %640 = vmatpush.msrb.mxu1 %v9002_v4  ;;  %189 = vmatmul.f32.gmra.mxu0 %v188_v15  ;;  %v195_v4 = vsub.f32 %v9290_v22, %v194_v3  ;;  %v9373_v62 = vand.u32 4294901760, %v141_v46 }
  0x41   :  { %399 = vmatpush.msrb.mxu2 %v9119_v53  ;;  %470 = vmatpush.msrb.mxu3 %v9019_v11 }
  0x42   :  { %642 = vmatpush.msrb.mxu1 %v9004_v5  ;;  %559 = vmatpush.msrb.mxu0 %v267_v32  ;;  %v9320_v5 = vsub.f32 %v59_v23, %v9304_v19  ;;  %v9392_v12 = vsub.f32 %v141_v46, %v9373_v62  ;;  %v138_v23 = vld [vmem:[%s14393_s3 + $0xd0] sm:$0xff] }
  0x43   :  { %402 = vmatpush.msrb.mxu2 %v9135_v60  ;;  %472 = vmatpush.msrb.mxu3 %v9041_v18  ;;  %v14633_v60 = vand.u32 4294901760, %v9194_v55 }
  0x44   :  { %644 = vmatpush.msrb.mxu1 %v9015_v9  ;;  %563 = vmatpush.msrb.mxu0 %v273_v39  ;;  %v196_v9 = vand.u32 4294901760, %v195_v4  ;;  %v202_v20 = vand.u32 4294901760, %v9320_v5 }
  0x45   :  { %405 = vmatpush.msrb.mxu2 %v9152_v6  ;;  %474 = vmatpush.msrb.mxu3 %v9053_v24  ;;  %v813_v6 = vand.u32 4294901760, %v9392_v12 }
  0x46   :  { %237 = vmatmul.f32.gmra.mxu2 %v236_v26  ;;  %362 = vmatmul.f32.gmra.mxu3 %v9229_v1  ;;  %v203_v32 = vsub.f32 %v9320_v5, %v202_v20  ;;  %v9420_v26 = vand.u32 4294901760, %v138_v23 }
  0x47   :  { %408 = vmatpush.msrb.mxu2 %v9166_v29  ;;  %476 = vmatpush.msrb.mxu3 %v9060_v27 }
  0x48   :  { %342 = vmatmul.f32.gmra.mxu1 %v9236_v57  ;;  %567 = vmatpush.msrb.mxu0 %v279_v45  ;;  %v204_v39 = vand.u32 4294901760, %v203_v32 }
  0x49   :  { %411 = vmatpush.msrb.mxu2 %v9177_v38  ;;  %478 = vmatpush.msrb.mxu3 %v9083_v35 }
  0x4a   :  { %646 = vmatpush.msrb.mxu1 %v9017_v10  ;;  %571 = vmatpush.msrb.mxu0 %v14628_v28  ;;  %v143_v10 = vld [vmem:[%s14393_s3 + $0xf8] sm:$0xff]  ;;  %v14635_v28 = vand.u32 4294901760, %v9177_v38  ;;  %v14636_v38 = vand.u32 4294901760, %v9191_v51 }
  0x4b   :  { %414 = vmatpush.msrb.mxu2 %v9191_v51  ;;  %480 = vmatpush.msrb.mxu3 %v9094_v41  ;;  %v135_v51 = vld [vmem:[%s14393_s3 + $0xb8] sm:$0xff] }
  0x4c   :  { %648 = vmatpush.msrb.mxu1 %v9019_v11  ;;  %197 = vmatmul.f32.gmra.mxu0 %v196_v9  ;;  %v9349_v11 = vand.u32 4294901760, %v143_v10 }
  0x4d   :  { %417 = vmatpush.msrb.mxu2 %v9203_v63  ;;  %482 = vmatpush.msrb.mxu3 %v9116_v52 }
  0x4e   :  { %650 = vmatpush.msrb.mxu1 %v9041_v18  ;;  %366 = vmatmul.f32.gmra.mxu3 %v9255_v43  ;;  %v142_v18 = vld [vmem:[%s14393_s3 + $0xf0] sm:$0xff]  ;;  %v9360_v40 = vsub.f32 %v143_v10, %v9349_v11  ;;  %v814_v10 = vsub.f32 %v9392_v12, %v813_v6 }
  0x4f   :  { %420 = vmatmul.f32.vlgmr.msrb.gmra.mxu2 %v9194_v55  ;;  %484 = vmatpush.msrb.mxu3 %v9132_v59  ;;  %v9362_v45 = vand.u32 4294901760, %v142_v18 }
  0x50   :  { %575 = vmatpush.msrb.mxu0 %v14629_v36  ;;  %652 = vmatpush.msrb.mxu1 %v9053_v24  ;;  %v140_v24 = vld [vmem:[%s14393_s3 + $0xe0] sm:$0xff]  ;;  %v801_v2 = vand.u32 4294901760, %v9360_v40 }
  0x51   :  { %346 = vmatmul.f32.gmra.mxu1 %v9276_v21  ;;  %486 = vmatpush.msrb.mxu3 %v9145_v0  ;;  %v9379_v25 = vsub.f32 %v142_v18, %v9362_v45  ;;  %v9384_v53 = vand.u32 4294901760, %v140_v24 }
  0x52   :  { %579 = vmatpush.msrb.mxu0 %v14630_v58  ;;  %654 = vmatpush.msrb.mxu1 %v9060_v27  ;;  %v802_v27 = vsub.f32 %v9360_v40, %v801_v2 }
  0x53   :  { %488 = vmatpush.msrb.mxu3 %v9162_v17  ;;  %703 = vmatpush.msra.mxu2 %v9349_v11  ;;  %v807_v61 = vand.u32 4294901760, %v9379_v25  ;;  %v9416_v55 = vsub.f32 %v140_v24, %v9384_v53 }
  0x54   :  { %583 = vmatpush.msrb.mxu0 %v14631_v30  ;;  %656 = vmatpush.msrb.mxu1 %v9083_v35  ;;  %v139_v35 = vld [vmem:[%s14393_s3 + $0xd8] sm:$0xff]  ;;  %v803_v15 = vand.u32 4294901760, %v802_v27  ;;  %v9470_v27 = vand.u32 4294901760, %v135_v51 }
  0x55   :  { %490 = vmatpush.msrb.mxu3 %v9168_v33  ;;  %205 = vmatmul.f32.gmra.mxu0 %v204_v39  ;;  %v9403_v48 = vand.u32 4294901760, %v139_v35  ;;  %v808_v16 = vsub.f32 %v9379_v25, %v807_v61  ;;  %v819_v36 = vand.u32 4294901760, %v9416_v55  ;;  %v9443_v39 = vsub.f32 %v138_v23, %v9420_v26 }
  0x56   :  { %587 = vmatpush.msrb.mxu0 %v14632_v14  ;;  %658 = vmatpush.msrb.mxu1 %v9094_v41  ;;  %v14634_v41 = vand.u32 4294901760, %v9166_v29  ;;  %v137_v29 = vld [vmem:[%s14393_s3 + $0xc8] sm:$0xff] }
  0x57   :  { %425 = vmatmul.f32.gmra.mxu2 %v9251_v31  ;;  %494 = vmatmul.f32.vlgmr.msrb.gmra.mxu3 %v14633_v60  ;;  %v809_v4 = vand.u32 4294901760, %v808_v16  ;;  %v9429_v9 = vsub.f32 %v139_v35, %v9403_v48  ;;  %v9434_v32 = vand.u32 4294901760, %v137_v29  ;;  %v820_v46 = vsub.f32 %v9416_v55, %v819_v36 }
  0x58   :  { %591 = vmatpush.msrb.mxu0 %v14634_v41  ;;  %660 = vmatpush.msrb.mxu1 %v9116_v52  ;;  %v136_v52 = vld [vmem:[%s14393_s3 + $0xc0] sm:$0xff]  ;;  %v831_v24 = vand.u32 4294901760, %v9443_v39  ;;  %v9492_v35 = vsub.f32 %v135_v51, %v9470_v27 }
  0x59   :  { %350 = vmatmul.f32.gmra.mxu1 %v9304_v19  ;;  %705 = vmatpush.msra.mxu2 %v9362_v45  ;;  %v825_v18 = vand.u32 4294901760, %v9429_v9  ;;  %v9456_v58 = vsub.f32 %v137_v29, %v9434_v32 }
  0x5a   :  { %595 = vmatpush.msrb.mxu0 %v14635_v28  ;;  %662 = vmatpush.msrb.mxu1 %v9132_v59  ;;  %v9448_v59 = vand.u32 4294901760, %v136_v52 }
  0x5b   :  { %707 = vmatpush.msra.mxu2 %v9373_v62  ;;  %804 = vmatpush.msra.mxu3 %v803_v15  ;;  %v826_v30 = vsub.f32 %v9429_v9, %v825_v18  ;;  %v837_v63 = vand.u32 4294901760, %v9456_v58  ;;  %v132_v15 = vld [vmem:[%s14393_s3 + $0xa0] sm:$0xff] }
  0x5c   :  { %599 = vmatpush.msrb.mxu0 %v14636_v38  ;;  %664 = vmatpush.msrb.mxu1 %v9145_v0  ;;  %v815_v0 = vand.u32 4294901760, %v814_v10  ;;  %v9479_v14 = vsub.f32 %v136_v52, %v9448_v59  ;;  %v9513_v52 = vand.u32 4294901760, %v132_v15  ;;  %v131_v38 = vld [vmem:[%s14393_s3 + $0x98] sm:$0xff] }
  0x5d   :  { %709 = vmatpush.msra.mxu2 %v9384_v53  ;;  %810 = vmatpush.msra.mxu3 %v809_v4  ;;  %v827_v60 = vand.u32 4294901760, %v826_v30  ;;  %v838_v41 = vsub.f32 %v9456_v58, %v837_v63  ;;  %v14408_v4 = vand.u32 4294901760, %v9492_v35 }
  0x5e   :  { %603 = vmatpush.msrb.mxu0 %v333_v49  ;;  %666 = vmatpush.msrb.mxu1 %v9162_v17  ;;  %v821_v17 = vand.u32 4294901760, %v820_v46  ;;  %v134_v49 = vld [vmem:[%s14393_s3 + $0xb0] sm:$0xff]  ;;  %v843_v16 = vand.u32 4294901760, %v9479_v14 }
  0x5f   :  { %430 = vmatmul.f32.gmra.mxu2 %v9290_v22  ;;  %500 = vmatmul.f32.gmra.mxu3 %v186_v44  ;;  %v9483_v31 = vand.u32 4294901760, %v134_v49  ;;  %v832_v44 = vsub.f32 %v9443_v39, %v831_v24  ;;  %v839_v46 = vand.u32 4294901760, %v838_v41  ;;  %v850_v30 = vsub.f32 %v9492_v35, %v14408_v4 }
  0x60   :  { %605 = vmatmul.f32.vlgmr.msrb.gmra.mxu0 %v9179_v42  ;;  %668 = vmatpush.msrb.mxu1 %v9168_v33  ;;  %v133_v33 = vld [vmem:[%s14393_s3 + $0xa8] sm:$0xff]  ;;  %v844_v28 = vsub.f32 %v9479_v14, %v843_v16 }
  0x61   :  { %670 = vmatmul.f32.vlgmr.msrb.gmra.mxu1 %v9179_v42  ;;  %711 = vmatpush.msra.mxu2 %v9403_v48  ;;  %v9495_v42 = vand.u32 4294901760, %v133_v33  ;;  %v9507_v23 = vsub.f32 %v134_v49, %v9483_v31  ;;  %v833_v29 = vand.u32 4294901760, %v832_v44  ;;  %v129_v49 = vld [vmem:[%s14393_s3 + $0x88] sm:$0xff] }
  0x62   :  { %816 = vmatpush.msra.mxu3 %v815_v0  ;;  %930 = vmatpush.msra.mxu0 %v9360_v40  ;;  %v9528_v0 = vand.u32 4294901760, %v131_v38  ;;  %v845_v22 = vand.u32 4294901760, %v844_v28 }
  0x63   :  { %713 = vmatpush.msra.mxu2 %v9420_v26  ;;  %1018 = vmatpush.msra.mxu1 %v9349_v11  ;;  %v9519_v10 = vsub.f32 %v133_v33, %v9495_v42  ;;  %v14406_v51 = vand.u32 4294901760, %v9507_v23  ;;  %v9547_v33 = vsub.f32 %v132_v15, %v9513_v52  ;;  %v9563_v15 = vand.u32 4294901760, %v129_v49 }
  0x64   :  { %822 = vmatpush.msra.mxu3 %v821_v17  ;;  %933 = vmatpush.msra.mxu0 %v9379_v25  ;;  %v130_v17 = vld [vmem:[%s14393_s3 + $0x90] sm:$0xff]  ;;  %v9559_v41 = vsub.f32 %v131_v38, %v9528_v0 }
  0x65   :  { %715 = vmatpush.msra.mxu2 %v9434_v32  ;;  %1020 = vmatpush.msra.mxu1 %v9362_v45  ;;  %v14407_v44 = vand.u32 4294901760, %v9519_v10 }
  0x66   :  { %828 = vmatpush.msra.mxu3 %v827_v60  ;;  %936 = vmatpush.msra.mxu0 %v9392_v12  ;;  %v128_v60 = vld [vmem:[%s14393_s3 + $0x80] sm:$0xff] }
  0x67   :  { %435 = vmatmul.f32.gmra.mxu2 %v9320_v5  ;;  %506 = vmatmul.f32.gmra.mxu3 %v194_v3  ;;  %v9540_v3 = vand.u32 4294901760, %v130_v17  ;;  %v862_v28 = vsub.f32 %v9519_v10, %v14407_v44  ;;  %v9575_v38 = vand.u32 4294901760, %v128_v60 }
  0x68   :  { %609 = vmatmul.f32.gmra.mxu0 %v9236_v57  ;;  %717 = vmatpush.msra.mxu2 %v9448_v59 }
  0x69   :  { %674 = vmatmul.f32.gmra.mxu1 %v9236_v57  ;;  %834 = vmatpush.msra.mxu3 %v833_v29  ;;  %v856_v57 = vsub.f32 %v9507_v23, %v14406_v51  ;;  %v851_v29 = vand.u32 4294901760, %v850_v30  ;;  %v9571_v51 = vsub.f32 %v130_v17, %v9540_v3  ;;  %v9584_v17 = vsub.f32 %v129_v49, %v9563_v15 }
  0x6a   :  { %719 = vmatpush.msra.mxu2 %v9470_v27  ;;  %939 = vmatpush.msra.mxu0 %v9416_v55  ;;  %v863_v44 = vand.u32 4294901760, %v862_v28  ;;  %v14637_v28 = vand.u32 4294901760, %v9159_v8  ;;  %v14640_v55 = vand.u32 4294901760, %v9519_v10 }
  0x6b   :  { %840 = vmatpush.msra.mxu3 %v839_v46  ;;  %1022 = vmatpush.msra.mxu1 %v9373_v62  ;;  %v867_v46 = vand.u32 4294901760, %v9547_v33  ;;  %v857_v30 = vand.u32 4294901760, %v856_v57  ;;  %v14409_v5 = vand.u32 4294901760, %v9571_v51  ;;  %v885_v49 = vand.u32 4294901760, %v9584_v17 }
  0x6c   :  { %721 = vmatpush.msra.mxu2 %v9483_v31  ;;  %942 = vmatpush.msra.mxu0 %v9429_v9  ;;  %v62_v9 = vld [vmem:[#allocation2 + $0x48] sm:$0xff] }
  0x6d   :  { %846 = vmatpush.msra.mxu3 %v845_v22  ;;  %1024 = vmatpush.msra.mxu1 %v9384_v53  ;;  %v873_v22 = vand.u32 4294901760, %v9559_v41  ;;  %v868_v4 = vsub.f32 %v9547_v33, %v867_v46 }
  0x6e   :  { %723 = vmatpush.msra.mxu2 %v9495_v42  ;;  %945 = vmatpush.msra.mxu0 %v9443_v39 }
  0x6f   :  { %440 = vmatmul.f32.gmra.mxu2 %v9159_v8  ;;  %512 = vmatmul.f32.gmra.mxu3 %v202_v20  ;;  %v9594_v20 = vsub.f32 %v128_v60, %v9575_v38  ;;  %v869_v57 = vand.u32 4294901760, %v868_v4  ;;  %v880_v60 = vsub.f32 %v9571_v51, %v14409_v5  ;;  %v54_v4 = vld [vmem:[#allocation2 + $0x8] sm:$0xff] }
  0x70   :  { %613 = vmatmul.f32.gmra.mxu0 %v9276_v21  ;;  %725 = vmatpush.msra.mxu2 %v9513_v52 }
  0x71   :  { %678 = vmatmul.f32.gmra.mxu1 %v9276_v21  ;;  %852 = vmatpush.msra.mxu3 %v851_v29  ;;  %v874_v21 = vsub.f32 %v9559_v41, %v873_v22  ;;  %v891_v29 = vand.u32 4294901760, %v9594_v20  ;;  %v881_v5 = vand.u32 4294901760, %v880_v60 }
  0x72   :  { %727 = vmatpush.msra.mxu2 %v9528_v0  ;;  %1026 = vmatpush.msra.mxu1 %v9403_v48 }
  0x73   :  { %858 = vmatpush.msra.mxu3 %v857_v30  ;;  %948 = vmatpush.msra.mxu0 %v9456_v58  ;;  %v875_v30 = vand.u32 4294901760, %v874_v21  ;;  %v892_v8 = vsub.f32 %v9594_v20, %v891_v29  ;;  %v9624_v21 = vand.u32 4294901760, %v54_v4 }
  0x74   :  { %729 = vmatpush.msra.mxu2 %v9540_v3  ;;  %1028 = vmatpush.msra.mxu1 %v9420_v26 }
  0x75   :  { %864 = vmatpush.msra.mxu3 %v863_v44  ;;  %951 = vmatpush.msra.mxu0 %v9479_v14  ;;  %v886_v44 = vsub.f32 %v9584_v17, %v885_v49  ;;  %v9638_v40 = vsub.f32 %v54_v4, %v9624_v21 }
  0x76   :  { %731 = vmatpush.msra.mxu2 %v9563_v15  ;;  %1030 = vmatpush.msra.mxu1 %v9434_v32 }
  0x77   :  { %445 = vmatmul.f32.gmra.mxu2 %v9210_v7  ;;  %518 = vmatmul.f32.gmra.mxu3 %v14637_v28  ;;  %v736_v25 = vand.u32 4294901760, %v9638_v40  ;;  %v58_v7 = vld [vmem:[#allocation2 + $0x28] sm:$0xff] }
  0x78   :  { %617 = vmatmul.f32.gmra.mxu0 %v9304_v19  ;;  %733 = vmatpush.msra.mxu2 %v9575_v38 }
  0x79   :  { %682 = vmatmul.f32.gmra.mxu1 %v9304_v19  ;;  %870 = vmatpush.msra.mxu3 %v869_v57  ;;  %v887_v19 = vand.u32 4294901760, %v886_v44  ;;  %v893_v57 = vand.u32 4294901760, %v892_v8 }
  0x7a   :  { %954 = vmatpush.msra.mxu0 %v9492_v35  ;;  %1032 = vmatpush.msra.mxu1 %v9448_v59 }
  0x7b   :  { %876 = vmatpush.msra.mxu3 %v875_v30  ;;  %1101 = vmatpush.msrb.mxu2 %v801_v2  ;;  %v56_v2 = vld [vmem:[#allocation2 + $0x18] sm:$0xff] }
  0x7c   :  { %957 = vmatpush.msra.mxu0 %v9507_v23  ;;  %1034 = vmatpush.msra.mxu1 %v9470_v27 }
  0x7d   :  { %882 = vmatpush.msra.mxu3 %v881_v5  ;;  %1105 = vmatpush.msrb.mxu2 %v807_v61  ;;  %v9645_v61 = vand.u32 4294901760, %v56_v2 }
  0x7e   :  { %960 = vmatpush.msra.mxu0 %v9519_v10  ;;  %1036 = vmatpush.msra.mxu1 %v9483_v31  ;;  %v68_v10 = vld [vmem:[#allocation2 + $0x78] sm:$0xff] }
  0x7f   :  { %450 = vmatmul.f32.gmra.mxu2 %v9246_v13  ;;  %524 = vmatmul.f32.gmra.mxu3 %v218_v50  ;;  %v9664_v50 = vsub.f32 %v56_v2, %v9645_v61 }
  0x80   :  { %621 = vmatmul.f32.gmra.mxu0 %v9126_v56  ;;  %888 = vmatpush.msra.mxu3 %v887_v19 }
  0x81   :  { %686 = vmatmul.f32.gmra.mxu1 %v9126_v56  ;;  %963 = vmatpush.msra.mxu0 %v9547_v33  ;;  %v737_v56 = vsub.f32 %v9638_v40, %v736_v25  ;;  %v9751_v33 = vand.u32 4294901760, %v68_v10 }
  0x82   :  { %894 = vmatpush.msra.mxu3 %v893_v57  ;;  %1038 = vmatpush.msra.mxu1 %v9495_v42 }
  0x83   :  { %966 = vmatpush.msra.mxu0 %v9559_v41  ;;  %1109 = vmatpush.msrb.mxu2 %v813_v6  ;;  %v738_v13 = vand.u32 4294901760, %v737_v56  ;;  %v14639_v6 = vand.u32 4294901760, %v9507_v23 }
  0x84   :  { %1040 = vmatpush.msra.mxu1 %v9513_v52  ;;  %1196 = vmatpush.msrb.mxu3 %v9349_v11  ;;  %v9675_v11 = vand.u32 4294901760, %v58_v7 }
  0x85   :  { %969 = vmatpush.msra.mxu0 %v9571_v51  ;;  %1113 = vmatpush.msrb.mxu2 %v819_v36  ;;  %v9718_v36 = vand.u32 4294901760, %v62_v9 }
  0x86   :  { %1042 = vmatpush.msra.mxu1 %v9528_v0  ;;  %1198 = vmatpush.msrb.mxu3 %v9362_v45  ;;  %v9690_v45 = vsub.f32 %v58_v7, %v9675_v11 }
  0x87   :  { %455 = vmatmul.f32.gmra.mxu2 %v9267_v34  ;;  %530 = vmatmul.f32.gmra.mxu3 %v226_v37  ;;  %v744_v37 = vand.u32 4294901760, %v9664_v50  ;;  %v14638_v34 = vand.u32 4294901760, %v9492_v35  ;;  %v767_v39 = vsub.f32 %v62_v9, %v9718_v36 }
  0x88   :  { %625 = vmatmul.f32.gmra.mxu0 %v9183_v47  ;;  %1044 = vmatpush.msra.mxu1 %v9540_v3 }
  0x89   :  { %690 = vmatmul.f32.gmra.mxu1 %v9183_v47  ;;  %972 = vmatpush.msra.mxu0 %v9584_v17  ;;  %v745_v47 = vsub.f32 %v9664_v50, %v744_v37  ;;  %v768_v58 = vand.u32 4294901760, %v767_v39 }
  0x8a   :  { %1046 = vmatpush.msra.mxu1 %v9563_v15  ;;  %1117 = vmatpush.msrb.mxu2 %v825_v18  ;;  %v14641_v18 = vand.u32 4294901760, %v9571_v51 }
  0x8b   :  { %975 = vmatpush.msra.mxu0 %v9594_v20  ;;  %1200 = vmatpush.msrb.mxu3 %v9373_v62  ;;  %v60_v62 = vld [vmem:[#allocation2 + $0x38] sm:$0xff] }
  0x8c   :  { %1048 = vmatpush.msra.mxu1 %v9575_v38  ;;  %1121 = vmatpush.msrb.mxu2 %v831_v24  ;;  %v9700_v12 = vand.u32 4294901760, %v60_v62 }
  0x8d   :  { %1202 = vmatpush.msrb.mxu3 %v9384_v53  ;;  %v752_v53 = vand.u32 4294901760, %v9690_v45 }
  0x8e   :  { %1125 = vmatpush.msrb.mxu2 %v837_v63  ;;  %v769_v63 = vsub.f32 %v767_v39, %v768_v58 }
  0x8f   :  { %536 = vmatmul.f32.gmra.mxu3 %v234_v54  ;;  %739 = vmatmul.f32.vlgmr.msra.gmra.mxu2 %v738_v13  ;;  %v746_v54 = vand.u32 4294901760, %v745_v47 }
  0x90   :  { %629 = vmatmul.f32.gmra.mxu0 %v9229_v1  ;;  %1129 = vmatpush.msrb.mxu2 %v843_v16  ;;  %v770_v35 = vand.u32 4294901760, %v769_v63 }
  0x91   :  { %694 = vmatmul.f32.gmra.mxu1 %v9229_v1  ;;  %1204 = vmatpush.msrb.mxu3 %v9403_v48  ;;  %v753_v1 = vsub.f32 %v9690_v45, %v752_v53  ;;  %v759_v48 = vsub.f32 %v60_v62, %v9700_v12 }
  0x92   :  { %1133 = vmatpush.msrb.mxu2 %v14638_v34 }
  0x93   :  { %1206 = vmatpush.msrb.mxu3 %v9420_v26  ;;  %v754_v26 = vand.u32 4294901760, %v753_v1 }
  0x94   :  { %1137 = vmatpush.msrb.mxu2 %v14639_v6 }
  0x95   :  { %1208 = vmatpush.msrb.mxu3 %v9434_v32  ;;  %v760_v32 = vand.u32 4294901760, %v759_v48 }
  0x96   :  { %1141 = vmatpush.msrb.mxu2 %v14640_v55 }
  0x97   :  { %747 = vmatmul.f32.gmra.mxu2 %v746_v54  ;;  %896 = vmatmul.f32.vlgmr.msra.gmra.mxu3 %v9624_v21 }
  0x98   :  { %633 = vmatmul.f32.gmra.mxu0 %v9255_v43  ;;  %1145 = vmatpush.msrb.mxu2 %v867_v46 }
  0x99   :  { %698 = vmatmul.f32.gmra.mxu1 %v9255_v43  ;;  %1210 = vmatpush.msrb.mxu3 %v9448_v59  ;;  %v761_v43 = vsub.f32 %v759_v48, %v760_v32  ;;  %v64_v59 = vld [vmem:[#allocation2 + $0x58] sm:$0xff] }
  0x9a   :  { %1149 = vmatpush.msrb.mxu2 %v873_v22 }
  0x9b   :  { %1212 = vmatpush.msrb.mxu3 %v9470_v27  ;;  %v762_v24 = vand.u32 4294901760, %v761_v43  ;;  %v9735_v27 = vand.u32 4294901760, %v64_v59 }
  0x9c   :  { %1153 = vmatpush.msrb.mxu2 %v14641_v18 }
  0x9d   :  { %1214 = vmatpush.msrb.mxu3 %v9483_v31  ;;  %v775_v14 = vsub.f32 %v64_v59, %v9735_v27  ;;  %v66_v31 = vld [vmem:[#allocation2 + $0x68] sm:$0xff] }
  0x9e   :  { %1157 = vmatpush.msrb.mxu2 %v885_v49  ;;  %v9746_v16 = vand.u32 4294901760, %v66_v31 }
  0x9f   :  { %755 = vmatmul.f32.gmra.mxu2 %v754_v26  ;;  %900 = vmatmul.f32.gmra.mxu3 %v9645_v61 }
  0xa0   :  { %978 = vmatmul.f32.vlgmr.msra.gmra.mxu0 %v9638_v40  ;;  %1216 = vmatpush.msrb.mxu3 %v9495_v42  ;;  %v776_v42 = vand.u32 4294901760, %v775_v14 }
  0xa1   :  { %1052 = vmatmul.f32.vlgmr.msra.gmra.mxu1 %v736_v25  ;;  %1161 = vmatpush.msrb.mxu2 %v891_v29 }
  0xa2   :  { %1218 = vmatpush.msrb.mxu3 %v9513_v52  ;;  %v777_v23 = vsub.f32 %v775_v14, %v776_v42  ;;  %v783_v52 = vsub.f32 %v66_v31, %v9746_v16 }
  0xa4   :  { %1220 = vmatpush.msrb.mxu3 %v9528_v0  ;;  %v778_v51 = vand.u32 4294901760, %v777_v23 }
  0xa6   :  { %1222 = vmatpush.msrb.mxu3 %v9540_v3  ;;  %v784_v3 = vand.u32 4294901760, %v783_v52 }
  0xa7   :  { %763 = vmatmul.f32.gmra.mxu2 %v762_v24  ;;  %904 = vmatmul.f32.gmra.mxu3 %v9675_v11 }
  0xa8   :  { %983 = vmatmul.f32.gmra.mxu0 %v9664_v50  ;;  %1224 = vmatpush.msrb.mxu3 %v9563_v15  ;;  %v785_v41 = vsub.f32 %v783_v52, %v784_v3  ;;  %v791_v15 = vsub.f32 %v68_v10, %v9751_v33 }
  0xa9   :  { %1058 = vmatmul.f32.gmra.mxu1 %v744_v37 }
  0xaa   :  { %1226 = vmatpush.msrb.mxu3 %v9575_v38  ;;  %v786_v17 = vand.u32 4294901760, %v785_v41  ;;  %v792_v5 = vand.u32 4294901760, %v791_v15 }
  0xac   :  { %v793_v20 = vsub.f32 %v791_v15, %v792_v5 }
  0xae   :  { %v794_v28 = vand.u32 4294901760, %v793_v20 }
  0xaf   :  { %771 = vmatmul.f32.gmra.mxu2 %v770_v35  ;;  %908 = vmatmul.f32.gmra.mxu3 %v9700_v12  ;;  %v9761_v30 = vpop.f32.mrf.mxu0 }
  0xb0   :  { %988 = vmatmul.f32.gmra.mxu0 %v9690_v45 }
  0xb1   :  { %1064 = vmatmul.f32.gmra.mxu1 %v752_v53  ;;  %v214_v0 = vpop.f32.mrf.mxu2 }
  0xb7   :  { %779 = vmatmul.f32.gmra.mxu2 %v778_v51  ;;  %912 = vmatmul.f32.gmra.mxu3 %v9718_v36  ;;  %v9765_v19 = vpop.f32.mrf.mxu1 }
  0xb8   :  { %993 = vmatmul.f32.gmra.mxu0 %v759_v48 }
  0xb9   :  { %1070 = vmatmul.f32.gmra.mxu1 %v760_v32  ;;  %v222_v46 = vpop.f32.mrf.mxu2  ;;  %v355_v38 = vpop.f32.mrf.mxu3 }
  0xba   :  { %v9755_v22 = vadd.f32 %v355_v38, %v214_v0 }
  0xbd   :  { %v9773_v25 = vpop.f32.mrf.mxu0 }
  0xbf   :  { %787 = vmatmul.f32.gmra.mxu2 %v786_v17  ;;  %916 = vmatmul.f32.gmra.mxu3 %v9735_v27 }
  0xc0   :  { %998 = vmatmul.f32.gmra.mxu0 %v767_v39 }
  0xc1   :  { %1076 = vmatmul.f32.gmra.mxu1 %v768_v58  ;;  %v230_v49 = vpop.f32.mrf.mxu2  ;;  %v359_v60 = vpop.f32.mrf.mxu3 }
  0xc2   :  { %v9758_v29 = vadd.f32 %v359_v60, %v222_v46 }
  0xc5   :  { %v9775_v56 = vpop.f32.mrf.mxu1 }
  0xc7   :  { %795 = vmatmul.f32.gmra.mxu2 %v794_v28  ;;  %920 = vmatmul.f32.gmra.mxu3 %v9746_v16 }
  0xc8   :  { %1003 = vmatmul.f32.gmra.mxu0 %v775_v14 }
  0xc9   :  { %1082 = vmatmul.f32.gmra.mxu1 %v776_v42  ;;  %v238_v4 = vpop.f32.mrf.mxu2  ;;  %v363_v44 = vpop.f32.mrf.mxu3 }
  0xca   :  { %v9763_v8 = vadd.f32 %v363_v44, %v230_v49  ;;  %v9783_v13 = vpop.f32.mrf.mxu0 }
  0xce   :  { %v9787_v37 = vpop.f32.mrf.mxu1 }
  0xcf   :  { %924 = vmatmul.f32.gmra.mxu3 %v9751_v33  ;;  %1163 = vmatmul.f32.vlgmr.msrb.gmra.mxu2 %v9624_v21 }
  0xd0   :  { %1008 = vmatmul.f32.gmra.mxu0 %v783_v52 }
  0xd1   :  { %1088 = vmatmul.f32.gmra.mxu1 %v784_v3  ;;  %v367_v57 = vpop.f32.mrf.mxu3 }
  0xd2   :  { %v9769_v40 = vadd.f32 %v367_v57, %v238_v4  ;;  %v9771_v2 = vpop.f32.mrf.mxu2  ;;  %v9793_v62 = vpop.f32.mrf.mxu0 }
  0xd6   :  { %v9801_v54 = vpop.f32.mrf.mxu1 }
  0xd7   :  { %1167 = vmatmul.f32.gmra.mxu2 %v9645_v61  ;;  %1228 = vmatmul.f32.vlgmr.msrb.gmra.mxu3 %v9624_v21 }
  0xd8   :  { %1013 = vmatmul.f32.gmra.mxu0 %v791_v15 }
  0xd9   :  { %1094 = vmatmul.f32.gmra.mxu1 %v792_v5 }
  0xda   :  { %v9779_v50 = vpop.f32.mrf.mxu2  ;;  %v9781_v7 = vpop.f32.mrf.mxu3 }
  0xde   :  { %v9811_v55 = vpop.f32.mrf.mxu1 }
  0xdf   :  { %1171 = vmatmul.f32.gmra.mxu2 %v9675_v11  ;;  %1232 = vmatmul.f32.gmra.mxu3 %v9645_v61  ;;  %v9805_v61 = vpop.f32.mrf.mxu0  ;;  %14642 = vst [vmem:[#allocation11_spill] sm:$0xff] %v9811_v55 }
  0xe2   :  { %v9789_v47 = vpop.f32.mrf.mxu2  ;;  %v9791_v45 = vpop.f32.mrf.mxu3 }
  0xe6   :  { %v9821_v9 = vpop.f32.mrf.mxu1 }
  0xe7   :  { %1175 = vmatmul.f32.gmra.mxu2 %v9700_v12  ;;  %1236 = vmatmul.f32.gmra.mxu3 %v9675_v11  ;;  %v9819_v48 = vpop.f32.mrf.mxu0 }
  0xea   :  { %v9797_v21 = vpop.f32.mrf.mxu2  ;;  %v9799_v34 = vpop.f32.mrf.mxu3 }
  0xef   :  { %1179 = vmatmul.f32.gmra.mxu2 %v9718_v36  ;;  %1240 = vmatmul.f32.gmra.mxu3 %v9700_v12  ;;  %v9827_v32 = vpop.f32.mrf.mxu0 }
  0xf2   :  { %v9807_v53 = vpop.f32.mrf.mxu2  ;;  %v9809_v6 = vpop.f32.mrf.mxu3 }
  0xf7   :  { %1183 = vmatmul.f32.gmra.mxu2 %v9735_v27  ;;  %1244 = vmatmul.f32.gmra.mxu3 %v9718_v36  ;;  %v9831_v36 = vpop.f32.mrf.mxu1  ;;  %v9835_v39 = vpop.f32.mrf.mxu0 }
  0xfa   :  { %v9815_v11 = vpop.f32.mrf.mxu2  ;;  %v9817_v1 = vpop.f32.mrf.mxu3 }
  0xff   :  { %1187 = vmatmul.f32.gmra.mxu2 %v9746_v16  ;;  %1248 = vmatmul.f32.gmra.mxu3 %v9735_v27  ;;  %v9842_v58 = vpop.f32.mrf.mxu1  ;;  %v9844_v27 = vpop.f32.mrf.mxu0 }
 0x102   :  { %v451_v12 = vpop.f32.mrf.mxu2  ;;  %v9825_v26 = vpop.f32.mrf.mxu3 }
 0x107   :  { %1191 = vmatmul.f32.gmra.mxu2 %v9751_v33  ;;  %1252 = vmatmul.f32.gmra.mxu3 %v9746_v16  ;;  %v9850_v31 = vpop.f32.mrf.mxu1  ;;  %v626_v16 = vpop.f32.mrf.mxu0 }
 0x10a   :  { %v9833_v18 = vpop.f32.mrf.mxu2  ;;  %v531_v43 = vpop.f32.mrf.mxu3 }
 0x10f   :  { %1256 = vmatmul.f32.gmra.mxu3 %v9751_v33  ;;  %v9856_v23 = vpop.f32.mrf.mxu1  ;;  %v630_v0 = vpop.f32.mrf.mxu0 }
 0x112   :  { %v9838_v59 = vpop.f32.mrf.mxu3  ;;  %v9840_v24 = vpop.f32.mrf.mxu2 }
 0x113   :  { %14643 = vst [vmem:[#allocation12_spill] sm:$0xff] %v9840_v24 }
 0x117   :  { %v695_v51 = vpop.f32.mrf.mxu1  ;;  %v634_v41 = vpop.f32.mrf.mxu0 }
 0x11a   :  { %v9846_v63 = vpop.f32.mrf.mxu2  ;;  %v9848_v14 = vpop.f32.mrf.mxu3 }
 0x11b   :  { %14644 = vst [vmem:[#allocation13_spill] sm:$0xff] %v9846_v63 }
 0x11c   :  { %14645 = vst [vmem:[#allocation14_spill] sm:$0xff] %v9848_v14 }
 0x11f   :  { %v9868_v38 = vpop.f32.mrf.mxu1  ;;  %v9870_v17 = vpop.f32.mrf.mxu0 }
 0x120   :  { %14648 = vst [vmem:[#allocation17_spill] sm:$0xff] %v9870_v17 }
 0x122   :  { %v9852_v35 = vpop.f32.mrf.mxu2  ;;  %v9854_v42 = vpop.f32.mrf.mxu3 }
 0x123   :  { %14646 = vst [vmem:[#allocation15_spill] sm:$0xff] %v9854_v42 }
 0x127   :  { %v9872_v49 = vpop.f32.mrf.mxu1  ;;  %v9876_v4 = vpop.f32.mrf.mxu0 }
 0x128   :  { %14649 = vst [vmem:[#allocation18_spill] sm:$0xff] %v9872_v49 }
 0x129   :  { %14650 = vst [vmem:[#allocation19_spill] sm:$0xff] %v9876_v4 }
 0x12a   :  { %v9858_v52 = vpop.f32.mrf.mxu2  ;;  %v9860_v10 = vpop.f32.mrf.mxu3 }
 0x12b   :  { %14647 = vst [vmem:[#allocation16_spill] sm:$0xff] %v9860_v10 }
 0x12f   :  { %v9878_v44 = vpop.f32.mrf.mxu1  ;;  %v9884_v42 = vpop.f32.mrf.mxu0 }
 0x130   :  { %14651 = vst [vmem:[#allocation20_spill] sm:$0xff] %v9878_v44 }
 0x131   :  { %14654 = vst [vmem:[#allocation23_spill] sm:$0xff] %v9884_v42 }
 0x132   :  { %v9862_v3 = vpop.f32.mrf.mxu2  ;;  %v9864_v33 = vpop.f32.mrf.mxu3 }
 0x137   :  { %v9886_v24 = vpop.f32.mrf.mxu1  ;;  %v9892_v49 = vpop.f32.mrf.mxu0 }
 0x138   :  { %14655 = vst [vmem:[#allocation24_spill] sm:$0xff] %v9886_v24 }
 0x13a   :  { %v780_v15 = vpop.f32.mrf.mxu2  ;;  %v9866_v46 = vpop.f32.mrf.mxu3 }
 0x13f   :  { %v9898_v4 = vpop.f32.mrf.mxu1  ;;  %v9900_v44 = vpop.f32.mrf.mxu0 }
 0x140   :  { %14660 = vst [vmem:[#allocation29_spill] sm:$0xff] %v9898_v4  ;;  %v447_v4 = vadd.f32 %v9815_v11, %v9758_v29 }
 0x142   :  { %v788_v5 = vpop.f32.mrf.mxu2  ;;  %v917_v20 = vpop.f32.mrf.mxu3 }
 0x147   :  { %v9906_v42 = vpop.f32.mrf.mxu1 }
 0x148   :  { %14663 = vst [vmem:[#allocation32_spill] sm:$0xff] %v9906_v42  ;;  %v1004_v42 = vpop.f32.mrf.mxu0 }
 0x14a   :  { %v9874_v60 = vpop.f32.mrf.mxu2  ;;  %v921_v28 = vpop.f32.mrf.mxu3 }
 0x14f   :  { %v1083_v11 = vpop.f32.mrf.mxu1 }
 0x152   :  { %v9880_v57 = vpop.f32.mrf.mxu3  ;;  %v9882_v14 = vpop.f32.mrf.mxu2 }
 0x153   :  { %14652 = vst [vmem:[#allocation21_spill] sm:$0xff] %v9880_v57 }
 0x154   :  { %14653 = vst [vmem:[#allocation22_spill] sm:$0xff] %v9882_v14 }
 0x15a   :  { %v9888_v17 = vpop.f32.mrf.mxu2  ;;  %v9890_v63 = vpop.f32.mrf.mxu3 }
 0x15b   :  { %14656 = vst [vmem:[#allocation25_spill] sm:$0xff] %v9888_v17  ;;  %v352_v17 = vadd.f32 %v9801_v54, %v9793_v62  ;;  %v344_v62 = vadd.f32 %v9775_v56, %v9773_v25  ;;  %v526_v54 = vadd.f32 %v9825_v26, %v447_v4  ;;  %v457_v25 = vadd.f32 %v9833_v18, %v9769_v40  ;;  %v1009_v18 = vpop.f32.mrf.mxu0 }
 0x15c   :  { %14657 = vst [vmem:[#allocation26_spill] sm:$0xff] %v9890_v63  ;;  %v452_v63 = vadd.f32 %v451_v12, %v9763_v8 }
 0x15d   :  { %v437_v8 = vadd.f32 %v9797_v21, %v352_v17 }
 0x162   :  { %v9894_v10 = vpop.f32.mrf.mxu2  ;;  %v9896_v55 = vpop.f32.mrf.mxu3 }
 0x163   :  { %14658 = vst [vmem:[#allocation27_spill] sm:$0xff] %v9894_v10  ;;  %v348_v10 = vadd.f32 %v9787_v37, %v9783_v13  ;;  %v340_v13 = vadd.f32 %v9765_v19, %v9761_v30 }
 0x164   :  { %14659 = vst [vmem:[#allocation28_spill] sm:$0xff] %v9896_v55 }
 0x165   :  { %v432_v37 = vadd.f32 %v9789_v47, %v348_v10  ;;  %v422_v56 = vadd.f32 %v9771_v2, %v340_v13 }
 0x167   :  { %v508_v21 = vadd.f32 %v9799_v34, %v432_v37  ;;  %v496_v40 = vadd.f32 %v9781_v7, %v422_v56  ;;  %v1014_v37 = vpop.f32.mrf.mxu0 }
 0x169   :  { %v615_v2 = vadd.f32 %v9827_v32, %v508_v21  ;;  %v1089_v32 = vpop.f32.mrf.mxu1 }
 0x16a   :  { %v9902_v57 = vpop.f32.mrf.mxu2  ;;  %v9904_v14 = vpop.f32.mrf.mxu3 }
 0x16b   :  { %14661 = vst [vmem:[#allocation30_spill] sm:$0xff] %v9902_v57  ;;  %v532_v57 = vadd.f32 %v531_v43, %v452_v63  ;;  %v427_v43 = vadd.f32 %v9779_v50, %v344_v62 }
 0x16c   :  { %14662 = vst [vmem:[#allocation31_spill] sm:$0xff] %v9904_v14  ;;  %v442_v14 = vadd.f32 %v9807_v53, %v9755_v22  ;;  %v514_v22 = vadd.f32 %v9809_v6, %v437_v8  ;;  %v627_v53 = vadd.f32 %v626_v16, %v526_v54  ;;  %v14667_v8 = vld [vmem:[#allocation21_spill] sm:$0xff] }
 0x16d   :  { %v631_v29 = vadd.f32 %v630_v0, %v532_v57  ;;  %v502_v63 = vadd.f32 %v9791_v45, %v427_v43 }
 0x16e   :  { %v520_v12 = vadd.f32 %v9817_v1, %v442_v14  ;;  %v538_v1 = vadd.f32 %v9838_v59, %v457_v25  ;;  %v619_v50 = vadd.f32 %v9835_v39, %v514_v22  ;;  %v692_v6 = vadd.f32 %v9856_v23, %v627_v53  ;;  %v14671_v22 = vld [vmem:[#allocation23_spill] sm:$0xff]  ;;  %v14672_v25 = vld [vmem:[#allocation32_spill] sm:$0xff] }
 0x16f   :  { %v696_v26 = vadd.f32 %v695_v51, %v631_v29  ;;  %v611_v59 = vadd.f32 %v9819_v48, %v502_v63  ;;  %v607_v23 = vadd.f32 %v9805_v61, %v496_v40  ;;  %v680_v51 = vadd.f32 %v9831_v36, %v615_v2  ;;  %v14664_v36 = vld [vmem:[#allocation11_spill] sm:$0xff]  ;;  %v14670_v29 = vld [vmem:[#allocation14_spill] sm:$0xff]  ;;  %v14675_v2 = vld [vmem:[#allocation17_spill] sm:$0xff] }
 0x170   :  { %v623_v30 = vadd.f32 %v9844_v27, %v520_v12  ;;  %v635_v27 = vadd.f32 %v634_v41, %v538_v1  ;;  %v781_v16 = vadd.f32 %v780_v15, %v692_v6  ;;  %v684_v45 = vadd.f32 %v9842_v58, %v619_v50  ;;  %v14673_v50 = vld [vmem:[#allocation19_spill] sm:$0xff] }
 0x171   :  { %v789_v14 = vadd.f32 %v788_v5, %v696_v26  ;;  %v676_v48 = vadd.f32 %v9821_v9, %v611_v59  ;;  %v14669_v9 = vld [vmem:[#allocation15_spill] sm:$0xff]  ;;  %v1095_v1 = vpop.f32.mrf.mxu1 }
 0x172   :  { %v9913_v24 = vpop.f32.mrf.mxu2  ;;  %v9915_v55 = vpop.f32.mrf.mxu3  ;;  %v688_v34 = vadd.f32 %v9850_v31, %v623_v30  ;;  %v918_v39 = vadd.f32 %v917_v20, %v781_v16  ;;  %v700_v31 = vadd.f32 %v9868_v38, %v635_v27  ;;  %v765_v41 = vadd.f32 %v9858_v52, %v684_v45  ;;  %v14666_v38 = vld [vmem:[#allocation13_spill] sm:$0xff]  ;;  %v14678_v45 = vld [vmem:[#allocation27_spill] sm:$0xff] }
 0x173   :  { %v922_v10 = vadd.f32 %v921_v28, %v789_v14  ;;  %v672_v28 = vadd.f32 %v14664_v36, %v607_v23  ;;  %v749_v62 = vadd.f32 %v14666_v38, %v676_v48  ;;  %v14674_v14 = vld [vmem:[#allocation29_spill] sm:$0xff] }
 0x174   :  { %v773_v0 = vadd.f32 %v9862_v3, %v688_v34  ;;  %v757_v3 = vadd.f32 %v9852_v35, %v680_v51  ;;  %v910_v58 = vadd.f32 %v9864_v33, %v765_v41  ;;  %v1005_v20 = vadd.f32 %v1004_v42, %v918_v39  ;;  %v14668_v35 = vld [vmem:[#allocation12_spill] sm:$0xff]  ;;  %v14680_v41 = vld [vmem:[#allocation18_spill] sm:$0xff] }
 0x175   :  { %v1010_v15 = vadd.f32 %v1009_v18, %v922_v10  ;;  %v797_v61 = vadd.f32 %v9874_v60, %v700_v31  ;;  %v741_v13 = vadd.f32 %v14668_v35, %v672_v28  ;;  %v902_v12 = vadd.f32 %v14669_v9, %v749_v62  ;;  %v14676_v18 = vld [vmem:[#allocation24_spill] sm:$0xff] }
 0x176   :  { %v914_v7 = vadd.f32 %v9866_v46, %v773_v0  ;;  %v14665_v46 = vld [vmem:[#allocation16_spill] sm:$0xff]  ;;  %v995_v42 = vadd.f32 %v9892_v49, %v910_v58  ;;  %v1084_v33 = vadd.f32 %v1083_v11, %v1005_v20  ;;  %v69_v11 = vld [vmem:[%s14391_s1] sm:$0xff]  ;;  %v14677_v0 = vld [vmem:[#allocation30_spill] sm:$0xff] }
 0x177   :  { %v906_v4 = vadd.f32 %v14665_v46, %v757_v3  ;;  %v1090_v52 = vadd.f32 %v1089_v32, %v1010_v15  ;;  %v926_v54 = vadd.f32 %v14667_v8, %v797_v61  ;;  %v898_v43 = vadd.f32 %v14670_v29, %v741_v13  ;;  %v14679_v51 = vld [vmem:[#allocation20_spill] sm:$0xff]  ;;  %v14682_v58 = vld [vmem:[#allocation25_spill] sm:$0xff]  ;;  %v14683_v46 = vld [vmem:[#allocation22_spill] sm:$0xff] }
 0x178   :  { %v1000_v57 = vadd.f32 %v9900_v44, %v914_v7  ;;  %v985_v6 = vadd.f32 %v14673_v50, %v902_v12  ;;  %v1072_v40 = vadd.f32 %v14674_v14, %v995_v42  ;;  %v1302_v23 = vsel %vm1300_vm0, %v69_v11, 0  ;;  %v70_v8 = vld [vmem:[%s14391_s1 + $0x8] sm:$0xff] }
 0x179   :  { %v990_v53 = vadd.f32 %v14671_v22, %v906_v4  ;;  %v1015_v21 = vadd.f32 %v1014_v37, %v926_v54  ;;  %v980_v34 = vadd.f32 %v14675_v2, %v898_v43  ;;  %v9991_v28 = vand.u32 4294901760, %v1302_v23  ;;  %v14684_v4 = vld [vmem:[#allocation28_spill] sm:$0xff]  ;;  %v14685_v54 = vld [vmem:[#allocation26_spill] sm:$0xff] }
 0x17a   :  { %v1184_v19 = vpop.f32.mrf.mxu2  ;;  %v1245_v47 = vpop.f32.mrf.mxu3  ;;  %v1078_v44 = vadd.f32 %v14672_v25, %v1000_v57  ;;  %v1177_v59 = vadd.f32 %v14677_v0, %v1072_v40  ;;  %v1060_v7 = vadd.f32 %v14679_v51, %v985_v6  ;;  %v14410_v29 = vmov 0  }
 0x17b   :  { %v1185_v30 = vadd.f32 %v1184_v19, %v1084_v33  ;;  %v1066_v27 = vadd.f32 %v14676_v18, %v990_v53  ;;  %v1096_v10 = vadd.f32 %v1095_v1, %v1015_v21  ;;  %v1054_v15 = vadd.f32 %v14680_v41, %v980_v34  ;;  %v10023_v33 = vld [vmem:[%s14392_s2] sm:$0xff]  ;;  %8479 = vset.pattern.permute.xlu0 %v14410_v29 }
 0x17c   :  { %v1181_v63 = vadd.f32 %v9913_v24, %v1078_v44  ;;  %v1242_v32 = vadd.f32 %v9915_v55, %v1177_v59  ;;  %v1169_v20 = vadd.f32 %v14682_v58, %v1060_v7  ;;  %v10018_v42 = vsub.f32 %v1302_v23, %v9991_v28  ;;  %8480 = vset.pattern.permute.xlu1 %v14410_v29 }
 0x17d   :  { %v1173_v39 = vadd.f32 %v14678_v45, %v1066_v27  ;;  %v1165_v55 = vadd.f32 %v14683_v46, %v1054_v15  ;;  %1262 = vperm.xlu0 %8479, %v10023_v33   ;;  %8481 = vset.pattern.permute.xlu2 %v14410_v29  ;;  %v72_v15 = vld [vmem:[%s14391_s1 + $0x18] sm:$0xff] }
 0x17e   :  { %v1246_v16 = vadd.f32 %v1245_v47, %v1181_v63  ;;  %v14681_v47 = vld [vmem:[#allocation31_spill] sm:$0xff]  ;;  %v1234_v57 = vadd.f32 %v14684_v4, %v1169_v20  ;;  %v9995_v38 = vand.u32 4294901760, %v1242_v32  ;;  %v1351_v1 = vand.u32 4294901760, %v10018_v42 }
 0x17f   :  { %v1238_v3 = vadd.f32 %v14681_v47, %v1173_v39  ;;  %v1230_v35 = vadd.f32 %v14685_v54, %v1165_v55  ;;  %v1311_v20 = vsel %vm1300_vm0, %v72_v15, 0  ;;  %v10126_v55 = vld [vmem:[%s14392_s2 + $0x10] sm:$0xff] }
 0x180   :  { %v10028_v43 = vand.u32 4294901760, %v1234_v57  ;;  %v10031_v22 = vsub.f32 %v1242_v32, %v9995_v38  ;;  %v1352_v27 = vsub.f32 %v10018_v42, %v1351_v1  ;;  %v10130_v54 = vand.u32 4294901760, %v1311_v20  ;;  %1272 = vperm.xlu1 %8480, %v10126_v55  }
 0x181   :  { %v10006_v13 = vand.u32 4294901760, %v1238_v3  ;;  %v10037_v44 = vand.u32 4294901760, %v1230_v35 }
 0x182   :  { %v1249_v17 = vpop.f32.mrf.mxu3  ;;  %v1188_v5 = vpop.f32.mrf.mxu2  ;;  %v10059_v50 = vsub.f32 %v1234_v57, %v10028_v43  ;;  %v1448_v40 = vand.u32 4294901760, %v10031_v22  ;;  %v1353_v51 = vand.u32 4294901760, %v1352_v27  ;;  %v10196_v27 = vld [vmem:[%s14392_s2 + $0x38] sm:$0xff] }
 0x183   :  { %v1189_v60 = vadd.f32 %v1188_v5, %v1090_v52  ;;  %v1250_v49 = vadd.f32 %v1249_v17, %v1185_v30  ;;  %v9985_v5 = vand.u32 4294901760, %v1246_v16  ;;  %v10071_v11 = vsub.f32 %v1230_v35, %v10037_v44 }
 0x184   :  { %v1449_v0 = vsub.f32 %v10031_v22, %v1448_v40  ;;  %v1460_v59 = vand.u32 4294901760, %v10059_v50 }
 0x185   :  { %v9981_v17 = vand.u32 4294901760, %v1250_v49  ;;  %v10009_v37 = vsub.f32 %v1246_v16, %v9985_v5  ;;  %v1466_v39 = vand.u32 4294901760, %v10071_v11 }
 0x186   :  { %v1461_v41 = vsub.f32 %v10059_v50, %v1460_v59 }
 0x187   :  { %v9998_v62 = vsub.f32 %v1250_v49, %v9981_v17  ;;  %v1442_v21 = vand.u32 4294901760, %v10009_v37  ;;  %v71_v49 = vld [vmem:[%s14391_s1 + $0x10] sm:$0xff] }
 0x188   :  { %v1462_v46 = vand.u32 4294901760, %v1461_v41  ;;  %v8940_v41 = vmov 1  }
 0x189   :  { %v1436_v25 = vand.u32 4294901760, %v9998_v62  ;;  %v1443_v18 = vsub.f32 %v10009_v37, %v1442_v21 }
 0x18a   :  { %v1253_v56 = vpop.f32.mrf.mxu3  ;;  %v1192_v19 = vpop.f32.mrf.mxu2 }
 0x18b   :  { %v1254_v26 = vadd.f32 %v1253_v56, %v1189_v60  ;;  %v1193_v31 = vadd.f32 %v1192_v19, %v1096_v10  ;;  %v1305_v60 = vsel %vm1300_vm0, %v70_v8, 0  ;;  %v10040_v56 = vsub.f32 %v1238_v3, %v10006_v13 }
 0x18c   :  { %v10054_v63 = vand.u32 4294901760, %v1305_v60  ;;  %v1437_v14 = vsub.f32 %v9998_v62, %v1436_v25  ;;  %v1308_v19 = vsel %vm1300_vm0, %v71_v49, 0  ;;  %v1444_v23 = vand.u32 4294901760, %v1443_v18  ;;  %v10191_v18 = vld [vmem:[%s14392_s2 + $0x20] sm:$0xff] }
 0x18d   :  { %v9975_v24 = vand.u32 4294901760, %v1254_v26  ;;  %v1454_v2 = vand.u32 4294901760, %v10040_v56  ;;  %v10099_v32 = vand.u32 4294901760, %v1308_v19  ;;  %v1467_v3 = vsub.f32 %v10071_v11, %v1466_v39  ;;  %1282 = vperm.xlu2 %8481, %v10191_v18  }
 0x18e   :  { %v10081_v16 = vsub.f32 %v1305_v60, %v10054_v63  ;;  %v1438_v10 = vand.u32 4294901760, %v1437_v14 }
 0x18f   :  { %v9989_v61 = vsub.f32 %v1254_v26, %v9975_v24  ;;  %v1455_v45 = vsub.f32 %v10040_v56, %v1454_v2  ;;  %v1366_v58 = vsub.f32 %v1308_v19, %v10099_v32  ;;  %v1468_v4 = vand.u32 4294901760, %v1467_v3 }
 0x190   :  { %v1359_v7 = vand.u32 4294901760, %v10081_v16 }
 0x191   :  { %v1430_v12 = vand.u32 4294901760, %v9989_v61  ;;  %v1456_v47 = vand.u32 4294901760, %v1455_v45  ;;  %v1367_v8 = vand.u32 4294901760, %v1366_v58 }
 0x192   :  { %v1257_v48 = vpop.f32.mrf.mxu3 }
 0x193   :  { %v1258_v36 = vadd.f32 %v1257_v48, %v1193_v31  ;;  %v1431_v26 = vsub.f32 %v9989_v61, %v1430_v12  ;;  %v1450_v31 = vand.u32 4294901760, %v1449_v0  ;;  %v1360_v48 = vsub.f32 %v10081_v16, %v1359_v7  ;;  %v10203_v0 = vld [vmem:[%s14392_s2 + $0x28] sm:$0xff] }
 0x194   :  { %v1368_v35 = vsub.f32 %v1366_v58, %v1367_v8 }
 0x195   :  { %v10000_v52 = vand.u32 4294901760, %v1258_v36  ;;  %v1432_v34 = vand.u32 4294901760, %v1431_v26  ;;  %v1361_v57 = vand.u32 4294901760, %v1360_v48  ;;  %1287 = vperm.xlu2 %8481, %v10203_v0  }
 0x197   :  { %v10012_v9 = vsub.f32 %v1258_v36, %v10000_v52  ;;  %1334 = vmatpush.msrb.mxu0 %v10000_v52  ;;  %1585 = vmatpush.msra.mxu3 %v10000_v52  ;;  %v10120_v36 = vld [vmem:[%s14392_s2 + $0x8] sm:$0xff] }
 0x198   :  { %1267 = vperm.xlu0 %8479, %v10120_v36  }
 0x199   :  { %v1424_v53 = vand.u32 4294901760, %v10012_v9  ;;  %1336 = vmatpush.msrb.mxu0 %v9975_v24  ;;  %1513 = vmatpush.msra.mxu2 %v10012_v9 }
 0x19a   :  { %1587 = vmatpush.msra.mxu3 %v9975_v24 }
 0x19b   :  { %1338 = vmatpush.msrb.mxu0 %v9981_v17  ;;  %1516 = vmatpush.msra.mxu2 %v9989_v61  ;;  %v1425_v30 = vsub.f32 %v10012_v9, %v1424_v53  ;;  %v73_v61 = vld [vmem:[%s14391_s1 + $0x20] sm:$0xff]  ;;  %v1374_v9 = vsub.f32 %v1311_v20, %v10130_v54 }
 0x19c   :  { %1589 = vmatpush.msra.mxu3 %v9981_v17 }
 0x19d   :  { %1340 = vmatpush.msrb.mxu0 %v9985_v5  ;;  %1519 = vmatpush.msra.mxu2 %v9998_v62  ;;  %v1426_v6 = vand.u32 4294901760, %v1425_v30  ;;  %v1314_v62 = vsel %vm1300_vm0, %v73_v61, 0  ;;  %v1937_v61 = vld [vmem:[#allocation5 + $0x30] sm:$0xff] }
 0x19e   :  { %1591 = vmatpush.msra.mxu3 %v9985_v5  ;;  %8482 = vset.pattern.permute.xlu2 %v8940_v41 }
 0x19f   :  { %1342 = vmatpush.msrb.mxu0 %v9995_v38  ;;  %1427 = vmatpush.msrb.mxu1 %v1426_v6  ;;  %v10183_v6 = vld [vmem:[%s14392_s2 + $0x30] sm:$0xff] }
 0x1a0   :  { %1522 = vmatpush.msra.mxu2 %v10009_v37  ;;  %1593 = vmatpush.msra.mxu3 %v9995_v38  ;;  %v10152_v37 = vld [vmem:[%s14392_s2 + $0x18] sm:$0xff] }
 0x1a1   :  { %1344 = vmatpush.msrb.mxu0 %v10006_v13  ;;  %1433 = vmatpush.msrb.mxu1 %v1432_v34 }
 0x1a2   :  { %1525 = vmatpush.msra.mxu2 %v10031_v22  ;;  %1595 = vmatpush.msra.mxu3 %v10006_v13 }
 0x1a3   :  { %1346 = vmatpush.msrb.mxu0 %v10028_v43  ;;  %1439 = vmatpush.msrb.mxu1 %v1438_v10 }
 0x1a4   :  { %1528 = vmatpush.msra.mxu2 %v10040_v56  ;;  %1597 = vmatpush.msra.mxu3 %v10028_v43 }
 0x1a5   :  { %1348 = vmatpush.msrb.mxu0 %v10037_v44  ;;  %1445 = vmatpush.msrb.mxu1 %v1444_v23 }
 0x1a6   :  { %1531 = vmatpush.msra.mxu2 %v10059_v50  ;;  %1599 = vmatpush.msra.mxu3 %v10037_v44 }
 0x1a7   :  { %1354 = vmatmul.f32.vlgmr.msrb.gmra.mxu0 %v1353_v51  ;;  %1451 = vmatpush.msrb.mxu1 %v1450_v31 }
 0x1a8   :  { %1660 = vmatpush.msra.mxu0 %v1424_v53  ;;  %1534 = vmatpush.msra.mxu2 %v10071_v11 }
 0x1a9   :  { %1457 = vmatpush.msrb.mxu1 %v1456_v47  ;;  %1537 = vmatmul.f32.vlgmr.msra.gmra.mxu2 %v10018_v42  ;;  %v10157_v42 = vand.u32 4294901760, %v1314_v62 }
 0x1aa   :  { %1664 = vmatpush.msra.mxu0 %v1430_v12  ;;  %1603 = vmatmul.f32.vlgmr.msra.gmra.mxu3 %v1351_v1  ;;  %v1375_v12 = vand.u32 4294901760, %v1374_v9 }
 0x1ab   :  { %1463 = vmatpush.msrb.mxu1 %v1462_v46  ;;  %1277 = vperm.xlu1 %8480, %v10152_v37   ;;  %v1382_v60 = vsub.f32 %v1314_v62, %v10157_v42  ;;  %v1935_v62 = vld [vmem:[#allocation5 + $0x20] sm:$0xff] }
 0x1ac   :  { %1668 = vmatpush.msra.mxu0 %v1436_v25  ;;  %1292 = vperm.xlu0 %8479, %v10183_v6  }
 0x1ad   :  { %1469 = vmatpush.msrb.mxu1 %v1468_v4  ;;  %v1383_v53 = vand.u32 4294901760, %v1382_v60  ;;  %3821 = vperm.xlu2 %8482, %v10023_v33  }
 0x1ae   :  { %1672 = vmatpush.msra.mxu0 %v1442_v21  ;;  %1471 = vmatmul.f32.vlgmr.msrb.gmra.mxu1 %v9991_v28 }
 0x1af   :  { %1362 = vmatmul.f32.gmra.mxu0 %v1361_v57  ;;  %1731 = vmatpush.msra.mxu1 %v10000_v52  ;;  %v1369_v52 = vand.u32 4294901760, %v1368_v35  ;;  %v1384_v56 = vsub.f32 %v1382_v60, %v1383_v53  ;;  %v10247_v35 = vand.u32 4294901760, %v1937_v61 }
 0x1b0   :  { %1676 = vmatpush.msra.mxu0 %v1448_v40 }
 0x1b1   :  { %1733 = vmatpush.msra.mxu1 %v9975_v24  ;;  %1542 = vmatmul.f32.gmra.mxu2 %v10081_v16  ;;  %v74_v24 = vld [vmem:[%s14391_s1 + $0x28] sm:$0xff]  ;;  %v1385_v30 = vand.u32 4294901760, %v1384_v56 }
 0x1b2   :  { %1680 = vmatpush.msra.mxu0 %v1454_v2  ;;  %1609 = vmatmul.f32.gmra.mxu3 %v1359_v7  ;;  %v1317_v22 = vsel %vm1300_vm0, %v74_v24, 0 }
 0x1b3   :  { %1735 = vmatpush.msra.mxu1 %v9981_v17  ;;  %v1376_v17 = vsub.f32 %v1374_v9, %v1375_v12  ;;  %v1389_v25 = vand.u32 4294901760, %v1317_v22  ;;  %1297 = vperm.xlu1 %8480, %v10196_v27  }
 0x1b4   :  { %1684 = vmatpush.msra.mxu0 %v1460_v59  ;;  %8483 = vset.pattern.permute.xlu0 %v8940_v41 }
 0x1b5   :  { %1737 = vmatpush.msra.mxu1 %v9985_v5  ;;  %v1377_v5 = vand.u32 4294901760, %v1376_v17  ;;  %v1390_v21 = vsub.f32 %v1317_v22, %v1389_v25  ;;  %3825 = vperm.xlu0 %8483, %v10120_v36   ;;  %v1933_v17 = vld [vmem:[#allocation5 + $0x10] sm:$0xff] }
 0x1b6   :  { %1688 = vmatpush.msra.mxu0 %v1466_v39  ;;  %1475 = vmatmul.f32.gmra.mxu1 %v10054_v63 }
 0x1b7   :  { %1370 = vmatmul.f32.gmra.mxu0 %v1369_v52  ;;  %1739 = vmatpush.msra.mxu1 %v9995_v38  ;;  %v75_v38 = vld [vmem:[%s14391_s1 + $0x30] sm:$0xff] }
 0x1b8   :  { %3833 = vperm.xlu2 %8482, %v10152_v37   ;;  %1977 = vmatpush.msrb.mxu2 %v10247_v35 }
 0x1b9   :  { %1741 = vmatpush.msra.mxu1 %v10006_v13  ;;  %1547 = vmatmul.f32.gmra.mxu2 %v1366_v58  ;;  %v1320_v13 = vsel %vm1300_vm0, %v75_v38, 0  ;;  %v1931_v38 = vld [vmem:[#allocation5] sm:$0xff] }
 0x1ba   :  { %1615 = vmatmul.f32.gmra.mxu3 %v1367_v8  ;;  %v1397_v26 = vand.u32 4294901760, %v1320_v13 }
 0x1bb   :  { %1743 = vmatpush.msra.mxu1 %v10028_v43  ;;  %v1391_v43 = vand.u32 4294901760, %v1390_v21  ;;  %8484 = vset.pattern.permute.xlu1 %v8940_v41 }
 0x1bc   :  { %v1398_v50 = vsub.f32 %v1320_v13, %v1397_v26  ;;  %3829 = vperm.xlu1 %8484, %v10126_v55  }
 0x1bd   :  { %1745 = vmatpush.msra.mxu1 %v10037_v44  ;;  %v76_v44 = vld [vmem:[%s14391_s1 + $0x38] sm:$0xff]  ;;  %v1392_v1 = vsub.f32 %v1390_v21, %v1391_v43 }
 0x1be   :  { %1479 = vmatmul.f32.gmra.mxu1 %v10099_v32  ;;  %v1323_v14 = vsel %vm1300_vm0, %v76_v44, 0  ;;  %v1399_v49 = vand.u32 4294901760, %v1398_v50 }
 0x1bf   :  { %1378 = vmatmul.f32.gmra.mxu0 %v1377_v5  ;;  %v1393_v40 = vand.u32 4294901760, %v1392_v1  ;;  %v1405_v11 = vand.u32 4294901760, %v1323_v14  ;;  %2196 = vmatpush.msrb.mxu1 %v10247_v35  ;;  %v10258_v5 = vand.u32 4294901760, %v1933_v17 }
 0x1c0   :  { %v1400_v2 = vsub.f32 %v1398_v50, %v1399_v49  ;;  %3841 = vperm.xlu2 %8482, %v10203_v0  }
 0x1c1   :  { %1552 = vmatmul.f32.gmra.mxu2 %v1374_v9  ;;  %v1406_v34 = vsub.f32 %v1323_v14, %v1405_v11 }
 0x1c2   :  { %1621 = vmatmul.f32.gmra.mxu3 %v1375_v12  ;;  %v1401_v16 = vand.u32 4294901760, %v1400_v2  ;;  %v2062_v12 = vsub.f32 %v1937_v61, %v10247_v35 }
 0x1c3   :  { %v1407_v19 = vand.u32 4294901760, %v1406_v34 }
 0x1c4   :  { %3837 = vperm.xlu1 %8484, %v10191_v18   ;;  %2132 = vmatpush.msrb.mxu0 %v2062_v12 }
 0x1c5   :  { %v1408_v10 = vsub.f32 %v1406_v34, %v1407_v19 }
 0x1c6   :  { %1483 = vmatmul.f32.gmra.mxu1 %v10130_v54 }
 0x1c7   :  { %1386 = vmatmul.f32.gmra.mxu0 %v1385_v30  ;;  %v1409_v59 = vand.u32 4294901760, %v1408_v10 }
 0x1c8   :  { %3849 = vperm.xlu2 %8482, %v10196_v27  }
 0x1c9   :  { %1557 = vmatmul.f32.gmra.mxu2 %v1382_v60  ;;  %v2063_v60 = vand.u32 4294901760, %v2062_v12 }
 0x1ca   :  { %1627 = vmatmul.f32.gmra.mxu3 %v1383_v53 }
 0x1cb   :  { %v2064_v13 = vsub.f32 %v2062_v12, %v2063_v60 }
 0x1cc   :  { %3845 = vperm.xlu1 %8484, %v10183_v6  }
 0x1cd   :  { %v2065_v1 = vand.u32 4294901760, %v2064_v13 }
 0x1ce   :  { %1487 = vmatmul.f32.gmra.mxu1 %v10157_v42 }
 0x1cf   :  { %1394 = vmatmul.f32.gmra.mxu0 %v1393_v40  ;;  %2066 = vmatpush.msrb.mxu3 %v2065_v1 }
 0x1d1   :  { %1562 = vmatmul.f32.gmra.mxu2 %v1390_v21 }
 0x1d2   :  { %1633 = vmatmul.f32.gmra.mxu3 %v1391_v43  ;;  %v2074_v43 = vsub.f32 %v1933_v17, %v10258_v5 }
 0x1d4   :  { %v2075_v14 = vand.u32 4294901760, %v2074_v43 }
 0x1d6   :  { %1491 = vmatmul.f32.gmra.mxu1 %v1389_v25 }
 0x1d7   :  { %1402 = vmatmul.f32.gmra.mxu0 %v1401_v16  ;;  %v2076_v16 = vsub.f32 %v2074_v43, %v2075_v14 }
 0x1d9   :  { %1567 = vmatmul.f32.gmra.mxu2 %v1398_v50 }
 0x1da   :  { %1639 = vmatmul.f32.gmra.mxu3 %v1399_v49 }
 0x1de   :  { %1495 = vmatmul.f32.gmra.mxu1 %v1397_v26 }
 0x1df   :  { %1410 = vmatmul.f32.gmra.mxu0 %v1409_v59 }
 0x1e1   :  { %1572 = vmatmul.f32.gmra.mxu2 %v1406_v34 }
 0x1e2   :  { %1645 = vmatmul.f32.gmra.mxu3 %v1407_v19  ;;  %v8941_v19 = vmov 2  }
 0x1e3   :  { %8487 = vset.pattern.permute.xlu2 %v8941_v19  ;;  %8485 = vset.pattern.permute.xlu0 %v8941_v19 }
 0x1e4   :  { %3877 = vperm.xlu2 %8487, %v10126_v55   ;;  %3869 = vperm.xlu0 %8485, %v10023_v33  }
 0x1e5   :  { %8486 = vset.pattern.permute.xlu1 %v8941_v19 }
 0x1e6   :  { %1499 = vmatmul.f32.gmra.mxu1 %v1405_v11  ;;  %3873 = vperm.xlu1 %8486, %v10120_v36  }
 0x1e7   :  { %1690 = vmatmul.f32.vlgmr.msra.gmra.mxu0 %v9991_v28 }
 0x1ec   :  { %3885 = vperm.xlu2 %8487, %v10191_v18   ;;  %3889 = vperm.xlu0 %8485, %v10203_v0  }
 0x1ee   :  { %1747 = vmatmul.f32.vlgmr.msra.gmra.mxu1 %v9991_v28  ;;  %3881 = vperm.xlu1 %8486, %v10152_v37  }
 0x1ef   :  { %1694 = vmatmul.f32.gmra.mxu0 %v10054_v63  ;;  %v1263_v46 = vpop.permute.xlu0 %1262 }
 0x1f2   :  { %v1273_v49 = vpop.permute.xlu1 %1272 }
 0x1f4   :  { %3897 = vperm.xlu2 %8487, %v10196_v27  }
 0x1f6   :  { %1751 = vmatmul.f32.gmra.mxu1 %v10054_v63  ;;  %3893 = vperm.xlu1 %8486, %v10183_v6  }
 0x1f7   :  { %1698 = vmatmul.f32.gmra.mxu0 %v10099_v32 }
 0x1fe   :  { %1755 = vmatmul.f32.gmra.mxu1 %v10099_v32 }
 0x1ff   :  { %1702 = vmatmul.f32.gmra.mxu0 %v10130_v54 }
 0x206   :  { %1759 = vmatmul.f32.gmra.mxu1 %v10130_v54 }
 0x207   :  { %1706 = vmatmul.f32.gmra.mxu0 %v10157_v42 }
 0x20a   :  { %v1268_v24 = vpop.permute.xlu0 %1267 }
 0x20e   :  { %1763 = vmatmul.f32.gmra.mxu1 %v10157_v42  ;;  %v10254_v42 = vand.u32 4294901760, %v1935_v62 }
 0x20f   :  { %1710 = vmatmul.f32.gmra.mxu0 %v1389_v25 }
 0x210   :  { %v2068_v22 = vsub.f32 %v1935_v62, %v10254_v42  ;;  %1979 = vmatpush.msrb.mxu2 %v10254_v42  ;;  %2198 = vmatpush.msrb.mxu1 %v10254_v42 }
 0x212   :  { %v2069_v30 = vand.u32 4294901760, %v2068_v22  ;;  %2135 = vmatpush.msrb.mxu0 %v2068_v22  ;;  %1981 = vmatpush.msrb.mxu2 %v10258_v5 }
 0x213   :  { %2200 = vmatpush.msrb.mxu1 %v10258_v5 }
 0x214   :  { %v2070_v50 = vsub.f32 %v2068_v22, %v2069_v30  ;;  %2138 = vmatpush.msrb.mxu0 %v2074_v43 }
 0x216   :  { %1767 = vmatmul.f32.gmra.mxu1 %v1389_v25  ;;  %v2071_v34 = vand.u32 4294901760, %v2070_v50 }
 0x217   :  { %1714 = vmatmul.f32.gmra.mxu0 %v1397_v26 }
 0x218   :  { %2072 = vmatpush.msrb.mxu3 %v2071_v34 }
 0x21e   :  { %1771 = vmatmul.f32.gmra.mxu1 %v1397_v26  ;;  %v1982_v26 = vand.u32 4294901760, %v1931_v38 }
 0x21f   :  { %1718 = vmatmul.f32.gmra.mxu0 %v1405_v11 }
 0x220   :  { %2202 = vmatpush.msrb.mxu1 %v1982_v26  ;;  %1983 = vmatpush.msrb.mxu2 %v1982_v26 }
 0x222   :  { %2267 = vmatpush.msra.mxu2 %v2063_v60 }
 0x224   :  { %v1355_v28 = vpop.f32.mrf.mxu0  ;;  %2271 = vmatpush.msra.mxu2 %v2069_v30 }
 0x225   :  { %v1356_v4 = vadd.f32 %v1355_v28, %v1263_v46 }
 0x226   :  { %1775 = vmatmul.f32.gmra.mxu1 %v1405_v11  ;;  %v2080_v11 = vsub.f32 %v1931_v38, %v1982_v26  ;;  %2275 = vmatpush.msra.mxu2 %v2075_v14 }
 0x228   :  { %v2081_v10 = vand.u32 4294901760, %v2080_v11  ;;  %2141 = vmatpush.msrb.mxu0 %v2080_v11 }
 0x22a   :  { %v2082_v41 = vsub.f32 %v2080_v11, %v2081_v10  ;;  %2279 = vmatpush.msra.mxu2 %v2081_v10 }
 0x22b   :  { %v1472_v63 = vpop.f32.mrf.mxu1 }
 0x22c   :  { %v1363_v45 = vpop.f32.mrf.mxu0  ;;  %v1538_v3 = vpop.f32.mrf.mxu2  ;;  %v1473_v9 = vadd.f32 %v1472_v63, %v1356_v4  ;;  %v2077_v63 = vand.u32 4294901760, %v2076_v16  ;;  %v2083_v4 = vand.u32 4294901760, %v2082_v41 }
 0x22d   :  { %v1604_v20 = vpop.f32.mrf.mxu3  ;;  %v1364_v56 = vadd.f32 %v1363_v45, %v1268_v24 }
 0x22e   :  { %v1539_v53 = vadd.f32 %v1538_v3, %v1473_v9  ;;  %2078 = vmatpush.msrb.mxu3 %v2077_v63 }
 0x230   :  { %v1605_v40 = vadd.f32 %v1604_v20, %v1539_v53  ;;  %2084 = vmatpush.msrb.mxu3 %v2083_v4 }
 0x232   :  { %2326 = vmatpush.msra.mxu3 %v10247_v35 }
 0x233   :  { %v10216_v39 = vpop.f32.mrf.mxu1 }
 0x234   :  { %v10218_v23 = vpop.f32.mrf.mxu0  ;;  %v1543_v8 = vpop.f32.mrf.mxu2  ;;  %v1477_v2 = vadd.f32 %v10216_v39, %v1364_v56  ;;  %2328 = vmatpush.msra.mxu3 %v10254_v42 }
 0x235   :  { %v10249_v52 = vpop.f32.mrf.mxu3  ;;  %v1372_v39 = vadd.f32 %v10218_v23, %v1273_v49  ;;  %v1278_v23 = vpop.permute.xlu1 %1277 }
 0x236   :  { %v1544_v3 = vadd.f32 %v1543_v8, %v1477_v2  ;;  %2330 = vmatpush.msra.mxu3 %v10258_v5 }
 0x238   :  { %v1611_v55 = vadd.f32 %v10249_v52, %v1544_v3  ;;  %v1283_v52 = vpop.permute.xlu2 %1282  ;;  %2332 = vmatpush.msra.mxu3 %v1982_v26 }
 0x23b   :  { %v10220_v51 = vpop.f32.mrf.mxu1 }
 0x23c   :  { %v10222_v7 = vpop.f32.mrf.mxu0  ;;  %v1548_v44 = vpop.f32.mrf.mxu2  ;;  %v1481_v9 = vadd.f32 %v10220_v51, %v1372_v39 }
 0x23d   :  { %v1616_v59 = vpop.f32.mrf.mxu3  ;;  %v1380_v36 = vadd.f32 %v10222_v7, %v1278_v23 }
 0x23e   :  { %v1549_v12 = vadd.f32 %v1548_v44, %v1481_v9 }
 0x240   :  { %v1617_v22 = vadd.f32 %v1616_v59, %v1549_v12  ;;  %v1293_v59 = vpop.permute.xlu0 %1292 }
 0x243   :  { %v10224_v32 = vpop.f32.mrf.mxu1 }
 0x244   :  { %v10226_v31 = vpop.f32.mrf.mxu0  ;;  %v1553_v8 = vpop.f32.mrf.mxu2  ;;  %v1485_v42 = vadd.f32 %v10224_v32, %v1380_v36 }
 0x245   :  { %v1622_v24 = vpop.f32.mrf.mxu3  ;;  %v1388_v7 = vadd.f32 %v10226_v31, %v1283_v52  ;;  %v1288_v31 = vpop.permute.xlu2 %1287 }
 0x246   :  { %v1554_v5 = vadd.f32 %v1553_v8, %v1485_v42 }
 0x248   :  { %v1623_v44 = vadd.f32 %v1622_v24, %v1554_v5 }
 0x24b   :  { %v10231_v15 = vpop.f32.mrf.mxu1 }
 0x24c   :  { %v10233_v47 = vpop.f32.mrf.mxu0  ;;  %v1558_v53 = vpop.f32.mrf.mxu2  ;;  %v1489_v30 = vadd.f32 %v10231_v15, %v1388_v7 }
 0x24d   :  { %v1628_v37 = vpop.f32.mrf.mxu3 }
 0x24e   :  { %v1559_v27 = vadd.f32 %v1558_v53, %v1489_v30 }
 0x250   :  { %v1629_v10 = vadd.f32 %v1628_v37, %v1559_v27 }
 0x253   :  { %v10237_v48 = vpop.f32.mrf.mxu1 }
 0x254   :  { %v10239_v58 = vpop.f32.mrf.mxu0  ;;  %v1563_v11 = vpop.f32.mrf.mxu2 }
 0x255   :  { %v1634_v39 = vpop.f32.mrf.mxu3  ;;  %v1404_v4 = vadd.f32 %v10239_v58, %v1293_v59 }
 0x25b   :  { %v10243_v57 = vpop.f32.mrf.mxu1 }
 0x25c   :  { %v10245_v54 = vpop.f32.mrf.mxu0  ;;  %v1497_v58 = vadd.f32 %v10243_v57, %v1404_v4  ;;  %v1568_v52 = vpop.f32.mrf.mxu2 }
 0x263   :  { %v10261_v25 = vpop.f32.mrf.mxu1 }
 0x264   :  { %v1691_v21 = vpop.f32.mrf.mxu0 }
 0x265   :  { %v1692_v28 = vadd.f32 %v1691_v21, %v1605_v40  ;;  %v1396_v40 = vadd.f32 %v10233_v47, %v1288_v31 }
 0x267   :  { %v1493_v41 = vadd.f32 %v10237_v48, %v1396_v40 }
 0x269   :  { %v1564_v8 = vadd.f32 %v1563_v11, %v1493_v41 }
 0x26b   :  { %v1748_v45 = vpop.f32.mrf.mxu1  ;;  %v1635_v42 = vadd.f32 %v1634_v39, %v1564_v8 }
 0x26c   :  { %v1695_v20 = vpop.f32.mrf.mxu0  ;;  %v1749_v46 = vadd.f32 %v1748_v45, %v1692_v28 }
 0x26d   :  { %v1696_v62 = vadd.f32 %v1695_v20, %v1611_v55 }
 0x26e   :  { %v8389_v61 = vmul.f32 -1.442695, %v1749_v46 }
 0x270   :  { %8526 = vpow2.f32 %v8389_v61 }
 0x273   :  { %v1752_v33 = vpop.f32.mrf.mxu1 }
 0x274   :  { %v1699_v17 = vpop.f32.mrf.mxu0  ;;  %v1753_v60 = vadd.f32 %v1752_v33, %v1696_v62 }
 0x275   :  { %v1700_v38 = vadd.f32 %v1699_v17, %v1617_v22 }
 0x276   :  { %v8527_v51 = vpop.eup %8526  ;;  %v8390_v35 = vmul.f32 -1.442695, %v1753_v60 }
 0x277   :  { %v1803_v18 = vadd.f32 1.0, %v8527_v51 }
 0x278   :  { %8528 = vpow2.f32 %v8390_v35 }
 0x279   :  { %8530 = vrcp.f32 %v1803_v18  ;;  %v1822_v49 = vand.u32 2147483648, %v1803_v18  ;;  %v1820_v6 = vand.u32 2147483647, %v1803_v18  ;;  %vm1816_vm2 = vweird.f32 %v1803_v18 }
 0x27b   :  { %v1756_v0 = vpop.f32.mrf.mxu1  ;;  %v1823_v3 = vor.u32 1.1754944e-38, %v1822_v49  ;;  %vm1821_vm5 = vcmp.eq.f32.partialorder %v1820_v6, 8.507059e+37 }
 0x27c   :  { %v1703_v56 = vpop.f32.mrf.mxu0  ;;  %v1757_v21 = vadd.f32 %v1756_v0, %v1700_v38  ;;  %v1298_v38 = vpop.permute.xlu1 %1297 }
 0x27d   :  { %v1704_v14 = vadd.f32 %v1703_v56, %v1623_v44  ;;  %v1569_v56 = vadd.f32 %v1568_v52, %v1497_v58 }
 0x27e   :  { %v8529_v13 = vpop.eup %8528  ;;  %v8391_v43 = vmul.f32 -1.442695, %v1757_v21 }
 0x27f   :  { %v8531_v32 = vpop.eup %8530  ;;  %v10286_v26 = vadd.f32 1.0, %v8529_v13  ;;  %v1640_v13 = vpop.f32.mrf.mxu3 }
 0x280   :  { %v1812_v1 = vmul.f32 %v8531_v32, %v1803_v18  ;;  %8532 = vpow2.f32 %v8391_v43  ;;  %vm1817_vm1 = vweird.f32 %v8531_v32 }
 0x281   :  { %8534 = vrcp.f32 %v10286_v26  ;;  %vm1818_vm3 = vmor %vm1816_vm2, %vm1817_vm1  ;;  %v1837_v62 = vand.u32 2147483648, %v10286_v26  ;;  %v1835_v36 = vand.u32 2147483647, %v10286_v26  ;;  %vm1831_vm7 = vweird.f32 %v10286_v26 }
 0x282   :  { %v1813_v50 = vsub.f32 1.0, %v1812_v1 }
 0x283   :  { %v1760_v15 = vpop.f32.mrf.mxu1  ;;  %v1838_v7 = vor.u32 1.1754944e-38, %v1837_v62  ;;  %vm1836_vm9 = vcmp.eq.f32.partialorder %v1835_v36, 8.507059e+37 }
 0x284   :  { %v1814_v2 = vmul.f32 %v8531_v32, %v1813_v50  ;;  %v1707_v34 = vpop.f32.mrf.mxu0  ;;  %v1761_v16 = vadd.f32 %v1760_v15, %v1704_v14 }
 0x285   :  { %v1708_v48 = vadd.f32 %v1707_v34, %v1629_v10 }
 0x286   :  { %v8533_v19 = vpop.eup %8532  ;;  %v1815_v28 = vadd.f32 %v8531_v32, %v1814_v2  ;;  %v8392_v63 = vmul.f32 -1.442695, %v1761_v16 }
 0x287   :  { %v8535_v45 = vpop.eup %8534  ;;  %v10291_v47 = vadd.f32 1.0, %v8533_v19 }
 0x288   :  { %v1819_v20 = vsel %vm1818_vm3, %v8531_v32, %v1815_v28  ;;  %v1827_v46 = vmul.f32 %v8535_v45, %v10286_v26  ;;  %8536 = vpow2.f32 %v8392_v63  ;;  %vm1832_vm6 = vweird.f32 %v8535_v45  ;;  %v1573_v28 = vpop.f32.mrf.mxu2 }
 0x289   :  { %v1824_v61 = vsel %vm1821_vm5, %v1823_v3, %v1819_v20  ;;  %8538 = vrcp.f32 %v10291_v47  ;;  %vm1833_vm8 = vmor %vm1831_vm7, %vm1832_vm6  ;;  %v1412_v26 = vadd.f32 %v10245_v54, %v1298_v38  ;;  %v1850_v31 = vand.u32 2147483647, %v10291_v47  ;;  %v1938_v38 = vld [vmem:[#allocation5 + $0x38] sm:$0xff] }
 0x28a   :  { %v1941_v55 = vsel %vm1939_vm4, %v1824_v61, 0  ;;  %v1828_v9 = vsub.f32 1.0, %v1827_v46  ;;  %v1852_v1 = vand.u32 2147483648, %v10291_v47  ;;  %v1641_v54 = vadd.f32 %v1640_v13, %v1569_v56 }
 0x28b   :  { %v10297_v23 = vand.u32 4294901760, %v1941_v55  ;;  %v1764_v33 = vpop.f32.mrf.mxu1  ;;  %vm1846_vm11 = vweird.f32 %v10291_v47  ;;  %v1501_v16 = vadd.f32 %v10261_v25, %v1412_v26  ;;  %vm1851_vm13 = vcmp.eq.f32.partialorder %v1850_v31, 8.507059e+37 }
 0x28c   :  { %v1829_v12 = vmul.f32 %v8535_v45, %v1828_v9  ;;  %v1711_v24 = vpop.f32.mrf.mxu0  ;;  %v1765_v17 = vadd.f32 %v1764_v33, %v1708_v48  ;;  %v1853_v19 = vor.u32 1.1754944e-38, %v1852_v1  ;;  %v1646_v9 = vpop.f32.mrf.mxu3  ;;  %v10379_v31 = vand.u32 4294901760, %v1938_v38  ;;  %v1936_v1 = vld [vmem:[#allocation5 + $0x28] sm:$0xff] }
 0x28d   :  { %2086 = vmatmul.f32.vlgmr.msrb.gmra.mxu3 %v10297_v23  ;;  %v10304_v60 = vsub.f32 %v1941_v55, %v10297_v23  ;;  %v1712_v43 = vadd.f32 %v1711_v24, %v1635_v42  ;;  %v1574_v20 = vadd.f32 %v1573_v28, %v1501_v16 }
 0x28e   :  { %v8537_v51 = vpop.eup %8536  ;;  %v1830_v35 = vadd.f32 %v8535_v45, %v1829_v12  ;;  %v8393_v18 = vmul.f32 -1.442695, %v1765_v17  ;;  %2379 = vmatpush.msra.mxu0 %v10379_v31  ;;  %2598 = vmatpush.msrb.mxu3 %v10379_v31 }
 0x28f   :  { %14686 = vst [vmem:[#allocation11_spill] sm:$0xff] %v10304_v60  ;;  %v8539_v22 = vpop.eup %8538  ;;  %v10307_v53 = vadd.f32 1.0, %v8537_v51  ;;  %2144 = vmatmul.f32.vlgmr.msrb.gmra.mxu0 %v10304_v60  ;;  %v10311_v57 = vand.u32 4294901760, %v10304_v60  ;;  %v1647_v58 = vadd.f32 %v1646_v9, %v1574_v20  ;;  %v10420_v20 = vld [vmem:[#allocation2 + $0x40] sm:$0xff] }
 0x290   :  { %v1834_v0 = vsel %vm1833_vm8, %v8535_v45, %v1830_v35  ;;  %v1842_v5 = vmul.f32 %v8539_v22, %v10291_v47  ;;  %8540 = vpow2.f32 %v8393_v18  ;;  %vm1847_vm10 = vweird.f32 %v8539_v22 }
 0x291   :  { %14687 = vst [vmem:[#allocation16_spill] sm:$0xff] %v10311_v57  ;;  %v1839_v21 = vsel %vm1836_vm9, %v1838_v7, %v1834_v0  ;;  %8542 = vrcp.f32 %v10307_v53  ;;  %2206 = vmatmul.f32.vlgmr.msrb.gmra.mxu1 %v10311_v57  ;;  %v1987_v32 = vsub.f32 %v10304_v60, %v10311_v57  ;;  %vm1848_vm12 = vmor %vm1846_vm11, %vm1847_vm10  ;;  %v1865_v4 = vand.u32 2147483647, %v10307_v53 }
 0x292   :  { %v1944_v30 = vsel %vm1939_vm4, %v1839_v21, 0  ;;  %v1843_v37 = vsub.f32 1.0, %v1842_v5  ;;  %v1867_v61 = vand.u32 2147483648, %v10307_v53  ;;  %vm1861_vm15 = vweird.f32 %v10307_v53 }
 0x293   :  { %v10320_v44 = vand.u32 4294901760, %v1944_v30  ;;  %v1768_v27 = vpop.f32.mrf.mxu1  ;;  %v10324_v40 = vand.u32 4294901760, %v1987_v32  ;;  %vm1866_vm2 = vcmp.eq.f32.partialorder %v1865_v4, 8.507059e+37  ;;  %v10375_v32 = vld [vmem:[#allocation2 + $0x78] sm:$0xff]  ;;  %v10422_v4 = vld [vmem:[#allocation2 + $0x48] sm:$0xff] }
 0x294   :  { %v1844_v50 = vmul.f32 %v8539_v22, %v1843_v37  ;;  %v1769_v14 = vadd.f32 %v1768_v27, %v1712_v43  ;;  %v1715_v49 = vpop.f32.mrf.mxu0  ;;  %v1868_v51 = vor.u32 1.1754944e-38, %v1867_v61  ;;  %v10373_v43 = vld [vmem:[#allocation2 + $0x70] sm:$0xff]  ;;  %v3928_v61 = vadd.f32 %v10422_v4, %v10420_v20 }
 0x295   :  { %2090 = vmatmul.f32.gmra.mxu3 %v10320_v44  ;;  %v10328_v15 = vsub.f32 %v1944_v30, %v10320_v44  ;;  %1989 = vmatmul.f32.vlgmr.msrb.gmra.mxu2 %v10324_v40  ;;  %v1716_v47 = vadd.f32 %v1715_v49, %v1641_v54  ;;  %v3937_v26 = vadd.f32 %v10375_v32, %v10373_v43  ;;  %v1934_v54 = vld [vmem:[#allocation5 + $0x18] sm:$0xff] }
 0x296   :  { %v8541_v11 = vpop.eup %8540  ;;  %v1845_v2 = vadd.f32 %v8539_v22, %v1844_v50  ;;  %v8394_v6 = vmul.f32 -1.442695, %v1769_v14 }
 0x297   :  { %14688 = vst [vmem:[#allocation13_spill] sm:$0xff] %v10328_v15  ;;  %v8543_v34 = vpop.eup %8542  ;;  %v10333_v10 = vadd.f32 1.0, %v8541_v11  ;;  %2149 = vmatmul.f32.gmra.mxu0 %v10328_v15  ;;  %v10337_v59 = vand.u32 4294901760, %v10328_v15  ;;  %3938 = vadd.xlane.f32.xlu2 %v3937_v26  ;;  %v10389_v11 = vsub.f32 %v1938_v38, %v10379_v31 }
 0x298   :  { %v1849_v63 = vsel %vm1848_vm12, %v8539_v22, %v1845_v2  ;;  %v1857_v45 = vmul.f32 %v8543_v34, %v10307_v53  ;;  %8544 = vpow2.f32 %v8394_v6  ;;  %vm1862_vm14 = vweird.f32 %v8543_v34 }
 0x299   :  { %14689 = vst [vmem:[#allocation21_spill] sm:$0xff] %v10337_v59  ;;  %v1854_v41 = vsel %vm1851_vm13, %v1853_v19, %v1849_v63  ;;  %8546 = vrcp.f32 %v10333_v10  ;;  %2212 = vmatmul.f32.gmra.mxu1 %v10337_v59  ;;  %v1995_v39 = vsub.f32 %v10328_v15, %v10337_v59  ;;  %vm1863_vm1 = vmor %vm1861_vm15, %vm1862_vm14  ;;  %v1880_v53 = vand.u32 2147483647, %v10333_v10  ;;  %2534 = vmatpush.msrb.mxu2 %v10389_v11 }
 0x29a   :  { %v1947_v25 = vsel %vm1939_vm4, %v1854_v41, 0  ;;  %v1858_v3 = vsub.f32 1.0, %v1857_v45  ;;  %v1882_v30 = vand.u32 2147483648, %v10333_v10  ;;  %vm1876_vm5 = vweird.f32 %v10333_v10 }
 0x29b   :  { %v10345_v46 = vand.u32 4294901760, %v1947_v25  ;;  %v1772_v55 = vpop.f32.mrf.mxu1  ;;  %v10349_v62 = vand.u32 4294901760, %v1995_v39  ;;  %vm10391_vm6 = vcmp.eq.f32.partialorder %v1880_v53, 8.507059e+37  ;;  %v10397_v19 = vand.u32 4294901760, %v1936_v1 }
 0x29c   :  { %v1859_v48 = vmul.f32 %v8543_v34, %v1858_v3  ;;  %v1773_v8 = vadd.f32 %v1772_v55, %v1716_v47  ;;  %v1719_v35 = vpop.f32.mrf.mxu0  ;;  %v1883_v28 = vor.u32 1.1754944e-38, %v1882_v30  ;;  %v2465_v41 = vand.u32 4294901760, %v10389_v11  ;;  %v1932_v55 = vld [vmem:[#allocation5 + $0x8] sm:$0xff] }
 0x29d   :  { %2094 = vmatmul.f32.gmra.mxu3 %v10345_v46  ;;  %v10353_v33 = vsub.f32 %v1947_v25, %v10345_v46  ;;  %1997 = vmatmul.f32.gmra.mxu2 %v10349_v62  ;;  %v1720_v56 = vadd.f32 %v1719_v35, %v1647_v58  ;;  %v10413_v47 = vand.u32 4294901760, %v1934_v54  ;;  %v2470_v58 = vsub.f32 %v1936_v1, %v10397_v19 }
 0x29e   :  { %v8545_v12 = vpop.eup %8544  ;;  %v1860_v36 = vadd.f32 %v8543_v34, %v1859_v48  ;;  %v8395_v24 = vmul.f32 -1.442695, %v1773_v8  ;;  %2381 = vmatpush.msra.mxu0 %v10397_v19  ;;  %2600 = vmatpush.msrb.mxu3 %v10397_v19 }
 0x29f   :  { %14690 = vst [vmem:[#allocation12_spill] sm:$0xff] %v10353_v33  ;;  %v8547_v17 = vpop.eup %8546  ;;  %v10357_v52 = vadd.f32 1.0, %v8545_v12  ;;  %2154 = vmatmul.f32.gmra.mxu0 %v10353_v33  ;;  %v10361_v18 = vand.u32 4294901760, %v10353_v33  ;;  %3929 = vadd.xlane.f32.xlu2 %v3928_v61  ;;  %v2471_v53 = vand.u32 4294901760, %v2470_v58  ;;  %v2476_v38 = vsub.f32 %v1934_v54, %v10413_v47 }
 0x2a0   :  { %v1864_v22 = vsel %vm1863_vm1, %v8543_v34, %v1860_v36  ;;  %v1872_v42 = vmul.f32 %v8547_v17, %v10333_v10  ;;  %8548 = vpow2.f32 %v8395_v24  ;;  %vm1877_vm3 = vweird.f32 %v8547_v17  ;;  %2383 = vmatpush.msra.mxu0 %v10413_v47  ;;  %2602 = vmatpush.msrb.mxu3 %v10413_v47 }
 0x2a1   :  { %14691 = vst [vmem:[#allocation15_spill] sm:$0xff] %v10361_v18  ;;  %v1869_v7 = vsel %vm1866_vm2, %v1868_v51, %v1864_v22  ;;  %8550 = vrcp.f32 %v10357_v52  ;;  %2218 = vmatmul.f32.gmra.mxu1 %v10361_v18  ;;  %v2003_v21 = vsub.f32 %v10353_v33, %v10361_v18  ;;  %vm1878_vm7 = vmor %vm1876_vm5, %vm1877_vm3  ;;  %v1897_v8 = vand.u32 2147483648, %v10357_v52  ;;  %2537 = vmatpush.msrb.mxu2 %v2470_v58 }
 0x2a2   :  { %v1950_v0 = vsel %vm1939_vm4, %v1869_v7, 0  ;;  %v1873_v5 = vsub.f32 1.0, %v1872_v42  ;;  %v1895_v24 = vand.u32 2147483647, %v10357_v52  ;;  %v10441_v22 = vand.u32 4294901760, %v1932_v55 }
 0x2a3   :  { %v10370_v13 = vand.u32 4294901760, %v1950_v0  ;;  %v1776_v37 = vpop.f32.mrf.mxu1  ;;  %v10381_v14 = vand.u32 4294901760, %v2003_v21  ;;  %vm1891_vm9 = vweird.f32 %v10357_v52  ;;  %v2477_v1 = vand.u32 4294901760, %v2476_v38  ;;  %2540 = vmatpush.msrb.mxu2 %v2476_v38 }
 0x2a4   :  { %v1874_v27 = vmul.f32 %v8547_v17, %v1873_v5  ;;  %v1777_v50 = vadd.f32 %v1776_v37, %v1720_v56  ;;  %v1898_v56 = vor.u32 1.1754944e-38, %v1897_v8  ;;  %2385 = vmatpush.msra.mxu0 %v10441_v22  ;;  %v10454_v21 = vsub.f32 %v1932_v55, %v10441_v22  ;;  %2604 = vmatpush.msrb.mxu3 %v10441_v22  ;;  %v10486_v8 = vld [vmem:[#allocation2 + $0x18] sm:$0xff] }
 0x2a5   :  { %14692 = vst [vmem:[#allocation14_spill] sm:$0xff] %v10381_v14  ;;  %2098 = vmatmul.f32.gmra.mxu3 %v10370_v13  ;;  %v10386_v49 = vsub.f32 %v1950_v0, %v10370_v13  ;;  %2005 = vmatmul.f32.gmra.mxu2 %v10381_v14  ;;  %vm1896_vm11 = vcmp.eq.f32.partialorder %v1895_v24, 8.507059e+37  ;;  %v10490_v24 = vld [vmem:[#allocation2 + $0x60] sm:$0xff] }
 0x2a6   :  { %v8549_v2 = vpop.eup %8548  ;;  %v1875_v6 = vadd.f32 %v8547_v17, %v1874_v27  ;;  %v8396_v16 = vmul.f32 -1.442695, %v1777_v50  ;;  %2669 = vmatpush.msrb.mxu0 %v2465_v41  ;;  %2543 = vmatpush.msrb.mxu2 %v10454_v21 }
 0x2a7   :  { %14693 = vst [vmem:[#allocation23_spill] sm:$0xff] %v10386_v49  ;;  %v10399_v10 = vpop.eup %8550  ;;  %v10402_v63 = vadd.f32 1.0, %v8549_v2  ;;  %2159 = vmatmul.f32.gmra.mxu0 %v10386_v49  ;;  %v10406_v45 = vand.u32 4294901760, %v10386_v49 }
 0x2a8   :  { %v1879_v25 = vsel %vm1878_vm7, %v8547_v17, %v1875_v6  ;;  %v1887_v3 = vmul.f32 %v10399_v10, %v10357_v52  ;;  %8552 = vpow2.f32 %v8396_v16  ;;  %v2466_v17 = vsub.f32 %v10389_v11, %v2465_v41  ;;  %2673 = vmatpush.msrb.mxu0 %v2471_v53 }
 0x2a9   :  { %14696 = vst [vmem:[#allocation32_spill] sm:$0xff] %v10406_v45  ;;  %v1884_v39 = vsel %vm10391_vm6, %v1883_v28, %v1879_v25  ;;  %8554 = vrcp.f32 %v10402_v63  ;;  %2224 = vmatmul.f32.gmra.mxu1 %v10406_v45  ;;  %v2011_v12 = vsub.f32 %v10386_v49, %v10406_v45  ;;  %vm1892_vm8 = vweird.f32 %v10399_v10 }
 0x2aa   :  { %v1953_v9 = vsel %vm1939_vm4, %v1884_v39, 0  ;;  %v1888_v48 = vsub.f32 1.0, %v1887_v3  ;;  %v2467_v7 = vand.u32 4294901760, %v2466_v17  ;;  %vm1893_vm10 = vmor %vm1891_vm9, %vm1892_vm8  ;;  %v2472_v52 = vsub.f32 %v2470_v58, %v2471_v53  ;;  %2677 = vmatpush.msrb.mxu0 %v2477_v1  ;;  %v10492_v17 = vld [vmem:[#allocation2 + $0x68] sm:$0xff] }
 0x2ab   :  { %v10432_v36 = vand.u32 4294901760, %v1953_v9  ;;  %v10439_v35 = vand.u32 4294901760, %v2011_v12  ;;  %v2483_v11 = vand.u32 4294901760, %v10454_v21  ;;  %v1910_v34 = vand.u32 2147483647, %v10402_v63 }
 0x2ac   :  { %v1889_v51 = vmul.f32 %v10399_v10, %v1888_v48  ;;  %2468 = vmatpush.msra.mxu1 %v2467_v7  ;;  %v1912_v28 = vand.u32 2147483648, %v10402_v63  ;;  %v2473_v41 = vand.u32 4294901760, %v2472_v52  ;;  %v2478_v25 = vsub.f32 %v2476_v38, %v2477_v1  ;;  %v10484_v48 = vld [vmem:[#allocation2 + $0x10] sm:$0xff] }
 0x2ad   :  { %14697 = vst [vmem:[#allocation19_spill] sm:$0xff] %v10439_v35  ;;  %2102 = vmatmul.f32.gmra.mxu3 %v10432_v36  ;;  %v10446_v42 = vsub.f32 %v1953_v9, %v10432_v36  ;;  %2013 = vmatmul.f32.gmra.mxu2 %v10439_v35  ;;  %v2484_v61 = vsub.f32 %v10454_v21, %v2483_v11  ;;  %vm1906_vm13 = vweird.f32 %v10402_v63  ;;  %vm1911_vm15 = vcmp.eq.f32.partialorder %v1910_v34, 8.507059e+37  ;;  %v10518_v34 = vld [vmem:[#allocation2 + $0x38] sm:$0xff] }
 0x2ae   :  { %v8553_v0 = vpop.eup %8552  ;;  %v1890_v5 = vadd.f32 %v10399_v10, %v1889_v51  ;;  %2474 = vmatpush.msra.mxu1 %v2473_v41  ;;  %v2479_v9 = vand.u32 4294901760, %v2478_v25  ;;  %v3919_v12 = vadd.f32 %v10486_v8, %v10484_v48  ;;  %v3934_v58 = vadd.f32 %v10492_v17, %v10490_v24  ;;  %2681 = vmatpush.msrb.mxu0 %v2483_v11 }
 0x2af   :  { %v8555_v30 = vpop.eup %8554  ;;  %v10458_v37 = vadd.f32 1.0, %v8553_v0  ;;  %2164 = vmatmul.f32.gmra.mxu0 %v10446_v42  ;;  %v10462_v26 = vand.u32 4294901760, %v10446_v42  ;;  %v2485_v7 = vand.u32 4294901760, %v2484_v61  ;;  %v1913_v38 = vor.u32 1.1754944e-38, %v1912_v28 }
 0x2b0   :  { %v1894_v27 = vsel %vm1893_vm10, %v10399_v10, %v1890_v5  ;;  %v1902_v50 = vmul.f32 %v8555_v30, %v10402_v63  ;;  %vm1907_vm12 = vweird.f32 %v8555_v30  ;;  %2480 = vmatpush.msra.mxu1 %v2479_v9  ;;  %3920 = vadd.xlane.f32.xlu2 %v3919_v12  ;;  %v10543_v12 = vld [vmem:[#allocation2] sm:$0xff] }
 0x2b1   :  { %v1899_v54 = vsel %vm1896_vm11, %v1898_v56, %v1894_v27  ;;  %8556 = vrcp.f32 %v10458_v37  ;;  %2230 = vmatmul.f32.gmra.mxu1 %v10462_v26  ;;  %v2019_v16 = vsub.f32 %v10446_v42, %v10462_v26  ;;  %vm1908_vm14 = vmor %vm1906_vm13, %vm1907_vm12  ;;  %3935 = vadd.xlane.f32.xlu0 %v3934_v58  ;;  %vm1921_vm2 = vweird.f32 %v10458_v37 }
 0x2b2   :  { %v1956_v2 = vsel %vm1939_vm4, %v1899_v54, 0  ;;  %v1903_v6 = vsub.f32 1.0, %v1902_v50  ;;  %2486 = vmatpush.msra.mxu1 %v2485_v7 }
 0x2b3   :  { %v10474_v10 = vand.u32 4294901760, %v1956_v2  ;;  %v10477_v39 = vand.u32 4294901760, %v2019_v16 }
 0x2b4   :  { %v1904_v3 = vmul.f32 %v8555_v30, %v1903_v6  ;;  %2728 = vmatpush.msrb.mxu1 %v10379_v31  ;;  %v10516_v6 = vld [vmem:[#allocation2 + $0x30] sm:$0xff] }
 0x2b5   :  { %14698 = vst [vmem:[#allocation29_spill] sm:$0xff] %v10477_v39  ;;  %2106 = vmatmul.f32.gmra.mxu3 %v10474_v10  ;;  %v10482_v55 = vsub.f32 %v1956_v2, %v10474_v10  ;;  %2021 = vmatmul.f32.gmra.mxu2 %v10477_v39  ;;  %v1925_v2 = vand.u32 2147483647, %v10458_v37  ;;  %v3925_v21 = vadd.f32 %v10518_v34, %v10516_v6 }
 0x2b6   :  { %v1905_v51 = vadd.f32 %v8555_v30, %v1904_v3  ;;  %2730 = vmatpush.msrb.mxu1 %v10397_v19 }
 0x2b7   :  { %v8557_v53 = vpop.eup %8556  ;;  %2169 = vmatmul.f32.gmra.mxu0 %v10482_v55  ;;  %v10501_v0 = vand.u32 4294901760, %v10482_v55  ;;  %vm1926_vm5 = vcmp.eq.f32.partialorder %v1925_v2, 8.507059e+37  ;;  %v10609_v2 = vld [vmem:[#allocation2 + $0x58] sm:$0xff] }
 0x2b8   :  { %v1909_v5 = vsel %vm1908_vm14, %v8555_v30, %v1905_v51  ;;  %v1917_v56 = vmul.f32 %v8557_v53, %v10458_v37  ;;  %v1927_v30 = vand.u32 2147483648, %v10458_v37  ;;  %vm1922_vm1 = vweird.f32 %v8557_v53  ;;  %2732 = vmatpush.msrb.mxu1 %v10413_v47  ;;  %v10545_v47 = vld [vmem:[#allocation2 + $0x8] sm:$0xff]  ;;  %14709 = vst [vmem:[#allocation26_spill] sm:$0xff] %v10609_v2 }
 0x2b9   :  { %v1914_v63 = vsel %vm1911_vm15, %v1913_v38, %v1909_v5  ;;  %2236 = vmatmul.f32.gmra.mxu1 %v10501_v0  ;;  %v2027_v52 = vsub.f32 %v10482_v55, %v10501_v0  ;;  %vm1923_vm3 = vmor %vm1921_vm2, %vm1922_vm1  ;;  %3926 = vadd.xlane.f32.xlu0 %v3925_v21  ;;  %v3916_v58 = vadd.f32 %v10545_v47, %v10543_v12  ;;  %v10571_v38 = vpop.permute.xlu2 %3821 }
 0x2ba   :  { %v1959_v1 = vsel %vm1939_vm4, %v1914_v63, 0  ;;  %v1918_v27 = vsub.f32 1.0, %v1917_v56  ;;  %v1928_v31 = vor.u32 1.1754944e-38, %v1927_v30  ;;  %2734 = vmatpush.msrb.mxu1 %v10441_v22  ;;  %14702 = vst [vmem:[#allocation27_spill] sm:$0xff] %v10571_v38 }
 0x2bb   :  { %v10509_v50 = vand.u32 4294901760, %v1959_v1  ;;  %v10512_v11 = vand.u32 4294901760, %v2027_v52 }
 0x2bc   :  { %v1919_v54 = vmul.f32 %v8557_v53, %v1918_v27  ;;  %v8942_v27 = vmov 256.0  }
 0x2bd   :  { %14699 = vst [vmem:[#allocation17_spill] sm:$0xff] %v10512_v11  ;;  %2110 = vmatmul.f32.gmra.mxu3 %v10509_v50  ;;  %v10524_v16 = vsub.f32 %v1959_v1, %v10509_v50  ;;  %2029 = vmatmul.f32.gmra.mxu2 %v10512_v11  ;;  %8558 = vrcp.f32 %v8942_v27 }
 0x2be   :  { %v1920_v28 = vadd.f32 %v8557_v53, %v1919_v54  ;;  %v10607_v54 = vld [vmem:[#allocation2 + $0x50] sm:$0xff] }
 0x2bf   :  { %2174 = vmatmul.f32.gmra.mxu0 %v10524_v16  ;;  %v10531_v41 = vand.u32 4294901760, %v10524_v16  ;;  %14708 = vst [vmem:[#allocation28_spill] sm:$0xff] %v10607_v54  ;;  %v3931_v21 = vadd.f32 %v10609_v2, %v10607_v54 }
 0x2c0   :  { %v1924_v25 = vsel %vm1923_vm3, %v8557_v53, %v1920_v28 }
 0x2c1   :  { %v1929_v3 = vsel %vm1926_vm5, %v1928_v31, %v1924_v25  ;;  %2242 = vmatmul.f32.gmra.mxu1 %v10531_v41  ;;  %v2035_v19 = vsub.f32 %v10524_v16, %v10531_v41  ;;  %3917 = vadd.xlane.f32.xlu0 %v3916_v58  ;;  %v10577_v5 = vpop.permute.xlu2 %3833 }
 0x2c2   :  { %v1962_v37 = vsel %vm1939_vm4, %v1929_v3, 0  ;;  %14703 = vst [vmem:[#allocation20_spill] sm:$0xff] %v10577_v5  ;;  %3932 = vadd.xlane.f32.xlu1 %v3931_v21  ;;  %v10617_v3 = vpop.permute.xlu0 %3825 }
 0x2c3   :  { %v10539_v61 = vand.u32 4294901760, %v1962_v37  ;;  %v10541_v9 = vand.u32 4294901760, %v2035_v19  ;;  %v8559_v28 = vpop.eup %8558  ;;  %14711 = vst [vmem:[#allocation34_spill] sm:$0xff] %v10617_v3 }
 0x2c4   :  { %v3638_v19 = vmul.f32 256.0, %v8559_v28  ;;  %vm3642_vm4 = vweird.f32 %v8559_v28 }
 0x2c5   :  { %14700 = vst [vmem:[#allocation24_spill] sm:$0xff] %v10541_v9  ;;  %2114 = vmatmul.f32.gmra.mxu3 %v10539_v61  ;;  %v10551_v51 = vsub.f32 %v1962_v37, %v10539_v61  ;;  %2037 = vmatmul.f32.gmra.mxu2 %v10541_v9 }
 0x2c6   :  { %v3639_v58 = vsub.f32 1.0, %v3638_v19 }
 0x2c7   :  { %2179 = vmatmul.f32.gmra.mxu0 %v10551_v51  ;;  %v10556_v22 = vand.u32 4294901760, %v10551_v51 }
 0x2c9   :  { %2248 = vmatmul.f32.gmra.mxu1 %v10556_v22  ;;  %v2043_v7 = vsub.f32 %v10551_v51, %v10556_v22  ;;  %v10583_v56 = vpop.permute.xlu2 %3841 }
 0x2ca   :  { %14704 = vst [vmem:[#allocation18_spill] sm:$0xff] %v10583_v56 }
 0x2cb   :  { %v10561_v53 = vand.u32 4294901760, %v2043_v7  ;;  %v3640_v7 = vmul.f32 %v8559_v28, %v3639_v58  ;;  %v10634_v58 = vpop.permute.xlu0 %3869 }
 0x2cc   :  { %14715 = vst [vmem:[#allocation38_spill] sm:$0xff] %v10634_v58 }
 0x2cd   :  { %14701 = vst [vmem:[#allocation30_spill] sm:$0xff] %v10561_v53  ;;  %2334 = vmatmul.f32.vlgmr.msra.gmra.mxu3 %v10297_v23  ;;  %2045 = vmatmul.f32.gmra.mxu2 %v10561_v53  ;;  %v3641_v29 = vadd.f32 %v8559_v28, %v3640_v7 }
 0x2cf   :  { %2391 = vmatmul.f32.vlgmr.msra.gmra.mxu0 %v10324_v40  ;;  %v10631_v19 = vsel %vm3642_vm4, %v8559_v28, %v3641_v29 }
 0x2d0   :  { %14714 = vst [vmem:[#allocation37_spill] sm:$0xff] %v10631_v19 }
 0x2d1   :  { %2488 = vmatmul.f32.vlgmr.msra.gmra.mxu1 %v10297_v23  ;;  %v10589_v63 = vpop.permute.xlu2 %3849 }
 0x2d2   :  { %14705 = vst [vmem:[#allocation31_spill] sm:$0xff] %v10589_v63  ;;  %v10621_v63 = vld [vmem:[#allocation2 + $0x20] sm:$0xff] }
 0x2d3   :  { %14712 = vst [vmem:[#allocation35_spill] sm:$0xff] %v10621_v63 }
 0x2d5   :  { %2338 = vmatmul.f32.gmra.mxu3 %v10320_v44  ;;  %2281 = vmatmul.f32.vlgmr.msra.gmra.mxu2 %v10297_v23 }
 0x2d7   :  { %2399 = vmatmul.f32.gmra.mxu0 %v10349_v62 }
 0x2d9   :  { %2492 = vmatmul.f32.gmra.mxu1 %v10320_v44  ;;  %v10595_v52 = vpop.permute.xlu2 %3877 }
 0x2da   :  { %14706 = vst [vmem:[#allocation25_spill] sm:$0xff] %v10595_v52 }
 0x2dd   :  { %2342 = vmatmul.f32.gmra.mxu3 %v10345_v46  ;;  %2285 = vmatmul.f32.gmra.mxu2 %v10320_v44 }
 0x2df   :  { %2407 = vmatmul.f32.gmra.mxu0 %v10381_v14 }
 0x2e1   :  { %2496 = vmatmul.f32.gmra.mxu1 %v10345_v46  ;;  %v10601_v1 = vpop.permute.xlu2 %3885 }
 0x2e2   :  { %14707 = vst [vmem:[#allocation22_spill] sm:$0xff] %v10601_v1 }
 0x2e5   :  { %2346 = vmatmul.f32.gmra.mxu3 %v10370_v13  ;;  %2289 = vmatmul.f32.gmra.mxu2 %v10345_v46 }
 0x2e7   :  { %2415 = vmatmul.f32.gmra.mxu0 %v10439_v35 }
 0x2e9   :  { %2500 = vmatmul.f32.gmra.mxu1 %v10370_v13  ;;  %v10614_v31 = vpop.permute.xlu2 %3897 }
 0x2ea   :  { %14710 = vst [vmem:[#allocation33_spill] sm:$0xff] %v10614_v31  ;;  %v10623_v31 = vld [vmem:[#allocation2 + $0x28] sm:$0xff] }
 0x2eb   :  { %14713 = vst [vmem:[#allocation36_spill] sm:$0xff] %v10623_v31  ;;  %v3922_v21 = vadd.f32 %v10623_v31, %v10621_v63 }
 0x2ed   :  { %2350 = vmatmul.f32.gmra.mxu3 %v10432_v36  ;;  %2293 = vmatmul.f32.gmra.mxu2 %v10370_v13 }
 0x2ee   :  { %3923 = vadd.xlane.f32.xlu1 %v3922_v21 }
 0x2ef   :  { %2423 = vmatmul.f32.gmra.mxu0 %v10477_v39 }
 0x2f1   :  { %2504 = vmatmul.f32.gmra.mxu1 %v10432_v36 }
 0x2f5   :  { %2354 = vmatmul.f32.gmra.mxu3 %v10474_v10  ;;  %2297 = vmatmul.f32.gmra.mxu2 %v10432_v36 }
 0x2f7   :  { %2431 = vmatmul.f32.gmra.mxu0 %v10512_v11 }
 0x2f9   :  { %2508 = vmatmul.f32.gmra.mxu1 %v10474_v10 }
 0x2fd   :  { %2358 = vmatmul.f32.gmra.mxu3 %v10509_v50  ;;  %2301 = vmatmul.f32.gmra.mxu2 %v10474_v10 }
 0x2ff   :  { %2439 = vmatmul.f32.gmra.mxu0 %v10541_v9 }
 0x301   :  { %2512 = vmatmul.f32.gmra.mxu1 %v10509_v50 }
 0x305   :  { %2362 = vmatmul.f32.gmra.mxu3 %v10539_v61  ;;  %2305 = vmatmul.f32.gmra.mxu2 %v10509_v50 }
 0x307   :  { %2447 = vmatmul.f32.gmra.mxu0 %v10561_v53 }
 0x309   :  { %2516 = vmatmul.f32.gmra.mxu1 %v10539_v61 }
 0x30a   :  { %v3939_v1 = vpop.xlane.xlu2 %3938 }
 0x30b   :  { %v10638_v52 = vmul.f32 %v3939_v1, %v10631_v19 }
 0x30c   :  { %v2145_v30 = vpop.f32.mrf.mxu0 }
 0x30d   :  { %2608 = vmatmul.f32.vlgmr.msrb.gmra.mxu3 %v10311_v57  ;;  %2309 = vmatmul.f32.gmra.mxu2 %v10539_v61  ;;  %14716 = vst [vmem:[#allocation39_spill] sm:$0xff] %v10638_v52  ;;  %v10642_v38 = vsub.f32 %v10373_v43, %v10638_v52  ;;  %v10646_v29 = vsub.f32 %v10375_v32, %v10638_v52 }
 0x30e   :  { %v2207_v25 = vpop.f32.mrf.mxu1 }
 0x30f   :  { %2683 = vmatmul.f32.vlgmr.msrb.gmra.mxu0 %v10297_v23  ;;  %14717 = vst [vmem:[#allocation40_spill] sm:$0xff] %v10642_v38  ;;  %v3978_v58 = vmul.f32 %v10642_v38, %v10642_v38  ;;  %v3979_v1 = vmul.f32 %v10646_v29, %v10646_v29 }
 0x310   :  { %v2087_v37 = vpop.f32.mrf.mxu3  ;;  %14718 = vst [vmem:[#allocation41_spill] sm:$0xff] %v10646_v29 }
 0x311   :  { %2736 = vmatmul.f32.vlgmr.msrb.gmra.mxu1 %v10297_v23 }
 0x312   :  { %v3930_v31 = vpop.xlane.xlu2 %3929 }
 0x314   :  { %v2150_v27 = vpop.f32.mrf.mxu0 }
 0x315   :  { %2614 = vmatmul.f32.gmra.mxu3 %v10337_v59  ;;  %2546 = vmatmul.f32.vlgmr.msrb.gmra.mxu2 %v10304_v60 }
 0x316   :  { %v10629_v56 = vpop.f32.mrf.mxu1 }
 0x317   :  { %2687 = vmatmul.f32.gmra.mxu0 %v10320_v44 }
 0x318   :  { %v2091_v7 = vpop.f32.mrf.mxu3  ;;  %v1990_v5 = vpop.f32.mrf.mxu2 }
 0x319   :  { %2740 = vmatmul.f32.gmra.mxu1 %v10320_v44  ;;  %v2088_v3 = vadd.f32 %v2087_v37, %v1990_v5  ;;  %v2775_v5 = vld [vmem:[#allocation5 + $0x70] sm:$0xff] }
 0x31a   :  { %v10658_v37 = vand.u32 4294901760, %v2775_v5 }
 0x31b   :  { %v2146_v28 = vadd.f32 %v2145_v30, %v2088_v3  ;;  %v4001_v30 = vadd.f32 %v3979_v1, %v3978_v58  ;;  %v2773_v3 = vld [vmem:[#allocation5 + $0x60] sm:$0xff]  ;;  %v2771_v58 = vld [vmem:[#allocation5 + $0x50] sm:$0xff] }
 0x31c   :  { %v10648_v21 = vpop.f32.mrf.mxu0  ;;  %2790 = vmatpush.msra.mxu2 %v10658_v37  ;;  %v2875_v38 = vsub.f32 %v2775_v5, %v10658_v37  ;;  %v10665_v29 = vand.u32 4294901760, %v2773_v3  ;;  %3009 = vmatpush.msra.mxu1 %v10658_v37  ;;  %v10675_v5 = vand.u32 4294901760, %v2771_v58 }
 0x31d   :  { %2620 = vmatmul.f32.gmra.mxu3 %v10361_v18  ;;  %2551 = vmatmul.f32.gmra.mxu2 %v10328_v15  ;;  %v10660_v32 = vadd.f32 %v2207_v25, %v2146_v28  ;;  %v10670_v25 = vmul.f32 %v3930_v31, %v10631_v19  ;;  %v10672_v28 = vpop.permute.xlu0 %3889 }
 0x31e   :  { %v10656_v43 = vpop.f32.mrf.mxu1  ;;  %4002 = vadd.xlane.f32.xlu1 %v4001_v30  ;;  %14720 = vst [vmem:[#allocation43_spill] sm:$0xff] %v10672_v28  ;;  %v2876_v53 = vand.u32 4294901760, %v2875_v38  ;;  %v2881_v9 = vsub.f32 %v2773_v3, %v10665_v29  ;;  %2945 = vmatpush.msra.mxu0 %v2875_v38  ;;  %v2769_v30 = vld [vmem:[#allocation5 + $0x40] sm:$0xff]  ;;  %v2887_v54 = vsub.f32 %v2771_v58, %v10675_v5 }
 0x31f   :  { %2691 = vmatmul.f32.gmra.mxu0 %v10345_v46  ;;  %14719 = vst [vmem:[#allocation42_spill] sm:$0xff] %v10670_v25  ;;  %3011 = vmatpush.msra.mxu1 %v10665_v29  ;;  %v10680_v2 = vsub.f32 %v10420_v20, %v10670_v25  ;;  %v10684_v31 = vsub.f32 %v10422_v4, %v10670_v25  ;;  %v10696_v25 = vand.u32 4294901760, %v2769_v30 }
 0x320   :  { %v2095_v52 = vpop.f32.mrf.mxu3  ;;  %v1998_v63 = vpop.f32.mrf.mxu2  ;;  %2792 = vmatpush.msra.mxu2 %v10665_v29  ;;  %v2877_v3 = vsub.f32 %v2875_v38, %v2876_v53  ;;  %v2882_v28 = vand.u32 4294901760, %v2881_v9  ;;  %2948 = vmatpush.msra.mxu0 %v2881_v9 }
 0x321   :  { %2744 = vmatmul.f32.gmra.mxu1 %v10345_v46  ;;  %v2092_v1 = vadd.f32 %v2091_v7, %v1998_v63  ;;  %14721 = vst [vmem:[#allocation44_spill] sm:$0xff] %v10680_v2  ;;  %v3972_v20 = vmul.f32 %v10680_v2, %v10680_v2  ;;  %v3973_v4 = vmul.f32 %v10684_v31, %v10684_v31 }
 0x322   :  { %14722 = vst [vmem:[#allocation45_spill] sm:$0xff] %v10684_v31  ;;  %3013 = vmatpush.msra.mxu1 %v10675_v5  ;;  %2794 = vmatpush.msra.mxu2 %v10675_v5  ;;  %v2883_v58 = vsub.f32 %v2881_v9, %v2882_v28  ;;  %v2893_v31 = vsub.f32 %v2769_v30, %v10696_v25 }
 0x323   :  { %v2151_v63 = vadd.f32 %v2150_v27, %v2092_v1  ;;  %v2878_v27 = vand.u32 4294901760, %v2877_v3  ;;  %v2888_v1 = vand.u32 4294901760, %v2887_v54  ;;  %2951 = vmatpush.msra.mxu0 %v2887_v54  ;;  %v3992_v2 = vadd.f32 %v3973_v4, %v3972_v20  ;;  %v3921_v20 = vpop.xlane.xlu2 %3920 }
 0x324   :  { %v10687_v7 = vpop.f32.mrf.mxu0  ;;  %3015 = vmatpush.msra.mxu1 %v10696_v25  ;;  %v2884_v35 = vand.u32 4294901760, %v2883_v58  ;;  %2796 = vmatpush.msra.mxu2 %v10696_v25  ;;  %v2894_v9 = vand.u32 4294901760, %v2893_v31 }
 0x325   :  { %2626 = vmatmul.f32.gmra.mxu3 %v10406_v45  ;;  %2556 = vmatmul.f32.gmra.mxu2 %v10353_v33  ;;  %v10703_v11 = vadd.f32 %v10629_v56, %v2151_v63  ;;  %v2889_v45 = vsub.f32 %v2887_v54, %v2888_v1  ;;  %v3936_v4 = vpop.xlane.xlu0 %3935  ;;  %v10712_v54 = vmul.f32 %v3921_v20, %v10631_v19 }
 0x326   :  { %v10700_v38 = vpop.f32.mrf.mxu1  ;;  %2879 = vmatpush.msra.mxu3 %v2878_v27  ;;  %3993 = vadd.xlane.f32.xlu1 %v3992_v2  ;;  %v2895_v30 = vsub.f32 %v2893_v31, %v2894_v9  ;;  %v10715_v58 = vmul.f32 %v3936_v4, %v10631_v19 }
 0x327   :  { %2695 = vmatmul.f32.gmra.mxu0 %v10370_v13  ;;  %v2890_v63 = vand.u32 4294901760, %v2889_v45  ;;  %3080 = vmatpush.msrb.mxu2 %v2876_v53  ;;  %14723 = vst [vmem:[#allocation46_spill] sm:$0xff] %v10712_v54  ;;  %v10725_v53 = vsub.f32 %v10486_v8, %v10712_v54 }
 0x328   :  { %v2099_v39 = vpop.f32.mrf.mxu3  ;;  %v2006_v3 = vpop.f32.mrf.mxu2  ;;  %2885 = vmatpush.msra.mxu3 %v2884_v35  ;;  %2954 = vmatpush.msra.mxu0 %v2893_v31  ;;  %14724 = vst [vmem:[#allocation47_spill] sm:$0xff] %v10715_v58  ;;  %v10721_v35 = vsub.f32 %v10484_v48, %v10712_v54  ;;  %v10729_v2 = vsub.f32 %v10490_v24, %v10715_v58  ;;  %v2774_v54 = vld [vmem:[#allocation5 + $0x68] sm:$0xff] }
 0x329   :  { %2748 = vmatmul.f32.gmra.mxu1 %v10370_v13  ;;  %v2096_v56 = vadd.f32 %v2095_v52, %v2006_v3  ;;  %v2896_v52 = vand.u32 4294901760, %v2895_v30  ;;  %3084 = vmatpush.msrb.mxu2 %v2882_v28  ;;  %14726 = vst [vmem:[#allocation49_spill] sm:$0xff] %v10725_v53  ;;  %v3967_v8 = vmul.f32 %v10725_v53, %v10725_v53 }
 0x32a   :  { %2891 = vmatpush.msra.mxu3 %v2890_v63  ;;  %14725 = vst [vmem:[#allocation48_spill] sm:$0xff] %v10721_v35  ;;  %v3966_v31 = vmul.f32 %v10721_v35, %v10721_v35  ;;  %v3976_v24 = vmul.f32 %v10729_v2, %v10729_v2 }
 0x32b   :  { %v2156_v14 = vadd.f32 %v10648_v21, %v2096_v56  ;;  %v10733_v21 = vsub.f32 %v10492_v17, %v10715_v58  ;;  %3088 = vmatpush.msrb.mxu2 %v2888_v1 }
 0x32c   :  { %v2165_v27 = vpop.f32.mrf.mxu0  ;;  %2897 = vmatpush.msra.mxu3 %v2896_v52 }
 0x32d   :  { %2632 = vmatmul.f32.gmra.mxu3 %v10462_v26  ;;  %2561 = vmatmul.f32.gmra.mxu2 %v10386_v49  ;;  %v10737_v28 = vadd.f32 %v10656_v43, %v2156_v14  ;;  %v3977_v17 = vmul.f32 %v10733_v21, %v10733_v21  ;;  %v3983_v43 = vadd.f32 %v3967_v8, %v3966_v31  ;;  %v3927_v63 = vpop.xlane.xlu0 %3926 }
 0x32e   :  { %v2231_v45 = vpop.f32.mrf.mxu1  ;;  %3139 = vmatpush.msrb.mxu3 %v10658_v37  ;;  %3092 = vmatpush.msrb.mxu2 %v2894_v9  ;;  %v10752_v30 = vmul.f32 %v3927_v63, %v10631_v19 }
 0x32f   :  { %2699 = vmatmul.f32.gmra.mxu0 %v10432_v36  ;;  %v3998_v56 = vadd.f32 %v3977_v17, %v3976_v24  ;;  %3984 = vadd.xlane.f32.xlu1 %v3983_v43 }
 0x330   :  { %v2103_v48 = vpop.f32.mrf.mxu3  ;;  %v2014_v3 = vpop.f32.mrf.mxu2  ;;  %3141 = vmatpush.msrb.mxu3 %v10665_v29  ;;  %14727 = vst [vmem:[#allocation50_spill] sm:$0xff] %v10752_v30  ;;  %v10762_v29 = vsub.f32 %v10518_v34, %v10752_v30 }
 0x331   :  { %2752 = vmatmul.f32.gmra.mxu1 %v10432_v36  ;;  %v2100_v14 = vadd.f32 %v2099_v39, %v2014_v3  ;;  %3999 = vadd.xlane.f32.xlu2 %v3998_v56  ;;  %v10758_v39 = vsub.f32 %v10516_v6, %v10752_v30 }
 0x332   :  { %14729 = vst [vmem:[#allocation52_spill] sm:$0xff] %v10762_v29  ;;  %3143 = vmatpush.msrb.mxu3 %v10675_v5  ;;  %v3971_v52 = vmul.f32 %v10762_v29, %v10762_v29 }
 0x333   :  { %v2161_v20 = vadd.f32 %v10687_v7, %v2100_v14  ;;  %14728 = vst [vmem:[#allocation51_spill] sm:$0xff] %v10758_v39  ;;  %v3970_v9 = vmul.f32 %v10758_v39, %v10758_v39 }
 0x334   :  { %v2170_v4 = vpop.f32.mrf.mxu0  ;;  %3145 = vmatpush.msrb.mxu3 %v10696_v25 }
 0x335   :  { %2638 = vmatmul.f32.gmra.mxu3 %v10501_v0  ;;  %2566 = vmatmul.f32.gmra.mxu2 %v10446_v42  ;;  %v10765_v7 = vadd.f32 %v10700_v38, %v2161_v20  ;;  %v3989_v31 = vadd.f32 %v3971_v52, %v3970_v9  ;;  %v3918_v38 = vpop.xlane.xlu0 %3917 }
 0x336   :  { %v2237_v37 = vpop.f32.mrf.mxu1  ;;  %v10776_v5 = vmul.f32 %v3918_v38, %v10631_v19  ;;  %v10809_v38 = vld [vmem:[%s14392_s2 + $0x30] sm:$0xff] }
 0x337   :  { %2703 = vmatmul.f32.gmra.mxu0 %v10474_v10  ;;  %vm4218_vm8 = vcmp.gt.f32.partialorder %v10809_v38, 0.5 }
 0x338   :  { %v2107_v1 = vpop.f32.mrf.mxu3  ;;  %v2022_v6 = vpop.f32.mrf.mxu2  ;;  %14730 = vst [vmem:[#allocation53_spill] sm:$0xff] %v10776_v5  ;;  %v10782_v25 = vsub.f32 %v10543_v12, %v10776_v5 }
 0x339   :  { %2756 = vmatmul.f32.gmra.mxu1 %v10474_v10  ;;  %v2104_v34 = vadd.f32 %v2103_v48, %v2022_v6  ;;  %3990 = vadd.xlane.f32.xlu2 %v3989_v31  ;;  %v10786_v48 = vsub.f32 %v10545_v47, %v10776_v5  ;;  %v14450_v47 = vmov 5  }
 0x33a   :  { %14731 = vst [vmem:[#allocation54_spill] sm:$0xff] %v10782_v25  ;;  %v3964_v14 = vmul.f32 %v10782_v25, %v10782_v25  ;;  %8488 = vset.pattern.permute.xlu1 %v14450_v47  ;;  %v10868_v25 = vand.u32 4294901760, %v2774_v54 }
 0x33b   :  { %v2166_v8 = vadd.f32 %v2165_v27, %v2104_v34  ;;  %14732 = vst [vmem:[#allocation55_spill] sm:$0xff] %v10786_v48  ;;  %v3965_v43 = vmul.f32 %v10786_v48, %v10786_v48 }
 0x33c   :  { %v2175_v24 = vpop.f32.mrf.mxu0  ;;  %v3283_v29 = vsub.f32 %v2774_v54, %v10868_v25 }
 0x33d   :  { %2644 = vmatmul.f32.gmra.mxu3 %v10531_v41  ;;  %2571 = vmatmul.f32.gmra.mxu2 %v10482_v55  ;;  %v10788_v3 = vadd.f32 %v2231_v45, %v2166_v8  ;;  %v3980_v63 = vadd.f32 %v3965_v43, %v3964_v14  ;;  %v10823_v14 = vld [vmem:[%s14392_s2 + $0x38] sm:$0xff] }
 0x33e   :  { %v2243_v17 = vpop.f32.mrf.mxu1  ;;  %vm4219_vm6 = vcmp.gt.f32.partialorder %v10823_v14, 0.5 }
 0x33f   :  { %2707 = vmatmul.f32.gmra.mxu0 %v10509_v50 }
 0x340   :  { %v2111_v27 = vpop.f32.mrf.mxu3  ;;  %v2030_v56 = vpop.f32.mrf.mxu2 }
 0x341   :  { %2760 = vmatmul.f32.gmra.mxu1 %v10509_v50  ;;  %v2108_v12 = vadd.f32 %v2107_v1, %v2030_v56  ;;  %3981 = vadd.xlane.f32.xlu2 %v3980_v63 }
 0x343   :  { %v2171_v20 = vadd.f32 %v2170_v4, %v2108_v12  ;;  %v14734_v12 = vmov 0  }
 0x344   :  { %v2180_v9 = vpop.f32.mrf.mxu0  ;;  %v4227_v63 = vsel %vm4219_vm6, 1, %v14734_v12 }
 0x345   :  { %2650 = vmatmul.f32.gmra.mxu3 %v10556_v22  ;;  %2576 = vmatmul.f32.gmra.mxu2 %v10524_v16  ;;  %v10799_v52 = vadd.f32 %v2237_v37, %v2171_v20 }
 0x346   :  { %v2249_v45 = vpop.f32.mrf.mxu1 }
 0x347   :  { %2711 = vmatmul.f32.gmra.mxu0 %v10539_v61 }
 0x348   :  { %v2115_v6 = vpop.f32.mrf.mxu3  ;;  %v2038_v34 = vpop.f32.mrf.mxu2  ;;  %4141 = vperm.xlu1 %8488, %v10809_v38  }
 0x349   :  { %2764 = vmatmul.f32.gmra.mxu1 %v10539_v61  ;;  %v2112_v1 = vadd.f32 %v2111_v27, %v2038_v34  ;;  %v14448_v34 = vmov 7  }
 0x34b   :  { %v2176_v4 = vadd.f32 %v2175_v24, %v2112_v1  ;;  %v10818_v24 = vpop.permute.xlu1 %3829 }
 0x34c   :  { %v10803_v31 = vpop.f32.mrf.mxu0  ;;  %14733 = vst [vmem:[#allocation56_spill] sm:$0xff] %v10818_v24  ;;  %v8803_v24 = vld [vmem:[%s14392_s2 + $0x20] sm:$0xff] }
 0x34d   :  { %2899 = vmatmul.f32.vlgmr.msra.gmra.mxu3 %v10297_v23  ;;  %2581 = vmatmul.f32.gmra.mxu2 %v10551_v51  ;;  %v10815_v8 = vadd.f32 %v2243_v17, %v2176_v4 }
 0x34e   :  { %v10813_v37 = vpop.f32.mrf.mxu1 }
 0x34f   :  { %2957 = vmatmul.f32.vlgmr.msra.gmra.mxu0 %v10304_v60 }
 0x350   :  { %v2335_v27 = vpop.f32.mrf.mxu3  ;;  %v2046_v43 = vpop.f32.mrf.mxu2  ;;  %8490 = vset.pattern.permute.xlu1 %v14448_v34 }
 0x351   :  { %3019 = vmatmul.f32.vlgmr.msra.gmra.mxu1 %v10311_v57  ;;  %v2116_v56 = vadd.f32 %v2115_v6, %v2046_v43  ;;  %4250 = vperm.xlu1 %8490, %v4227_v63  }
 0x353   :  { %v2181_v17 = vadd.f32 %v2180_v9, %v2116_v56  ;;  %v10838_v6 = vpop.permute.xlu1 %3837  ;;  %v14458_v9 = vmov 6  }
 0x354   :  { %v10828_v20 = vpop.f32.mrf.mxu0  ;;  %14735 = vst [vmem:[#allocation57_spill] sm:$0xff] %v10838_v6  ;;  %8489 = vset.pattern.permute.xlu2 %v14458_v9 }
 0x355   :  { %2903 = vmatmul.f32.gmra.mxu3 %v10320_v44  ;;  %2802 = vmatmul.f32.vlgmr.msra.gmra.mxu2 %v10324_v40  ;;  %v10835_v4 = vadd.f32 %v2249_v45, %v2181_v17  ;;  %v2776_v17 = vld [vmem:[#allocation5 + $0x78] sm:$0xff] }
 0x356   :  { %v10833_v1 = vpop.f32.mrf.mxu1 }
 0x357   :  { %2962 = vmatmul.f32.gmra.mxu0 %v10328_v15  ;;  %v14742_v15 = vld [vmem:[#allocation32_spill] sm:$0xff] }
 0x358   :  { %v2339_v43 = vpop.f32.mrf.mxu3  ;;  %v2282_v56 = vpop.f32.mrf.mxu2 }
 0x359   :  { %3025 = vmatmul.f32.gmra.mxu1 %v10337_v59  ;;  %v2283_v34 = vadd.f32 %v2282_v56, %v10660_v32  ;;  %4193 = vperm.xlu2 %8489, %v10823_v14   ;;  %v10859_v56 = vand.u32 4294901760, %v2776_v17 }
 0x35a   :  { %8492 = vset.pattern.permute.xlu1 %v14458_v9  ;;  %v14739_v9 = vmov 5  }
 0x35b   :  { %v10843_v47 = vadd.f32 %v2335_v27, %v2283_v34  ;;  %4189 = vperm.xlu1 %8492, %v10809_v38   ;;  %v10855_v63 = vpop.permute.xlu1 %3845  ;;  %3192 = vmatpush.msrb.mxu0 %v10859_v56  ;;  %v3277_v48 = vsub.f32 %v2776_v17, %v10859_v56 }
 0x35c   :  { %v10845_v5 = vpop.f32.mrf.mxu0  ;;  %14737 = vst [vmem:[#allocation59_spill] sm:$0xff] %v10855_v63  ;;  %v2770_v63 = vld [vmem:[#allocation5 + $0x48] sm:$0xff]  ;;  %3411 = vmatpush.msra.mxu3 %v10859_v56 }
 0x35d   :  { %14736 = vst [vmem:[#allocation58_spill] sm:$0xff] %v10843_v47  ;;  %2907 = vmatmul.f32.gmra.mxu3 %v10345_v46  ;;  %2810 = vmatmul.f32.gmra.mxu2 %v10349_v62  ;;  %v3278_v30 = vand.u32 4294901760, %v3277_v48  ;;  %v3284_v47 = vand.u32 4294901760, %v3283_v29 }
 0x35e   :  { %v10850_v45 = vpop.f32.mrf.mxu1  ;;  %3194 = vmatpush.msrb.mxu0 %v10868_v25  ;;  %3347 = vmatpush.msra.mxu2 %v3277_v48 }
 0x35f   :  { %2967 = vmatmul.f32.gmra.mxu0 %v10353_v33  ;;  %v10892_v33 = vand.u32 4294901760, %v2770_v63  ;;  %v3285_v58 = vsub.f32 %v3283_v29, %v3284_v47  ;;  %3413 = vmatpush.msra.mxu3 %v10868_v25 }
 0x360   :  { %v2343_v32 = vpop.f32.mrf.mxu3  ;;  %v2286_v27 = vpop.f32.mrf.mxu2  ;;  %3350 = vmatpush.msra.mxu2 %v3283_v29 }
 0x361   :  { %3031 = vmatmul.f32.gmra.mxu1 %v10361_v18  ;;  %v2287_v34 = vadd.f32 %v2286_v27, %v10703_v11  ;;  %8491 = vset.pattern.permute.xlu2 %v14739_v9  ;;  %v10874_v11 = vld [vmem:[%s14392_s2 + $0x28] sm:$0xff]  ;;  %v14740_v27 = vld [vmem:[#allocation14_spill] sm:$0xff]  ;;  %v3295_v60 = vsub.f32 %v2770_v63, %v10892_v33 }
 0x362   :  { %4137 = vperm.xlu2 %8491, %v10874_v11   ;;  %vm4217_vm7 = vcmp.gt.f32.partialorder %v10874_v11, 0.5 }
 0x363   :  { %v10861_v53 = vadd.f32 %v2339_v43, %v2287_v34  ;;  %v2772_v43 = vld [vmem:[#allocation5 + $0x58] sm:$0xff]  ;;  %8495 = vset.pattern.permute.xlu1 %v14739_v9  ;;  %v10886_v39 = vpop.permute.xlu1 %3873 }
 0x364   :  { %v10863_v35 = vpop.f32.mrf.mxu0  ;;  %v10881_v17 = vand.u32 4294901760, %v2772_v43  ;;  %14741 = vst [vmem:[#allocation14_spill] sm:$0xff] %v10886_v39  ;;  %4133 = vperm.xlu1 %8495, %v8803_v24  }
 0x365   :  { %14738 = vst [vmem:[#allocation60_spill] sm:$0xff] %v10861_v53  ;;  %2911 = vmatmul.f32.gmra.mxu3 %v10370_v13  ;;  %2818 = vmatmul.f32.gmra.mxu2 %v14740_v27  ;;  %v3279_v53 = vsub.f32 %v3277_v48, %v3278_v30  ;;  %v3286_v48 = vand.u32 4294901760, %v3285_v58 }
 0x366   :  { %v10878_v34 = vpop.f32.mrf.mxu1  ;;  %3196 = vmatpush.msrb.mxu0 %v10881_v17  ;;  %v3289_v54 = vsub.f32 %v2772_v43, %v10881_v17  ;;  %3415 = vmatpush.msra.mxu3 %v10881_v17 }
 0x367   :  { %2972 = vmatmul.f32.gmra.mxu0 %v10386_v49  ;;  %v3280_v18 = vand.u32 4294901760, %v3279_v53 }
 0x368   :  { %v2347_v6 = vpop.f32.mrf.mxu3  ;;  %v2290_v49 = vpop.f32.mrf.mxu2  ;;  %3198 = vmatpush.msrb.mxu0 %v10892_v33  ;;  %v3290_v24 = vand.u32 4294901760, %v3289_v54  ;;  %3417 = vmatpush.msra.mxu3 %v10892_v33 }
 0x369   :  { %3037 = vmatmul.f32.gmra.mxu1 %v14742_v15  ;;  %v2291_v39 = vadd.f32 %v2290_v49, %v10737_v28  ;;  %v14744_v49 = vmov 7   ;;  %v3296_v28 = vand.u32 4294901760, %v3295_v60  ;;  %v14745_v15 = vld [vmem:[#allocation19_spill] sm:$0xff]  ;;  %3353 = vmatpush.msra.mxu2 %v3289_v54 }
 0x36a   :  { %3482 = vmatpush.msra.mxu0 %v3278_v30  ;;  %3281 = vmatpush.msrb.mxu1 %v3280_v18  ;;  %v3291_v53 = vsub.f32 %v3289_v54, %v3290_v24  ;;  %v4225_v30 = vsel %vm4217_vm7, 1, %v14734_v12  ;;  %v4226_v18 = vsel %vm4218_vm8, 1, %v14734_v12 }
 0x36b   :  { %v10901_v43 = vadd.f32 %v2343_v32, %v2291_v39  ;;  %8493 = vset.pattern.permute.xlu2 %v14744_v49  ;;  %v10917_v39 = vpop.permute.xlu1 %3881  ;;  %v3297_v29 = vsub.f32 %v3295_v60, %v3296_v28  ;;  %3356 = vmatpush.msra.mxu2 %v3295_v60  ;;  %v14751_v60 = vld [vmem:[#allocation17_spill] sm:$0xff] }
 0x36c   :  { %v10903_v59 = vpop.f32.mrf.mxu0  ;;  %3287 = vmatpush.msrb.mxu1 %v3286_v48  ;;  %v3292_v58 = vand.u32 4294901760, %v3291_v53  ;;  %14746 = vst [vmem:[#allocation19_spill] sm:$0xff] %v10917_v39  ;;  %8497 = vset.pattern.permute.xlu1 %v14744_v49 }
 0x36d   :  { %14743 = vst [vmem:[#allocation61_spill] sm:$0xff] %v10901_v43  ;;  %2915 = vmatmul.f32.gmra.mxu3 %v10432_v36  ;;  %2826 = vmatmul.f32.gmra.mxu2 %v14745_v15  ;;  %v3298_v48 = vand.u32 4294901760, %v3297_v29 }
 0x36e   :  { %v10909_v57 = vpop.f32.mrf.mxu1  ;;  %4247 = vperm.xlu2 %8493, %v4226_v18   ;;  %4244 = vperm.xlu1 %8497, %v4225_v30   ;;  %v14747_v18 = vld [vmem:[#allocation29_spill] sm:$0xff] }
 0x36f   :  { %2977 = vmatmul.f32.gmra.mxu0 %v10446_v42  ;;  %3293 = vmatpush.msrb.mxu1 %v3292_v58 }
 0x370   :  { %v2351_v63 = vpop.f32.mrf.mxu3  ;;  %v2294_v32 = vpop.f32.mrf.mxu2  ;;  %3486 = vmatpush.msra.mxu0 %v3284_v47 }
 0x371   :  { %3043 = vmatmul.f32.gmra.mxu1 %v10462_v26  ;;  %v2295_v43 = vadd.f32 %v2294_v32, %v10765_v7 }
 0x372   :  { %3299 = vmatpush.msrb.mxu1 %v3298_v48  ;;  %3490 = vmatpush.msra.mxu0 %v3290_v24  ;;  %v8804_v24 = vld [vmem:[%s14392_s2 + $0x18] sm:$0xff]  ;;  %v14753_v48 = vld [vmem:[#allocation28_spill] sm:$0xff] }
 0x373   :  { %v10924_v53 = vadd.f32 %v2347_v6, %v2295_v43  ;;  %v10934_v7 = vpop.permute.xlu1 %3893  ;;  %v14749_v6 = vmov 6  }
 0x374   :  { %v10926_v39 = vpop.f32.mrf.mxu0  ;;  %3541 = vmatpush.msra.mxu1 %v10859_v56  ;;  %3494 = vmatpush.msra.mxu0 %v3296_v28  ;;  %14748 = vst [vmem:[#allocation29_spill] sm:$0xff] %v10934_v7  ;;  %v14480_v28 = vmov 3  }
 0x375   :  { %2919 = vmatmul.f32.gmra.mxu3 %v10474_v10  ;;  %2834 = vmatmul.f32.gmra.mxu2 %v14747_v18 }
 0x376   :  { %v10931_v30 = vpop.f32.mrf.mxu1  ;;  %3543 = vmatpush.msra.mxu1 %v10868_v25  ;;  %8496 = vset.pattern.permute.xlu2 %v14749_v6 }
 0x377   :  { %2982 = vmatmul.f32.gmra.mxu0 %v10482_v55  ;;  %8500 = vset.pattern.permute.xlu1 %v14739_v9 }
 0x378   :  { %v2355_v47 = vpop.f32.mrf.mxu3  ;;  %v2298_v54 = vpop.f32.mrf.mxu2  ;;  %4129 = vperm.xlu1 %8500, %v8804_v24   ;;  %4185 = vperm.xlu2 %8496, %v10874_v11   ;;  %v14755_v24 = vld [vmem:[#allocation24_spill] sm:$0xff] }
 0x379   :  { %3049 = vmatmul.f32.gmra.mxu1 %v10501_v0  ;;  %v2299_v56 = vadd.f32 %v2298_v54, %v10788_v3  ;;  %8494 = vset.pattern.permute.xlu0 %v14480_v28 }
 0x37a   :  { %3545 = vmatpush.msra.mxu1 %v10881_v17 }
 0x37b   :  { %v10946_v25 = vadd.f32 %v2351_v63, %v2299_v56  ;;  %v3933_v17 = vpop.xlane.xlu1 %3932  ;;  %v14754_v56 = vld [vmem:[#allocation26_spill] sm:$0xff] }
 0x37c   :  { %v10948_v43 = vpop.f32.mrf.mxu0  ;;  %3547 = vmatpush.msra.mxu1 %v10892_v33  ;;  %v10960_v63 = vmul.f32 %v3933_v17, %v10631_v19 }
 0x37d   :  { %14750 = vst [vmem:[#allocation62_spill] sm:$0xff] %v10946_v25  ;;  %2923 = vmatmul.f32.gmra.mxu3 %v10509_v50  ;;  %2842 = vmatmul.f32.gmra.mxu2 %v14751_v60 }
 0x37e   :  { %v10953_v3 = vpop.f32.mrf.mxu1  ;;  %v10971_v54 = vsub.f32 %v14753_v48, %v10960_v63 }
 0x37f   :  { %2987 = vmatmul.f32.gmra.mxu0 %v10524_v16 }
 0x380   :  { %v2359_v11 = vpop.f32.mrf.mxu3  ;;  %v2302_v58 = vpop.f32.mrf.mxu2  ;;  %8498 = vset.pattern.permute.xlu2 %v14480_v28  ;;  %8502 = vset.pattern.permute.xlu1 %v14744_v49  ;;  %v14757_v49 = vld [vmem:[#allocation30_spill] sm:$0xff] }
 0x381   :  { %3055 = vmatmul.f32.gmra.mxu1 %v10531_v41  ;;  %v2303_v29 = vadd.f32 %v2302_v58, %v10799_v52  ;;  %4301 = vperm.xlu2 %8498, %v10809_v38   ;;  %v10975_v52 = vsub.f32 %v14754_v56, %v10960_v63  ;;  %v3974_v38 = vmul.f32 %v10971_v54, %v10971_v54 }
 0x383   :  { %v10965_v33 = vadd.f32 %v2355_v47, %v2303_v29  ;;  %v3975_v47 = vmul.f32 %v10975_v52, %v10975_v52  ;;  %v3924_v12 = vpop.xlane.xlu1 %3923 }
 0x384   :  { %v10967_v32 = vpop.f32.mrf.mxu0 }
 0x385   :  { %14752 = vst [vmem:[#allocation17_spill] sm:$0xff] %v10965_v33  ;;  %2927 = vmatmul.f32.gmra.mxu3 %v10539_v61  ;;  %2850 = vmatmul.f32.gmra.mxu2 %v14755_v24  ;;  %v3995_v29 = vadd.f32 %v3975_v47, %v3974_v38  ;;  %v10995_v47 = vmul.f32 %v3924_v12, %v10631_v19 }
 0x386   :  { %v10979_v58 = vpop.f32.mrf.mxu1 }
 0x387   :  { %2992 = vmatmul.f32.gmra.mxu0 %v10551_v51  ;;  %3996 = vadd.xlane.f32.xlu0 %v3995_v29  ;;  %14758 = vst [vmem:[#allocation26_spill] sm:$0xff] %v10995_v47 }
 0x388   :  { %v2363_v17 = vpop.f32.mrf.mxu3  ;;  %v2306_v48 = vpop.f32.mrf.mxu2 }
 0x389   :  { %3061 = vmatmul.f32.gmra.mxu1 %v10556_v22  ;;  %v2307_v56 = vadd.f32 %v2306_v48, %v10815_v8  ;;  %8501 = vset.pattern.permute.xlu2 %v14749_v6  ;;  %v14760_v48 = vld [vmem:[#allocation35_spill] sm:$0xff]  ;;  %v14762_v6 = vld [vmem:[#allocation36_spill] sm:$0xff] }
 0x38b   :  { %v10989_v28 = vadd.f32 %v2359_v11, %v2307_v56  ;;  %v11003_v56 = vsub.f32 %v14760_v48, %v10995_v47 }
 0x38c   :  { %v2684_v7 = vpop.f32.mrf.mxu0 }
 0x38d   :  { %14756 = vst [vmem:[#allocation28_spill] sm:$0xff] %v10989_v28  ;;  %3147 = vmatmul.f32.vlgmr.msrb.gmra.mxu3 %v10297_v23  ;;  %2858 = vmatmul.f32.gmra.mxu2 %v14757_v49  ;;  %v11007_v28 = vsub.f32 %v14762_v6, %v10995_v47  ;;  %v3968_v12 = vmul.f32 %v11003_v56, %v11003_v56 }
 0x38e   :  { %v2737_v9 = vpop.f32.mrf.mxu1  ;;  %14761 = vst [vmem:[#allocation30_spill] sm:$0xff] %v11003_v56 }
 0x38f   :  { %3204 = vmatmul.f32.vlgmr.msrb.gmra.mxu0 %v10324_v40  ;;  %14763 = vst [vmem:[#allocation35_spill] sm:$0xff] %v11007_v28 }
 0x390   :  { %v2609_v38 = vpop.f32.mrf.mxu3  ;;  %v2310_v33 = vpop.f32.mrf.mxu2 }
 0x391   :  { %3301 = vmatmul.f32.vlgmr.msrb.gmra.mxu1 %v10297_v23  ;;  %v2311_v8 = vadd.f32 %v2310_v33, %v10835_v4  ;;  %v3969_v4 = vmul.f32 %v11007_v28, %v11007_v28  ;;  %v2490_v33 = vadd.f32 %v10813_v37, %v10803_v31 }
 0x393   :  { %v10999_v11 = vadd.f32 %v2363_v17, %v2311_v8  ;;  %v3986_v8 = vadd.f32 %v3969_v4, %v3968_v12 }
 0x394   :  { %v2688_v29 = vpop.f32.mrf.mxu0 }
 0x395   :  { %14759 = vst [vmem:[#allocation24_spill] sm:$0xff] %v10999_v11  ;;  %3151 = vmatmul.f32.gmra.mxu3 %v10320_v44  ;;  %3094 = vmatmul.f32.vlgmr.msrb.gmra.mxu2 %v10297_v23 }
 0x396   :  { %v2741_v40 = vpop.f32.mrf.mxu1  ;;  %3987 = vadd.xlane.f32.xlu0 %v3986_v8  ;;  %v11029_v8 = vpop.xlane.xlu1 %4002 }
 0x397   :  { %3212 = vmatmul.f32.gmra.mxu0 %v10349_v62  ;;  %v2494_v62 = vadd.f32 %v10833_v1, %v10828_v20  ;;  %14764 = vst [vmem:[#allocation36_spill] sm:$0xff] %v11029_v8  ;;  %v2498_v1 = vadd.f32 %v10850_v45, %v10845_v5  ;;  %v2502_v45 = vadd.f32 %v10878_v34, %v10863_v35 }
 0x398   :  { %v2615_v17 = vpop.f32.mrf.mxu3  ;;  %v2547_v6 = vpop.f32.mrf.mxu2 }
 0x399   :  { %3305 = vmatmul.f32.gmra.mxu1 %v10320_v44  ;;  %v2548_v48 = vadd.f32 %v2547_v6, %v2490_v33 }
 0x39b   :  { %v2610_v47 = vadd.f32 %v2609_v38, %v2548_v48 }
 0x39c   :  { %v2692_v11 = vpop.f32.mrf.mxu0 }
 0x39d   :  { %3155 = vmatmul.f32.gmra.mxu3 %v10345_v46  ;;  %v2685_v56 = vadd.f32 %v2684_v7, %v2610_v47  ;;  %3098 = vmatmul.f32.gmra.mxu2 %v10320_v44 }
 0x39e   :  { %v2745_v28 = vpop.f32.mrf.mxu1  ;;  %v3994_v5 = vpop.xlane.xlu1 %3993 }
 0x39f   :  { %3220 = vmatmul.f32.gmra.mxu0 %v14740_v27  ;;  %v11024_v37 = vadd.f32 %v2737_v9, %v2685_v56 }
 0x3a0   :  { %v2621_v31 = vpop.f32.mrf.mxu3  ;;  %v2552_v12 = vpop.f32.mrf.mxu2 }
 0x3a1   :  { %3309 = vmatmul.f32.gmra.mxu1 %v10345_v46  ;;  %v2553_v4 = vadd.f32 %v2552_v12, %v2494_v62 }
 0x3a3   :  { %v2616_v38 = vadd.f32 %v2615_v17, %v2553_v4 }
 0x3a4   :  { %v2696_v33 = vpop.f32.mrf.mxu0  ;;  %v4000_v20 = vpop.xlane.xlu2 %3999 }
 0x3a5   :  { %3159 = vmatmul.f32.gmra.mxu3 %v10370_v13  ;;  %v2689_v7 = vadd.f32 %v2688_v29, %v2616_v38  ;;  %3102 = vmatmul.f32.gmra.mxu2 %v10345_v46  ;;  %v4010_v27 = vmul.f32 %v4000_v20, %v10631_v19 }
 0x3a6   :  { %v2749_v47 = vpop.f32.mrf.mxu1  ;;  %v11052_v34 = vpop.xlane.xlu1 %3984 }
 0x3a7   :  { %3228 = vmatmul.f32.gmra.mxu0 %v14745_v15  ;;  %v11035_v56 = vadd.f32 %v2741_v40, %v2689_v7  ;;  %v4018_v6 = vadd.f32 1e-05, %v4010_v27  ;;  %14766 = vst [vmem:[#allocation64_spill] sm:$0xff] %v11052_v34 }
 0x3a8   :  { %v2627_v9 = vpop.f32.mrf.mxu3  ;;  %v2557_v17 = vpop.f32.mrf.mxu2 }
 0x3a9   :  { %3313 = vmatmul.f32.gmra.mxu1 %v10370_v13  ;;  %v2558_v29 = vadd.f32 %v2557_v17, %v2498_v1  ;;  %8560 = vrsqrt.f32 %v4018_v6  ;;  %v4008_v1 = vmul.f32 %v3994_v5, %v10631_v19  ;;  %vm4086_vm9 = vweird.f32 %v4018_v6 }
 0x3aa   :  { %4305 = vperm.xlu0 %8494, %v10823_v14  }
 0x3ab   :  { %v2622_v48 = vadd.f32 %v2621_v31, %v2558_v29 }
 0x3ac   :  { %v2700_v62 = vpop.f32.mrf.mxu0  ;;  %v11044_v4 = vpop.xlane.xlu2 %3990 }
 0x3ad   :  { %3163 = vmatmul.f32.gmra.mxu3 %v10432_v36  ;;  %v2693_v15 = vadd.f32 %v2692_v11, %v2622_v48  ;;  %3106 = vmatmul.f32.gmra.mxu2 %v10370_v13  ;;  %14765 = vst [vmem:[#allocation63_spill] sm:$0xff] %v11044_v4  ;;  %v11055_v48 = vadd.f32 1e-05, %v4008_v1 }
 0x3ae   :  { %v2753_v12 = vpop.f32.mrf.mxu1 }
 0x3af   :  { %3236 = vmatmul.f32.gmra.mxu0 %v14747_v18  ;;  %v11046_v31 = vadd.f32 %v2745_v28, %v2693_v15  ;;  %v8561_v11 = vpop.eup %8560  ;;  %v2506_v15 = vadd.f32 %v10909_v57, %v10903_v59  ;;  %8562 = vrsqrt.f32 %v11055_v48  ;;  %vm4066_vm12 = vweird.f32 %v11055_v48 }
 0x3b0   :  { %v2633_v40 = vpop.f32.mrf.mxu3  ;;  %v2562_v38 = vpop.f32.mrf.mxu2  ;;  %v4081_v20 = vmul.f32 %v8561_v11, %v4018_v6  ;;  %vm4087_vm10 = vweird.f32 %v8561_v11 }
 0x3b1   :  { %3317 = vmatmul.f32.gmra.mxu1 %v10432_v36  ;;  %v2563_v7 = vadd.f32 %v2562_v38, %v2502_v45  ;;  %vm4088_vm11 = vmor %vm4086_vm9, %vm4087_vm10 }
 0x3b2   :  { %v4082_v18 = vmul.f32 %v8561_v11, %v4081_v20 }
 0x3b3   :  { %v2628_v27 = vadd.f32 %v2627_v9, %v2563_v7 }
 0x3b4   :  { %v2704_v17 = vpop.f32.mrf.mxu0  ;;  %v4083_v28 = vmul.f32 0.5, %v4082_v18  ;;  %v11062_v7 = vpop.xlane.xlu2 %3981 }
 0x3b5   :  { %3167 = vmatmul.f32.gmra.mxu3 %v10474_v10  ;;  %v2697_v29 = vadd.f32 %v2696_v33, %v2628_v27  ;;  %3110 = vmatmul.f32.gmra.mxu2 %v10432_v36  ;;  %14767 = vst [vmem:[#allocation65_spill] sm:$0xff] %v11062_v7  ;;  %v2510_v27 = vadd.f32 %v10931_v30, %v10926_v39 }
 0x3b6   :  { %v2757_v35 = vpop.f32.mrf.mxu1  ;;  %v4084_v33 = vsub.f32 1.5, %v4083_v28  ;;  %v2514_v39 = vadd.f32 %v10953_v3, %v10948_v43 }
 0x3b7   :  { %3244 = vmatmul.f32.gmra.mxu0 %v14751_v60  ;;  %v11059_v9 = vadd.f32 %v2749_v47, %v2697_v29 }
 0x3b8   :  { %v2639_v5 = vpop.f32.mrf.mxu3  ;;  %v2567_v45 = vpop.f32.mrf.mxu2  ;;  %v4085_v57 = vmul.f32 %v8561_v11, %v4084_v33 }
 0x3b9   :  { %3321 = vmatmul.f32.gmra.mxu1 %v10474_v10  ;;  %v2568_v38 = vadd.f32 %v2567_v45, %v2506_v15  ;;  %v8563_v15 = vpop.eup %8562 }
 0x3ba   :  { %v4142_v1 = vpop.permute.xlu1 %4141  ;;  %v4089_v6 = vsel %vm4088_vm11, %v8561_v11, %v4085_v57  ;;  %v4061_v11 = vmul.f32 %v8563_v15, %v11055_v48  ;;  %vm4067_vm13 = vweird.f32 %v8563_v15 }
 0x3bb   :  { %v2634_v60 = vadd.f32 %v2633_v40, %v2568_v38  ;;  %v4112_v29 = vmul.f32 %v4089_v6, %v10729_v2  ;;  %v4113_v40 = vmul.f32 %v4089_v6, %v10733_v21  ;;  %vm4068_vm14 = vmor %vm4066_vm12, %vm4067_vm13 }
 0x3bc   :  { %v2708_v20 = vpop.f32.mrf.mxu0  ;;  %v11076_v57 = vpop.permute.xlu2 %4193 }
 0x3bd   :  { %3171 = vmatmul.f32.gmra.mxu3 %v10509_v50  ;;  %v2701_v59 = vadd.f32 %v2700_v62, %v2634_v60  ;;  %3114 = vmatmul.f32.gmra.mxu2 %v10474_v10  ;;  %v4160_v33 = vmul.f32 %v4142_v1, %v4112_v29  ;;  %v4161_v38 = vmul.f32 %v4142_v1, %v4113_v40  ;;  %v14772_v40 = vld [vmem:[#allocation16_spill] sm:$0xff] }
 0x3be   :  { %v2761_v47 = vpop.f32.mrf.mxu1  ;;  %14769 = vst [vmem:[#allocation67_spill] sm:$0xff] %v11076_v57 }
 0x3bf   :  { %3252 = vmatmul.f32.gmra.mxu0 %v14755_v24  ;;  %v11072_v28 = vadd.f32 %v2753_v12, %v2701_v59  ;;  %v4062_v12 = vmul.f32 %v8563_v15, %v4061_v11 }
 0x3c0   :  { %v2645_v18 = vpop.f32.mrf.mxu3  ;;  %v2572_v45 = vpop.f32.mrf.mxu2 }
 0x3c1   :  { %14768 = vst [vmem:[#allocation66_spill] sm:$0xff] %v11072_v28  ;;  %3325 = vmatmul.f32.gmra.mxu1 %v10509_v50  ;;  %v2573_v62 = vadd.f32 %v2572_v45, %v2510_v27  ;;  %v4063_v29 = vmul.f32 0.5, %v4062_v12 }
 0x3c3   :  { %v2640_v24 = vadd.f32 %v2639_v5, %v2573_v62  ;;  %v11083_v59 = vpop.permute.xlu1 %4250  ;;  %v4064_v45 = vsub.f32 1.5, %v4063_v29 }
 0x3c4   :  { %v2712_v60 = vpop.f32.mrf.mxu0  ;;  %14770 = vst [vmem:[#allocation68_spill] sm:$0xff] %v11083_v59  ;;  %v11094_v3 = vpop.permute.xlu2 %4137 }
 0x3c5   :  { %3175 = vmatmul.f32.gmra.mxu3 %v10539_v61  ;;  %v2705_v2 = vadd.f32 %v2704_v17, %v2640_v24  ;;  %3118 = vmatmul.f32.gmra.mxu2 %v10509_v50 }
 0x3c6   :  { %v2765_v21 = vpop.f32.mrf.mxu1 }
 0x3c7   :  { %3260 = vmatmul.f32.gmra.mxu0 %v14757_v49  ;;  %v11085_v5 = vadd.f32 %v2757_v35, %v2705_v2  ;;  %v2518_v35 = vadd.f32 %v10979_v58, %v10967_v32  ;;  %v4065_v58 = vmul.f32 %v8563_v15, %v4064_v45 }
 0x3c8   :  { %v2651_v30 = vpop.f32.mrf.mxu3  ;;  %v2577_v1 = vpop.f32.mrf.mxu2 }
 0x3c9   :  { %14771 = vst [vmem:[#allocation69_spill] sm:$0xff] %v11085_v5  ;;  %3329 = vmatmul.f32.gmra.mxu1 %v10539_v61  ;;  %v2578_v6 = vadd.f32 %v2577_v1, %v2514_v39  ;;  %v14774_v1 = vld [vmem:[#allocation21_spill] sm:$0xff] }
 0x3cb   :  { %v2646_v27 = vadd.f32 %v2645_v18, %v2578_v6  ;;  %v14775_v6 = vld [vmem:[#allocation11_spill] sm:$0xff] }
 0x3cc   :  { %v11088_v17 = vpop.f32.mrf.mxu0 }
 0x3cd   :  { %3421 = vmatmul.f32.vlgmr.msra.gmra.mxu3 %v14772_v40  ;;  %v2709_v49 = vadd.f32 %v2708_v20, %v2646_v27  ;;  %3122 = vmatmul.f32.gmra.mxu2 %v10539_v61  ;;  %v4190_v24 = vpop.permute.xlu1 %4189  ;;  %v14777_v40 = vld [vmem:[#allocation45_spill] sm:$0xff] }
 0x3ce   :  { %v11092_v43 = vpop.f32.mrf.mxu1  ;;  %v4208_v2 = vadd.f32 %v4190_v24, %v4160_v33  ;;  %v4209_v39 = vadd.f32 %v4190_v24, %v4161_v38  ;;  %v14781_v24 = vld [vmem:[#allocation47_spill] sm:$0xff] }
 0x3cf   :  { %3496 = vmatmul.f32.vlgmr.msra.gmra.mxu0 %v10297_v23  ;;  %v11102_v62 = vadd.f32 %v2761_v47, %v2709_v49  ;;  %v4069_v47 = vsel %vm4068_vm14, %v8563_v15, %v4065_v58  ;;  %v14785_v58 = vld [vmem:[#allocation13_spill] sm:$0xff] }
 0x3d0   :  { %v11100_v18 = vpop.f32.mrf.mxu3  ;;  %v2582_v20 = vpop.f32.mrf.mxu2  ;;  %v4109_v33 = vmul.f32 %v4069_v47, %v14777_v40 }
 0x3d1   :  { %14773 = vst [vmem:[#allocation16_spill] sm:$0xff] %v11102_v62  ;;  %3549 = vmatmul.f32.vlgmr.msra.gmra.mxu1 %v10297_v23  ;;  %v2583_v11 = vadd.f32 %v2582_v20, %v2518_v35  ;;  %v14776_v23 = vld [vmem:[#allocation44_spill] sm:$0xff] }
 0x3d2   :  { %v4108_v29 = vmul.f32 %v4069_v47, %v14776_v23 }
 0x3d3   :  { %v2652_v12 = vadd.f32 %v2651_v30, %v2583_v11  ;;  %v4248_v30 = vpop.permute.xlu2 %4247 }
 0x3d4   :  { %v11105_v32 = vpop.f32.mrf.mxu0  ;;  %vm4258_vm15 = vcmp.eq.s32.totalorder %v4248_v30, 1 }
 0x3d5   :  { %3427 = vmatmul.f32.gmra.mxu3 %v14774_v1  ;;  %v2713_v48 = vadd.f32 %v2712_v60, %v2652_v12  ;;  %3359 = vmatmul.f32.vlgmr.msra.gmra.mxu2 %v14775_v6  ;;  %v11128_v11 = vsel %vm4258_vm15, %v14781_v24, %v4208_v2  ;;  %v11131_v12 = vsel %vm4258_vm15, %v14781_v24, %v4209_v39  ;;  %v14786_v2 = vld [vmem:[#allocation32_spill] sm:$0xff] }
 0x3d6   :  { %v11109_v27 = vpop.f32.mrf.mxu1  ;;  %v4134_v60 = vpop.permute.xlu1 %4133  ;;  %14782 = vst [vmem:[#allocation45_spill] sm:$0xff] %v11128_v11  ;;  %v14787_v39 = vld [vmem:[#allocation12_spill] sm:$0xff] }
 0x3d7   :  { %3500 = vmatmul.f32.gmra.mxu0 %v10320_v44  ;;  %v11116_v49 = vadd.f32 %v2765_v21, %v2713_v48  ;;  %v11121_v45 = vmul.f32 %v4134_v60, %v4108_v29  ;;  %v11123_v15 = vmul.f32 %v4134_v60, %v4109_v33  ;;  %14783 = vst [vmem:[#allocation47_spill] sm:$0xff] %v11131_v12  ;;  %v14784_v21 = vld [vmem:[#allocation15_spill] sm:$0xff] }
 0x3d8   :  { %v11114_v38 = vpop.f32.mrf.mxu3  ;;  %v11118_v35 = vpop.f32.mrf.mxu2 }
 0x3d9   :  { %14778 = vst [vmem:[#allocation21_spill] sm:$0xff] %v11116_v49  ;;  %3553 = vmatmul.f32.gmra.mxu1 %v10320_v44 }
 0x3da   :  { %14779 = vst [vmem:[#allocation11_spill] sm:$0xff] %v11121_v45 }
 0x3db   :  { %14780 = vst [vmem:[#allocation44_spill] sm:$0xff] %v11123_v15  ;;  %v4186_v45 = vpop.permute.xlu2 %4185 }
 0x3dc   :  { %v11125_v20 = vpop.f32.mrf.mxu0 }
 0x3dd   :  { %3433 = vmatmul.f32.gmra.mxu3 %v14784_v21  ;;  %3364 = vmatmul.f32.gmra.mxu2 %v14785_v58 }
 0x3de   :  { %v11135_v1 = vpop.f32.mrf.mxu1 }
 0x3df   :  { %3504 = vmatmul.f32.gmra.mxu0 %v10345_v46 }
 0x3e0   :  { %v11138_v44 = vpop.f32.mrf.mxu3  ;;  %v11140_v48 = vpop.f32.mrf.mxu2 }
 0x3e1   :  { %3557 = vmatmul.f32.gmra.mxu1 %v10345_v46  ;;  %v14788_v46 = vld [vmem:[#allocation23_spill] sm:$0xff] }
 0x3e4   :  { %v11143_v6 = vpop.f32.mrf.mxu0 }
 0x3e5   :  { %3439 = vmatmul.f32.gmra.mxu3 %v14786_v2  ;;  %3369 = vmatmul.f32.gmra.mxu2 %v14787_v39 }
 0x3e6   :  { %v11147_v47 = vpop.f32.mrf.mxu1 }
 0x3e7   :  { %3508 = vmatmul.f32.gmra.mxu0 %v10370_v13 }
 0x3e8   :  { %v11150_v23 = vpop.f32.mrf.mxu3  ;;  %v11152_v29 = vpop.f32.mrf.mxu2 }
 0x3e9   :  { %3561 = vmatmul.f32.gmra.mxu1 %v10370_v13 }
 0x3ec   :  { %v11155_v40 = vpop.f32.mrf.mxu0 }
 0x3ed   :  { %3445 = vmatmul.f32.gmra.mxu3 %v10462_v26  ;;  %3374 = vmatmul.f32.gmra.mxu2 %v14788_v46 }
 0x3ee   :  { %v11159_v33 = vpop.f32.mrf.mxu1 }
 0x3ef   :  { %3512 = vmatmul.f32.gmra.mxu0 %v10432_v36 }
 0x3f0   :  { %v11162_v30 = vpop.f32.mrf.mxu3  ;;  %v11164_v60 = vpop.f32.mrf.mxu2 }
 0x3f1   :  { %3565 = vmatmul.f32.gmra.mxu1 %v10432_v36 }
 0x3f4   :  { %v11167_v24 = vpop.f32.mrf.mxu0 }
 0x3f5   :  { %14789 = vst [vmem:[#allocation15_spill] sm:$0xff] %v11167_v24  ;;  %3451 = vmatmul.f32.gmra.mxu3 %v10501_v0  ;;  %3379 = vmatmul.f32.gmra.mxu2 %v10446_v42  ;;  %v8806_v24 = vld [vmem:[#allocation2 + $0x8] sm:$0xff] }
 0x3f6   :  { %v11171_v13 = vpop.f32.mrf.mxu1 }
 0x3f7   :  { %14790 = vst [vmem:[#allocation13_spill] sm:$0xff] %v11171_v13  ;;  %3516 = vmatmul.f32.gmra.mxu0 %v10474_v10 }
 0x3f8   :  { %v11174_v26 = vpop.f32.mrf.mxu3  ;;  %v11176_v21 = vpop.f32.mrf.mxu2 }
 0x3f9   :  { %3569 = vmatmul.f32.gmra.mxu1 %v10474_v10 }
 0x3fa   :  { %v3997_v36 = vpop.xlane.xlu0 %3996 }
 0x3fb   :  { %v4009_v42 = vmul.f32 %v3997_v36, %v10631_v19 }
 0x3fc   :  { %v11179_v58 = vpop.f32.mrf.mxu0 }
 0x3fd   :  { %14791 = vst [vmem:[#allocation32_spill] sm:$0xff] %v11179_v58  ;;  %3457 = vmatmul.f32.gmra.mxu3 %v10531_v41  ;;  %3384 = vmatmul.f32.gmra.mxu2 %v10482_v55  ;;  %v4017_v39 = vadd.f32 1e-05, %v4009_v42 }
 0x3fe   :  { %v11183_v0 = vpop.f32.mrf.mxu1 }
 0x3ff   :  { %14792 = vst [vmem:[#allocation12_spill] sm:$0xff] %v11183_v0  ;;  %3520 = vmatmul.f32.gmra.mxu0 %v10509_v50  ;;  %8564 = vrsqrt.f32 %v4017_v39  ;;  %vm4076_vm1 = vweird.f32 %v4017_v39 }
 0x400   :  { %v11187_v2 = vpop.f32.mrf.mxu3  ;;  %v11189_v46 = vpop.f32.mrf.mxu2 }
 0x401   :  { %14793 = vst [vmem:[#allocation23_spill] sm:$0xff] %v11187_v2  ;;  %3573 = vmatmul.f32.gmra.mxu1 %v10509_v50 }
 0x404   :  { %v11192_v10 = vpop.f32.mrf.mxu0 }
 0x405   :  { %14794 = vst [vmem:[#allocation70_spill] sm:$0xff] %v11192_v10  ;;  %3463 = vmatmul.f32.gmra.mxu3 %v10556_v22  ;;  %3389 = vmatmul.f32.gmra.mxu2 %v10524_v16  ;;  %v8565_v41 = vpop.eup %8564 }
 0x406   :  { %v11196_v55 = vpop.f32.mrf.mxu1  ;;  %v4071_v42 = vmul.f32 %v8565_v41, %v4017_v39  ;;  %vm4077_vm2 = vweird.f32 %v8565_v41  ;;  %v4245_v39 = vpop.permute.xlu1 %4244 }
 0x407   :  { %14795 = vst [vmem:[#allocation71_spill] sm:$0xff] %v11196_v55  ;;  %3524 = vmatmul.f32.gmra.mxu0 %v10539_v61  ;;  %vm4078_vm3 = vmor %vm4076_vm1, %vm4077_vm2  ;;  %vm4257_vm5 = vcmp.eq.s32.totalorder %v4245_v39, 1 }
 0x408   :  { %v11199_v36 = vpop.f32.mrf.mxu3  ;;  %v11201_v57 = vpop.f32.mrf.mxu2  ;;  %v4072_v50 = vmul.f32 %v8565_v41, %v4071_v42 }
 0x409   :  { %14796 = vst [vmem:[#allocation72_spill] sm:$0xff] %v11199_v36  ;;  %3577 = vmatmul.f32.gmra.mxu1 %v10539_v61 }
 0x40a   :  { %14797 = vst [vmem:[#allocation73_spill] sm:$0xff] %v11201_v57  ;;  %v4073_v7 = vmul.f32 0.5, %v4072_v50 }
 0x40c   :  { %v3205_v59 = vpop.f32.mrf.mxu0  ;;  %v4074_v22 = vsub.f32 1.5, %v4073_v7 }
 0x40d   :  { %3394 = vmatmul.f32.gmra.mxu2 %v10551_v51 }
 0x40e   :  { %v3302_v16 = vpop.f32.mrf.mxu1  ;;  %v4075_v4 = vmul.f32 %v8565_v41, %v4074_v22 }
 0x410   :  { %v11205_v34 = vpop.f32.mrf.mxu3  ;;  %v11207_v8 = vpop.f32.mrf.mxu2  ;;  %v4079_v12 = vsel %vm4078_vm3, %v8565_v41, %v4075_v4 }
 0x411   :  { %14798 = vst [vmem:[#allocation74_spill] sm:$0xff] %v11207_v8  ;;  %v4110_v61 = vmul.f32 %v4079_v12, %v10971_v54  ;;  %v4111_v42 = vmul.f32 %v4079_v12, %v10975_v52 }
 0x413   :  { %v4158_v51 = vmul.f32 %v11094_v3, %v4110_v61  ;;  %v4159_v7 = vmul.f32 %v11094_v3, %v4111_v42  ;;  %v14495_v3 = vmov 4  }
 0x414   :  { %v11209_v11 = vpop.f32.mrf.mxu0  ;;  %8499 = vset.pattern.permute.xlu0 %v14495_v3 }
 0x415   :  { %v4206_v22 = vadd.f32 %v4186_v45, %v4158_v51  ;;  %v4207_v4 = vadd.f32 %v4186_v45, %v4159_v7  ;;  %4353 = vperm.xlu0 %8499, %v10823_v14  }
 0x416   :  { %v11213_v50 = vpop.f32.mrf.mxu1 }
 0x417   :  { %v11222_v54 = vsel %vm4257_vm5, %v10960_v63, %v4206_v22  ;;  %v11225_v52 = vsel %vm4257_vm5, %v10960_v63, %v4207_v4 }
 0x418   :  { %v11215_v15 = vpop.f32.mrf.mxu3  ;;  %v3095_v19 = vpop.f32.mrf.mxu2  ;;  %14799 = vst [vmem:[#allocation75_spill] sm:$0xff] %v11222_v54 }
 0x419   :  { %14800 = vst [vmem:[#allocation76_spill] sm:$0xff] %v11225_v52 }
 0x41c   :  { %v11219_v41 = vpop.f32.mrf.mxu0 }
 0x41e   :  { %v11227_v12 = vpop.f32.mrf.mxu1 }
 0x420   :  { %v11229_v49 = vpop.f32.mrf.mxu3  ;;  %v3099_v61 = vpop.f32.mrf.mxu2 }
 0x424   :  { %v11231_v62 = vpop.f32.mrf.mxu0 }
 0x426   :  { %v11235_v45 = vpop.f32.mrf.mxu1 }
 0x428   :  { %v11237_v42 = vpop.f32.mrf.mxu3  ;;  %v11239_v39 = vpop.f32.mrf.mxu2 }
 0x42c   :  { %v11241_v63 = vpop.f32.mrf.mxu0 }
 0x42e   :  { %v11243_v51 = vpop.f32.mrf.mxu1 }
 0x430   :  { %v11245_v7 = vpop.f32.mrf.mxu3  ;;  %v11247_v22 = vpop.f32.mrf.mxu2 }
 0x431   :  { %14801 = vst [vmem:[#allocation77_spill] sm:$0xff] %v11245_v7  ;;  %v8805_v7 = vld [vmem:[#allocation2] sm:$0xff] }
 0x434   :  { %v11249_v4 = vpop.f32.mrf.mxu0 }
 0x435   :  { %14802 = vst [vmem:[#allocation78_spill] sm:$0xff] %v11249_v4 }
 0x436   :  { %v11251_v52 = vpop.f32.mrf.mxu1 }
 0x437   :  { %14803 = vst [vmem:[#allocation79_spill] sm:$0xff] %v11251_v52 }
 0x438   :  { %v11253_v3 = vpop.f32.mrf.mxu3  ;;  %v11255_v14 = vpop.f32.mrf.mxu2 }
 0x439   :  { %14804 = vst [vmem:[#allocation80_spill] sm:$0xff] %v11253_v3  ;;  %v2901_v3 = vadd.f32 %v11100_v18, %v11118_v35 }
 0x43c   :  { %v11257_v54 = vpop.f32.mrf.mxu0 }
 0x43d   :  { %14805 = vst [vmem:[#allocation81_spill] sm:$0xff] %v11257_v54 }
 0x43e   :  { %v11259_v55 = vpop.f32.mrf.mxu1 }
 0x43f   :  { %14806 = vst [vmem:[#allocation82_spill] sm:$0xff] %v11259_v55  ;;  %v2905_v55 = vadd.f32 %v11114_v38, %v11140_v48 }
 0x440   :  { %v11261_v10 = vpop.f32.mrf.mxu3  ;;  %v11263_v0 = vpop.f32.mrf.mxu2 }
 0x441   :  { %14807 = vst [vmem:[#allocation83_spill] sm:$0xff] %v11261_v10  ;;  %v2959_v10 = vadd.f32 %v11088_v17, %v2901_v3  ;;  %v2964_v18 = vadd.f32 %v11105_v32, %v2905_v55  ;;  %v14814_v17 = vld [vmem:[#allocation58_spill] sm:$0xff]  ;;  %v14815_v55 = vld [vmem:[#allocation60_spill] sm:$0xff] }
 0x442   :  { %14808 = vst [vmem:[#allocation84_spill] sm:$0xff] %v11263_v0  ;;  %v3581_v3 = vmul.f32 %v8805_v7, %v14814_v17  ;;  %v8810_v17 = vld [vmem:[#allocation2 + $0x28] sm:$0xff] }
 0x444   :  { %v11265_v36 = vpop.f32.mrf.mxu0 }
 0x445   :  { %14809 = vst [vmem:[#allocation85_spill] sm:$0xff] %v11265_v36  ;;  %v3303_v36 = vadd.f32 %v3302_v16, %v3205_v59  ;;  %v3582_v59 = vmul.f32 %v8806_v24, %v11024_v37  ;;  %v8808_v16 = vld [vmem:[#allocation2 + $0x18] sm:$0xff] }
 0x446   :  { %v11267_v8 = vpop.f32.mrf.mxu1 }
 0x447   :  { %14810 = vst [vmem:[#allocation86_spill] sm:$0xff] %v11267_v8  ;;  %v3021_v8 = vadd.f32 %v11092_v43, %v2959_v10  ;;  %v2909_v43 = vadd.f32 %v11138_v44, %v11152_v29  ;;  %v8807_v10 = vld [vmem:[#allocation2 + $0x10] sm:$0xff] }
 0x448   :  { %v11269_v5 = vpop.f32.mrf.mxu3  ;;  %v11271_v58 = vpop.f32.mrf.mxu2 }
 0x449   :  { %14811 = vst [vmem:[#allocation87_spill] sm:$0xff] %v11269_v5  ;;  %v2969_v37 = vadd.f32 %v11125_v20, %v2909_v43  ;;  %v3311_v20 = vadd.f32 %v11227_v12, %v11219_v41  ;;  %v8809_v12 = vld [vmem:[#allocation2 + $0x20] sm:$0xff] }
 0x44a   :  { %14812 = vst [vmem:[#allocation88_spill] sm:$0xff] %v11271_v58  ;;  %v3096_v58 = vadd.f32 %v3095_v19, %v3021_v8  ;;  %v3307_v19 = vadd.f32 %v11213_v50, %v11209_v11  ;;  %v3027_v8 = vadd.f32 %v11109_v27, %v2964_v18  ;;  %v2913_v50 = vadd.f32 %v11150_v23, %v11164_v60 }
 0x44c   :  { %v3497_v13 = vpop.f32.mrf.mxu0  ;;  %v3149_v25 = vadd.f32 %v11205_v34, %v3096_v58  ;;  %v3100_v48 = vadd.f32 %v3099_v61, %v3027_v8 }
 0x44e   :  { %v3550_v54 = vpop.f32.mrf.mxu1  ;;  %v3153_v11 = vadd.f32 %v11215_v15, %v3100_v48 }
 0x450   :  { %v3422_v52 = vpop.f32.mrf.mxu3  ;;  %v11275_v4 = vpop.f32.mrf.mxu2 }
 0x451   :  { %14813 = vst [vmem:[#allocation89_spill] sm:$0xff] %v11275_v4 }
 0x454   :  { %v3501_v5 = vpop.f32.mrf.mxu0 }
 0x456   :  { %v3554_v28 = vpop.f32.mrf.mxu1 }
 0x458   :  { %v3428_v0 = vpop.f32.mrf.mxu3  ;;  %v3360_v2 = vpop.f32.mrf.mxu2 }
 0x459   :  { %v3361_v57 = vadd.f32 %v3360_v2, %v3303_v36  ;;  %v3583_v36 = vmul.f32 %v8807_v10, %v14815_v55 }
 0x45b   :  { %v3423_v35 = vadd.f32 %v3422_v52, %v3361_v57  ;;  %v11306_v61 = vmul.f32 %v3583_v36, %v3153_v11  ;;  %v14817_v36 = vld [vmem:[#allocation15_spill] sm:$0xff] }
 0x45c   :  { %v3505_v2 = vpop.f32.mrf.mxu0 }
 0x45d   :  { %v3498_v4 = vadd.f32 %v3497_v13, %v3423_v35  ;;  %v11290_v13 = vmul.f32 %v3581_v3, %v3149_v25  ;;  %v3584_v25 = vmul.f32 %v8808_v16, %v11035_v56  ;;  %v2974_v56 = vadd.f32 %v11143_v6, %v2913_v50  ;;  %v14819_v50 = vld [vmem:[#allocation62_spill] sm:$0xff] }
 0x45e   :  { %v3558_v29 = vpop.f32.mrf.mxu1  ;;  %v3586_v3 = vmul.f32 %v8810_v17, %v11046_v31  ;;  %v3315_v6 = vadd.f32 %v11235_v45, %v11231_v62 }
 0x45f   :  { %v3551_v38 = vadd.f32 %v3550_v54, %v3498_v4  ;;  %v3039_v43 = vadd.f32 %v11147_v47, %v2974_v56  ;;  %v14824_v56 = vld [vmem:[#allocation79_spill] sm:$0xff] }
 0x460   :  { %v3365_v32 = vpop.f32.mrf.mxu2  ;;  %v3434_v57 = vpop.f32.mrf.mxu3 }
 0x461   :  { %v3366_v34 = vadd.f32 %v3365_v32, %v3307_v19  ;;  %v11292_v58 = vmul.f32 %v3582_v59, %v3551_v38  ;;  %v2917_v59 = vadd.f32 %v11162_v30, %v11176_v21 }
 0x463   :  { %v3429_v24 = vadd.f32 %v3428_v0, %v3366_v34  ;;  %v3613_v44 = vadd.f32 %v11292_v58, %v11290_v13  ;;  %v3033_v0 = vadd.f32 %v11135_v1, %v2969_v37  ;;  %v2979_v48 = vadd.f32 %v11155_v40, %v2917_v59  ;;  %v8811_v34 = vld [vmem:[#allocation2 + $0x30] sm:$0xff] }
 0x464   :  { %v3509_v60 = vpop.f32.mrf.mxu0  ;;  %v3319_v40 = vadd.f32 %v11243_v51, %v11241_v63 }
 0x465   :  { %v3502_v27 = vadd.f32 %v3501_v5, %v3429_v24  ;;  %3614 = vadd.xlane.f32.xlu2 %v3613_v44  ;;  %v3104_v15 = vadd.f32 %v11239_v39, %v3033_v0  ;;  %v14816_v39 = vld [vmem:[#allocation61_spill] sm:$0xff]  ;;  %v2921_v24 = vadd.f32 %v11174_v26, %v11189_v46  ;;  %v3045_v44 = vadd.f32 %v11159_v33, %v2979_v48  ;;  %v14820_v0 = vld [vmem:[#allocation66_spill] sm:$0xff] }
 0x466   :  { %v3585_v35 = vmul.f32 %v8809_v12, %v14816_v39  ;;  %v14818_v46 = vld [vmem:[#allocation77_spill] sm:$0xff]  ;;  %v14826_v12 = vld [vmem:[#allocation84_spill] sm:$0xff] }
 0x467   :  { %v3555_v54 = vadd.f32 %v3554_v28, %v3502_v27  ;;  %v3157_v41 = vadd.f32 %v11229_v49, %v3104_v15  ;;  %v3562_v28 = vpop.f32.mrf.mxu1  ;;  %v3108_v49 = vadd.f32 %v11247_v22, %v3039_v43  ;;  %v3587_v22 = vmul.f32 %v8811_v34, %v10924_v53  ;;  %v14822_v15 = vld [vmem:[#allocation23_spill] sm:$0xff]  ;;  %v14831_v34 = vld [vmem:[#allocation74_spill] sm:$0xff] }
 0x468   :  { %v3370_v52 = vpop.f32.mrf.mxu2  ;;  %v3440_v4 = vpop.f32.mrf.mxu3  ;;  %v3112_v27 = vadd.f32 %v11255_v14, %v3045_v44  ;;  %v8814_v14 = vld [vmem:[#allocation2 + $0x48] sm:$0xff] }
 0x469   :  { %v3371_v5 = vadd.f32 %v3370_v52, %v3311_v20  ;;  %v11308_v7 = vmul.f32 %v3584_v25, %v3555_v54  ;;  %v11322_v32 = vmul.f32 %v3585_v35, %v3157_v41  ;;  %v3161_v62 = vadd.f32 %v11237_v42, %v3108_v49  ;;  %v8813_v25 = vld [vmem:[#allocation2 + $0x40] sm:$0xff]  ;;  %v14821_v52 = vld [vmem:[#allocation73_spill] sm:$0xff]  ;;  %v14828_v49 = vld [vmem:[#allocation80_spill] sm:$0xff] }
 0x46a   :  { %v3165_v63 = vadd.f32 %v14818_v46, %v3112_v27  ;;  %v3589_v20 = vmul.f32 %v8813_v25, %v14819_v50  ;;  %v3590_v54 = vmul.f32 %v8814_v14, %v14820_v0  ;;  %v14835_v44 = vld [vmem:[#allocation12_spill] sm:$0xff] }
 0x46b   :  { %v3435_v18 = vadd.f32 %v3434_v57, %v3371_v5  ;;  %v3616_v23 = vadd.f32 %v11308_v7, %v11306_v61  ;;  %v11338_v55 = vmul.f32 %v3587_v22, %v3161_v62  ;;  %v2925_v5 = vadd.f32 %v14822_v15, %v14821_v52  ;;  %v11366_v62 = vld [vmem:[#allocation2 + $0x58] sm:$0xff]  ;;  %v14832_v22 = vld [vmem:[#allocation72_spill] sm:$0xff] }
 0x46c   :  { %v3513_v47 = vpop.f32.mrf.mxu0  ;;  %v11354_v17 = vmul.f32 %v3589_v20, %v3165_v63  ;;  %v14837_v63 = vld [vmem:[#allocation70_spill] sm:$0xff]  ;;  %v14838_v20 = vld [vmem:[#allocation83_spill] sm:$0xff]  ;;  %v14839_v52 = vld [vmem:[#allocation28_spill] sm:$0xff] }
 0x46d   :  { %v3506_v1 = vadd.f32 %v3505_v2, %v3435_v18  ;;  %3617 = vadd.xlane.f32.xlu0 %v3616_v23  ;;  %v8812_v2 = vld [vmem:[#allocation2 + $0x38] sm:$0xff]  ;;  %v14825_v23 = vld [vmem:[#allocation13_spill] sm:$0xff] }
 0x46e   :  { %v3588_v37 = vmul.f32 %v8812_v2, %v11059_v9  ;;  %v2984_v9 = vadd.f32 %v14817_v36, %v2921_v24  ;;  %v2929_v2 = vadd.f32 %v14832_v22, %v14831_v34  ;;  %v14834_v24 = vld [vmem:[#allocation82_spill] sm:$0xff]  ;;  %v8819_v34 = vld [vmem:[#allocation2 + $0x70] sm:$0xff]  ;;  %v14846_v22 = vld [vmem:[#allocation24_spill] sm:$0xff] }
 0x46f   :  { %v3559_v19 = vadd.f32 %v3558_v29, %v3506_v1  ;;  %v3566_v11 = vpop.f32.mrf.mxu1 }
 0x470   :  { %v3375_v8 = vpop.f32.mrf.mxu2  ;;  %v3446_v21 = vpop.f32.mrf.mxu3 }
 0x471   :  { %v3376_v38 = vadd.f32 %v3375_v8, %v3315_v6  ;;  %v11324_v57 = vmul.f32 %v3586_v3, %v3559_v19  ;;  %v14827_v6 = vld [vmem:[#allocation32_spill] sm:$0xff] }
 0x472   :  { %v2989_v43 = vadd.f32 %v14827_v6, %v2925_v5  ;;  %v14840_v5 = vld [vmem:[#allocation85_spill] sm:$0xff] }
 0x473   :  { %v3441_v31 = vadd.f32 %v3440_v4, %v3376_v38  ;;  %v3619_v30 = vadd.f32 %v11324_v57, %v11322_v32  ;;  %v14823_v4 = vld [vmem:[#allocation78_spill] sm:$0xff] }
 0x474   :  { %v3323_v18 = vadd.f32 %v14824_v56, %v14823_v4  ;;  %v3517_v1 = vpop.f32.mrf.mxu0  ;;  %v14841_v4 = vld [vmem:[#allocation86_spill] sm:$0xff] }
 0x475   :  { %v3510_v45 = vadd.f32 %v3509_v60, %v3441_v31  ;;  %3620 = vadd.xlane.f32.xlu1 %v3619_v30  ;;  %v3051_v60 = vadd.f32 %v14825_v23, %v2984_v9  ;;  %v11362_v31 = vld [vmem:[#allocation2 + $0x50] sm:$0xff]  ;;  %v3331_v56 = vadd.f32 %v14841_v4, %v14840_v5  ;;  %v11440_v4 = vpop.permute.xlu1 %4129 }
 0x476   :  { %v14829_v30 = vld [vmem:[#allocation17_spill] sm:$0xff] }
 0x477   :  { %v3563_v29 = vadd.f32 %v3562_v28, %v3510_v45  ;;  %v3116_v39 = vadd.f32 %v14826_v12, %v3051_v60  ;;  %v3570_v59 = vpop.f32.mrf.mxu1  ;;  %v14830_v45 = vld [vmem:[#allocation69_spill] sm:$0xff] }
 0x478   :  { %v3380_v42 = vpop.f32.mrf.mxu2  ;;  %v3452_v33 = vpop.f32.mrf.mxu3 }
 0x479   :  { %v3381_v10 = vadd.f32 %v3380_v42, %v3319_v40  ;;  %v11340_v53 = vmul.f32 %v3588_v37, %v3563_v29  ;;  %v3169_v38 = vadd.f32 %v14828_v49, %v3116_v39  ;;  %v14833_v37 = vld [vmem:[#allocation81_spill] sm:$0xff]  ;;  %v3057_v29 = vadd.f32 %v14835_v44, %v2989_v43 }
 0x47a   :  { %v3327_v40 = vadd.f32 %v14834_v24, %v14833_v37  ;;  %v14844_v39 = vld [vmem:[#allocation89_spill] sm:$0xff]  ;;  %v8820_v37 = vld [vmem:[#allocation2 + $0x78] sm:$0xff] }
 0x47b   :  { %v3447_v16 = vadd.f32 %v3446_v21, %v3381_v10  ;;  %v3622_v26 = vadd.f32 %v11340_v53, %v11338_v55  ;;  %v3591_v21 = vmul.f32 %v11362_v31, %v14829_v30  ;;  %v14836_v10 = vld [vmem:[#allocation88_spill] sm:$0xff]  ;;  %v14847_v24 = vld [vmem:[#allocation21_spill] sm:$0xff] }
 0x47c   :  { %v3120_v36 = vadd.f32 %v14836_v10, %v3057_v29  ;;  %v3521_v46 = vpop.f32.mrf.mxu0 }
 0x47d   :  { %v3514_v51 = vadd.f32 %v3513_v47, %v3447_v16  ;;  %3623 = vadd.xlane.f32.xlu2 %v3622_v26  ;;  %v3592_v47 = vmul.f32 %v11366_v62, %v14830_v45  ;;  %v11376_v16 = vmul.f32 %v3591_v21, %v3169_v38 }
 0x47e   :  { %v3173_v14 = vadd.f32 %v14838_v20, %v3120_v36  ;;  %v14849_v36 = vmov 5  }
 0x47f   :  { %v3567_v41 = vadd.f32 %v3566_v11, %v3514_v51  ;;  %v2994_v51 = vadd.f32 %v14837_v63, %v2929_v2  ;;  %v3574_v50 = vpop.f32.mrf.mxu1  ;;  %v3595_v2 = vmul.f32 %v8819_v34, %v14846_v22 }
 0x480   :  { %v3385_v28 = vpop.f32.mrf.mxu2  ;;  %v3458_v42 = vpop.f32.mrf.mxu3 }
 0x481   :  { %v3386_v35 = vadd.f32 %v3385_v28, %v3323_v18  ;;  %v11356_v3 = vmul.f32 %v3590_v54, %v3567_v41  ;;  %v11384_v54 = vld [vmem:[#allocation2 + $0x60] sm:$0xff]  ;;  %v11391_v41 = vld [vmem:[#allocation2 + $0x68] sm:$0xff] }
 0x482   :  { %v3593_v15 = vmul.f32 %v11384_v54, %v14839_v52  ;;  %v14842_v18 = vld [vmem:[#allocation71_spill] sm:$0xff] }
 0x483   :  { %v3453_v19 = vadd.f32 %v3452_v33, %v3386_v35  ;;  %v3625_v8 = vadd.f32 %v11356_v3, %v11354_v17  ;;  %v3063_v23 = vadd.f32 %v14842_v18, %v2994_v51  ;;  %v11425_v51 = vpop.permute.xlu2 %4301 }
 0x484   :  { %v11396_v6 = vmul.f32 %v3593_v15, %v3173_v14  ;;  %v3525_v38 = vpop.f32.mrf.mxu0 }
 0x485   :  { %v3518_v48 = vadd.f32 %v3517_v1, %v3453_v19  ;;  %3626 = vadd.xlane.f32.xlu2 %v3625_v8  ;;  %v14843_v1 = vld [vmem:[#allocation16_spill] sm:$0xff]  ;;  %v3124_v35 = vadd.f32 %v14844_v39, %v3063_v23 }
 0x486   :  { %v3594_v28 = vmul.f32 %v11391_v41, %v14843_v1 }
 0x487   :  { %v3571_v11 = vadd.f32 %v3570_v59, %v3518_v48  ;;  %v14845_v48 = vld [vmem:[#allocation87_spill] sm:$0xff]  ;;  %v3578_v45 = vpop.f32.mrf.mxu1 }
 0x488   :  { %v3390_v27 = vpop.f32.mrf.mxu2  ;;  %v3464_v19 = vpop.f32.mrf.mxu3  ;;  %v3177_v30 = vadd.f32 %v14845_v48, %v3124_v35 }
 0x489   :  { %v3391_v9 = vadd.f32 %v3390_v27, %v3327_v40  ;;  %v11378_v26 = vmul.f32 %v3592_v47, %v3571_v11  ;;  %v3596_v40 = vmul.f32 %v8820_v37, %v14847_v24  ;;  %v14848_v27 = vmov 0  }
 0x48a   :  { %v11405_v44 = vmul.f32 %v3595_v2, %v3177_v30 }
 0x48b   :  { %v3459_v33 = vadd.f32 %v3458_v42, %v3391_v9  ;;  %v3628_v25 = vadd.f32 %v11378_v26, %v11376_v16  ;;  %v11414_v42 = vld [vmem:[%s14392_s2 + $0x20] sm:$0xff]  ;;  %v14850_v9 = vmov 3  }
 0x48c   :  { %vm4216_vm4 = vcmp.gt.f32.partialorder %v11414_v42, 0.5 }
 0x48d   :  { %v3522_v0 = vadd.f32 %v3521_v46, %v3459_v33  ;;  %3629 = vadd.xlane.f32.xlu0 %v3628_v25  ;;  %v4224_v10 = vsel %vm4216_vm4, 1, %v14848_v27  ;;  %v11421_v46 = vpop.xlane.xlu0 %3987 }
 0x48f   :  { %v3575_v60 = vadd.f32 %v3574_v50, %v3522_v0  ;;  %v14851_v50 = vld [vmem:[#allocation37_spill] sm:$0xff] }
 0x490   :  { %v3395_v12 = vpop.f32.mrf.mxu2 }
 0x491   :  { %v3396_v59 = vadd.f32 %v3395_v12, %v3331_v56  ;;  %v11398_v43 = vmul.f32 %v3594_v28, %v3575_v60 }
 0x493   :  { %v3465_v8 = vadd.f32 %v3464_v19, %v3396_v59  ;;  %v3631_v49 = vadd.f32 %v11398_v43, %v11396_v6 }
 0x495   :  { %v3526_v21 = vadd.f32 %v3525_v38, %v3465_v8  ;;  %3632 = vadd.xlane.f32.xlu1 %v3631_v49  ;;  %v11423_v63 = vpop.permute.xlu0 %4305 }
 0x497   :  { %v3579_v47 = vadd.f32 %v3578_v45, %v3526_v21 }
 0x499   :  { %v11407_v29 = vmul.f32 %v3596_v40, %v3579_v47 }
 0x49b   :  { %v3634_v11 = vadd.f32 %v11407_v29, %v11405_v44 }
 0x49d   :  { %3635 = vadd.xlane.f32.xlu2 %v3634_v11  ;;  %v11427_v33 = vpop.permute.xlu0 %4353  ;;  %v8822_v11 = vld [vmem:[%s14392_s2 + $0x30] sm:$0xff] }
 0x4ae   :  { %4241 = vperm.xlu1 %8502, %v4224_v10  }
 0x4b5   :  { %4181 = vperm.xlu2 %8501, %v11414_v42  }
 0x4b6   :  { %8504 = vset.pattern.permute.xlu1 %v14849_v36 }
 0x4bd   :  { %8503 = vset.pattern.permute.xlu2 %v14850_v9 }
 0x4d8   :  { %v3615_v25 = vpop.xlane.xlu2 %3614 }
 0x4d9   :  { %v3644_v20 = vmul.f32 %v14851_v50, %v3615_v25 }
 0x4db   :  { %v11431_v14 = vsub.f32 %v11290_v13, %v3644_v20  ;;  %v11434_v0 = vsub.f32 %v11292_v58, %v3644_v20 }
 0x4dd   :  { %v3668_v52 = vmul.f32 %v11431_v14, %v11431_v14  ;;  %v3669_v15 = vmul.f32 %v11434_v0, %v11434_v0 }
 0x4df   :  { %v3684_v5 = vadd.f32 %v3669_v15, %v3668_v52  ;;  %v14852_v15 = vmov 7  }
 0x4e0   :  { %v3618_v56 = vpop.xlane.xlu0 %3617 }
 0x4e1   :  { %v3645_v18 = vmul.f32 %v14851_v50, %v3618_v56  ;;  %3685 = vadd.xlane.f32.xlu0 %v3684_v5 }
 0x4e3   :  { %v11444_v23 = vsub.f32 %v11306_v61, %v3645_v18  ;;  %v11447_v13 = vsub.f32 %v11308_v7, %v3645_v18 }
 0x4e5   :  { %v3670_v58 = vmul.f32 %v11444_v23, %v11444_v23  ;;  %v3671_v60 = vmul.f32 %v11447_v13, %v11447_v13 }
 0x4e7   :  { %v3687_v1 = vadd.f32 %v3671_v60, %v3670_v58  ;;  %v14853_v58 = vld [vmem:[#allocation11_spill] sm:$0xff] }
 0x4e8   :  { %v3621_v28 = vpop.xlane.xlu1 %3620 }
 0x4e9   :  { %v3646_v12 = vmul.f32 %v14851_v50, %v3621_v28  ;;  %3688 = vadd.xlane.f32.xlu1 %v3687_v1  ;;  %v14854_v1 = vld [vmem:[#allocation44_spill] sm:$0xff] }
 0x4eb   :  { %v11455_v39 = vsub.f32 %v11322_v32, %v3646_v12  ;;  %v11458_v61 = vsub.f32 %v11324_v57, %v3646_v12  ;;  %v14855_v12 = vld [vmem:[#allocation42_spill] sm:$0xff] }
 0x4ed   :  { %v3672_v7 = vmul.f32 %v11455_v39, %v11455_v39  ;;  %v3673_v35 = vmul.f32 %v11458_v61, %v11458_v61 }
 0x4ef   :  { %v3690_v59 = vadd.f32 %v3673_v35, %v3672_v7 }
 0x4f0   :  { %v3624_v19 = vpop.xlane.xlu2 %3623 }
 0x4f1   :  { %v3647_v8 = vmul.f32 %v14851_v50, %v3624_v19  ;;  %3691 = vadd.xlane.f32.xlu2 %v3690_v59  ;;  %v14856_v19 = vmov 6  }
 0x4f3   :  { %v11466_v49 = vsub.f32 %v11338_v55, %v3647_v8  ;;  %v11469_v32 = vsub.f32 %v11340_v53, %v3647_v8 }
 0x4f5   :  { %v3674_v57 = vmul.f32 %v11466_v49, %v11466_v49  ;;  %v3675_v38 = vmul.f32 %v11469_v32, %v11469_v32 }
 0x4f7   :  { %v3693_v48 = vadd.f32 %v3675_v38, %v3674_v57 }
 0x4f8   :  { %v3627_v30 = vpop.xlane.xlu2 %3626 }
 0x4f9   :  { %v3648_v21 = vmul.f32 %v14851_v50, %v3627_v30  ;;  %3694 = vadd.xlane.f32.xlu0 %v3693_v48  ;;  %v11541_v30 = vld [vmem:[%s14392_s2 + $0x10] sm:$0xff] }
 0x4fb   :  { %v11477_v45 = vsub.f32 %v11354_v17, %v3648_v21  ;;  %v11480_v55 = vsub.f32 %v11356_v3, %v3648_v21 }
 0x4fd   :  { %v3676_v53 = vmul.f32 %v11477_v45, %v11477_v45  ;;  %v3677_v47 = vmul.f32 %v11480_v55, %v11480_v55 }
 0x4ff   :  { %v3696_v34 = vadd.f32 %v3677_v47, %v3676_v53 }
 0x500   :  { %v3630_v22 = vpop.xlane.xlu0 %3629 }
 0x501   :  { %v3649_v2 = vmul.f32 %v14851_v50, %v3630_v22  ;;  %3697 = vadd.xlane.f32.xlu1 %v3696_v34 }
 0x503   :  { %v11488_v37 = vsub.f32 %v11376_v16, %v3649_v2  ;;  %v11491_v17 = vsub.f32 %v11378_v26, %v3649_v2 }
 0x505   :  { %v3678_v3 = vmul.f32 %v11488_v37, %v11488_v37  ;;  %v3679_v24 = vmul.f32 %v11491_v17, %v11491_v17 }
 0x507   :  { %v3699_v40 = vadd.f32 %v3679_v24, %v3678_v3 }
 0x508   :  { %v3633_v56 = vpop.xlane.xlu1 %3632 }
 0x509   :  { %3700 = vadd.xlane.f32.xlu2 %v3699_v40  ;;  %v3650_v59 = vmul.f32 %v14851_v50, %v3633_v56 }
 0x50b   :  { %v11529_v8 = vsub.f32 %v11396_v6, %v3650_v59  ;;  %v11532_v57 = vsub.f32 %v11398_v43, %v3650_v59  ;;  %v14857_v59 = vld [vmem:[#allocation27_spill] sm:$0xff] }
 0x50d   :  { %4349 = vperm.xlu0 %8499, %v8822_v11   ;;  %v3680_v38 = vmul.f32 %v11529_v8, %v11529_v8  ;;  %v3681_v48 = vmul.f32 %v11532_v57, %v11532_v57 }
 0x50f   :  { %v3702_v21 = vadd.f32 %v3681_v48, %v3680_v38 }
 0x510   :  { %v3636_v10 = vpop.xlane.xlu2 %3635 }
 0x511   :  { %v3651_v16 = vmul.f32 %v14851_v50, %v3636_v10 }
 0x513   :  { %v11502_v25 = vsub.f32 %v11405_v44, %v3651_v16  ;;  %v11505_v26 = vsub.f32 %v11407_v29, %v3651_v16  ;;  %v11517_v29 = vld [vmem:[%s14392_s2 + $0x28] sm:$0xff] }
 0x515   :  { %v3682_v20 = vmul.f32 %v11502_v25, %v11502_v25  ;;  %v3683_v52 = vmul.f32 %v11505_v26, %v11505_v26  ;;  %8506 = vset.pattern.permute.xlu0 %v14852_v15 }
 0x517   :  { %v3705_v5 = vadd.f32 %v3683_v52, %v3682_v20 }
 0x518   :  { %v4182_v18 = vpop.permute.xlu2 %4181 }
 0x519   :  { %3706 = vadd.xlane.f32.xlu1 %v3705_v5  ;;  %v4204_v60 = vadd.f32 %v4182_v18, %v14853_v58  ;;  %v4205_v44 = vadd.f32 %v4182_v18, %v14854_v1 }
 0x520   :  { %v4242_v28 = vpop.permute.xlu1 %4241 }
 0x521   :  { %vm4256_vm6 = vcmp.eq.s32.totalorder %v4242_v28, 1  ;;  %4297 = vperm.xlu2 %8503, %v11517_v29  }
 0x522   :  { %v11521_v7 = vsel %vm4256_vm6, %v14855_v12, %v4204_v60  ;;  %v11524_v35 = vsel %vm4256_vm6, %v14855_v12, %v4205_v44 }
 0x529   :  { %8505 = vset.pattern.permute.xlu2 %v14856_v19 }
 0x532   :  { %4125 = vperm.xlu1 %8504, %v11541_v30  }
 0x537   :  { %3703 = vadd.xlane.f32.xlu0 %v3702_v21 }
 0x53a   :  { %8507 = vset.pattern.permute.xlu1 %v14850_v9 }
 0x554   :  { %v3686_v6 = vpop.xlane.xlu0 %3685 }
 0x555   :  { %v3708_v43 = vmul.f32 %v3686_v6, %v14851_v50 }
 0x557   :  { %v3716_v53 = vadd.f32 1e-05, %v3708_v43 }
 0x559   :  { %8566 = vrsqrt.f32 %v3716_v53  ;;  %vm3730_vm8 = vweird.f32 %v3716_v53 }
 0x55c   :  { %v3689_v47 = vpop.xlane.xlu1 %3688 }
 0x55d   :  { %v3709_v34 = vmul.f32 %v3689_v47, %v14851_v50 }
 0x55f   :  { %v8567_v22 = vpop.eup %8566  ;;  %v3717_v2 = vadd.f32 1e-05, %v3709_v34 }
 0x560   :  { %v3725_v3 = vmul.f32 %v8567_v22, %v3716_v53  ;;  %vm3731_vm7 = vweird.f32 %v8567_v22  ;;  %v14858_v53 = vld [vmem:[#allocation38_spill] sm:$0xff] }
 0x561   :  { %8568 = vrsqrt.f32 %v3717_v2  ;;  %vm3732_vm9 = vmor %vm3730_vm8, %vm3731_vm7  ;;  %vm3740_vm11 = vweird.f32 %v3717_v2 }
 0x562   :  { %v3726_v24 = vmul.f32 %v8567_v22, %v3725_v3 }
 0x564   :  { %v3727_v40 = vmul.f32 0.5, %v3726_v24  ;;  %v3692_v11 = vpop.xlane.xlu2 %3691 }
 0x565   :  { %v3710_v10 = vmul.f32 %v3692_v11, %v14851_v50 }
 0x566   :  { %v3728_v16 = vsub.f32 1.5, %v3727_v40 }
 0x567   :  { %v8569_v20 = vpop.eup %8568  ;;  %v3718_v52 = vadd.f32 1e-05, %v3710_v10 }
 0x568   :  { %v3729_v5 = vmul.f32 %v8567_v22, %v3728_v16  ;;  %v3735_v56 = vmul.f32 %v8569_v20, %v3717_v2  ;;  %vm3741_vm10 = vweird.f32 %v8569_v20 }
 0x569   :  { %8570 = vrsqrt.f32 %v3718_v52  ;;  %vm3742_vm12 = vmor %vm3740_vm11, %vm3741_vm10  ;;  %vm3750_vm14 = vweird.f32 %v3718_v52 }
 0x56a   :  { %v3736_v18 = vmul.f32 %v8569_v20, %v3735_v56  ;;  %v3733_v58 = vsel %vm3732_vm9, %v8567_v22, %v3729_v5  ;;  %v14861_v56 = vld [vmem:[#allocation34_spill] sm:$0xff] }
 0x56b   :  { %v3804_v60 = vmul.f32 %v3733_v58, %v11431_v14  ;;  %v3805_v1 = vmul.f32 %v3733_v58, %v11434_v0 }
 0x56c   :  { %v3737_v44 = vmul.f32 0.5, %v3736_v18  ;;  %v3695_v28 = vpop.xlane.xlu0 %3694 }
 0x56d   :  { %v3711_v12 = vmul.f32 %v3695_v28, %v14851_v50  ;;  %v3852_v38 = vmul.f32 %v14857_v59, %v3804_v60  ;;  %v3853_v48 = vmul.f32 %v14857_v59, %v3805_v1 }
 0x56e   :  { %v3738_v21 = vsub.f32 1.5, %v3737_v44  ;;  %v14862_v44 = vld [vmem:[#allocation14_spill] sm:$0xff] }
 0x56f   :  { %v8571_v6 = vpop.eup %8570  ;;  %v3719_v43 = vadd.f32 1e-05, %v3711_v12  ;;  %v11554_v47 = vadd.f32 %v14858_v53, %v3852_v38  ;;  %v11557_v34 = vadd.f32 %v14858_v53, %v3853_v48 }
 0x570   :  { %v3739_v14 = vmul.f32 %v8569_v20, %v3738_v21  ;;  %v3745_v0 = vmul.f32 %v8571_v6, %v3718_v52  ;;  %vm3751_vm13 = vweird.f32 %v8571_v6 }
 0x571   :  { %14859 = vst [vmem:[#allocation58_spill] sm:$0xff] %v11554_v47  ;;  %8572 = vrsqrt.f32 %v3719_v43  ;;  %v4692_v22 = vadd.f32 %v11557_v34, %v11554_v47  ;;  %vm3752_vm15 = vmor %vm3750_vm14, %vm3751_vm13  ;;  %vm3760_vm2 = vweird.f32 %v3719_v43 }
 0x572   :  { %14860 = vst [vmem:[#allocation60_spill] sm:$0xff] %v11557_v34  ;;  %v3746_v3 = vmul.f32 %v8571_v6, %v3745_v0  ;;  %v3743_v24 = vsel %vm3742_vm12, %v8569_v20, %v3739_v14 }
 0x573   :  { %4693 = vadd.xlane.f32.xlu0 %v4692_v22  ;;  %v3806_v40 = vmul.f32 %v3743_v24, %v11444_v23  ;;  %v3807_v11 = vmul.f32 %v3743_v24, %v11447_v13  ;;  %v14865_v22 = vld [vmem:[#allocation56_spill] sm:$0xff]  ;;  %v14866_v24 = vld [vmem:[#allocation45_spill] sm:$0xff] }
 0x574   :  { %v3747_v10 = vmul.f32 0.5, %v3746_v3  ;;  %v3698_v16 = vpop.xlane.xlu1 %3697 }
 0x575   :  { %v3712_v5 = vmul.f32 %v3698_v16, %v14851_v50  ;;  %v3854_v18 = vmul.f32 %v14861_v56, %v3806_v40  ;;  %v3855_v2 = vmul.f32 %v14861_v56, %v3807_v11  ;;  %v4320_v40 = vmul.f32 %v11425_v51, %v14866_v24 }
 0x576   :  { %v3748_v58 = vsub.f32 1.5, %v3747_v10 }
 0x577   :  { %v8573_v60 = vpop.eup %8572  ;;  %v3720_v1 = vadd.f32 1e-05, %v3712_v5  ;;  %v11567_v28 = vadd.f32 %v14862_v44, %v3854_v18  ;;  %v11570_v20 = vadd.f32 %v14862_v44, %v3855_v2 }
 0x578   :  { %v3749_v23 = vmul.f32 %v8571_v6, %v3748_v58  ;;  %v3755_v13 = vmul.f32 %v8573_v60, %v3719_v43  ;;  %vm3761_vm1 = vweird.f32 %v8573_v60 }
 0x579   :  { %14863 = vst [vmem:[#allocation61_spill] sm:$0xff] %v11567_v28  ;;  %8574 = vrsqrt.f32 %v3720_v1  ;;  %v4695_v12 = vadd.f32 %v11570_v20, %v11567_v28  ;;  %vm3762_vm3 = vmor %vm3760_vm2, %vm3761_vm1  ;;  %vm3770_vm4 = vweird.f32 %v3720_v1 }
 0x57a   :  { %14864 = vst [vmem:[#allocation15_spill] sm:$0xff] %v11570_v20  ;;  %v3756_v59 = vmul.f32 %v8573_v60, %v3755_v13  ;;  %v3753_v38 = vsel %vm3752_vm15, %v8571_v6, %v3749_v23  ;;  %v14867_v6 = vld [vmem:[#allocation47_spill] sm:$0xff] }
 0x57b   :  { %4696 = vadd.xlane.f32.xlu1 %v4695_v12  ;;  %v3808_v48 = vmul.f32 %v3753_v38, %v11455_v39  ;;  %v3809_v21 = vmul.f32 %v3753_v38, %v11458_v61  ;;  %v4321_v16 = vmul.f32 %v11425_v51, %v14867_v6  ;;  %v14868_v61 = vld [vmem:[#allocation25_spill] sm:$0xff] }
 0x57c   :  { %v3757_v53 = vmul.f32 0.5, %v3756_v59  ;;  %v3701_v14 = vpop.xlane.xlu2 %3700 }
 0x57d   :  { %v3713_v0 = vmul.f32 %v3701_v14, %v14851_v50  ;;  %v3856_v3 = vmul.f32 %v14865_v22, %v3808_v48  ;;  %v3857_v52 = vmul.f32 %v14865_v22, %v3809_v21  ;;  %v14871_v21 = vld [vmem:[#allocation20_spill] sm:$0xff]  ;;  %v14872_v22 = vld [vmem:[#allocation19_spill] sm:$0xff] }
 0x57e   :  { %v3758_v11 = vsub.f32 1.5, %v3757_v53 }
 0x57f   :  { %v8575_v10 = vpop.eup %8574  ;;  %v3721_v39 = vadd.f32 1e-05, %v3713_v0  ;;  %v4350_v5 = vpop.permute.xlu0 %4349  ;;  %v11584_v56 = vadd.f32 %v14868_v61, %v3856_v3  ;;  %v11587_v18 = vadd.f32 %v14868_v61, %v3857_v52 }
 0x580   :  { %v3759_v2 = vmul.f32 %v8573_v60, %v3758_v11  ;;  %v3765_v58 = vmul.f32 %v8575_v10, %v3720_v1  ;;  %v11589_v44 = vadd.f32 %v4350_v5, %v4320_v40  ;;  %v11591_v23 = vadd.f32 %v4350_v5, %v4321_v16  ;;  %v14875_v1 = vld [vmem:[#allocation57_spill] sm:$0xff] }
 0x581   :  { %14869 = vst [vmem:[#allocation77_spill] sm:$0xff] %v11584_v56  ;;  %8576 = vrsqrt.f32 %v3721_v39  ;;  %v4698_v51 = vadd.f32 %v11587_v18, %v11584_v56  ;;  %vm3771_vm5 = vweird.f32 %v8575_v10  ;;  %vm3780_vm8 = vweird.f32 %v3721_v39 }
 0x582   :  { %14870 = vst [vmem:[#allocation62_spill] sm:$0xff] %v11587_v18  ;;  %v3766_v13 = vmul.f32 %v8575_v10, %v3765_v58  ;;  %v3763_v12 = vsel %vm3762_vm3, %v8573_v60, %v3759_v2  ;;  %vm3772_vm6 = vmor %vm3770_vm4, %vm3771_vm5  ;;  %vm4214_vm3 = vcmp.gt.f32.partialorder %v11541_v30, 0.5 }
 0x583   :  { %4699 = vadd.xlane.f32.xlu2 %v4698_v51  ;;  %v3810_v59 = vmul.f32 %v3763_v12, %v11466_v49  ;;  %v3811_v38 = vmul.f32 %v3763_v12, %v11469_v32  ;;  %v14876_v12 = vld [vmem:[#allocation22_spill] sm:$0xff] }
 0x584   :  { %v3767_v48 = vmul.f32 0.5, %v3766_v13 }
 0x585   :  { %v3858_v43 = vmul.f32 %v14871_v21, %v3810_v59  ;;  %v3859_v14 = vmul.f32 %v14871_v21, %v3811_v38 }
 0x586   :  { %v3768_v53 = vsub.f32 1.5, %v3767_v48 }
 0x587   :  { %v8577_v0 = vpop.eup %8576  ;;  %v11600_v3 = vadd.f32 %v14872_v22, %v3858_v43  ;;  %v11603_v60 = vadd.f32 %v14872_v22, %v3859_v14  ;;  %v14879_v43 = vld [vmem:[#allocation18_spill] sm:$0xff] }
 0x588   :  { %v3769_v52 = vmul.f32 %v8575_v10, %v3768_v53  ;;  %v3775_v24 = vmul.f32 %v8577_v0, %v3721_v39  ;;  %vm3781_vm7 = vweird.f32 %v8577_v0 }
 0x589   :  { %14873 = vst [vmem:[#allocation66_spill] sm:$0xff] %v11600_v3  ;;  %v4701_v32 = vadd.f32 %v11603_v60, %v11600_v3  ;;  %vm3782_vm9 = vmor %vm3780_vm8, %vm3781_vm7 }
 0x58a   :  { %14874 = vst [vmem:[#allocation73_spill] sm:$0xff] %v11603_v60  ;;  %v3776_v49 = vmul.f32 %v8577_v0, %v3775_v24  ;;  %v3773_v40 = vsel %vm3772_vm6, %v8575_v10, %v3769_v52  ;;  %v14880_v52 = vld [vmem:[#allocation43_spill] sm:$0xff] }
 0x58b   :  { %v3812_v11 = vmul.f32 %v3773_v40, %v11477_v45  ;;  %v3813_v6 = vmul.f32 %v3773_v40, %v11480_v55  ;;  %4702 = vadd.xlane.f32.xlu0 %v4701_v32 }
 0x58c   :  { %v3777_v16 = vmul.f32 0.5, %v3776_v49  ;;  %v3707_v5 = vpop.xlane.xlu1 %3706 }
 0x58d   :  { %v3715_v61 = vmul.f32 %v3707_v5, %v14851_v50  ;;  %v3860_v2 = vmul.f32 %v14875_v1, %v3812_v11  ;;  %v3861_v58 = vmul.f32 %v14875_v1, %v3813_v6  ;;  %v14883_v1 = vld [vmem:[#allocation31_spill] sm:$0xff] }
 0x58e   :  { %v3778_v51 = vsub.f32 1.5, %v3777_v16 }
 0x58f   :  { %v3723_v13 = vadd.f32 1e-05, %v3715_v61  ;;  %v11613_v59 = vadd.f32 %v14876_v12, %v3860_v2  ;;  %v11616_v10 = vadd.f32 %v14876_v12, %v3861_v58 }
 0x590   :  { %v3779_v45 = vmul.f32 %v8577_v0, %v3778_v51  ;;  %v14884_v51 = vld [vmem:[#allocation33_spill] sm:$0xff] }
 0x591   :  { %14877 = vst [vmem:[#allocation23_spill] sm:$0xff] %v11613_v59  ;;  %8578 = vrsqrt.f32 %v3723_v13  ;;  %v4704_v55 = vadd.f32 %v11616_v10, %v11613_v59  ;;  %vm3800_vm12 = vweird.f32 %v3723_v13 }
 0x592   :  { %14878 = vst [vmem:[#allocation78_spill] sm:$0xff] %v11616_v10  ;;  %v3783_v38 = vsel %vm3782_vm9, %v8577_v0, %v3779_v45 }
 0x593   :  { %4705 = vadd.xlane.f32.xlu1 %v4704_v55  ;;  %v3814_v48 = vmul.f32 %v3783_v38, %v11488_v37  ;;  %v3815_v21 = vmul.f32 %v3783_v38, %v11491_v17  ;;  %v11635_v37 = vld [vmem:[%s14392_s2 + $0x18] sm:$0xff] }
 0x594   :  { %vm4215_vm10 = vcmp.gt.f32.partialorder %v11635_v37, 0.5 }
 0x595   :  { %v3862_v53 = vmul.f32 %v14879_v43, %v3814_v48  ;;  %v3863_v14 = vmul.f32 %v14879_v43, %v3815_v21  ;;  %v4223_v40 = vsel %vm4215_vm10, 1, %v14848_v27 }
 0x597   :  { %v8579_v22 = vpop.eup %8578  ;;  %v11625_v24 = vadd.f32 %v14880_v52, %v3862_v53  ;;  %v11628_v39 = vadd.f32 %v14880_v52, %v3863_v14  ;;  %v14887_v53 = vmov 4  }
 0x598   :  { %v3795_v49 = vmul.f32 %v8579_v22, %v3723_v13  ;;  %vm3801_vm11 = vweird.f32 %v8579_v22 }
 0x599   :  { %14881 = vst [vmem:[#allocation79_spill] sm:$0xff] %v11625_v24  ;;  %v4707_v0 = vadd.f32 %v11628_v39, %v11625_v24  ;;  %vm3802_vm13 = vmor %vm3800_vm12, %vm3801_vm11 }
 0x59a   :  { %14882 = vst [vmem:[#allocation13_spill] sm:$0xff] %v11628_v39  ;;  %v3796_v32 = vmul.f32 %v8579_v22, %v3795_v49 }
 0x59b   :  { %4708 = vadd.xlane.f32.xlu2 %v4707_v0 }
 0x59c   :  { %v3797_v17 = vmul.f32 0.5, %v3796_v32  ;;  %v14888_v32 = vld [vmem:[#allocation59_spill] sm:$0xff] }
 0x59e   :  { %v3798_v11 = vsub.f32 1.5, %v3797_v17 }
 0x59f   :  { %4238 = vperm.xlu0 %8506, %v4223_v40  }
 0x5a0   :  { %v3799_v6 = vmul.f32 %v8579_v22, %v3798_v11  ;;  %v14889_v11 = vld [vmem:[#allocation29_spill] sm:$0xff] }
 0x5a2   :  { %v3803_v16 = vsel %vm3802_vm13, %v8579_v22, %v3799_v6 }
 0x5a3   :  { %v3818_v5 = vmul.f32 %v3803_v16, %v11502_v25  ;;  %v3819_v61 = vmul.f32 %v3803_v16, %v11505_v26 }
 0x5a5   :  { %v3866_v2 = vmul.f32 %v14883_v1, %v3818_v5  ;;  %v3867_v58 = vmul.f32 %v14883_v1, %v3819_v61  ;;  %v4222_v5 = vsel %vm4214_vm3, 1, %v14848_v27  ;;  %v8828_v61 = vld [vmem:[%s14392_s2] sm:$0xff]  ;;  %v8410_v1 = vmul.f32 -1.442695, %v11591_v23 }
 0x5a6   :  { %vm4212_vm5 = vcmp.gt.f32.partialorder %v8828_v61, 0.5 }
 0x5a7   :  { %v11644_v12 = vadd.f32 %v14884_v51, %v3866_v2  ;;  %v11647_v45 = vadd.f32 %v14884_v51, %v3867_v58 }
 0x5a9   :  { %14885 = vst [vmem:[#allocation84_spill] sm:$0xff] %v11644_v12  ;;  %v4713_v13 = vadd.f32 %v11647_v45, %v11644_v12 }
 0x5aa   :  { %14886 = vst [vmem:[#allocation32_spill] sm:$0xff] %v11647_v45  ;;  %v3704_v55 = vpop.xlane.xlu0 %3703 }
 0x5ab   :  { %v3714_v38 = vmul.f32 %v3704_v55, %v14851_v50  ;;  %4714 = vadd.xlane.f32.xlu1 %v4713_v13 }
 0x5ad   :  { %v3722_v25 = vadd.f32 1e-05, %v3714_v38 }
 0x5af   :  { %8580 = vrsqrt.f32 %v3722_v25  ;;  %vm3790_vm15 = vweird.f32 %v3722_v25 }
 0x5b3   :  { %4177 = vperm.xlu2 %8505, %v11635_v37  }
 0x5b5   :  { %v8581_v26 = vpop.eup %8580 }
 0x5b6   :  { %v3785_v48 = vmul.f32 %v8581_v26, %v3722_v25  ;;  %vm3791_vm14 = vweird.f32 %v8581_v26 }
 0x5b7   :  { %vm3792_vm1 = vmor %vm3790_vm15, %vm3791_vm14 }
 0x5b8   :  { %v3786_v21 = vmul.f32 %v8581_v26, %v3785_v48 }
 0x5ba   :  { %v3787_v43 = vmul.f32 0.5, %v3786_v21 }
 0x5bb   :  { %8508 = vset.pattern.permute.xlu2 %v14887_v53 }
 0x5bc   :  { %v3788_v14 = vsub.f32 1.5, %v3787_v43  ;;  %4345 = vperm.xlu2 %8508, %v11517_v29   ;;  %v11715_v43 = vpop.permute.xlu1 %4125 }
 0x5be   :  { %v3789_v22 = vmul.f32 %v8581_v26, %v3788_v14 }
 0x5c0   :  { %v3793_v52 = vsel %vm3792_vm1, %v8581_v26, %v3789_v22 }
 0x5c1   :  { %v3816_v49 = vmul.f32 %v3793_v52, %v11529_v8  ;;  %v3817_v0 = vmul.f32 %v3793_v52, %v11532_v57  ;;  %v8826_v57 = vld [vmem:[%s14392_s2 + $0x8] sm:$0xff]  ;;  %v14893_v52 = vld [vmem:[#allocation75_spill] sm:$0xff] }
 0x5c2   :  { %vm4213_vm2 = vcmp.gt.f32.partialorder %v8826_v57, 0.5 }
 0x5c3   :  { %v3864_v17 = vmul.f32 %v14888_v32, %v3816_v49  ;;  %v3865_v40 = vmul.f32 %v14888_v32, %v3817_v0  ;;  %v4221_v16 = vsel %vm4213_vm2, 1, %v14848_v27 }
 0x5c4   :  { %4293 = vperm.xlu1 %8507, %v11414_v42   ;;  %8510 = vset.pattern.permute.xlu2 %v14856_v19 }
 0x5c5   :  { %v11662_v6 = vadd.f32 %v14889_v11, %v3864_v17  ;;  %v11665_v29 = vadd.f32 %v14889_v11, %v3865_v40  ;;  %4173 = vperm.xlu2 %8510, %v11541_v30   ;;  %v14894_v17 = vld [vmem:[#allocation76_spill] sm:$0xff] }
 0x5c7   :  { %14890 = vst [vmem:[#allocation80_spill] sm:$0xff] %v11662_v6  ;;  %v4710_v8 = vadd.f32 %v11665_v29, %v11662_v6 }
 0x5c8   :  { %14891 = vst [vmem:[#allocation17_spill] sm:$0xff] %v11665_v29 }
 0x5c9   :  { %4711 = vadd.xlane.f32.xlu0 %v4710_v8 }
 0x5cc   :  { %8509 = vset.pattern.permute.xlu1 %v14849_v36 }
 0x5cd   :  { %4121 = vperm.xlu1 %8509, %v8826_v57   ;;  %8513 = vset.pattern.permute.xlu2 %v14887_v53 }
 0x5ce   :  { %4341 = vperm.xlu2 %8513, %v11414_v42   ;;  %v8827_v42 = vld [vmem:[%s14392_s2 + $0x38] sm:$0xff] }
 0x5d5   :  { %8512 = vset.pattern.permute.xlu1 %v14850_v9 }
 0x5d6   :  { %4289 = vperm.xlu1 %8512, %v11635_v37   ;;  %8515 = vset.pattern.permute.xlu2 %v14852_v15 }
 0x5d7   :  { %4232 = vperm.xlu2 %8515, %v4221_v16  }
 0x5dd   :  { %4235 = vperm.xlu0 %8506, %v4222_v5  }
 0x5de   :  { %8514 = vset.pattern.permute.xlu1 %v14856_v19 }
 0x5df   :  { %4169 = vperm.xlu1 %8514, %v8826_v57   ;;  %8517 = vset.pattern.permute.xlu2 %v14887_v53 }
 0x5e0   :  { %4337 = vperm.xlu2 %8517, %v11635_v37   ;;  %v4220_v37 = vsel %vm4212_vm5, 1, %v14848_v27 }
 0x5e5   :  { %8511 = vset.pattern.permute.xlu0 %v14849_v36  ;;  %v8409_v36 = vmul.f32 -1.442695, %v11589_v44 }
 0x5e6   :  { %4145 = vperm.xlu0 %8511, %v8827_v42  }
 0x5e7   :  { %8516 = vset.pattern.permute.xlu1 %v14850_v9  ;;  %8582 = vpow2.f32 %v8409_v36 }
 0x5e8   :  { %4285 = vperm.xlu1 %8516, %v11541_v30   ;;  %8520 = vset.pattern.permute.xlu2 %v14850_v9  ;;  %8584 = vpow2.f32 %v8410_v1  ;;  %v4298_v9 = vpop.permute.xlu2 %4297 }
 0x5e9   :  { %4281 = vperm.xlu2 %8520, %v8826_v57   ;;  %v4318_v49 = vmul.f32 %v4298_v9, %v14893_v52  ;;  %v4319_v40 = vmul.f32 %v4298_v9, %v14894_v17 }
 0x5ed   :  { %v8583_v2 = vpop.eup %8582 }
 0x5ee   :  { %4117 = vperm.xlu0 %8511, %v8828_v61   ;;  %v4432_v44 = vadd.f32 1.0, %v8583_v2  ;;  %v11725_v16 = vpop.xlane.xlu1 %4696 }
 0x5f0   :  { %8519 = vset.pattern.permute.xlu1 %v14852_v15  ;;  %v8585_v15 = vpop.eup %8584  ;;  %8586 = vrcp.f32 %v4432_v44  ;;  %vm4621_vm7 = vweird.f32 %v4432_v44  ;;  %v4627_v11 = vand.u32 2147483648, %v4432_v44 }
 0x5f1   :  { %4229 = vperm.xlu1 %8519, %v4220_v37   ;;  %4277 = vperm.xlu2 %8520, %v8828_v61   ;;  %v4433_v23 = vadd.f32 1.0, %v8585_v15 }
 0x5f3   :  { %8588 = vrcp.f32 %v4433_v23  ;;  %v4642_v8 = vand.u32 2147483648, %v4433_v23  ;;  %vm4636_vm9 = vweird.f32 %v4433_v23  ;;  %v4640_v37 = vand.u32 2147483647, %v4433_v23 }
 0x5f5   :  { %vm4641_vm12 = vcmp.eq.f32.partialorder %v4640_v37, 8.507059e+37 }
 0x5f6   :  { %8518 = vset.pattern.permute.xlu0 %v14856_v19  ;;  %v11704_v19 = vpop.xlane.xlu2 %4699  ;;  %v8587_v58 = vpop.eup %8586 }
 0x5f7   :  { %4165 = vperm.xlu0 %8518, %v8828_v61   ;;  %v4617_v38 = vmul.f32 %v8587_v58, %v4432_v44  ;;  %vm4622_vm4 = vweird.f32 %v8587_v58 }
 0x5f8   :  { %vm11727_vm8 = vmor %vm4621_vm7, %vm4622_vm4 }
 0x5f9   :  { %8521 = vset.pattern.permute.xlu1 %v14887_v53  ;;  %8523 = vset.pattern.permute.xlu2 %v14848_v27  ;;  %v8589_v51 = vpop.eup %8588  ;;  %v4618_v48 = vsub.f32 1.0, %v4617_v38  ;;  %v4643_v38 = vor.u32 1.1754944e-38, %v4642_v8 }
 0x5fa   :  { %4333 = vperm.xlu1 %8521, %v11541_v30   ;;  %v14892_v30 = vld [vmem:[#allocation63_spill] sm:$0xff]  ;;  %v4632_v25 = vmul.f32 %v8589_v51, %v4433_v23  ;;  %vm4637_vm6 = vweird.f32 %v8589_v51  ;;  %v4694_v23 = vpop.xlane.xlu0 %4693 }
 0x5fb   :  { %v4007_v13 = vmul.f32 %v14892_v30, %v14851_v50  ;;  %vm4638_vm10 = vmor %vm4636_vm9, %vm4637_vm6 }
 0x5fc   :  { %v4633_v21 = vsub.f32 1.0, %v4632_v25 }
 0x5fd   :  { %v11712_v26 = vadd.f32 1e-05, %v4007_v13  ;;  %v4628_v13 = vor.u32 1.1754944e-38, %v4627_v11  ;;  %v14900_v11 = vld [vmem:[#allocation64_spill] sm:$0xff] }
 0x5fe   :  { %v4634_v14 = vmul.f32 %v8589_v51, %v4633_v21  ;;  %v4005_v8 = vmul.f32 %v14900_v11, %v14851_v50 }
 0x5ff   :  { %8522 = vset.pattern.permute.xlu0 %v14887_v53  ;;  %8590 = vrsqrt.f32 %v11712_v26  ;;  %vm4056_vm13 = vweird.f32 %v11712_v26 }
 0x600   :  { %4329 = vperm.xlu0 %8522, %v8826_v57   ;;  %v4635_v32 = vadd.f32 %v8589_v51, %v4634_v14 }
 0x602   :  { %4325 = vperm.xlu1 %8521, %v8828_v61   ;;  %v4625_v61 = vand.u32 2147483647, %v4432_v44  ;;  %v4639_v2 = vsel %vm4638_vm10, %v8589_v51, %v4635_v32  ;;  %v4703_v42 = vpop.xlane.xlu0 %4702 }
 0x603   :  { %v4644_v44 = vsel %vm4641_vm12, %v4643_v38, %v4639_v2 }
 0x604   :  { %vm4626_vm11 = vcmp.eq.f32.partialorder %v4625_v61, 8.507059e+37 }
 0x605   :  { %v11719_v22 = vpop.eup %8590 }
 0x606   :  { %v4051_v57 = vmul.f32 %v11719_v22, %v11712_v26  ;;  %vm4057_vm14 = vweird.f32 %v11719_v22 }
 0x607   :  { %vm4058_vm15 = vmor %vm4056_vm13, %vm4057_vm14 }
 0x608   :  { %8524 = vset.pattern.permute.xlu0 %v14848_v27  ;;  %v4052_v25 = vmul.f32 %v11719_v22, %v4051_v57 }
 0x60a   :  { %8525 = vset.pattern.permute.xlu1 %v14848_v27  ;;  %v4619_v27 = vmul.f32 %v8587_v58, %v4618_v48  ;;  %v4053_v21 = vmul.f32 0.5, %v4052_v25  ;;  %v14902_v25 = vld [vmem:[#allocation51_spill] sm:$0xff] }
 0x60c   :  { %v4620_v0 = vadd.f32 %v8587_v58, %v4619_v27  ;;  %v11734_v27 = vpop.xlane.xlu1 %4705  ;;  %v4054_v32 = vsub.f32 1.5, %v4053_v21 }
 0x60e   :  { %v11710_v55 = vpop.xlane.xlu2 %4708  ;;  %v4624_v9 = vsel %vm11727_vm8, %v8587_v58, %v4620_v0  ;;  %v11740_v58 = vmul.f32 %v11391_v41, %v4644_v44  ;;  %v4055_v37 = vmul.f32 %v11719_v22, %v4054_v32  ;;  %v14903_v44 = vld [vmem:[#allocation52_spill] sm:$0xff] }
 0x60f   :  { %v4629_v48 = vsel %vm4626_vm11, %v4628_v13, %v4624_v9 }
 0x610   :  { %v11737_v14 = vmul.f32 %v11384_v54, %v4629_v48  ;;  %14898 = vst [vmem:[#allocation74_spill] sm:$0xff] %v11740_v58  ;;  %v14901_v54 = vld [vmem:[#allocation65_spill] sm:$0xff] }
 0x611   :  { %v4004_v41 = vmul.f32 %v14901_v54, %v14851_v50 }
 0x612   :  { %14897 = vst [vmem:[#allocation69_spill] sm:$0xff] %v11737_v14 }
 0x613   :  { %v11767_v9 = vadd.f32 1e-05, %v4004_v41 }
 0x615   :  { %vm4026_vm14 = vweird.f32 %v11767_v9 }
 0x616   :  { %v11717_v53 = vpop.permute.xlu2 %4177 }
 0x61e   :  { %v4346_v5 = vpop.permute.xlu2 %4345 }
 0x61f   :  { %v4366_v36 = vadd.f32 %v4346_v5, %v4318_v49  ;;  %v4367_v1 = vadd.f32 %v4346_v5, %v4319_v40  ;;  %v14899_v49 = vld [vmem:[#allocation36_spill] sm:$0xff]  ;;  %v5379_v40 = vadd.f32 %v11740_v58, %v11737_v14  ;;  %v4006_v5 = vmul.f32 %v11421_v46, %v14851_v50 }
 0x620   :  { %v4011_v0 = vmul.f32 %v14899_v49, %v14851_v50  ;;  %v4059_v46 = vsel %vm4058_vm15, %v11719_v22, %v4055_v37  ;;  %v11783_v22 = vmul.f32 %v4694_v23, %v14851_v50  ;;  %v11787_v49 = vmul.f32 %v11725_v16, %v14851_v50 }
 0x621   :  { %v8407_v15 = vmul.f32 -1.442695, %v4366_v36  ;;  %v8408_v30 = vmul.f32 -1.442695, %v4367_v1  ;;  %v4715_v36 = vpop.xlane.xlu1 %4714  ;;  %v11765_v1 = vadd.f32 1e-05, %v4005_v8  ;;  %v4106_v48 = vmul.f32 %v4059_v46, %v14902_v25 }
 0x622   :  { %v11760_v61 = vadd.f32 1e-05, %v4011_v0  ;;  %v11769_v2 = vadd.f32 1e-05, %v4006_v5  ;;  %v4107_v21 = vmul.f32 %v4059_v46, %v14903_v44  ;;  %v11796_v23 = vmul.f32 %v11704_v19, %v14851_v50 }
 0x623   :  { %8592 = vpow2.f32 %v8407_v15 }
 0x624   :  { %8594 = vpow2.f32 %v8408_v30  ;;  %vm4096_vm10 = vweird.f32 %v11760_v61  ;;  %vm4046_vm12 = vweird.f32 %v11769_v2 }
 0x626   :  { %v11763_v26 = vpop.permute.xlu2 %4173 }
 0x629   :  { %v8593_v51 = vpop.eup %8592 }
 0x62a   :  { %v8595_v52 = vpop.eup %8594  ;;  %v11744_v17 = vadd.f32 1.0, %v8593_v51  ;;  %v11780_v51 = vpop.permute.xlu0 %4238 }
 0x62b   :  { %v11750_v57 = vadd.f32 1.0, %v8595_v52  ;;  %vm4255_vm9 = vcmp.eq.s32.totalorder %v11780_v51, 1 }
 0x62c   :  { %8596 = vrcp.f32 %v11744_v17  ;;  %5380 = vadd.xlane.f32.xlu1 %v5379_v40  ;;  %v4597_v40 = vand.u32 2147483648, %v11744_v17  ;;  %v4595_v54 = vand.u32 2147483647, %v11744_v17  ;;  %vm4591_vm3 = vweird.f32 %v11744_v17 }
 0x62d   :  { %8598 = vrcp.f32 %v11750_v57  ;;  %v4612_v41 = vand.u32 2147483648, %v11750_v57  ;;  %v4610_v16 = vand.u32 2147483647, %v11750_v57  ;;  %vm4606_vm4 = vweird.f32 %v11750_v57 }
 0x62e   :  { %8600 = vrsqrt.f32 %v11760_v61  ;;  %v4342_v32 = vpop.permute.xlu2 %4341  ;;  %vm4596_vm6 = vcmp.eq.f32.partialorder %v4595_v54, 8.507059e+37 }
 0x62f   :  { %8602 = vrsqrt.f32 %v11765_v1  ;;  %vm4611_vm8 = vcmp.eq.f32.partialorder %v4610_v16, 8.507059e+37 }
 0x630   :  { %8604 = vrsqrt.f32 %v11767_v9 }
 0x631   :  { %8606 = vrsqrt.f32 %v11769_v2 }
 0x632   :  { %v8597_v15 = vpop.eup %8596 }
 0x633   :  { %v8599_v30 = vpop.eup %8598  ;;  %v4587_v13 = vmul.f32 %v8597_v15, %v11744_v17  ;;  %vm4592_vm1 = vweird.f32 %v8597_v15  ;;  %v4613_v17 = vor.u32 1.1754944e-38, %v4612_v41 }
 0x634   :  { %v4602_v38 = vmul.f32 %v8599_v30, %v11750_v57  ;;  %v11792_v5 = vpop.eup %8600  ;;  %vm4607_vm2 = vweird.f32 %v8599_v30  ;;  %vm4593_vm5 = vmor %vm4591_vm3, %vm4592_vm1 }
 0x635   :  { %v4588_v52 = vsub.f32 1.0, %v4587_v13  ;;  %v11799_v46 = vpop.eup %8602  ;;  %v11803_v13 = vmul.f32 %v11710_v55, %v14851_v50  ;;  %v11816_v55 = vmul.f32 %v11734_v27, %v14851_v50  ;;  %vm4608_vm7 = vmor %vm4606_vm4, %vm4607_vm2  ;;  %vm4097_vm11 = vweird.f32 %v11792_v5 }
 0x636   :  { %v4294_v0 = vpop.permute.xlu1 %4293  ;;  %v4603_v11 = vsub.f32 1.0, %v4602_v38  ;;  %v11807_v44 = vpop.eup %8604  ;;  %vm4098_vm1 = vmor %vm4096_vm10, %vm4097_vm11  ;;  %vm4036_vm2 = vweird.f32 %v11765_v1  ;;  %vm4037_vm3 = vweird.f32 %v11799_v46 }
 0x637   :  { %v4589_v8 = vmul.f32 %v8597_v15, %v4588_v52  ;;  %v4316_v38 = vmul.f32 %v4294_v0, %v11521_v7  ;;  %v4317_v19 = vmul.f32 %v4294_v0, %v11524_v35  ;;  %v4598_v52 = vor.u32 1.1754944e-38, %v4597_v40  ;;  %v11812_v20 = vpop.eup %8606 }
 0x638   :  { %v4604_v37 = vmul.f32 %v8599_v30, %v4603_v11  ;;  %v11823_v40 = vmul.f32 %v4703_v42, %v14851_v50  ;;  %v4724_v16 = vmax.f32 %v11783_v22, %v11816_v55  ;;  %vm4047_vm13 = vweird.f32 %v11812_v20 }
 0x639   :  { %v4590_v25 = vadd.f32 %v8597_v15, %v4589_v8  ;;  %v11820_v8 = vmul.f32 %v4715_v36, %v14851_v50  ;;  %v4364_v57 = vadd.f32 %v4342_v32, %v4316_v38  ;;  %v4365_v54 = vadd.f32 %v4342_v32, %v4317_v19 }
 0x63a   :  { %v4605_v11 = vadd.f32 %v8599_v30, %v4604_v37  ;;  %vm4027_vm15 = vweird.f32 %v11807_v44 }
 0x63b   :  { %v4594_v7 = vsel %vm4593_vm5, %v8597_v15, %v4590_v25  ;;  %v4725_v15 = vmax.f32 %v11787_v49, %v11803_v13  ;;  %v4155_v25 = vmul.f32 %v11440_v4, %v4107_v21  ;;  %v8405_v19 = vmul.f32 -1.442695, %v4364_v57  ;;  %vm4048_vm5 = vmor %vm4046_vm12, %vm4047_vm13 }
 0x63c   :  { %v4599_v35 = vsel %vm4596_vm6, %v4598_v52, %v4594_v7  ;;  %v4609_v0 = vsel %vm4608_vm7, %v8599_v30, %v4605_v11  ;;  %v4712_v37 = vpop.xlane.xlu0 %4711  ;;  %v11836_v30 = vpop.permute.xlu2 %4232  ;;  %v4041_v52 = vmul.f32 %v11812_v20, %v11769_v2  ;;  %v8406_v7 = vmul.f32 -1.442695, %v4365_v54  ;;  %vm4028_vm4 = vmor %vm4026_vm14, %vm4027_vm15 }
 0x63d   :  { %v4614_v28 = vsel %vm4611_vm8, %v4613_v17, %v4609_v0  ;;  %v11826_v27 = vmul.f32 %v11362_v31, %v4599_v35  ;;  %v11831_v41 = vmul.f32 %v4712_v37, %v14851_v50  ;;  %v4727_v31 = vmax.f32 %v11823_v40, %v11820_v8  ;;  %vm4038_vm6 = vmor %vm4036_vm2, %vm4037_vm3 }
 0x63e   :  { %v11834_v36 = vmul.f32 %v11366_v62, %v4614_v28  ;;  %v4091_v62 = vmul.f32 %v11792_v5, %v11760_v61  ;;  %v4154_v28 = vmul.f32 %v11440_v4, %v4106_v48  ;;  %v4728_v11 = vmax.f32 %v4724_v16, %v4725_v15 }
 0x63f   :  { %14904 = vst [vmem:[#allocation72_spill] sm:$0xff] %v11826_v27  ;;  %v11838_v42 = vpop.permute.xlu1 %4121  ;;  %v4726_v38 = vmax.f32 %v11796_v23, %v11831_v41  ;;  %v4021_v35 = vmul.f32 %v11807_v44, %v11767_v9  ;;  %v4031_v0 = vmul.f32 %v11799_v46, %v11765_v1  ;;  %v4203_v48 = vadd.f32 %v11717_v53, %v4155_v25 }
 0x640   :  { %14905 = vst [vmem:[#allocation81_spill] sm:$0xff] %v11834_v36  ;;  %v5376_v32 = vadd.f32 %v11834_v36, %v11826_v27  ;;  %v4202_v37 = vadd.f32 %v11717_v53, %v4154_v28  ;;  %v4092_v4 = vmul.f32 %v11792_v5, %v4091_v62  ;;  %8608 = vpow2.f32 %v8405_v19 }
 0x641   :  { %v4729_v17 = vmax.f32 %v4726_v38, %v4727_v31  ;;  %v4042_v21 = vmul.f32 %v11812_v20, %v4041_v52  ;;  %8610 = vpow2.f32 %v8406_v7  ;;  %v4022_v15 = vmul.f32 %v11807_v44, %v4021_v35  ;;  %v14906_v31 = vld [vmem:[#allocation50_spill] sm:$0xff] }
 0x642   :  { %5377 = vadd.xlane.f32.xlu0 %v5376_v32  ;;  %v4032_v54 = vmul.f32 %v11799_v46, %v4031_v0  ;;  %v4266_v38 = vsel %vm4255_vm9, %v14906_v31, %v4202_v37  ;;  %v4267_v32 = vsel %vm4255_vm9, %v14906_v31, %v4203_v48  ;;  %v4093_v25 = vmul.f32 0.5, %v4092_v4 }
 0x643   :  { %v4730_v34 = vmax.f32 %v4728_v11, %v4729_v17  ;;  %v4043_v11 = vmul.f32 0.5, %v4042_v21  ;;  %v4023_v17 = vmul.f32 0.5, %v4022_v15  ;;  %vm4253_vm10 = vcmp.eq.s32.totalorder %v11836_v30, 1 }
 0x644   :  { %v4338_v53 = vpop.permute.xlu2 %4337  ;;  %v4033_v18 = vmul.f32 0.5, %v4032_v54  ;;  %v4094_v51 = vsub.f32 1.5, %v4093_v25 }
 0x645   :  { %v4731_v57 = vrot.slane %v4730_v34, 4  ;;  %v4024_v21 = vsub.f32 1.5, %v4023_v17 }
 0x646   :  { %v8609_v7 = vpop.eup %8608  ;;  %v4095_v31 = vmul.f32 %v11792_v5, %v4094_v51 }
 0x647   :  { %v4732_v28 = vmax.f32 %v4730_v34, %v4731_v57  ;;  %v8611_v0 = vpop.eup %8610  ;;  %v4044_v34 = vsub.f32 1.5, %v4043_v11  ;;  %v11869_v48 = vadd.f32 1.0, %v8609_v7  ;;  %v4034_v57 = vsub.f32 1.5, %v4033_v18  ;;  %v14908_v11 = vld [vmem:[#allocation41_spill] sm:$0xff]  ;;  %v14909_v7 = vld [vmem:[#allocation68_spill] sm:$0xff] }
 0x648   :  { %v4290_v16 = vpop.permute.xlu1 %4289  ;;  %v4099_v1 = vsel %vm4098_vm1, %v11792_v5, %v4095_v31  ;;  %vm4259_vm7 = vcmp.eq.s32.totalorder %v14909_v7, 1 }
 0x649   :  { %v4314_v62 = vmul.f32 %v4290_v16, %v4266_v38  ;;  %v4315_v19 = vmul.f32 %v4290_v16, %v4267_v32  ;;  %v4733_v52 = vrot.slane %v4732_v28, 2  ;;  %v11871_v16 = vadd.f32 1.0, %v8611_v0 }
 0x64a   :  { %v4035_v18 = vmul.f32 %v11799_v46, %v4034_v57  ;;  %vm4561_vm13 = vweird.f32 %v11869_v48 }
 0x64b   :  { %v4362_v35 = vadd.f32 %v4338_v53, %v4314_v62  ;;  %v4363_v60 = vadd.f32 %v4338_v53, %v4315_v19  ;;  %v4734_v56 = vmax.f32 %v4732_v28, %v4733_v52  ;;  %v14907_v62 = vld [vmem:[#allocation40_spill] sm:$0xff]  ;;  %v4115_v52 = vmul.f32 %v4099_v1, %v14908_v11 }
 0x64c   :  { %v4039_v25 = vsel %vm4038_vm6, %v11799_v46, %v4035_v18  ;;  %v4114_v19 = vmul.f32 %v4099_v1, %v14907_v62  ;;  %v14915_v18 = vld [vmem:[#allocation49_spill] sm:$0xff]  ;;  %v14916_v1 = vld [vmem:[#allocation67_spill] sm:$0xff]  ;;  %v4582_v7 = vand.u32 2147483648, %v11871_v16  ;;  %vm4576_vm15 = vweird.f32 %v11871_v16 }
 0x64d   :  { %v8403_v37 = vmul.f32 -1.442695, %v4362_v35  ;;  %v8404_v47 = vmul.f32 -1.442695, %v4363_v60  ;;  %v4735_v4 = vrot.slane %v4734_v56, 1  ;;  %v14911_v35 = vld [vmem:[#allocation35_spill] sm:$0xff] }
 0x64f   :  { %8612 = vpow2.f32 %v8403_v37  ;;  %v11875_v15 = vpop.permute.xlu0 %4235  ;;  %v4736_v54 = vmax.f32 %v4734_v56, %v4735_v4  ;;  %v4025_v56 = vmul.f32 %v11807_v44, %v4024_v21  ;;  %v14913_v21 = vld [vmem:[#allocation55_spill] sm:$0xff] }
 0x650   :  { %8614 = vpow2.f32 %v8404_v47  ;;  %v4045_v47 = vmul.f32 %v11812_v20, %v4044_v34  ;;  %v14912_v34 = vld [vmem:[#allocation54_spill] sm:$0xff]  ;;  %vm4254_vm8 = vcmp.eq.s32.totalorder %v11875_v15, 1 }
 0x651   :  { %v11879_v60 = vpop.permute.xlu1 %4169  ;;  %8616 = vrcp.f32 %v11869_v48  ;;  %8461 = vpush %v4736_v54  ;;  %v4029_v2 = vsel %vm4028_vm4, %v11807_v44, %v4025_v56 }
 0x652   :  { %8618 = vrcp.f32 %v11871_v16  ;;  %v4049_v38 = vsel %vm4048_vm5, %v11812_v20, %v4045_v47  ;;  %v14910_v20 = vld [vmem:[#allocation30_spill] sm:$0xff]  ;;  %v11917_v4 = vmul.f32 %v4029_v2, %v14912_v34  ;;  %v11920_v57 = vmul.f32 %v4029_v2, %v14913_v21  ;;  %v14914_v47 = vld [vmem:[#allocation48_spill] sm:$0xff] }
 0x653   :  { %v4104_v17 = vmul.f32 %v4049_v38, %v14910_v20  ;;  %v4105_v0 = vmul.f32 %v4049_v38, %v14911_v35  ;;  %v4102_v56 = vmul.f32 %v4039_v25, %v14914_v47  ;;  %v14917_v20 = vld [vmem:[#allocation39_spill] sm:$0xff]  ;;  %v4580_v34 = vand.u32 2147483647, %v11871_v16 }
 0x655   :  { %v8613_v61 = vpop.eup %8612  ;;  %v4152_v54 = vmul.f32 %v11715_v43, %v4104_v17  ;;  %v4153_v31 = vmul.f32 %v11715_v43, %v4105_v0  ;;  %v4150_v43 = vmul.f32 %v11838_v42, %v4102_v56  ;;  %v4565_v0 = vand.u32 2147483647, %v11869_v48 }
 0x656   :  { %v8615_v9 = vpop.eup %8614  ;;  %v11897_v32 = vadd.f32 1.0, %v8613_v61  ;;  %v4103_v61 = vmul.f32 %v4039_v25, %v14915_v18 }
 0x657   :  { %v11899_v53 = vadd.f32 1.0, %v8615_v9  ;;  %v11902_v28 = vpop.eup %8616  ;;  %v4200_v2 = vadd.f32 %v11763_v26, %v4152_v54  ;;  %v4201_v11 = vadd.f32 %v11763_v26, %v4153_v31 }
 0x658   :  { %8620 = vrcp.f32 %v11897_v32  ;;  %v11908_v5 = vpop.eup %8618  ;;  %v4146_v44 = vpop.permute.xlu0 %4145  ;;  %v4557_v62 = vmul.f32 %v11902_v28, %v11869_v48  ;;  %vm4562_vm9 = vweird.f32 %v11902_v28  ;;  %vm4531_vm1 = vweird.f32 %v11897_v32 }
 0x659   :  { %8622 = vrcp.f32 %v11899_v53  ;;  %v4162_v51 = vmul.f32 %v4146_v44, %v4114_v19  ;;  %v4163_v37 = vmul.f32 %v4146_v44, %v4115_v52  ;;  %v4572_v19 = vmul.f32 %v11908_v5, %v11871_v16  ;;  %v8832_v16 = vld [vmem:[#allocation2 + $0x48] sm:$0xff] }
 0x65a   :  { %v11914_v46 = vpop.permute.xlu1 %4285  ;;  %v11936_v52 = vmul.f32 %v11838_v42, %v4103_v61  ;;  %v4567_v44 = vand.u32 2147483648, %v11869_v48  ;;  %v4558_v54 = vsub.f32 1.0, %v4557_v62  ;;  %vm4577_vm11 = vweird.f32 %v11908_v5 }
 0x65b   :  { %v4210_v9 = vadd.f32 %v14916_v1, %v4162_v51  ;;  %v4211_v38 = vadd.f32 %v14916_v1, %v4163_v37  ;;  %v4573_v31 = vsub.f32 1.0, %v4572_v19  ;;  %v4537_v1 = vand.u32 2147483648, %v11897_v32 }
 0x65c   :  { %vm4546_vm3 = vweird.f32 %v11899_v53  ;;  %v4199_v15 = vadd.f32 %v11879_v60, %v11936_v52  ;;  %v4583_v48 = vor.u32 1.1754944e-38, %v4582_v7 }
 0x65d   :  { %v4274_v17 = vsel %vm4259_vm7, %v14917_v20, %v4210_v9  ;;  %v4275_v35 = vsel %vm4259_vm7, %v14917_v20, %v4211_v38  ;;  %v4552_v38 = vand.u32 2147483648, %v11899_v53  ;;  %vm11975_vm7 = vcmp.eq.f32.partialorder %v4565_v0, 8.507059e+37  ;;  %v8830_v0 = vld [vmem:[#allocation2 + $0x38] sm:$0xff] }
 0x65e   :  { %v8621_v25 = vpop.eup %8620  ;;  %v4322_v26 = vmul.f32 %v11423_v63, %v4274_v17  ;;  %v4323_v37 = vmul.f32 %v11423_v63, %v4275_v35  ;;  %v4535_v63 = vand.u32 2147483647, %v11897_v32  ;;  %v4550_v35 = vand.u32 2147483647, %v11899_v53 }
 0x65f   :  { %v8623_v51 = vpop.eup %8622  ;;  %v4527_v42 = vmul.f32 %v8621_v25, %v11897_v32  ;;  %vm4532_vm12 = vweird.f32 %v8621_v25 }
 0x660   :  { %v4542_v21 = vmul.f32 %v8623_v51, %v11899_v53  ;;  %v4370_v47 = vadd.f32 %v11427_v33, %v4322_v26  ;;  %v4371_v56 = vadd.f32 %v11427_v33, %v4323_v37  ;;  %v4118_v18 = vpop.permute.xlu0 %4117  ;;  %vm4547_vm14 = vweird.f32 %v8623_v51  ;;  %vm4533_vm2 = vmor %vm4531_vm1, %vm4532_vm12 }
 0x661   :  { %v4528_v61 = vsub.f32 1.0, %v4527_v42  ;;  %v4559_v26 = vmul.f32 %v11902_v28, %v4558_v54  ;;  %v4574_v42 = vmul.f32 %v11908_v5, %v4573_v31  ;;  %vm4536_vm5 = vcmp.eq.f32.partialorder %v4535_v63, 8.507059e+37  ;;  %vm4548_vm4 = vmor %vm4546_vm3, %vm4547_vm14 }
 0x662   :  { %v4543_v9 = vsub.f32 1.0, %v4542_v21  ;;  %v8411_v62 = vmul.f32 -1.442695, %v4370_v47  ;;  %v8412_v19 = vmul.f32 -1.442695, %v4371_v56  ;;  %v4538_v21 = vor.u32 1.1754944e-38, %v4537_v1  ;;  %vm12017_vm12 = vmor %vm4576_vm15, %vm4577_vm11 }
 0x663   :  { %v11961_v20 = vpop.permute.xlu1 %4229  ;;  %v4529_v33 = vmul.f32 %v8621_v25, %v4528_v61  ;;  %v4198_v56 = vadd.f32 %v11879_v60, %v4150_v43  ;;  %v4553_v54 = vor.u32 1.1754944e-38, %v4552_v38  ;;  %vm4551_vm6 = vcmp.eq.f32.partialorder %v4550_v35, 8.507059e+37  ;;  %v4282_v38 = vpop.permute.xlu2 %4281 }
 0x664   :  { %v4544_v17 = vmul.f32 %v8623_v51, %v4543_v9  ;;  %8624 = vpow2.f32 %v8411_v62  ;;  %v14918_v9 = vld [vmem:[#allocation26_spill] sm:$0xff]  ;;  %v4560_v1 = vadd.f32 %v11902_v28, %v4559_v26  ;;  %v4575_v35 = vadd.f32 %v11908_v5, %v4574_v42 }
 0x665   :  { %v4530_v37 = vadd.f32 %v8621_v25, %v4529_v33  ;;  %8626 = vpow2.f32 %v8412_v19  ;;  %v4264_v62 = vsel %vm4254_vm8, %v14918_v9, %v4200_v2  ;;  %v4265_v53 = vsel %vm4254_vm8, %v14918_v9, %v4201_v11  ;;  %vm12004_vm8 = vmor %vm4561_vm13, %vm4562_vm9 }
 0x666   :  { %v4545_v47 = vadd.f32 %v8623_v51, %v4544_v17  ;;  %v4148_v2 = vmul.f32 %v4118_v18, %v11917_v4  ;;  %v4312_v11 = vmul.f32 %v11914_v46, %v4264_v62  ;;  %v4568_v26 = vor.u32 1.1754944e-38, %v4567_v44 }
 0x667   :  { %v4534_v61 = vsel %vm4533_vm2, %v8621_v25, %v4530_v37  ;;  %v8829_v25 = vld [vmem:[#allocation2 + $0x30] sm:$0xff]  ;;  %vm4252_vm9 = vcmp.eq.s32.totalorder %v11961_v20, 1  ;;  %vm4581_vm11 = vcmp.eq.f32.partialorder %v4580_v34, 8.507059e+37 }
 0x668   :  { %v4539_v32 = vsel %vm4536_vm5, %v4538_v21, %v4534_v61  ;;  %v4549_v33 = vsel %vm4548_vm4, %v8623_v51, %v4545_v47  ;;  %v4149_v51 = vmul.f32 %v4118_v18, %v11920_v57  ;;  %v4313_v21 = vmul.f32 %v11914_v46, %v4265_v53  ;;  %v14925_v46 = vld [vmem:[#allocation46_spill] sm:$0xff]  ;;  %v14928_v53 = vld [vmem:[#allocation53_spill] sm:$0xff] }
 0x669   :  { %v4554_v43 = vsel %vm4551_vm6, %v4553_v54, %v4549_v33  ;;  %v11982_v63 = vmul.f32 %v8829_v25, %v4539_v32  ;;  %v4166_v19 = vpop.permute.xlu0 %4165  ;;  %v4262_v52 = vsel %vm4253_vm10, %v14925_v46, %v4198_v56  ;;  %v4564_v56 = vsel %vm12004_vm8, %v11902_v28, %v4560_v1 }
 0x66a   :  { %v11987_v17 = vmul.f32 %v8830_v0, %v4554_v43  ;;  %v8625_v37 = vpop.eup %8624  ;;  %v4196_v57 = vadd.f32 %v4166_v19, %v4148_v2  ;;  %v4197_v18 = vadd.f32 %v4166_v19, %v4149_v51  ;;  %v4579_v32 = vsel %vm12017_vm12, %v11908_v5, %v4575_v35 }
 0x66b   :  { %14921 = vst [vmem:[#allocation82_spill] sm:$0xff] %v11982_v63  ;;  %v8627_v4 = vpop.eup %8626  ;;  %v11996_v47 = vadd.f32 1.0, %v8625_v37  ;;  %v4263_v33 = vsel %vm4253_vm10, %v14925_v46, %v4199_v15  ;;  %v4569_v28 = vsel %vm11975_vm7, %v4568_v26, %v4564_v56  ;;  %v4584_v5 = vsel %vm4581_vm11, %v4583_v48, %v4579_v32  ;;  %v4278_v51 = vpop.permute.xlu2 %4277 }
 0x66c   :  { %14922 = vst [vmem:[#allocation12_spill] sm:$0xff] %v11987_v17  ;;  %v4334_v61 = vpop.permute.xlu1 %4333  ;;  %v5370_v42 = vadd.f32 %v11987_v17, %v11982_v63  ;;  %v12011_v44 = vadd.f32 1.0, %v8627_v4  ;;  %v4260_v43 = vsel %vm4252_vm9, %v14928_v53, %v4196_v57  ;;  %v4261_v25 = vsel %vm4252_vm9, %v14928_v53, %v4197_v18 }
 0x66d   :  { %v4360_v54 = vadd.f32 %v4334_v61, %v4312_v11  ;;  %8628 = vrcp.f32 %v11996_v47  ;;  %v4361_v62 = vadd.f32 %v4334_v61, %v4313_v21  ;;  %v4310_v30 = vmul.f32 %v4282_v38, %v4262_v52  ;;  %v8831_v21 = vld [vmem:[#allocation2 + $0x40] sm:$0xff] }
 0x66e   :  { %5371 = vadd.xlane.f32.xlu1 %v5370_v42  ;;  %8630 = vrcp.f32 %v12011_v44  ;;  %v4311_v1 = vmul.f32 %v4282_v38, %v4263_v33  ;;  %v4308_v19 = vmul.f32 %v4278_v51, %v4260_v43  ;;  %v4309_v20 = vmul.f32 %v4278_v51, %v4261_v25 }
 0x66f   :  { %v8401_v7 = vmul.f32 -1.442695, %v4360_v54  ;;  %v8402_v2 = vmul.f32 -1.442695, %v4361_v62  ;;  %v12041_v4 = vmul.f32 %v8831_v21, %v4569_v28  ;;  %v12043_v34 = vmul.f32 %v8832_v16, %v4584_v5 }
 0x670   :  { %vm4651_vm10 = vweird.f32 %v11996_v47  ;;  %v4655_v42 = vand.u32 2147483647, %v11996_v47  ;;  %v4657_v54 = vand.u32 2147483648, %v11996_v47  ;;  %v4672_v9 = vand.u32 2147483648, %v12011_v44 }
 0x671   :  { %8632 = vpow2.f32 %v8401_v7  ;;  %14929 = vst [vmem:[#allocation88_spill] sm:$0xff] %v12041_v4  ;;  %v4670_v25 = vand.u32 2147483647, %v12011_v44  ;;  %vm4666_vm1 = vweird.f32 %v12011_v44  ;;  %v12070_v16 = vadd.f32 %v12043_v34, %v12041_v4 }
 0x672   :  { %8634 = vpow2.f32 %v8402_v2  ;;  %v4330_v0 = vpop.permute.xlu0 %4329  ;;  %14930 = vst [vmem:[#allocation70_spill] sm:$0xff] %v12043_v34  ;;  %vm4656_vm15 = vcmp.eq.f32.partialorder %v4655_v42, 8.507059e+37  ;;  %v4658_v28 = vor.u32 1.1754944e-38, %v4657_v54 }
 0x673   :  { %v8629_v35 = vpop.eup %8628  ;;  %v4358_v37 = vadd.f32 %v4330_v0, %v4310_v30  ;;  %v4359_v15 = vadd.f32 %v4330_v0, %v4311_v1  ;;  %v4673_v30 = vor.u32 1.1754944e-38, %v4672_v9  ;;  %vm4671_vm5 = vcmp.eq.f32.partialorder %v4670_v25, 8.507059e+37 }
 0x674   :  { %v4326_v11 = vpop.permute.xlu1 %4325  ;;  %v8631_v31 = vpop.eup %8630  ;;  %v4647_v38 = vmul.f32 %v8629_v35, %v11996_v47  ;;  %vm4652_vm13 = vweird.f32 %v8629_v35  ;;  %v8833_v47 = vld [vmem:[#allocation2 + $0x70] sm:$0xff] }
 0x675   :  { %v4356_v26 = vadd.f32 %v4326_v11, %v4308_v19  ;;  %v4357_v57 = vadd.f32 %v4326_v11, %v4309_v20  ;;  %v8399_v18 = vmul.f32 -1.442695, %v4358_v37  ;;  %v8400_v61 = vmul.f32 -1.442695, %v4359_v15  ;;  %vm4653_vm2 = vmor %vm4651_vm10, %vm4652_vm13 }
 0x676   :  { %v4662_v60 = vmul.f32 %v8631_v31, %v12011_v44  ;;  %v4648_v52 = vsub.f32 1.0, %v4647_v38  ;;  %vm4667_vm14 = vweird.f32 %v8631_v31 }
 0x677   :  { %v8633_v46 = vpop.eup %8632  ;;  %8636 = vpow2.f32 %v8399_v18  ;;  %v8397_v56 = vmul.f32 -1.442695, %v4356_v26  ;;  %v8398_v7 = vmul.f32 -1.442695, %v4357_v57  ;;  %vm4668_vm3 = vmor %vm4666_vm1, %vm4667_vm14  ;;  %v8834_v57 = vld [vmem:[#allocation2 + $0x78] sm:$0xff] }
 0x678   :  { %v8635_v48 = vpop.eup %8634  ;;  %v12051_v62 = vadd.f32 1.0, %v8633_v46  ;;  %v4663_v32 = vsub.f32 1.0, %v4662_v60  ;;  %8638 = vpow2.f32 %v8400_v61  ;;  %v4649_v53 = vmul.f32 %v8629_v35, %v4648_v52 }
 0x679   :  { %v12053_v33 = vadd.f32 1.0, %v8635_v48 }
 0x67a   :  { %8640 = vrcp.f32 %v12051_v62  ;;  %v4664_v43 = vmul.f32 %v8631_v31, %v4663_v32  ;;  %v4650_v2 = vadd.f32 %v8629_v35, %v4649_v53  ;;  %v4507_v51 = vand.u32 2147483648, %v12051_v62 }
 0x67b   :  { %8642 = vrcp.f32 %v12053_v33  ;;  %v4522_v19 = vand.u32 2147483648, %v12053_v33  ;;  %v4520_v18 = vand.u32 2147483647, %v12053_v33  ;;  %vm4501_vm4 = vweird.f32 %v12051_v62 }
 0x67c   :  { %8644 = vpow2.f32 %v8397_v56  ;;  %v4665_v5 = vadd.f32 %v8631_v31, %v4664_v43  ;;  %v4654_v1 = vsel %vm4653_vm2, %v8629_v35, %v4650_v2  ;;  %v12085_v60 = vor.u32 1.1754944e-38, %v4507_v51 }
 0x67d   :  { %8646 = vpow2.f32 %v8398_v7  ;;  %v8637_v20 = vpop.eup %8636  ;;  %v4659_v0 = vsel %vm4656_vm15, %v4658_v28, %v4654_v1  ;;  %v12087_v46 = vor.u32 1.1754944e-38, %v4522_v19  ;;  %vm4516_vm12 = vweird.f32 %v12053_v33 }
 0x67e   :  { %v4669_v37 = vsel %vm4668_vm3, %v8631_v31, %v4665_v5  ;;  %v8639_v44 = vpop.eup %8638  ;;  %v12064_v15 = vadd.f32 1.0, %v8637_v20  ;;  %v12066_v21 = vmul.f32 %v8833_v47, %v4659_v0  ;;  %v4505_v31 = vand.u32 2147483647, %v12051_v62 }
 0x67f   :  { %v4674_v11 = vsel %vm4671_vm5, %v4673_v30, %v4669_v37  ;;  %v12074_v26 = vadd.f32 1.0, %v8639_v44  ;;  %vm12116_vm9 = vcmp.eq.f32.partialorder %v4520_v18, 8.507059e+37 }
 0x680   :  { %14931 = vst [vmem:[#allocation83_spill] sm:$0xff] %v12066_v21  ;;  %v12072_v35 = vpop.eup %8640  ;;  %v12076_v38 = vmul.f32 %v8834_v57, %v4674_v11  ;;  %8648 = vrcp.f32 %v12064_v15  ;;  %v4475_v7 = vand.u32 2147483647, %v12064_v15  ;;  %vm12102_vm8 = vcmp.eq.f32.partialorder %v4505_v31, 8.507059e+37 }
 0x681   :  { %v12080_v61 = vpop.eup %8642  ;;  %v4497_v42 = vmul.f32 %v12072_v35, %v12051_v62  ;;  %8650 = vrcp.f32 %v12074_v26  ;;  %vm4502_vm6 = vweird.f32 %v12072_v35  ;;  %v4477_v28 = vand.u32 2147483648, %v12064_v15 }
 0x682   :  { %14932 = vst [vmem:[#allocation28_spill] sm:$0xff] %v12076_v38  ;;  %v8645_v52 = vpop.eup %8644  ;;  %v5382_v54 = vadd.f32 %v12076_v38, %v12066_v21  ;;  %v4512_v9 = vmul.f32 %v12080_v61, %v12053_v33  ;;  %s8462_s2 = spop %8461  ;;  %vm4517_vm7 = vweird.f32 %v12080_v61  ;;  %vm4471_vm11 = vweird.f32 %v12064_v15  ;;  %vm4503_vm10 = vmor %vm4501_vm4, %vm4502_vm6 }
 0x683   :  { %v8647_v48 = vpop.eup %8646  ;;  %v12096_v56 = vadd.f32 1.0, %v8645_v52  ;;  %v4498_v32 = vsub.f32 1.0, %v4497_v42  ;;  %v4738_v43 = vstv %s8462_s2  ;;  %vm12139_vm14 = vcmp.eq.f32.partialorder %v4475_v7, 8.507059e+37  ;;  %vm4518_vm1 = vmor %vm4516_vm12, %vm4517_vm7 }
 0x684   :  { %v12100_v53 = vadd.f32 1.0, %v8647_v48  ;;  %5383 = vadd.xlane.f32.xlu2 %v5382_v54  ;;  %v4513_v2 = vsub.f32 1.0, %v4512_v9  ;;  %v4739_v5 = vsub.f32 %v11783_v22, %v4738_v43  ;;  %v4740_v30 = vsub.f32 %v11787_v49, %v4738_v43 }
 0x685   :  { %8652 = vrcp.f32 %v12096_v56  ;;  %v4741_v1 = vsub.f32 %v11796_v23, %v4738_v43  ;;  %v4742_v51 = vsub.f32 %v11823_v40, %v4738_v43  ;;  %v4743_v19 = vsub.f32 %v11816_v55, %v4738_v43 }
 0x686   :  { %8654 = vrcp.f32 %v12100_v53  ;;  %v4744_v20 = vsub.f32 %v11803_v13, %v4738_v43  ;;  %v12120_v37 = vpop.eup %8648  ;;  %v4745_v22 = vsub.f32 %v11831_v41, %v4738_v43  ;;  %v4746_v49 = vsub.f32 %v11820_v8, %v4738_v43 }
 0x687   :  { %v4747_v44 = vmul.f32 1.442695, %v4739_v5  ;;  %v4749_v23 = vmul.f32 1.442695, %v4740_v30  ;;  %v12124_v11 = vpop.eup %8650  ;;  %v4751_v47 = vmul.f32 1.442695, %v4741_v1  ;;  %v4499_v55 = vmul.f32 %v12072_v35, %v4498_v32 }
 0x688   :  { %v4753_v40 = vmul.f32 1.442695, %v4742_v51  ;;  %v4755_v57 = vmul.f32 1.442695, %v4743_v19  ;;  %v4757_v13 = vmul.f32 1.442695, %v4744_v20  ;;  %v4514_v8 = vmul.f32 %v12080_v61, %v4513_v2 }
 0x689   :  { %8656 = vpow2.f32 %v4747_v44  ;;  %v4759_v31 = vmul.f32 1.442695, %v4745_v22  ;;  %v4761_v18 = vmul.f32 1.442695, %v4746_v49  ;;  %v4500_v41 = vadd.f32 %v12072_v35, %v4499_v55  ;;  %v8836_v51 = vld [vmem:[#allocation2 + $0x28] sm:$0xff] }
 0x68a   :  { %8658 = vpow2.f32 %v4749_v23  ;;  %v4467_v42 = vmul.f32 %v12120_v37, %v12064_v15  ;;  %vm4472_vm13 = vweird.f32 %v12120_v37  ;;  %v4478_v9 = vor.u32 1.1754944e-38, %v4477_v28 }
 0x68b   :  { %v12132_v52 = vpop.eup %8652  ;;  %8660 = vpow2.f32 %v4751_v47  ;;  %vm4486_vm15 = vweird.f32 %v12074_v26  ;;  %v4504_v32 = vsel %vm4503_vm10, %v12072_v35, %v4500_v41  ;;  %v4515_v43 = vadd.f32 %v12080_v61, %v4514_v8  ;;  %v8835_v35 = vld [vmem:[#allocation2 + $0x20] sm:$0xff]  ;;  %vm4473_vm3 = vmor %vm4471_vm11, %vm4472_vm13 }
 0x68c   :  { %v12144_v48 = vpop.eup %8654  ;;  %8662 = vpow2.f32 %v4753_v40  ;;  %5374 = vadd.xlane.f32.xlu2 %v12070_v16  ;;  %v4468_v62 = vsub.f32 1.0, %v4467_v42  ;;  %v4509_v7 = vsel %vm12102_vm8, %v12085_v60, %v4504_v32  ;;  %v4482_v2 = vmul.f32 %v12124_v11, %v12074_v26 }
 0x68d   :  { %8664 = vpow2.f32 %v4755_v57  ;;  %vm4487_vm2 = vweird.f32 %v12124_v11  ;;  %v4519_v16 = vsel %vm4518_vm1, %v12080_v61, %v4515_v43  ;;  %v12160_v28 = vmul.f32 %v8835_v35, %v4509_v7 }
 0x68e   :  { %8666 = vpow2.f32 %v4757_v13  ;;  %v4469_v5 = vmul.f32 %v12120_v37, %v4468_v62  ;;  %v4524_v33 = vsel %vm12116_vm9, %v12087_v46, %v4519_v16  ;;  %v4483_v60 = vsub.f32 1.0, %v4482_v2  ;;  %vm4488_vm7 = vmor %vm4486_vm15, %vm4487_vm2 }
 0x68f   :  { %14939 = vst [vmem:[#allocation85_spill] sm:$0xff] %v12160_v28  ;;  %v12163_v25 = vpop.eup %8656  ;;  %8668 = vpow2.f32 %v4759_v31  ;;  %v4490_v30 = vand.u32 2147483647, %v12074_v26  ;;  %v12171_v61 = vmul.f32 %v8836_v51, %v4524_v33  ;;  %v4492_v20 = vand.u32 2147483648, %v12074_v26 }
 0x690   :  { %14940 = vst [vmem:[#allocation86_spill] sm:$0xff] %v12163_v25  ;;  %v12169_v1 = vpop.eup %8658  ;;  %8670 = vpow2.f32 %v4761_v18  ;;  %v4470_v19 = vadd.f32 %v12120_v37, %v4469_v5  ;;  %v4484_v46 = vmul.f32 %v12124_v11, %v4483_v60  ;;  %v4437_v49 = vmul.f32 %v12132_v52, %v12096_v56 }
 0x691   :  { %14941 = vst [vmem:[#allocation71_spill] sm:$0xff] %v12169_v1  ;;  %v12175_v22 = vpop.eup %8660  ;;  %vm12182_vm5 = vcmp.eq.f32.partialorder %v4490_v30, 8.507059e+37  ;;  %vm4441_vm4 = vweird.f32 %v12096_v56  ;;  %v5367_v23 = vadd.f32 %v12171_v61, %v12160_v28  ;;  %v4493_v15 = vor.u32 1.1754944e-38, %v4492_v20 }
 0x692   :  { %14942 = vst [vmem:[#allocation16_spill] sm:$0xff] %v12171_v61  ;;  %v12189_v44 = vpop.eup %8662  ;;  %v4474_v47 = vsel %vm4473_vm3, %v12120_v37, %v4470_v19  ;;  %vm4442_vm6 = vweird.f32 %v12132_v52  ;;  %v4485_v55 = vadd.f32 %v12124_v11, %v4484_v46  ;;  %v4438_v13 = vsub.f32 1.0, %v4437_v49  ;;  %v8837_v37 = vld [vmem:[#allocation2 + $0x10] sm:$0xff] }
 0x693   :  { %14943 = vst [vmem:[#allocation89_spill] sm:$0xff] %v12175_v22  ;;  %v12195_v40 = vpop.eup %8664  ;;  %v4479_v57 = vsel %vm12139_vm14, %v4478_v9, %v4474_v47  ;;  %v4445_v31 = vand.u32 2147483647, %v12096_v56  ;;  %v4447_v42 = vand.u32 2147483648, %v12096_v56  ;;  %v4452_v54 = vmul.f32 %v12144_v48, %v12100_v53  ;;  %vm4443_vm12 = vmor %vm4441_vm4, %vm4442_vm6 }
 0x694   :  { %14946 = vst [vmem:[#allocation87_spill] sm:$0xff] %v12189_v44  ;;  %v12201_v18 = vpop.eup %8666  ;;  %5368 = vadd.xlane.f32.xlu2 %v5367_v23  ;;  %v12207_v41 = vmul.f32 %v8837_v37, %v4479_v57  ;;  %v12210_v8 = vand.u32 4294901760, %v12195_v40  ;;  %v4489_v43 = vsel %vm4488_vm7, %v12124_v11, %v4485_v55  ;;  %v4439_v26 = vmul.f32 %v12132_v52, %v4438_v13  ;;  %v8838_v11 = vld [vmem:[#allocation2 + $0x18] sm:$0xff]  ;;  %v8839_v13 = vld [vmem:[#allocation2] sm:$0xff] }
 0x695   :  { %14947 = vst [vmem:[#allocation24_spill] sm:$0xff] %v12195_v40  ;;  %v12215_v9 = vpop.eup %8668  ;;  %v12218_v32 = vand.u32 4294901760, %v12201_v18  ;;  %vm12222_vm8 = vcmp.eq.f32.partialorder %v4445_v31, 8.507059e+37  ;;  %v4494_v16 = vsel %vm12182_vm5, %v4493_v15, %v4489_v43  ;;  %v4448_v35 = vor.u32 1.1754944e-38, %v4447_v42 }
 0x696   :  { %14948 = vst [vmem:[#allocation21_spill] sm:$0xff] %v12201_v18  ;;  %v12226_v7 = vpop.eup %8670  ;;  %v12229_v2 = vand.u32 4294901760, %v12215_v9  ;;  %v4453_v5 = vsub.f32 1.0, %v4452_v54  ;;  %v12236_v60 = vmul.f32 %v8838_v11, %v4494_v16  ;;  %v4440_v51 = vadd.f32 %v12132_v52, %v4439_v26 }
 0x697   :  { %14949 = vst [vmem:[#allocation37_spill] sm:$0xff] %v12207_v41  ;;  %v12234_v33 = vand.u32 4294901760, %v12226_v7  ;;  %v12240_v30 = vsub.f32 %v12201_v18, %v12218_v32  ;;  %vm4456_vm9 = vweird.f32 %v12100_v53  ;;  %vm4457_vm11 = vweird.f32 %v12144_v48 }
 0x698   :  { %14950 = vst [vmem:[#allocation11_spill] sm:$0xff] %v12215_v9  ;;  %v12245_v19 = vsub.f32 %v12215_v9, %v12229_v2  ;;  %v4454_v20 = vmul.f32 %v12144_v48, %v4453_v5  ;;  %v5364_v0 = vadd.f32 %v12236_v60, %v12207_v41  ;;  %v4444_v56 = vsel %vm4443_vm12, %v12132_v52, %v4440_v51  ;;  %vm12273_vm10 = vmor %vm4456_vm9, %vm4457_vm11  ;;  %v8381_v5 = vld [vmem:[%s14391_s1 + $0xc0] sm:$0xff] }
 0x699   :  { %14953 = vst [vmem:[#allocation44_spill] sm:$0xff] %v12226_v7  ;;  %4796 = vmatpush.msrb.mxu2 %v12234_v33  ;;  %5047 = vmatpush.msrb.mxu1 %v12234_v33  ;;  %v12258_v46 = vsub.f32 %v12226_v7, %v12234_v33  ;;  %v4460_v49 = vand.u32 2147483647, %v12100_v53  ;;  %v4449_v23 = vsel %vm12222_vm8, %v4448_v35, %v4444_v56  ;;  %v4462_v15 = vand.u32 2147483648, %v12100_v53  ;;  %v8840_v56 = vld [vmem:[#allocation2 + $0x8] sm:$0xff] }
 0x69a   :  { %14954 = vst [vmem:[#allocation42_spill] sm:$0xff] %v12236_v60  ;;  %v4455_v47 = vadd.f32 %v12144_v48, %v4454_v20  ;;  %v12269_v57 = vand.u32 4294901760, %v12189_v44  ;;  %v12281_v31 = vmul.f32 %v8839_v13, %v4449_v23  ;;  %v12286_v37 = vsub.f32 %v12195_v40, %v12210_v8  ;;  %5365 = vadd.xlane.f32.xlu0 %v5364_v0  ;;  %v8382_v13 = vld [vmem:[%s14391_s1 + $0xc8] sm:$0xff] }
 0x69b   :  { %4798 = vmatpush.msrb.mxu2 %v12229_v2  ;;  %4975 = vmatpush.msrb.mxu0 %v12258_v46  ;;  %vm12277_vm13 = vcmp.eq.f32.partialorder %v4460_v49, 8.507059e+37  ;;  %v14507_v53 = vand.u32 4294901760, %v12258_v46  ;;  %v4463_v54 = vor.u32 1.1754944e-38, %v4462_v15  ;;  %v12293_v43 = vand.u32 4294901760, %v12175_v22 }
 0x69c   :  { %14959 = vst [vmem:[#allocation27_spill] sm:$0xff] %v12281_v31  ;;  %5049 = vmatpush.msrb.mxu1 %v12229_v2  ;;  %v4459_v42 = vsel %vm12273_vm10, %v12144_v48, %v4455_v47  ;;  %v14506_v26 = vand.u32 4294901760, %v12245_v19  ;;  %v12303_v16 = vsub.f32 %v12189_v44, %v12269_v57  ;;  %v12306_v48 = vand.u32 4294901760, %v12169_v1 }
 0x69d   :  { %4800 = vmatpush.msrb.mxu2 %v12218_v32  ;;  %4978 = vmatpush.msrb.mxu0 %v12245_v19  ;;  %v4887_v62 = vsub.f32 %v12258_v46, %v14507_v53  ;;  %v14504_v35 = vand.u32 4294901760, %v12240_v30  ;;  %v4464_v11 = vsel %vm12277_vm13, %v4463_v54, %v4459_v42  ;;  %v12320_v20 = vsub.f32 %v12175_v22, %v12293_v43 }
 0x69e   :  { %5051 = vmatpush.msrb.mxu1 %v12218_v32  ;;  %v4893_v51 = vsub.f32 %v12245_v19, %v14506_v26  ;;  %v12323_v0 = vand.u32 4294901760, %v12163_v25  ;;  %v12327_v49 = vmul.f32 %v8840_v56, %v4464_v11  ;;  %v14505_v47 = vand.u32 4294901760, %v12286_v37 }
 0x69f   :  { %4802 = vmatpush.msrb.mxu2 %v12210_v8  ;;  %4981 = vmatpush.msrb.mxu0 %v12240_v30  ;;  %v4888_v23 = vand.u32 4294901760, %v4887_v62  ;;  %v4899_v15 = vsub.f32 %v12240_v30, %v14504_v35  ;;  %v12336_v55 = vsub.f32 %v12169_v1, %v12306_v48  ;;  %v4764_v52 = vsel %vm1300_vm0, %v8381_v5, 0 }
 0x6a0   :  { %14960 = vst [vmem:[#allocation38_spill] sm:$0xff] %v12327_v49  ;;  %5053 = vmatpush.msrb.mxu1 %v12210_v8  ;;  %v5361_v42 = vadd.f32 %v12327_v49, %v12281_v31  ;;  %v4894_v54 = vand.u32 4294901760, %v4893_v51  ;;  %v12345_v62 = vand.u32 4294901760, %v4764_v52  ;;  %v4905_v5 = vsub.f32 %v12286_v37, %v14505_v47  ;;  %v8383_v51 = vld [vmem:[%s14391_s1 + $0xd0] sm:$0xff] }
 0x6a1   :  { %4804 = vmatpush.msrb.mxu2 %v12269_v57  ;;  %4889 = vmatpush.msrb.mxu3 %v4888_v23  ;;  %v4910_v11 = vand.u32 4294901760, %v12303_v16  ;;  %v12355_v56 = vsub.f32 %v12163_v25, %v12323_v0  ;;  %v4767_v47 = vsel %vm1300_vm0, %v8382_v13, 0  ;;  %v4900_v26 = vand.u32 4294901760, %v4899_v15 }
 0x6a2   :  { %14961 = vst [vmem:[#allocation34_spill] sm:$0xff] %v12345_v62  ;;  %4984 = vmatpush.msrb.mxu0 %v12286_v37  ;;  %5055 = vmatpush.msrb.mxu1 %v12269_v57  ;;  %v12363_v23 = vsub.f32 %v4764_v52, %v12345_v62  ;;  %v4922_v35 = vand.u32 4294901760, %v12336_v55  ;;  %v12374_v49 = vand.u32 4294901760, %v4767_v47  ;;  %v4770_v52 = vsel %vm1300_vm0, %v8383_v51, 0 }
 0x6a3   :  { %5362 = vadd.xlane.f32.xlu1 %v5361_v42  ;;  %4806 = vmatpush.msrb.mxu2 %v12293_v43  ;;  %v4911_v53 = vsub.f32 %v12303_v16, %v4910_v11  ;;  %v4906_v13 = vand.u32 4294901760, %v4905_v5  ;;  %v14965_v15 = vand.u32 4294901760, %v12320_v20  ;;  %v14969_v61 = vand.u32 4294901760, %v12258_v46 }
 0x6a4   :  { %14962 = vst [vmem:[#allocation14_spill] sm:$0xff] %v12363_v23  ;;  %4895 = vmatpush.msrb.mxu3 %v4894_v54  ;;  %4987 = vmatpush.msrb.mxu0 %v12303_v16  ;;  %v12372_v42 = vand.u32 4294901760, %v12363_v23  ;;  %v4928_v54 = vand.u32 4294901760, %v12355_v56  ;;  %v12387_v41 = vsub.f32 %v4767_v47, %v12374_v49  ;;  %v4923_v51 = vsub.f32 %v12336_v55, %v4922_v35  ;;  %v8384_v47 = vld [vmem:[%s14391_s1 + $0xd8] sm:$0xff] }
 0x6a5   :  { %5057 = vmatpush.msrb.mxu1 %v12293_v43  ;;  %4808 = vmatpush.msrb.mxu2 %v12306_v48  ;;  %14964 = vst [vmem:[#allocation45_spill] sm:$0xff] %v12374_v49  ;;  %v4917_v16 = vsub.f32 %v12320_v20, %v14965_v15  ;;  %v4912_v5 = vand.u32 4294901760, %v4911_v53  ;;  %v14972_v46 = vand.u32 4294901760, %v12245_v19  ;;  %v14977_v19 = vand.u32 4294901760, %v12286_v37 }
 0x6a6   :  { %14963 = vst [vmem:[#allocation56_spill] sm:$0xff] %v12372_v42  ;;  %4901 = vmatpush.msrb.mxu3 %v4900_v26  ;;  %4990 = vmatpush.msrb.mxu0 %v12320_v20  ;;  %v4814_v60 = vsub.f32 %v12363_v23, %v12372_v42  ;;  %v12389_v26 = vand.u32 4294901760, %v4770_v52  ;;  %v12399_v28 = vand.u32 4294901760, %v12387_v41  ;;  %v14979_v37 = vand.u32 4294901760, %v12320_v20 }
 0x6a7   :  { %5059 = vmatpush.msrb.mxu1 %v12306_v48  ;;  %4810 = vmatpush.msrb.mxu2 %v12323_v0  ;;  %14966 = vst [vmem:[#allocation47_spill] sm:$0xff] %v12387_v41  ;;  %v4918_v53 = vand.u32 4294901760, %v4917_v16  ;;  %vm5871_vm14 = vcmask 7168  }
 0x6a8   :  { %14967 = vst [vmem:[#allocation25_spill] sm:$0xff] %v12389_v26  ;;  %4907 = vmatpush.msrb.mxu3 %v4906_v13  ;;  %4993 = vmatpush.msrb.mxu0 %v12336_v55  ;;  %v12394_v15 = vand.u32 4294901760, %v4814_v60  ;;  %v4929_v55 = vsub.f32 %v12355_v56, %v4928_v54  ;;  %v4822_v60 = vsub.f32 %v12387_v41, %v12399_v28  ;;  %v4924_v13 = vand.u32 4294901760, %v4923_v51 }
 0x6a9   :  { %5061 = vmatpush.msrb.mxu1 %v12323_v0  ;;  %5122 = vmatpush.msra.mxu2 %v14969_v61  ;;  %14970 = vst [vmem:[#allocation19_spill] sm:$0xff] %v12399_v28  ;;  %v12410_v61 = vsub.f32 %v4770_v52, %v12389_v26 }
 0x6aa   :  { %14968 = vst [vmem:[#allocation20_spill] sm:$0xff] %v12394_v15  ;;  %4913 = vmatpush.msrb.mxu3 %v4912_v5  ;;  %4996 = vmatpush.msrb.mxu0 %v12355_v56  ;;  %v4773_v5 = vsel %vm1300_vm0, %v8384_v47, 0  ;;  %v14973_v56 = vand.u32 4294901760, %v12240_v30  ;;  %v4930_v16 = vand.u32 4294901760, %v4929_v55  ;;  %v12419_v17 = vand.u32 4294901760, %v4822_v60  ;;  %v8385_v30 = vld [vmem:[%s14391_s1 + $0xe0] sm:$0xff] }
 0x6ab   :  { %4816 = vmatmul.f32.vlgmr.msrb.gmra.mxu2 %v12394_v15  ;;  %14971 = vst [vmem:[#allocation57_spill] sm:$0xff] %v12410_v61  ;;  %4999 = vmatmul.f32.vlgmr.msrb.gmra.mxu0 %v12363_v23  ;;  %v12422_v52 = vand.u32 4294901760, %v12410_v61  ;;  %v12424_v31 = vand.u32 4294901760, %v4773_v5 }
 0x6ac   :  { %5126 = vmatpush.msra.mxu2 %v14972_v46  ;;  %4919 = vmatpush.msrb.mxu3 %v4918_v53  ;;  %14974 = vst [vmem:[#allocation22_spill] sm:$0xff] %v12419_v17  ;;  %v4776_v53 = vsel %vm1300_vm0, %v8385_v30, 0 }
 0x6ad   :  { %5065 = vmatmul.f32.vlgmr.msrb.gmra.mxu1 %v12372_v42  ;;  %14975 = vst [vmem:[#allocation18_spill] sm:$0xff] %v12422_v52  ;;  %v4830_v51 = vsub.f32 %v12410_v61, %v12422_v52  ;;  %v12437_v47 = vsub.f32 %v4773_v5, %v12424_v31  ;;  %v12451_v55 = vand.u32 4294901760, %v4776_v53 }
 0x6ae   :  { %5130 = vmatpush.msra.mxu2 %v14973_v56  ;;  %4925 = vmatpush.msrb.mxu3 %v4924_v13  ;;  %14976 = vst [vmem:[#allocation43_spill] sm:$0xff] %v12424_v31  ;;  %v8388_v56 = vld [vmem:[%s14391_s1 + $0xf8] sm:$0xff] }
 0x6af   :  { %14978 = vst [vmem:[#allocation31_spill] sm:$0xff] %v12437_v47  ;;  %v4785_v30 = vsel %vm1300_vm0, %v8388_v56, 0  ;;  %v5381_v56 = vpop.xlane.xlu1 %5380 }
 0x6b0   :  { %5134 = vmatpush.msra.mxu2 %v14977_v19  ;;  %4931 = vmatpush.msrb.mxu3 %v4930_v16  ;;  %14982 = vst [vmem:[#allocation29_spill] sm:$0xff] %v12451_v55 }
 0x6b1   :  { %4933 = vmatmul.f32.vlgmr.msrb.gmra.mxu3 %v12345_v62 }
 0x6b2   :  { %5138 = vmatpush.msra.mxu2 %v4910_v11  ;;  %5193 = vmatpush.msra.mxu3 %v12234_v33  ;;  %v12446_v33 = vand.u32 4294901760, %v4830_v51  ;;  %v12449_v11 = vand.u32 4294901760, %v12437_v47 }
 0x6b3   :  { %4824 = vmatmul.f32.gmra.mxu2 %v12419_v17  ;;  %5004 = vmatmul.f32.gmra.mxu0 %v12387_v41 }
 0x6b4   :  { %5142 = vmatpush.msra.mxu2 %v14979_v37  ;;  %5195 = vmatpush.msra.mxu3 %v12229_v2  ;;  %14980 = vst [vmem:[#allocation33_spill] sm:$0xff] %v12446_v33  ;;  %v8386_v2 = vld [vmem:[%s14391_s1 + $0xe8] sm:$0xff] }
 0x6b5   :  { %5071 = vmatmul.f32.gmra.mxu1 %v12399_v28  ;;  %14981 = vst [vmem:[#allocation59_spill] sm:$0xff] %v12449_v11 }
 0x6b6   :  { %5146 = vmatpush.msra.mxu2 %v4922_v35  ;;  %5197 = vmatpush.msra.mxu3 %v12218_v32  ;;  %v4838_v32 = vsub.f32 %v12437_v47, %v12449_v11  ;;  %v12463_v35 = vsub.f32 %v4776_v53, %v12451_v55  ;;  %v12516_v53 = vand.u32 4294901760, %v4785_v30 }
 0x6b8   :  { %5150 = vmatpush.msra.mxu2 %v4928_v54  ;;  %5199 = vmatpush.msra.mxu3 %v12210_v8  ;;  %14983 = vst [vmem:[#allocation63_spill] sm:$0xff] %v12463_v35  ;;  %v4779_v8 = vsel %vm1300_vm0, %v8386_v2, 0  ;;  %v12470_v20 = vand.u32 4294901760, %v4838_v32  ;;  %v12523_v32 = vsub.f32 %v4785_v30, %v12516_v53  ;;  %v5378_v30 = vpop.xlane.xlu0 %5377 }
 0x6b9   :  { %4937 = vmatmul.f32.gmra.mxu3 %v12374_v49  ;;  %v12475_v54 = vand.u32 4294901760, %v4779_v8  ;;  %14994 = vst [vmem:[#allocation68_spill] sm:$0xff] %v12516_v53 }
 0x6ba   :  { %5201 = vmatpush.msra.mxu3 %v12269_v57  ;;  %14984 = vst [vmem:[#allocation75_spill] sm:$0xff] %v12470_v20  ;;  %v12473_v57 = vand.u32 4294901760, %v12463_v35 }
 0x6bb   :  { %4832 = vmatmul.f32.gmra.mxu2 %v12446_v33  ;;  %5009 = vmatmul.f32.gmra.mxu0 %v12410_v61  ;;  %14986 = vst [vmem:[#allocation36_spill] sm:$0xff] %v12475_v54  ;;  %v12486_v60 = vsub.f32 %v4779_v8, %v12475_v54 }
 0x6bc   :  { %5203 = vmatpush.msra.mxu3 %v12293_v43  ;;  %14985 = vst [vmem:[#allocation76_spill] sm:$0xff] %v12473_v57  ;;  %v8387_v43 = vld [vmem:[%s14391_s1 + $0xf0] sm:$0xff] }
 0x6bd   :  { %5077 = vmatmul.f32.gmra.mxu1 %v12422_v52  ;;  %14987 = vst [vmem:[#allocation64_spill] sm:$0xff] %v12486_v60  ;;  %v4782_v46 = vsel %vm1300_vm0, %v8387_v43, 0  ;;  %v12494_v13 = vand.u32 4294901760, %v12486_v60  ;;  %v12530_v43 = vand.u32 4294901760, %v12523_v32 }
 0x6be   :  { %5205 = vmatpush.msra.mxu3 %v12306_v48  ;;  %v4846_v48 = vsub.f32 %v12463_v35, %v12473_v57  ;;  %v12496_v5 = vand.u32 4294901760, %v4782_v46  ;;  %14995 = vst [vmem:[#allocation30_spill] sm:$0xff] %v12523_v32 }
 0x6bf   :  { %14989 = vst [vmem:[#allocation51_spill] sm:$0xff] %v12494_v13  ;;  %v4854_v16 = vsub.f32 %v12486_v60, %v12494_v13 }
 0x6c0   :  { %5207 = vmatpush.msra.mxu3 %v12323_v0  ;;  %v12491_v0 = vand.u32 4294901760, %v4846_v48  ;;  %14990 = vst [vmem:[#allocation52_spill] sm:$0xff] %v12496_v5  ;;  %v12506_v19 = vsub.f32 %v4782_v46, %v12496_v5  ;;  %v4870_v48 = vsub.f32 %v12523_v32, %v12530_v43 }
 0x6c1   :  { %4941 = vmatmul.f32.gmra.mxu3 %v12389_v26  ;;  %v12511_v51 = vand.u32 4294901760, %v4854_v16  ;;  %14997 = vst [vmem:[#allocation54_spill] sm:$0xff] %v12530_v43  ;;  %v5391_v16 = vmul.f32 %v5381_v56, %v14851_v50 }
 0x6c2   :  { %14988 = vst [vmem:[#allocation65_spill] sm:$0xff] %v12491_v0  ;;  %v12514_v37 = vand.u32 4294901760, %v12506_v19  ;;  %v12538_v46 = vand.u32 4294901760, %v4870_v48 }
 0x6c3   :  { %4840 = vmatmul.f32.gmra.mxu2 %v12470_v20  ;;  %5014 = vmatmul.f32.gmra.mxu0 %v12437_v47  ;;  %14991 = vst [vmem:[#allocation50_spill] sm:$0xff] %v12506_v19  ;;  %v12549_v48 = vand.u32 4294901760, %v5391_v16 }
 0x6c4   :  { %14992 = vst [vmem:[#allocation40_spill] sm:$0xff] %v12511_v51  ;;  %v4862_v2 = vsub.f32 %v12506_v19, %v12514_v37 }
 0x6c5   :  { %5083 = vmatmul.f32.gmra.mxu1 %v12449_v11  ;;  %14993 = vst [vmem:[#allocation41_spill] sm:$0xff] %v12514_v37  ;;  %v12555_v58 = vsub.f32 %v5391_v16, %v12549_v48 }
 0x6c6   :  { %v12527_v8 = vand.u32 4294901760, %v4862_v2  ;;  %14998 = vst [vmem:[#allocation55_spill] sm:$0xff] %v12538_v46  ;;  %v5390_v2 = vmul.f32 %v5378_v30, %v14851_v50 }
 0x6c7   :  { %v14526_v21 = vand.u32 4294901760, %v12555_v58 }
 0x6c8   :  { %14996 = vst [vmem:[#allocation35_spill] sm:$0xff] %v12527_v8  ;;  %v12552_v10 = vand.u32 4294901760, %v5390_v2 }
 0x6c9   :  { %4945 = vmatmul.f32.gmra.mxu3 %v12424_v31 }
 0x6ca   :  { %v12561_v38 = vsub.f32 %v5390_v2, %v12552_v10 }
 0x6cb   :  { %4848 = vmatmul.f32.gmra.mxu2 %v12491_v0  ;;  %5019 = vmatmul.f32.gmra.mxu0 %v12463_v35 }
 0x6cd   :  { %5089 = vmatmul.f32.gmra.mxu1 %v12473_v57 }
 0x6d1   :  { %4949 = vmatmul.f32.gmra.mxu3 %v12451_v55 }
 0x6d3   :  { %4856 = vmatmul.f32.gmra.mxu2 %v12511_v51  ;;  %5024 = vmatmul.f32.gmra.mxu0 %v12486_v60 }
 0x6d5   :  { %5095 = vmatmul.f32.gmra.mxu1 %v12494_v13 }
 0x6d9   :  { %4953 = vmatmul.f32.gmra.mxu3 %v12475_v54 }
 0x6db   :  { %4864 = vmatmul.f32.gmra.mxu2 %v12527_v8  ;;  %5029 = vmatmul.f32.gmra.mxu0 %v12506_v19 }
 0x6dd   :  { %5101 = vmatmul.f32.gmra.mxu1 %v12514_v37 }
 0x6e1   :  { %4957 = vmatmul.f32.gmra.mxu3 %v12496_v5  ;;  %v5372_v29 = vpop.xlane.xlu1 %5371 }
 0x6e2   :  { %v5388_v45 = vmul.f32 %v5372_v29, %v14851_v50 }
 0x6e3   :  { %4872 = vmatmul.f32.gmra.mxu2 %v12538_v46  ;;  %5034 = vmatmul.f32.gmra.mxu0 %v12523_v32 }
 0x6e4   :  { %v12567_v12 = vand.u32 4294901760, %v5388_v45 }
 0x6e5   :  { %5107 = vmatmul.f32.gmra.mxu1 %v12530_v43 }
 0x6e6   :  { %v12583_v39 = vsub.f32 %v5388_v45, %v12567_v12 }
 0x6e8   :  { %v14533_v59 = vand.u32 4294901760, %v12583_v39 }
 0x6e9   :  { %4961 = vmatmul.f32.gmra.mxu3 %v12516_v53 }
 0x6eb   :  { %5152 = vmatmul.f32.vlgmr.msra.gmra.mxu2 %v12345_v62 }
 0x6f1   :  { %5209 = vmatmul.f32.vlgmr.msra.gmra.mxu3 %v12345_v62 }
 0x6f3   :  { %5156 = vmatmul.f32.gmra.mxu2 %v12374_v49 }
 0x6f7   :  { %v5384_v34 = vpop.xlane.xlu2 %5383 }
 0x6f8   :  { %v5392_v56 = vmul.f32 %v5384_v34, %v14851_v50 }
 0x6f9   :  { %5213 = vmatmul.f32.gmra.mxu3 %v12374_v49 }
 0x6fa   :  { %v12563_v30 = vand.u32 4294901760, %v5392_v56 }
 0x6fb   :  { %5160 = vmatmul.f32.gmra.mxu2 %v12389_v26 }
 0x6fc   :  { %v12570_v16 = vsub.f32 %v5392_v56, %v12563_v30  ;;  %5426 = vmatpush.msra.mxu0 %v12563_v30  ;;  %5677 = vmatpush.msrb.mxu3 %v12563_v30  ;;  %v5523_v56 = vsub.f32 %v12555_v58, %v14526_v21  ;;  %v14999_v21 = vand.u32 4294901760, %v12561_v38 }
 0x6fe   :  { %v14528_v29 = vand.u32 4294901760, %v12570_v16  ;;  %5428 = vmatpush.msra.mxu0 %v12549_v48  ;;  %5605 = vmatpush.msrb.mxu2 %v12570_v16  ;;  %v5529_v63 = vsub.f32 %v12561_v38, %v14999_v21  ;;  %v5524_v6 = vand.u32 4294901760, %v5523_v56 }
 0x6ff   :  { %5679 = vmatpush.msrb.mxu3 %v12549_v48  ;;  %v5375_v2 = vpop.xlane.xlu2 %5374 }
 0x700   :  { %v5517_v36 = vsub.f32 %v12570_v16, %v14528_v29  ;;  %v5389_v3 = vmul.f32 %v5375_v2, %v14851_v50  ;;  %5430 = vmatpush.msra.mxu0 %v12552_v10  ;;  %5608 = vmatpush.msrb.mxu2 %v12555_v58  ;;  %v8365_v2 = vld [vmem:[%s14391_s1 + $0x40] sm:$0xff]  ;;  %v5530_v21 = vand.u32 4294901760, %v5529_v63 }
 0x701   :  { %5217 = vmatmul.f32.gmra.mxu3 %v12389_v26 }
 0x702   :  { %v12592_v34 = vand.u32 4294901760, %v5389_v3  ;;  %5681 = vmatpush.msrb.mxu3 %v12552_v10  ;;  %5611 = vmatpush.msrb.mxu2 %v12561_v38  ;;  %v5518_v45 = vand.u32 4294901760, %v5517_v36  ;;  %v5394_v36 = vsel %vm1300_vm0, %v8365_v2, 0  ;;  %v5541_v2 = vsub.f32 %v12583_v39, %v14533_v59 }
 0x703   :  { %5164 = vmatmul.f32.gmra.mxu2 %v12424_v31 }
 0x704   :  { %v12604_v29 = vsub.f32 %v5389_v3, %v12592_v34  ;;  %5432 = vmatpush.msra.mxu0 %v12592_v34  ;;  %5519 = vmatpush.msra.mxu1 %v5518_v45  ;;  %v5542_v59 = vand.u32 4294901760, %v5541_v2 }
 0x705   :  { %5683 = vmatpush.msrb.mxu3 %v12592_v34 }
 0x706   :  { %5434 = vmatpush.msra.mxu0 %v12567_v12  ;;  %5525 = vmatpush.msra.mxu1 %v5524_v6  ;;  %v14534_v24 = vand.u32 4294901760, %v12604_v29  ;;  %v12621_v6 = vand.u32 4294901760, %v5394_v36 }
 0x707   :  { %5614 = vmatpush.msrb.mxu2 %v12604_v29  ;;  %5685 = vmatpush.msrb.mxu3 %v12567_v12  ;;  %v5369_v3 = vpop.xlane.xlu2 %5368 }
 0x708   :  { %v5387_v45 = vmul.f32 %v5369_v3, %v14851_v50  ;;  %5531 = vmatpush.msra.mxu1 %v5530_v21  ;;  %v5535_v56 = vsub.f32 %v12604_v29, %v14534_v24  ;;  %v8366_v21 = vld [vmem:[%s14391_s1 + $0x48] sm:$0xff]  ;;  %v12636_v24 = vsub.f32 %v5394_v36, %v12621_v6 }
 0x709   :  { %5221 = vmatmul.f32.gmra.mxu3 %v12424_v31  ;;  %5617 = vmatpush.msrb.mxu2 %v12583_v39 }
 0x70a   :  { %v12625_v63 = vand.u32 4294901760, %v5387_v45  ;;  %v5536_v14 = vand.u32 4294901760, %v5535_v56  ;;  %v5397_v56 = vsel %vm1300_vm0, %v8366_v21, 0  ;;  %v14555_v43 = vand.u32 4294901760, %v12636_v24 }
 0x70b   :  { %5168 = vmatmul.f32.gmra.mxu2 %v12451_v55  ;;  %v12645_v2 = vand.u32 4294901760, %v5397_v56 }
 0x70c   :  { %v12632_v3 = vsub.f32 %v5387_v45, %v12625_v63  ;;  %5436 = vmatpush.msra.mxu0 %v12625_v63  ;;  %5537 = vmatpush.msra.mxu1 %v5536_v14 }
 0x70d   :  { %5687 = vmatpush.msrb.mxu3 %v12625_v63  ;;  %v5366_v27 = vpop.xlane.xlu0 %5365 }
 0x70e   :  { %5543 = vmatpush.msra.mxu1 %v5542_v59  ;;  %5620 = vmatpush.msrb.mxu2 %v12632_v3  ;;  %v5546_v4 = vand.u32 4294901760, %v12632_v3  ;;  %v5386_v45 = vmul.f32 %v5366_v27, %v14851_v50  ;;  %v8367_v59 = vld [vmem:[%s14391_s1 + $0x50] sm:$0xff]  ;;  %v5444_v27 = vsub.f32 %v12636_v24, %v14555_v43 }
 0x710   :  { %v5547_v14 = vsub.f32 %v12632_v3, %v5546_v4  ;;  %v12648_v36 = vand.u32 4294901760, %v5386_v45  ;;  %v12661_v3 = vsub.f32 %v5397_v56, %v12645_v2 }
 0x711   :  { %5225 = vmatmul.f32.gmra.mxu3 %v12451_v55 }
 0x712   :  { %v5548_v32 = vand.u32 4294901760, %v5547_v14  ;;  %v5551_v21 = vsub.f32 %v5386_v45, %v12648_v36  ;;  %5438 = vmatpush.msra.mxu0 %v12648_v36  ;;  %5689 = vmatpush.msrb.mxu3 %v12648_v36  ;;  %v5400_v14 = vsel %vm1300_vm0, %v8367_v59, 0  ;;  %v5445_v45 = vand.u32 4294901760, %v5444_v27 }
 0x713   :  { %5172 = vmatmul.f32.gmra.mxu2 %v12475_v54  ;;  %v14560_v46 = vand.u32 4294901760, %v12661_v3  ;;  %v12666_v57 = vand.u32 4294901760, %v5400_v14  ;;  %v15000_v59 = vand.u32 4294901760, %v12570_v16  ;;  %v8369_v16 = vld [vmem:[%s14391_s1 + $0x60] sm:$0xff] }
 0x714   :  { %5549 = vmatpush.msra.mxu1 %v5548_v32  ;;  %5623 = vmatpush.msrb.mxu2 %v5551_v21  ;;  %v5552_v19 = vand.u32 4294901760, %v5551_v21  ;;  %v8368_v32 = vld [vmem:[%s14391_s1 + $0x58] sm:$0xff] }
 0x716   :  { %v5363_v37 = vpop.xlane.xlu1 %5362  ;;  %v5553_v60 = vsub.f32 %v5551_v21, %v5552_v19  ;;  %v5403_v21 = vsel %vm1300_vm0, %v8368_v32, 0  ;;  %v15004_v32 = vand.u32 4294901760, %v12583_v39  ;;  %v8370_v39 = vld [vmem:[%s14391_s1 + $0x68] sm:$0xff] }
 0x717   :  { %v5385_v13 = vmul.f32 %v5363_v37, %v14851_v50  ;;  %v5452_v50 = vsub.f32 %v12661_v3, %v14560_v46  ;;  %v12677_v37 = vsub.f32 %v5400_v14, %v12666_v57  ;;  %v12685_v8 = vand.u32 4294901760, %v5403_v21 }
 0x718   :  { %v5554_v43 = vand.u32 4294901760, %v5553_v60  ;;  %v15002_v14 = vand.u32 4294901760, %v12561_v38 }
 0x719   :  { %v5439_v35 = vand.u32 4294901760, %v5385_v13  ;;  %5229 = vmatmul.f32.gmra.mxu3 %v12475_v54  ;;  %v5459_v54 = vand.u32 4294901760, %v12677_v37  ;;  %v12700_v38 = vsub.f32 %v5403_v21, %v12685_v8  ;;  %v8371_v21 = vld [vmem:[%s14391_s1 + $0x70] sm:$0xff] }
 0x71a   :  { %5555 = vmatpush.msra.mxu1 %v5554_v43  ;;  %v15003_v43 = vand.u32 4294901760, %v12604_v29 }
 0x71b   :  { %v5557_v56 = vsub.f32 %v5385_v13, %v5439_v35  ;;  %5440 = vmatpush.msra.mxu0 %v5439_v35  ;;  %5691 = vmatpush.msrb.mxu3 %v5439_v35  ;;  %v15001_v13 = vand.u32 4294901760, %v12555_v58  ;;  %v5460_v58 = vsub.f32 %v12677_v37, %v5459_v54  ;;  %v5467_v29 = vand.u32 4294901760, %v12700_v38 }
 0x71c   :  { %5176 = vmatmul.f32.gmra.mxu2 %v12496_v5  ;;  %5446 = vmatmul.f32.vlgmr.msra.gmra.mxu0 %v5445_v45  ;;  %v5453_v45 = vand.u32 4294901760, %v5452_v50 }
 0x71d   :  { %5752 = vmatpush.msrb.mxu0 %v15000_v59  ;;  %5626 = vmatpush.msrb.mxu2 %v5557_v56  ;;  %v5558_v60 = vand.u32 4294901760, %v5557_v56 }
 0x71f   :  { %5756 = vmatpush.msrb.mxu0 %v15001_v13  ;;  %v5559_v27 = vsub.f32 %v5557_v56, %v5558_v60  ;;  %v5406_v56 = vsel %vm1300_vm0, %v8369_v16, 0  ;;  %v8372_v16 = vld [vmem:[%s14391_s1 + $0x78] sm:$0xff] }
 0x720   :  { %v12709_v50 = vand.u32 4294901760, %v5406_v56 }
 0x721   :  { %5760 = vmatpush.msrb.mxu0 %v15002_v14  ;;  %v5560_v46 = vand.u32 4294901760, %v5559_v27  ;;  %5233 = vmatmul.f32.gmra.mxu3 %v12496_v5 }
 0x723   :  { %5764 = vmatpush.msrb.mxu0 %v15003_v43  ;;  %5561 = vmatpush.msra.mxu1 %v5560_v46  ;;  %v5461_v46 = vand.u32 4294901760, %v5460_v58 }
 0x724   :  { %5180 = vmatmul.f32.gmra.mxu2 %v12516_v53  ;;  %5454 = vmatmul.f32.gmra.mxu0 %v5453_v45 }
 0x725   :  { %5563 = vmatmul.f32.vlgmr.msra.gmra.mxu1 %v12621_v6  ;;  %5768 = vmatpush.msrb.mxu0 %v15004_v32 }
 0x726   :  { %5823 = vmatpush.msrb.mxu1 %v12563_v30 }
 0x727   :  { %5772 = vmatpush.msrb.mxu0 %v5546_v4  ;;  %v5468_v4 = vsub.f32 %v12700_v38, %v5467_v29 }
 0x728   :  { %5825 = vmatpush.msrb.mxu1 %v12549_v48  ;;  %v5474_v48 = vsub.f32 %v5406_v56, %v12709_v50  ;;  %v5415_v56 = vsel %vm1300_vm0, %v8372_v16, 0 }
 0x729   :  { %5776 = vmatpush.msrb.mxu0 %v5552_v19  ;;  %5237 = vmatmul.f32.gmra.mxu3 %v12516_v53  ;;  %v5409_v19 = vsel %vm1300_vm0, %v8370_v39, 0  ;;  %v5469_v30 = vand.u32 4294901760, %v5468_v4  ;;  %v12757_v4 = vand.u32 4294901760, %v5415_v56 }
 0x72a   :  { %5827 = vmatpush.msrb.mxu1 %v12552_v10  ;;  %v5475_v59 = vand.u32 4294901760, %v5474_v48 }
 0x72b   :  { %5780 = vmatpush.msrb.mxu0 %v5558_v60  ;;  %v15005_v60 = vand.u32 4294901760, %v12636_v24 }
 0x72c   :  { %5829 = vmatpush.msrb.mxu1 %v12592_v34  ;;  %5462 = vmatmul.f32.gmra.mxu0 %v5461_v46  ;;  %v12726_v34 = vand.u32 4294901760, %v5409_v19  ;;  %v5476_v13 = vsub.f32 %v5474_v48, %v5475_v59 }
 0x72d   :  { %5567 = vmatmul.f32.gmra.mxu1 %v12645_v2  ;;  %5629 = vmatmul.f32.vlgmr.msrb.gmra.mxu2 %v12636_v24  ;;  %v5412_v24 = vsel %vm1300_vm0, %v8371_v21, 0 }
 0x72e   :  { %5831 = vmatpush.msrb.mxu1 %v12567_v12  ;;  %v12723_v10 = vpop.f32.mrf.mxu2  ;;  %v12742_v14 = vand.u32 4294901760, %v5412_v24 }
 0x730   :  { %5833 = vmatpush.msrb.mxu1 %v12625_v63  ;;  %v5482_v63 = vsub.f32 %v5409_v19, %v12726_v34  ;;  %v5490_v32 = vsub.f32 %v5412_v24, %v12742_v14  ;;  %v12766_v24 = vpop.f32.mrf.mxu0 }
 0x731   :  { %5695 = vmatmul.f32.vlgmr.msrb.gmra.mxu3 %v15005_v60  ;;  %v5498_v60 = vsub.f32 %v5415_v56, %v12757_v4  ;;  %15012 = vst [vmem:[#allocation46_spill] sm:$0xff] %v12766_v24 }
 0x732   :  { %5835 = vmatpush.msrb.mxu1 %v12648_v36  ;;  %v5477_v36 = vand.u32 4294901760, %v5476_v13  ;;  %v5483_v45 = vand.u32 4294901760, %v5482_v63  ;;  %v5491_v39 = vand.u32 4294901760, %v5490_v32 }
 0x733   :  { %v5499_v13 = vand.u32 4294901760, %v5498_v60 }
 0x734   :  { %5837 = vmatpush.msrb.mxu1 %v5439_v35  ;;  %5470 = vmatmul.f32.gmra.mxu0 %v5469_v30  ;;  %v12734_v12 = vpop.f32.mrf.mxu3  ;;  %v15008_v35 = vand.u32 4294901760, %v12661_v3  ;;  %v5484_v58 = vsub.f32 %v5482_v63, %v5483_v45  ;;  %v5492_v30 = vsub.f32 %v5490_v32, %v5491_v39 }
 0x735   :  { %15006 = vst [vmem:[#allocation48_spill] sm:$0xff] %v12734_v12  ;;  %5571 = vmatmul.f32.gmra.mxu1 %v12666_v57  ;;  %5634 = vmatmul.f32.gmra.mxu2 %v12661_v3 }
 0x736   :  { %v12740_v27 = vpop.f32.mrf.mxu2  ;;  %v5485_v3 = vand.u32 4294901760, %v5484_v58  ;;  %v5493_v21 = vand.u32 4294901760, %v5492_v30 }
 0x737   :  { %15007 = vst [vmem:[#allocation49_spill] sm:$0xff] %v12740_v27 }
 0x738   :  { %v12773_v16 = vpop.f32.mrf.mxu0 }
 0x739   :  { %5701 = vmatmul.f32.gmra.mxu3 %v15008_v35  ;;  %15015 = vst [vmem:[#allocation91_spill] sm:$0xff] %v12773_v16 }
 0x73c   :  { %5478 = vmatmul.f32.gmra.mxu0 %v5477_v36  ;;  %v12749_v43 = vpop.f32.mrf.mxu3 }
 0x73d   :  { %15009 = vst [vmem:[#allocation67_spill] sm:$0xff] %v12749_v43  ;;  %5575 = vmatmul.f32.gmra.mxu1 %v12685_v8  ;;  %5639 = vmatmul.f32.gmra.mxu2 %v12677_v37 }
 0x73e   :  { %v12755_v46 = vpop.f32.mrf.mxu2 }
 0x73f   :  { %15010 = vst [vmem:[#allocation39_spill] sm:$0xff] %v12755_v46 }
 0x741   :  { %5707 = vmatmul.f32.gmra.mxu3 %v5459_v54  ;;  %v5500_v54 = vsub.f32 %v5498_v60, %v5499_v13 }
 0x743   :  { %v5501_v35 = vand.u32 4294901760, %v5500_v54 }
 0x744   :  { %5486 = vmatmul.f32.gmra.mxu0 %v5485_v3  ;;  %v12761_v19 = vpop.f32.mrf.mxu3 }
 0x745   :  { %15011 = vst [vmem:[#allocation26_spill] sm:$0xff] %v12761_v19  ;;  %5579 = vmatmul.f32.gmra.mxu1 %v12709_v50  ;;  %5644 = vmatmul.f32.gmra.mxu2 %v12700_v38  ;;  %v12777_v38 = vpop.f32.mrf.mxu1 }
 0x746   :  { %v12768_v36 = vpop.f32.mrf.mxu2  ;;  %15017 = vst [vmem:[#allocation93_spill] sm:$0xff] %v12777_v38 }
 0x747   :  { %15013 = vst [vmem:[#allocation53_spill] sm:$0xff] %v12768_v36 }
 0x749   :  { %5713 = vmatmul.f32.gmra.mxu3 %v5467_v29 }
 0x74c   :  { %5494 = vmatmul.f32.gmra.mxu0 %v5493_v21  ;;  %v12770_v37 = vpop.f32.mrf.mxu3 }
 0x74d   :  { %15014 = vst [vmem:[#allocation90_spill] sm:$0xff] %v12770_v37  ;;  %5583 = vmatmul.f32.gmra.mxu1 %v12726_v34  ;;  %5649 = vmatmul.f32.gmra.mxu2 %v5474_v48  ;;  %v12784_v48 = vpop.f32.mrf.mxu0  ;;  %v12788_v56 = vpop.f32.mrf.mxu1 }
 0x74e   :  { %v12775_v58 = vpop.f32.mrf.mxu2  ;;  %15019 = vst [vmem:[#allocation95_spill] sm:$0xff] %v12784_v48 }
 0x74f   :  { %15016 = vst [vmem:[#allocation92_spill] sm:$0xff] %v12775_v58 }
 0x750   :  { %15021 = vst [vmem:[#allocation97_spill] sm:$0xff] %v12788_v56 }
 0x751   :  { %5719 = vmatmul.f32.gmra.mxu3 %v5475_v59 }
 0x754   :  { %5502 = vmatmul.f32.gmra.mxu0 %v5501_v35  ;;  %v12780_v29 = vpop.f32.mrf.mxu3 }
 0x755   :  { %5587 = vmatmul.f32.gmra.mxu1 %v12742_v14  ;;  %5654 = vmatmul.f32.gmra.mxu2 %v5482_v63  ;;  %15018 = vst [vmem:[#allocation94_spill] sm:$0xff] %v12780_v29  ;;  %v12794_v63 = vpop.f32.mrf.mxu0  ;;  %v12798_v30 = vpop.f32.mrf.mxu1 }
 0x756   :  { %v12786_v59 = vpop.f32.mrf.mxu2  ;;  %15023 = vst [vmem:[#allocation99_spill] sm:$0xff] %v12794_v63 }
 0x757   :  { %15020 = vst [vmem:[#allocation96_spill] sm:$0xff] %v12786_v59 }
 0x758   :  { %15025 = vst [vmem:[#allocation101_spill] sm:$0xff] %v12798_v30 }
 0x759   :  { %5725 = vmatmul.f32.gmra.mxu3 %v5483_v45 }
 0x75c   :  { %5782 = vmatmul.f32.vlgmr.msrb.gmra.mxu0 %v12621_v6  ;;  %v12790_v3 = vpop.f32.mrf.mxu3 }
 0x75d   :  { %5591 = vmatmul.f32.gmra.mxu1 %v12757_v4  ;;  %5659 = vmatmul.f32.gmra.mxu2 %v5490_v32  ;;  %15022 = vst [vmem:[#allocation98_spill] sm:$0xff] %v12790_v3  ;;  %v12804_v21 = vpop.f32.mrf.mxu0 }
 0x75e   :  { %v12796_v45 = vpop.f32.mrf.mxu2  ;;  %15027 = vst [vmem:[#allocation103_spill] sm:$0xff] %v12804_v21 }
 0x75f   :  { %15024 = vst [vmem:[#allocation100_spill] sm:$0xff] %v12796_v45 }
 0x761   :  { %5731 = vmatmul.f32.gmra.mxu3 %v5491_v39 }
 0x764   :  { %5786 = vmatmul.f32.gmra.mxu0 %v12645_v2  ;;  %v12800_v32 = vpop.f32.mrf.mxu3 }
 0x765   :  { %5664 = vmatmul.f32.gmra.mxu2 %v5498_v60  ;;  %5839 = vmatmul.f32.vlgmr.msrb.gmra.mxu1 %v12621_v6  ;;  %15026 = vst [vmem:[#allocation102_spill] sm:$0xff] %v12800_v32  ;;  %v12808_v60 = vpop.f32.mrf.mxu1  ;;  %v12814_v54 = vpop.f32.mrf.mxu0 }
 0x766   :  { %v12806_v39 = vpop.f32.mrf.mxu2  ;;  %15029 = vst [vmem:[#allocation105_spill] sm:$0xff] %v12808_v60 }
 0x767   :  { %15028 = vst [vmem:[#allocation104_spill] sm:$0xff] %v12806_v39 }
 0x768   :  { %15031 = vst [vmem:[#allocation107_spill] sm:$0xff] %v12814_v54 }
 0x769   :  { %5737 = vmatmul.f32.gmra.mxu3 %v5499_v13 }
 0x76c   :  { %5790 = vmatmul.f32.gmra.mxu0 %v12666_v57  ;;  %v12810_v6 = vpop.f32.mrf.mxu3 }
 0x76d   :  { %5843 = vmatmul.f32.gmra.mxu1 %v12645_v2  ;;  %15030 = vst [vmem:[#allocation106_spill] sm:$0xff] %v12810_v6  ;;  %v12819_v35 = vpop.f32.mrf.mxu1  ;;  %v12826_v53 = vpop.f32.mrf.mxu0 }
 0x76e   :  { %v12816_v13 = vpop.f32.mrf.mxu2  ;;  %15033 = vst [vmem:[#allocation109_spill] sm:$0xff] %v12819_v35 }
 0x76f   :  { %15032 = vst [vmem:[#allocation108_spill] sm:$0xff] %v12816_v13 }
 0x770   :  { %15035 = vst [vmem:[#allocation111_spill] sm:$0xff] %v12826_v53 }
 0x774   :  { %5794 = vmatmul.f32.gmra.mxu0 %v12685_v8  ;;  %v12822_v2 = vpop.f32.mrf.mxu3 }
 0x775   :  { %5847 = vmatmul.f32.gmra.mxu1 %v12666_v57  ;;  %15034 = vst [vmem:[#allocation110_spill] sm:$0xff] %v12822_v2  ;;  %v12830_v57 = vpop.f32.mrf.mxu1  ;;  %v12836_v47 = vpop.f32.mrf.mxu0 }
 0x776   :  { %v12828_v5 = vpop.f32.mrf.mxu2  ;;  %15037 = vst [vmem:[#allocation113_spill] sm:$0xff] %v12830_v57 }
 0x777   :  { %15036 = vst [vmem:[#allocation112_spill] sm:$0xff] %v12828_v5 }
 0x778   :  { %15039 = vst [vmem:[#allocation115_spill] sm:$0xff] %v12836_v47 }
 0x77c   :  { %5798 = vmatmul.f32.gmra.mxu0 %v12709_v50  ;;  %v12832_v11 = vpop.f32.mrf.mxu3 }
 0x77d   :  { %5851 = vmatmul.f32.gmra.mxu1 %v12685_v8  ;;  %15038 = vst [vmem:[#allocation114_spill] sm:$0xff] %v12832_v11  ;;  %v12840_v55 = vpop.f32.mrf.mxu1 }
 0x77e   :  { %v12838_v8 = vpop.f32.mrf.mxu2  ;;  %15041 = vst [vmem:[#allocation117_spill] sm:$0xff] %v12840_v55 }
 0x77f   :  { %15040 = vst [vmem:[#allocation116_spill] sm:$0xff] %v12838_v8 }
 0x784   :  { %5802 = vmatmul.f32.gmra.mxu0 %v12726_v34  ;;  %v12842_v51 = vpop.f32.mrf.mxu3 }
 0x785   :  { %5855 = vmatmul.f32.gmra.mxu1 %v12709_v50  ;;  %15042 = vst [vmem:[#allocation118_spill] sm:$0xff] %v12842_v51  ;;  %v12848_v61 = vpop.f32.mrf.mxu1 }
 0x786   :  { %v12846_v52 = vpop.f32.mrf.mxu2  ;;  %15044 = vst [vmem:[#allocation120_spill] sm:$0xff] %v12848_v61 }
 0x787   :  { %15043 = vst [vmem:[#allocation119_spill] sm:$0xff] %v12846_v52 }
 0x78c   :  { %5806 = vmatmul.f32.gmra.mxu0 %v12742_v14  ;;  %v12850_v31 = vpop.f32.mrf.mxu3 }
 0x78d   :  { %5859 = vmatmul.f32.gmra.mxu1 %v12726_v34  ;;  %15045 = vst [vmem:[#allocation121_spill] sm:$0xff] %v12850_v31 }
 0x78e   :  { %v12853_v28 = vpop.f32.mrf.mxu2 }
 0x78f   :  { %15046 = vst [vmem:[#allocation122_spill] sm:$0xff] %v12853_v28 }
 0x794   :  { %5810 = vmatmul.f32.gmra.mxu0 %v12757_v4  ;;  %v12855_v41 = vpop.f32.mrf.mxu3 }
 0x795   :  { %5863 = vmatmul.f32.gmra.mxu1 %v12742_v14  ;;  %15047 = vst [vmem:[#allocation123_spill] sm:$0xff] %v12855_v41 }
 0x796   :  { %v12857_v23 = vpop.f32.mrf.mxu2 }
 0x797   :  { %15048 = vst [vmem:[#allocation124_spill] sm:$0xff] %v12857_v23 }
 0x799   :  { %v5447_v50 = vpop.f32.mrf.mxu0 }
 0x79c   :  { %v12859_v14 = vpop.f32.mrf.mxu3 }
 0x79d   :  { %5867 = vmatmul.f32.gmra.mxu1 %v12757_v4  ;;  %15049 = vst [vmem:[#allocation125_spill] sm:$0xff] %v12859_v14 }
 0x79f   :  { %v12861_v42 = vpop.f32.mrf.mxu2 }
 0x7a0   :  { %15050 = vst [vmem:[#allocation126_spill] sm:$0xff] %v12861_v42 }
 0x7a1   :  { %v5455_v34 = vpop.f32.mrf.mxu0 }
 0x7a2   :  { %v5564_v0 = vpop.f32.mrf.mxu1 }
 0x7a3   :  { %v5565_v45 = vadd.f32 %v5564_v0, %v5447_v50  ;;  %v15061_v50 = vld [vmem:[#allocation91_spill] sm:$0xff] }
 0x7a4   :  { %v12863_v17 = vpop.f32.mrf.mxu3 }
 0x7a5   :  { %15051 = vst [vmem:[#allocation127_spill] sm:$0xff] %v12863_v17 }
 0x7a7   :  { %v12865_v25 = vpop.f32.mrf.mxu2 }
 0x7a8   :  { %15052 = vst [vmem:[#allocation128_spill] sm:$0xff] %v12865_v25 }
 0x7a9   :  { %v5463_v26 = vpop.f32.mrf.mxu0 }
 0x7aa   :  { %v5568_v20 = vpop.f32.mrf.mxu1 }
 0x7ab   :  { %v5569_v56 = vadd.f32 %v5568_v20, %v5455_v34 }
 0x7ac   :  { %v12867_v22 = vpop.f32.mrf.mxu3 }
 0x7ad   :  { %15053 = vst [vmem:[#allocation129_spill] sm:$0xff] %v12867_v22 }
 0x7b0   :  { %v5630_v18 = vpop.f32.mrf.mxu2 }
 0x7b1   :  { %v5471_v49 = vpop.f32.mrf.mxu0  ;;  %v5631_v16 = vadd.f32 %v5630_v18, %v5565_v45 }
 0x7b2   :  { %v5572_v33 = vpop.f32.mrf.mxu1 }
 0x7b3   :  { %v5573_v2 = vadd.f32 %v5572_v33, %v5463_v26 }
 0x7b4   :  { %v5696_v9 = vpop.f32.mrf.mxu3 }
 0x7b8   :  { %v5635_v14 = vpop.f32.mrf.mxu2 }
 0x7b9   :  { %v5479_v62 = vpop.f32.mrf.mxu0  ;;  %v5636_v29 = vadd.f32 %v5635_v14, %v5569_v56  ;;  %v15062_v14 = vld [vmem:[#allocation108_spill] sm:$0xff] }
 0x7ba   :  { %v5576_v4 = vpop.f32.mrf.mxu1 }
 0x7bb   :  { %v5577_v58 = vadd.f32 %v5576_v4, %v5471_v49 }
 0x7bc   :  { %v5702_v52 = vpop.f32.mrf.mxu3 }
 0x7bd   :  { %v5703_v46 = vadd.f32 %v5702_v52, %v5636_v29 }
 0x7c0   :  { %v5640_v42 = vpop.f32.mrf.mxu2 }
 0x7c1   :  { %v5487_v15 = vpop.f32.mrf.mxu0  ;;  %v5641_v19 = vadd.f32 %v5640_v42, %v5573_v2  ;;  %v15059_v2 = vld [vmem:[#allocation39_spill] sm:$0xff] }
 0x7c2   :  { %v5580_v1 = vpop.f32.mrf.mxu1 }
 0x7c3   :  { %v5581_v3 = vadd.f32 %v5580_v1, %v5479_v62  ;;  %v5697_v1 = vadd.f32 %v5696_v9, %v5631_v16 }
 0x7c4   :  { %v5708_v17 = vpop.f32.mrf.mxu3 }
 0x7c8   :  { %v5645_v57 = vpop.f32.mrf.mxu2 }
 0x7c9   :  { %v5495_v44 = vpop.f32.mrf.mxu0  ;;  %v5646_v38 = vadd.f32 %v5645_v57, %v5577_v58  ;;  %v15060_v57 = vld [vmem:[#allocation26_spill] sm:$0xff] }
 0x7ca   :  { %v5584_v40 = vpop.f32.mrf.mxu1 }
 0x7cb   :  { %v5585_v48 = vadd.f32 %v5584_v40, %v5487_v15 }
 0x7cc   :  { %v5714_v55 = vpop.f32.mrf.mxu3 }
 0x7d0   :  { %v5650_v35 = vpop.f32.mrf.mxu2 }
 0x7d1   :  { %v5503_v7 = vpop.f32.mrf.mxu0  ;;  %v5651_v6 = vadd.f32 %v5650_v35, %v5581_v3 }
 0x7d2   :  { %v5588_v31 = vpop.f32.mrf.mxu1 }
 0x7d3   :  { %v5589_v59 = vadd.f32 %v5588_v31, %v5495_v44  ;;  %v5709_v44 = vadd.f32 %v5708_v17, %v5641_v19  ;;  %v5715_v31 = vadd.f32 %v5714_v55, %v5646_v38 }
 0x7d4   :  { %v5720_v61 = vpop.f32.mrf.mxu3 }
 0x7d5   :  { %v5721_v24 = vadd.f32 %v5720_v61, %v5651_v6  ;;  %v15057_v6 = vld [vmem:[#allocation67_spill] sm:$0xff] }
 0x7d8   :  { %v5655_v11 = vpop.f32.mrf.mxu2 }
 0x7d9   :  { %v5783_v41 = vpop.f32.mrf.mxu0  ;;  %v5656_v32 = vadd.f32 %v5655_v11, %v5585_v48 }
 0x7da   :  { %v5592_v23 = vpop.f32.mrf.mxu1  ;;  %v5784_v18 = vadd.f32 %v5783_v41, %v5697_v1 }
 0x7db   :  { %v5593_v12 = vadd.f32 %v5592_v23, %v5503_v7 }
 0x7dc   :  { %v5726_v30 = vpop.f32.mrf.mxu3 }
 0x7dd   :  { %v5727_v13 = vadd.f32 %v5726_v30, %v5656_v32  ;;  %v15054_v30 = vld [vmem:[#allocation48_spill] sm:$0xff] }
 0x7de   :  { %v4935_v32 = vadd.f32 %v15054_v30, %v12723_v10 }
 0x7e0   :  { %v5660_v5 = vpop.f32.mrf.mxu2 }
 0x7e1   :  { %v5787_v60 = vpop.f32.mrf.mxu0  ;;  %v5661_v39 = vadd.f32 %v5660_v5, %v5589_v59 }
 0x7e2   :  { %v5840_v28 = vpop.f32.mrf.mxu1  ;;  %v5788_v62 = vadd.f32 %v5787_v60, %v5703_v46  ;;  %v15056_v60 = vld [vmem:[#allocation49_spill] sm:$0xff] }
 0x7e3   :  { %v12877_v17 = vadd.f32 %v5840_v28, %v5784_v18  ;;  %v15070_v18 = vld [vmem:[#allocation96_spill] sm:$0xff] }
 0x7e4   :  { %v5732_v47 = vpop.f32.mrf.mxu3 }
 0x7e5   :  { %v5733_v40 = vadd.f32 %v5732_v47, %v5661_v39  ;;  %v5872_v28 = vsel %vm5871_vm14, %v12877_v17, -inf }
 0x7e8   :  { %v5665_v43 = vpop.f32.mrf.mxu2 }
 0x7e9   :  { %v5791_v51 = vpop.f32.mrf.mxu0  ;;  %v5666_v33 = vadd.f32 %v5665_v43, %v5593_v12 }
 0x7ea   :  { %v5844_v25 = vpop.f32.mrf.mxu1  ;;  %v5792_v42 = vadd.f32 %v5791_v51, %v5709_v44  ;;  %v15065_v44 = vld [vmem:[#allocation92_spill] sm:$0xff] }
 0x7eb   :  { %v12871_v52 = vadd.f32 %v5844_v25, %v5788_v62  ;;  %v15067_v62 = vld [vmem:[#allocation110_spill] sm:$0xff] }
 0x7ec   :  { %v5738_v26 = vpop.f32.mrf.mxu3 }
 0x7ed   :  { %v5739_v5 = vadd.f32 %v5738_v26, %v5666_v33  ;;  %v5873_v25 = vsel %vm5871_vm14, %v12871_v52, -inf  ;;  %v15068_v33 = vld [vmem:[#allocation100_spill] sm:$0xff] }
 0x7f1   :  { %v5795_v8 = vpop.f32.mrf.mxu0 }
 0x7f2   :  { %v5848_v22 = vpop.f32.mrf.mxu1  ;;  %v5796_v61 = vadd.f32 %v5795_v8, %v5715_v31  ;;  %v4943_v8 = vadd.f32 %v15060_v57, %v15059_v2  ;;  %v15066_v31 = vld [vmem:[#allocation94_spill] sm:$0xff] }
 0x7f3   :  { %v12879_v9 = vadd.f32 %v5848_v22, %v5792_v42  ;;  %v4951_v10 = vadd.f32 %v15066_v31, %v15065_v44  ;;  %v15071_v42 = vld [vmem:[#allocation98_spill] sm:$0xff]  ;;  %v15095_v31 = vld [vmem:[#allocation124_spill] sm:$0xff] }
 0x7f4   :  { %v15090_v57 = vld [vmem:[#allocation118_spill] sm:$0xff] }
 0x7f5   :  { %v5874_v22 = vsel %vm5871_vm14, %v12879_v9, -inf }
 0x7f9   :  { %v5799_v63 = vpop.f32.mrf.mxu0 }
 0x7fa   :  { %v5852_v54 = vpop.f32.mrf.mxu1  ;;  %v5800_v49 = vadd.f32 %v5799_v63, %v5721_v24 }
 0x7fb   :  { %v12881_v47 = vadd.f32 %v5852_v54, %v5796_v61  ;;  %v4939_v54 = vadd.f32 %v15057_v6, %v15056_v60  ;;  %v15088_v6 = vld [vmem:[#allocation128_spill] sm:$0xff] }
 0x7fd   :  { %v5875_v46 = vsel %vm5871_vm14, %v12881_v47, -inf  ;;  %v5006_v34 = vadd.f32 %v15061_v50, %v4939_v54  ;;  %v15091_v50 = vld [vmem:[#allocation122_spill] sm:$0xff] }
 0x801   :  { %v5803_v53 = vpop.f32.mrf.mxu0 }
 0x802   :  { %v5856_v21 = vpop.f32.mrf.mxu1  ;;  %v5804_v15 = vadd.f32 %v5803_v53, %v5727_v13  ;;  %v15058_v13 = vld [vmem:[#allocation93_spill] sm:$0xff] }
 0x803   :  { %v12873_v7 = vadd.f32 %v5856_v21, %v5800_v49  ;;  %v15055_v21 = vld [vmem:[#allocation46_spill] sm:$0xff] }
 0x804   :  { %v5001_v39 = vadd.f32 %v15055_v21, %v4935_v32  ;;  %v15069_v49 = vld [vmem:[#allocation102_spill] sm:$0xff]  ;;  %v15086_v32 = vld [vmem:[#allocation116_spill] sm:$0xff] }
 0x805   :  { %v5876_v53 = vsel %vm5871_vm14, %v12873_v7, -inf }
 0x806   :  { %v5877_v24 = vmax.f32 %v5872_v28, %v5876_v53  ;;  %v5067_v35 = vadd.f32 %v15058_v13, %v5001_v39  ;;  %v15077_v28 = vld [vmem:[#allocation112_spill] sm:$0xff]  ;;  %v15087_v39 = vld [vmem:[#allocation117_spill] sm:$0xff] }
 0x808   :  { %v5154_v4 = vadd.f32 %v15062_v14, %v5067_v35  ;;  %v15089_v35 = vld [vmem:[#allocation113_spill] sm:$0xff] }
 0x809   :  { %v5807_v36 = vpop.f32.mrf.mxu0  ;;  %v15092_v14 = vld [vmem:[#allocation105_spill] sm:$0xff] }
 0x80a   :  { %v5860_v37 = vpop.f32.mrf.mxu1  ;;  %v5808_v11 = vadd.f32 %v5807_v36, %v5733_v40  ;;  %v15063_v40 = vld [vmem:[#allocation104_spill] sm:$0xff]  ;;  %v12908_v26 = vadd.f32 %v15067_v62, %v5154_v4  ;;  %v15096_v62 = vld [vmem:[#allocation123_spill] sm:$0xff] }
 0x80b   :  { %v12869_v20 = vadd.f32 %v5860_v37, %v5804_v15  ;;  %v15064_v15 = vld [vmem:[#allocation106_spill] sm:$0xff] }
 0x80c   :  { %v4963_v1 = vadd.f32 %v15064_v15, %v15063_v40  ;;  %8672 = vrcp.f32 %v12908_v26  ;;  %v15093_v40 = vld [vmem:[#allocation126_spill] sm:$0xff]  ;;  %vm5246_vm1 = vweird.f32 %v12908_v26 }
 0x80d   :  { %v5878_v55 = vsel %vm5871_vm14, %v12869_v20, -inf }
 0x811   :  { %v5811_v0 = vpop.f32.mrf.mxu0 }
 0x812   :  { %v5864_v27 = vpop.f32.mrf.mxu1  ;;  %v5812_v41 = vadd.f32 %v5811_v0, %v5739_v5  ;;  %v4955_v0 = vadd.f32 %v15071_v42, %v15070_v18  ;;  %v15072_v5 = vld [vmem:[#allocation97_spill] sm:$0xff]  ;;  %v12934_v13 = vpop.eup %8672  ;;  %v15098_v42 = vld [vmem:[#allocation127_spill] sm:$0xff] }
 0x813   :  { %v12875_v23 = vadd.f32 %v5864_v27, %v5808_v11  ;;  %v5879_v27 = vmax.f32 %v5873_v25, %v5878_v55  ;;  %v4959_v11 = vadd.f32 %v15069_v49, %v15068_v33  ;;  %v5073_v61 = vadd.f32 %v15072_v5, %v5006_v34  ;;  %v15073_v55 = vld [vmem:[#allocation95_spill] sm:$0xff]  ;;  %v15075_v25 = vld [vmem:[#allocation90_spill] sm:$0xff]  ;;  %v15099_v5 = vld [vmem:[#allocation125_spill] sm:$0xff] }
 0x814   :  { %v5242_v49 = vmul.f32 %v12934_v13, %v12908_v26  ;;  %vm5247_vm15 = vweird.f32 %v12934_v13 }
 0x815   :  { %v5880_v12 = vsel %vm5871_vm14, %v12875_v23, -inf  ;;  %v5884_v16 = vmax.f32 %v5877_v24, %v5879_v27  ;;  %v15079_v24 = vld [vmem:[#allocation111_spill] sm:$0xff]  ;;  %vm13007_vm2 = vmor %vm5246_vm1, %vm5247_vm15 }
 0x816   :  { %v5881_v36 = vmax.f32 %v5874_v22, %v5880_v12  ;;  %v15076_v12 = vld [vmem:[#allocation115_spill] sm:$0xff]  ;;  %v5158_v22 = vadd.f32 %v15077_v28, %v5073_v61 }
 0x817   :  { %v5036_v27 = vadd.f32 %v15076_v12, %v4963_v1  ;;  %v15094_v1 = vld [vmem:[#allocation129_spill] sm:$0xff] }
 0x81a   :  { %v5868_v51 = vpop.f32.mrf.mxu1 }
 0x81b   :  { %v12887_v43 = vadd.f32 %v5868_v51, %v5812_v41  ;;  %v5011_v41 = vadd.f32 %v15073_v55, %v4943_v8  ;;  %v15074_v51 = vld [vmem:[#allocation53_spill] sm:$0xff] }
 0x81c   :  { %v4947_v53 = vadd.f32 %v15075_v25, %v15074_v51  ;;  %v15100_v55 = vld [vmem:[#allocation121_spill] sm:$0xff]  ;;  %v5243_v25 = vsub.f32 1.0, %v5242_v49 }
 0x81d   :  { %v5882_v19 = vsel %vm5871_vm14, %v12887_v43, -inf }
 0x81e   :  { %v5883_v37 = vmax.f32 %v5875_v46, %v5882_v19  ;;  %v15078_v46 = vld [vmem:[#allocation103_spill] sm:$0xff]  ;;  %v5244_v28 = vmul.f32 %v12934_v13, %v5243_v25 }
 0x81f   :  { %v5021_v19 = vadd.f32 %v15078_v46, %v4951_v10 }
 0x820   :  { %v5885_v58 = vmax.f32 %v5881_v36, %v5883_v37  ;;  %v5031_v36 = vadd.f32 %v15079_v24, %v4959_v11  ;;  %v15080_v37 = vld [vmem:[#allocation101_spill] sm:$0xff]  ;;  %v15097_v11 = vld [vmem:[#allocation119_spill] sm:$0xff] }
 0x822   :  { %v5886_v38 = vmax.f32 %v5884_v16, %v5885_v58  ;;  %v5079_v16 = vadd.f32 %v15080_v37, %v5011_v41  ;;  %v15081_v58 = vld [vmem:[#allocation114_spill] sm:$0xff]  ;;  %v5103_v60 = vadd.f32 %v15087_v39, %v5031_v36 }
 0x824   :  { %5887 = vmax.xlane.f32.xlu2 %v5886_v38  ;;  %v12925_v38 = vadd.f32 %v15081_v58, %v5158_v22  ;;  %v5162_v21 = vadd.f32 %v15086_v32, %v5079_v16  ;;  %v5178_v15 = vadd.f32 %v15093_v40, %v5103_v60  ;;  %v5252_v16 = vand.u32 2147483648, %v12908_v26 }
 0x825   :  { %v5250_v32 = vand.u32 2147483647, %v12908_v26 }
 0x826   :  { %8674 = vrcp.f32 %v12925_v38  ;;  %v12939_v8 = vadd.f32 %v15090_v57, %v5162_v21  ;;  %v5267_v58 = vand.u32 2147483648, %v12925_v38  ;;  %v13016_v60 = vor.u32 1.1754944e-38, %v5252_v16 }
 0x827   :  { %vm5261_vm13 = vweird.f32 %v12925_v38 }
 0x828   :  { %8676 = vrcp.f32 %v12939_v8 }
 0x82c   :  { %v12965_v51 = vpop.eup %8674 }
 0x82d   :  { %vm5262_vm9 = vweird.f32 %v12965_v51 }
 0x82e   :  { %v12973_v12 = vpop.eup %8676 }
 0x82f   :  { %vm5277_vm14 = vweird.f32 %v12973_v12 }
 0x897   :  { %v5888_v29 = vpop.xlane.xlu2 %5887 }
 0x898   :  { %v5889_v48 = vrot.slane %v5888_v29, 4 }
 0x89a   :  { %v5890_v59 = vmax.f32 %v5888_v29, %v5889_v48  ;;  %v15082_v29 = vld [vmem:[#allocation107_spill] sm:$0xff] }
 0x89b   :  { %v5026_v48 = vadd.f32 %v15082_v29, %v4955_v0  ;;  %v12955_v0 = vadd.f32 %v15098_v42, %v5178_v15  ;;  %v12992_v29 = vadd.f32 %v12934_v13, %v5244_v28 }
 0x89c   :  { %v5891_v56 = vrot.slane %v5890_v59, 2 }
 0x89d   :  { %v5097_v2 = vadd.f32 %v15089_v35, %v5026_v48  ;;  %v5282_v48 = vand.u32 2147483648, %v12939_v8  ;;  %v5249_v35 = vsel %vm13007_vm2, %v12934_v13, %v12992_v29  ;;  %vm5336_vm6 = vweird.f32 %v12955_v0 }
 0x89e   :  { %v5892_v3 = vmax.f32 %v5890_v59, %v5891_v56  ;;  %v15083_v59 = vld [vmem:[#allocation99_spill] sm:$0xff] }
 0x89f   :  { %v5016_v56 = vadd.f32 %v15083_v59, %v4947_v53  ;;  %v5174_v10 = vadd.f32 %v15095_v31, %v5097_v2  ;;  %v5257_v53 = vmul.f32 %v12965_v51, %v12925_v38  ;;  %v5280_v2 = vand.u32 2147483647, %v12939_v8 }
 0x8a0   :  { %v5893_v63 = vrot.slane %v5892_v3, 1  ;;  %v13026_v57 = vor.u32 1.1754944e-38, %v5282_v48 }
 0x8a1   :  { %v5085_v4 = vadd.f32 %v15092_v14, %v5016_v56  ;;  %v12959_v61 = vadd.f32 %v15099_v5, %v5174_v10 }
 0x8a2   :  { %v5894_v45 = vmax.f32 %v5892_v3, %v5893_v63  ;;  %v15084_v3 = vld [vmem:[#allocation120_spill] sm:$0xff] }
 0x8a3   :  { %v5109_v63 = vadd.f32 %v15084_v3, %v5036_v27  ;;  %v5166_v18 = vadd.f32 %v15097_v11, %v5085_v4  ;;  %v5325_v11 = vand.u32 2147483647, %v12959_v61  ;;  %vm5321_vm5 = vweird.f32 %v12959_v61 }
 0x8a4   :  { %8463 = vpush %v5894_v45  ;;  %v15085_v45 = vld [vmem:[#allocation109_spill] sm:$0xff] }
 0x8a5   :  { %v5091_v30 = vadd.f32 %v15085_v45, %v5021_v19  ;;  %v5182_v54 = vadd.f32 %v15088_v6, %v5109_v63  ;;  %v12962_v41 = vadd.f32 %v15100_v55, %v5166_v18  ;;  %v5258_v19 = vsub.f32 1.0, %v5257_v53 }
 0x8a6   :  { %v13003_v63 = vmul.f32 %v12973_v12, %v12939_v8  ;;  %v5265_v6 = vand.u32 2147483647, %v12925_v38  ;;  %v5327_v18 = vand.u32 2147483648, %v12959_v61  ;;  %v15121_v38 = vld [vmem:[#allocation21_spill] sm:$0xff] }
 0x8a7   :  { %v5170_v34 = vadd.f32 %v15091_v50, %v5091_v30  ;;  %v12945_v44 = vadd.f32 %v15094_v1, %v5182_v54  ;;  %v5259_v3 = vmul.f32 %v12965_v51, %v5258_v19  ;;  %v13019_v54 = vor.u32 1.1754944e-38, %v5267_v58 }
 0x8a8   :  { %v5273_v14 = vsub.f32 1.0, %v13003_v63  ;;  %v5295_v4 = vand.u32 2147483647, %v12962_v41  ;;  %vm5291_vm15 = vweird.f32 %v12962_v41  ;;  %v15111_v63 = vld [vmem:[#allocation44_spill] sm:$0xff] }
 0x8a9   :  { %v12949_v33 = vadd.f32 %v15096_v62, %v5170_v34  ;;  %8678 = vrcp.f32 %v12945_v44  ;;  %v13031_v15 = vadd.f32 %v12965_v51, %v5259_v3  ;;  %v5357_v16 = vand.u32 2147483648, %v12945_v44 }
 0x8aa   :  { %vm5351_vm11 = vweird.f32 %v12945_v44 }
 0x8ab   :  { %8680 = vrcp.f32 %v12949_v33  ;;  %v5310_v31 = vand.u32 2147483647, %v12949_v33  ;;  %v5312_v49 = vand.u32 2147483648, %v12949_v33  ;;  %vm5306_vm7 = vweird.f32 %v12949_v33 }
 0x8ac   :  { %8682 = vrcp.f32 %v12955_v0 }
 0x8ad   :  { %8684 = vrcp.f32 %v12959_v61 }
 0x8ae   :  { %8686 = vrcp.f32 %v12962_v41 }
 0x8af   :  { %v12975_v27 = vpop.eup %8678 }
 0x8b0   :  { %v5347_v36 = vmul.f32 %v12975_v27, %v12945_v44  ;;  %vm5352_vm8 = vweird.f32 %v12975_v27 }
 0x8b1   :  { %v12978_v22 = vpop.eup %8680  ;;  %vm13071_vm10 = vmor %vm5351_vm11, %vm5352_vm8  ;;  %vm5276_vm11 = vweird.f32 %v12939_v8 }
 0x8b2   :  { %v12980_v46 = vpop.eup %8682  ;;  %v5302_v59 = vmul.f32 %v12978_v22, %v12949_v33  ;;  %v5348_v39 = vsub.f32 1.0, %v5347_v36  ;;  %vm5307_vm3 = vweird.f32 %v12978_v22 }
 0x8b3   :  { %v12982_v24 = vpop.eup %8684  ;;  %v5332_v56 = vmul.f32 %v12980_v46, %v12955_v0  ;;  %vm5337_vm12 = vweird.f32 %v12980_v46 }
 0x8b4   :  { %v12986_v37 = vpop.eup %8686  ;;  %v5317_v45 = vmul.f32 %v12982_v24, %v12959_v61  ;;  %v5303_v50 = vsub.f32 1.0, %v5302_v59  ;;  %v5349_v10 = vmul.f32 %v12975_v27, %v5348_v39  ;;  %vm5322_vm4 = vweird.f32 %v12982_v24  ;;  %vm13088_vm1 = vmor %vm5336_vm6, %vm5337_vm12 }
 0x8b5   :  { %v13014_v21 = vmul.f32 %v12986_v37, %v12962_v41  ;;  %v5333_v34 = vsub.f32 1.0, %v5332_v56  ;;  %v5342_v56 = vand.u32 2147483648, %v12955_v0  ;;  %vm13104_vm6 = vmor %vm5321_vm5, %vm5322_vm4  ;;  %vm5326_vm4 = vcmp.eq.f32.partialorder %v5325_v11, 8.507059e+37 }
 0x8b6   :  { %v5318_v40 = vsub.f32 1.0, %v5317_v45  ;;  %v5304_v5 = vmul.f32 %v12978_v22, %v5303_v50  ;;  %v5350_v19 = vadd.f32 %v12975_v27, %v5349_v10  ;;  %vm13118_vm5 = vmor %vm5306_vm7, %vm5307_vm3  ;;  %vm5292_vm3 = vweird.f32 %v12986_v37 }
 0x8b7   :  { %v5288_v1 = vsub.f32 1.0, %v13014_v21  ;;  %v5334_v55 = vmul.f32 %v12980_v46, %v5333_v34  ;;  %v5358_v34 = vor.u32 1.1754944e-38, %v5357_v16  ;;  %vm13138_vm7 = vcmp.eq.f32.partialorder %v5280_v2, 8.507059e+37 }
 0x8b8   :  { %v5319_v28 = vmul.f32 %v12982_v24, %v5318_v40 }
 0x8b9   :  { %v5335_v59 = vadd.f32 %v12980_v46, %v5334_v55 }
 0x8ba   :  { %v5320_v21 = vadd.f32 %v12982_v24, %v5319_v28 }
 0x8bb   :  { %v5339_v10 = vsel %vm13088_vm1, %v12980_v46, %v5335_v59  ;;  %vm13154_vm1 = vmor %vm5261_vm13, %vm5262_vm9  ;;  %vm13203_vm13 = vcmp.eq.f32.partialorder %v5250_v32, 8.507059e+37  ;;  %v15126_v32 = vld [vmem:[#allocation24_spill] sm:$0xff] }
 0x8bc   :  { %v5324_v46 = vsel %vm13104_vm6, %v12982_v24, %v5320_v21  ;;  %vm13177_vm9 = vmor %vm5291_vm15, %vm5292_vm3 }
 0x8bd   :  { %vm13213_vm15 = vmor %vm5276_vm11, %vm5277_vm14  ;;  %vm5296_vm14 = vcmp.eq.f32.partialorder %v5295_v4, 8.507059e+37 }
 0x8d5   :  { %s8464_s29 = spop %8463 }
 0x8d6   :  { %v13036_v62 = vstv %s8464_s29 }
 0x8d7   :  { %v5900_v42 = vsub.f32 %v12881_v47, %v13036_v62  ;;  %v5901_v25 = vsub.f32 %v12873_v7, %v13036_v62  ;;  %v5902_v53 = vsub.f32 %v12869_v20, %v13036_v62  ;;  %v5903_v47 = vsub.f32 %v12875_v23, %v13036_v62 }
 0x8d8   :  { %v5904_v7 = vsub.f32 %v12887_v43, %v13036_v62  ;;  %v5355_v20 = vand.u32 2147483647, %v12945_v44  ;;  %v5899_v23 = vsub.f32 %v12879_v9, %v13036_v62  ;;  %v5340_v43 = vand.u32 2147483647, %v12955_v0 }
 0x8d9   :  { %v5911_v36 = vmul.f32 1.442695, %v5900_v42  ;;  %v5913_v58 = vmul.f32 1.442695, %v5901_v25  ;;  %v5915_v48 = vmul.f32 1.442695, %v5902_v53  ;;  %v5354_v9 = vsel %vm13071_vm10, %v12975_v27, %v5350_v19 }
 0x8da   :  { %v5917_v45 = vmul.f32 1.442695, %v5903_v47  ;;  %v5898_v44 = vsub.f32 %v12871_v52, %v13036_v62  ;;  %v5919_v39 = vmul.f32 1.442695, %v5904_v7  ;;  %vm5356_vm8 = vcmp.eq.f32.partialorder %v5355_v20, 8.507059e+37  ;;  %v15114_v20 = vld [vmem:[#allocation11_spill] sm:$0xff] }
 0x8db   :  { %8688 = vpow2.f32 %v5911_v36  ;;  %v5305_v27 = vadd.f32 %v12978_v22, %v5304_v5  ;;  %v5897_v52 = vsub.f32 %v12877_v17, %v13036_v62  ;;  %v5909_v40 = vmul.f32 1.442695, %v5899_v23 }
 0x8dc   :  { %8690 = vpow2.f32 %v5913_v58  ;;  %v5289_v0 = vmul.f32 %v12986_v37, %v5288_v1  ;;  %v5343_v5 = vor.u32 1.1754944e-38, %v5342_v56  ;;  %v5359_v17 = vsel %vm5356_vm8, %v5358_v34, %v5354_v9 }
 0x8dd   :  { %8692 = vpow2.f32 %v5915_v48  ;;  %v5907_v62 = vmul.f32 1.442695, %v5898_v44  ;;  %vm5341_vm12 = vcmp.eq.f32.partialorder %v5340_v43, 8.507059e+37  ;;  %v5274_v1 = vmul.f32 %v12973_v12, %v5273_v14 }
 0x8de   :  { %8694 = vpow2.f32 %v5917_v45  ;;  %v5328_v25 = vor.u32 1.1754944e-38, %v5327_v18  ;;  %v5344_v53 = vsel %vm5341_vm12, %v5343_v5, %v5339_v10  ;;  %v5905_v24 = vmul.f32 1.442695, %v5897_v52 }
 0x8df   :  { %8696 = vpow2.f32 %v5919_v39  ;;  %v5360_v47 = vmul.f32 %v15111_v63, %v5359_v17  ;;  %v5309_v14 = vsel %vm13118_vm5, %v12978_v22, %v5305_v27  ;;  %v5313_v18 = vor.u32 1.1754944e-38, %v5312_v49 }
 0x8e0   :  { %8698 = vpow2.f32 %v5909_v40  ;;  %v5329_v7 = vsel %vm5326_vm4, %v5328_v25, %v5324_v46  ;;  %v5290_v61 = vadd.f32 %v12986_v37, %v5289_v0  ;;  %v5297_v22 = vand.u32 2147483648, %v12962_v41 }
 0x8e1   :  { %v13124_v28 = vpop.eup %8688  ;;  %8700 = vpow2.f32 %v5907_v62  ;;  %v5345_v16 = vmul.f32 %v15114_v20, %v5344_v53  ;;  %vm5311_vm10 = vcmp.eq.f32.partialorder %v5310_v31, 8.507059e+37  ;;  %v5275_v33 = vadd.f32 %v12973_v12, %v5274_v1 }
 0x8e2   :  { %v13130_v19 = vpop.eup %8690  ;;  %v5314_v48 = vsel %vm5311_vm10, %v5313_v18, %v5309_v14  ;;  %vm13167_vm8 = vcmp.eq.f32.partialorder %v5265_v6, 8.507059e+37  ;;  %8702 = vpow2.f32 %v5905_v24  ;;  %v13184_v3 = vand.u32 4294901760, %v5360_v47  ;;  %v15129_v18 = vld [vmem:[#allocation87_spill] sm:$0xff] }
 0x8e3   :  { %v13142_v36 = vpop.eup %8692  ;;  %v13162_v23 = vand.u32 4294901760, %v13130_v19  ;;  %v5330_v6 = vmul.f32 %v15121_v38, %v5329_v7  ;;  %v5294_v9 = vsel %vm13177_vm9, %v12986_v37, %v5290_v61  ;;  %v5264_v44 = vsel %vm13154_vm1, %v12965_v51, %v13031_v15 }
 0x8e4   :  { %v13148_v49 = vpop.eup %8694  ;;  %v13159_v58 = vand.u32 4294901760, %v13142_v36  ;;  %v13222_v26 = vand.u32 4294901760, %v13124_v28  ;;  %v13224_v51 = vand.u32 4294901760, %v5345_v16  ;;  %v5315_v15 = vmul.f32 %v15126_v32, %v5314_v48  ;;  %v15130_v48 = vld [vmem:[#allocation89_spill] sm:$0xff] }
 0x8e5   :  { %v13171_v59 = vpop.eup %8696  ;;  %v13182_v56 = vand.u32 4294901760, %v13148_v49  ;;  %v5298_v27 = vor.u32 1.1754944e-38, %v5297_v22  ;;  %v13235_v52 = vsub.f32 %v13130_v19, %v13162_v23  ;;  %v5279_v40 = vsel %vm13213_vm15, %v12973_v12, %v5275_v33 }
 0x8e6   :  { %v13188_v45 = vand.u32 4294901760, %v13171_v59  ;;  %v13192_v21 = vsub.f32 %v13142_v36, %v13159_v58  ;;  %v13207_v50 = vpop.eup %8698  ;;  %v13244_v42 = vsub.f32 %v5360_v47, %v13184_v3  ;;  %v13246_v5 = vand.u32 4294901760, %v5330_v6 }
 0x8e7   :  { %v13219_v37 = vsub.f32 %v13148_v49, %v13182_v56  ;;  %v13240_v10 = vpop.eup %8700  ;;  %v13254_v12 = vand.u32 4294901760, %v13207_v50  ;;  %v5299_v46 = vsel %vm5296_vm14, %v5298_v27, %v5294_v9  ;;  %v13262_v41 = vsub.f32 %v13124_v28, %v13222_v26  ;;  %v15132_v27 = vld [vmem:[#allocation86_spill] sm:$0xff] }
 0x8e8   :  { %5930 = vmatpush.msra.mxu2 %v13188_v45  ;;  %6181 = vmatpush.msra.mxu1 %v13188_v45  ;;  %v13231_v8 = vsub.f32 %v13171_v59, %v13188_v45  ;;  %15127 = vst [vmem:[#allocation48_spill] sm:$0xff] %v13240_v10  ;;  %v6032_v62 = vand.u32 4294901760, %v13192_v21  ;;  %v13257_v1 = vpop.eup %8702  ;;  %v13265_v4 = vsub.f32 %v5345_v16, %v13224_v51  ;;  %v13267_v55 = vand.u32 4294901760, %v5315_v15 }
 0x8e9   :  { %v6026_v0 = vand.u32 4294901760, %v13219_v37  ;;  %15128 = vst [vmem:[#allocation46_spill] sm:$0xff] %v13257_v1  ;;  %v5284_v25 = vsel %vm13138_vm7, %v13026_v57, %v5279_v40  ;;  %v13281_v63 = vand.u32 4294901760, %v13240_v10  ;;  %v6038_v47 = vand.u32 4294901760, %v13235_v52 }
 0x8ea   :  { %5932 = vmatpush.msra.mxu2 %v13182_v56  ;;  %6109 = vmatpush.msra.mxu0 %v13231_v8  ;;  %v6020_v17 = vand.u32 4294901760, %v13231_v8  ;;  %v6618_v57 = vand.u32 4294901760, %v13244_v42  ;;  %v13287_v14 = vsub.f32 %v5330_v6, %v13246_v5  ;;  %v5300_v7 = vmul.f32 %v15129_v18, %v5299_v46 }
 0x8eb   :  { %6183 = vmatpush.msra.mxu1 %v13182_v56  ;;  %v6027_v24 = vsub.f32 %v13219_v37, %v6026_v0  ;;  %v5269_v61 = vsel %vm13167_vm8, %v13019_v54, %v5264_v44  ;;  %v6033_v22 = vsub.f32 %v13192_v21, %v6032_v62  ;;  %v13300_v20 = vsub.f32 %v13207_v50, %v13254_v12 }
 0x8ec   :  { %5934 = vmatpush.msra.mxu2 %v13159_v58  ;;  %6112 = vmatpush.msra.mxu0 %v13219_v37  ;;  %v6021_v53 = vsub.f32 %v13231_v8, %v6020_v17  ;;  %v13303_v16 = vand.u32 4294901760, %v13257_v1  ;;  %v6044_v54 = vand.u32 4294901760, %v13262_v41  ;;  %v13308_v2 = vsub.f32 %v5315_v15, %v13267_v55 }
 0x8ed   :  { %6185 = vmatpush.msra.mxu1 %v13159_v58  ;;  %v5285_v33 = vmul.f32 %v15130_v48, %v5284_v25  ;;  %v5254_v31 = vsel %vm13203_vm13, %v13016_v60, %v5249_v35  ;;  %v6028_v43 = vand.u32 4294901760, %v6027_v24  ;;  %v6039_v38 = vsub.f32 %v13235_v52, %v6038_v47  ;;  %v15131_v60 = vld [vmem:[#allocation71_spill] sm:$0xff] }
 0x8ee   :  { %5936 = vmatpush.msra.mxu2 %v13162_v23  ;;  %6115 = vmatpush.msra.mxu0 %v13192_v21  ;;  %v6022_v11 = vand.u32 4294901760, %v6021_v53  ;;  %v13325_v6 = vsub.f32 %v13240_v10, %v13281_v63  ;;  %v6624_v30 = vand.u32 4294901760, %v13265_v4  ;;  %v6630_v13 = vand.u32 4294901760, %v13287_v14 }
 0x8ef   :  { %6187 = vmatpush.msra.mxu1 %v13162_v23  ;;  %v13331_v29 = vand.u32 4294901760, %v5300_v7  ;;  %v5270_v35 = vmul.f32 %v15131_v60, %v5269_v61  ;;  %v6034_v9 = vand.u32 4294901760, %v6033_v22  ;;  %v6619_v44 = vsub.f32 %v13244_v42, %v6618_v57  ;;  %v15133_v60 = vld [vmem:[#allocation20_spill] sm:$0xff] }
 0x8f0   :  { %5938 = vmatpush.msra.mxu2 %v13222_v26  ;;  %6023 = vmatpush.msra.mxu3 %v6022_v11  ;;  %v13340_v39 = vsub.f32 %v13257_v1, %v13303_v16  ;;  %v6050_v34 = vand.u32 4294901760, %v13300_v20  ;;  %v6045_v32 = vsub.f32 %v13262_v41, %v6044_v54  ;;  %v13348_v15 = vand.u32 4294901760, %v5285_v33 }
 0x8f1   :  { %6118 = vmatpush.msra.mxu0 %v13235_v52  ;;  %6189 = vmatpush.msra.mxu1 %v13222_v26  ;;  %v5255_v40 = vmul.f32 %v15132_v27, %v5254_v31  ;;  %v6040_v46 = vand.u32 4294901760, %v6039_v38  ;;  %v6625_v25 = vsub.f32 %v13265_v4, %v6624_v30  ;;  %v6056_v53 = vand.u32 4294901760, %v13325_v6 }
 0x8f2   :  { %5940 = vmatpush.msra.mxu2 %v13254_v12  ;;  %6029 = vmatpush.msra.mxu3 %v6028_v43  ;;  %v6636_v24 = vand.u32 4294901760, %v13308_v2  ;;  %v13360_v18 = vsub.f32 %v5300_v7, %v13331_v29  ;;  %v13362_v61 = vand.u32 4294901760, %v5270_v35  ;;  %v6620_v11 = vand.u32 4294901760, %v6619_v44 }
 0x8f3   :  { %6121 = vmatpush.msra.mxu0 %v13262_v41  ;;  %6191 = vmatpush.msra.mxu1 %v13254_v12  ;;  %v6051_v22 = vsub.f32 %v13300_v20, %v6050_v34  ;;  %v6631_v48 = vsub.f32 %v13287_v14, %v6630_v13  ;;  %v6062_v31 = vand.u32 4294901760, %v13340_v39  ;;  %v6046_v7 = vand.u32 4294901760, %v6045_v32 }
 0x8f4   :  { %5942 = vmatpush.msra.mxu2 %v13281_v63  ;;  %6035 = vmatpush.msra.mxu3 %v6034_v9  ;;  %v13375_v43 = vsub.f32 %v5285_v33, %v13348_v15  ;;  %v13377_v38 = vand.u32 4294901760, %v5255_v40  ;;  %v6626_v9 = vand.u32 4294901760, %v6625_v25  ;;  %v6057_v44 = vsub.f32 %v13325_v6, %v6056_v53 }
 0x8f5   :  { %6124 = vmatpush.msra.mxu0 %v13300_v20  ;;  %6193 = vmatpush.msra.mxu1 %v13281_v63  ;;  %v6637_v27 = vsub.f32 %v13308_v2, %v6636_v24  ;;  %v6642_v33 = vand.u32 4294901760, %v13360_v18  ;;  %v13390_v32 = vsub.f32 %v5270_v35, %v13362_v61  ;;  %v6632_v25 = vand.u32 4294901760, %v6631_v48  ;;  %v15137_v20 = vld [vmem:[#allocation33_spill] sm:$0xff] }
 0x8f6   :  { %5944 = vmatpush.msra.mxu2 %v13303_v16  ;;  %6041 = vmatpush.msra.mxu3 %v6040_v46  ;;  %v6052_v46 = vand.u32 4294901760, %v6051_v22  ;;  %v6648_v8 = vand.u32 4294901760, %v13375_v43  ;;  %v6058_v35 = vand.u32 4294901760, %v6057_v44  ;;  %v15135_v22 = vld [vmem:[#allocation34_spill] sm:$0xff] }
 0x8f7   :  { %6127 = vmatpush.msra.mxu0 %v13325_v6  ;;  %6195 = vmatpush.msra.mxu1 %v13303_v16  ;;  %v6643_v37 = vsub.f32 %v13360_v18, %v6642_v33  ;;  %v15154_v6 = vld [vmem:[#allocation63_spill] sm:$0xff] }
 0x8f8   :  { %5950 = vmatmul.f32.vlgmr.msra.gmra.mxu2 %v15133_v60  ;;  %6047 = vmatpush.msra.mxu3 %v6046_v7  ;;  %v6638_v7 = vand.u32 4294901760, %v6637_v27  ;;  %v6649_v21 = vsub.f32 %v13375_v43, %v6648_v8  ;;  %v15162_v27 = vld [vmem:[#allocation41_spill] sm:$0xff] }
 0x8f9   :  { %6621 = vmatpush.msrb.mxu1 %v6620_v11  ;;  %6256 = vmatpush.msrb.mxu2 %v6020_v17  ;;  %v6063_v11 = vsub.f32 %v13340_v39, %v6062_v31  ;;  %v13399_v17 = vsub.f32 %v5255_v40, %v13377_v38  ;;  %v15134_v40 = vld [vmem:[#allocation22_spill] sm:$0xff]  ;;  %v6644_v48 = vand.u32 4294901760, %v6643_v37 }
 0x8fa   :  { %6130 = vmatpush.msra.mxu0 %v13340_v39  ;;  %6053 = vmatpush.msra.mxu3 %v6052_v46  ;;  %v8375_v46 = vld [vmem:[%s14391_s1 + $0x90] sm:$0xff] }
 0x8fb   :  { %6627 = vmatpush.msrb.mxu1 %v6626_v9  ;;  %6260 = vmatpush.msrb.mxu2 %v6026_v0  ;;  %v6654_v0 = vand.u32 4294901760, %v13390_v32  ;;  %v6064_v39 = vand.u32 4294901760, %v6063_v11 }
 0x8fc   :  { %6528 = vmatpush.msrb.mxu0 %v13184_v3  ;;  %6059 = vmatpush.msra.mxu3 %v6058_v35  ;;  %v15164_v35 = vld [vmem:[#allocation54_spill] sm:$0xff] }
 0x8fd   :  { %6633 = vmatpush.msrb.mxu1 %v6632_v25  ;;  %6264 = vmatpush.msrb.mxu2 %v6032_v62  ;;  %v6660_v62 = vand.u32 4294901760, %v13399_v17  ;;  %v6655_v52 = vsub.f32 %v13390_v32, %v6654_v0  ;;  %v15163_v25 = vld [vmem:[#allocation30_spill] sm:$0xff] }
 0x8fe   :  { %6530 = vmatpush.msrb.mxu0 %v13224_v51  ;;  %6065 = vmatpush.msra.mxu3 %v6064_v39  ;;  %v8376_v39 = vld [vmem:[%s14391_s1 + $0x98] sm:$0xff] }
 0x8ff   :  { %6639 = vmatpush.msrb.mxu1 %v6638_v7  ;;  %6268 = vmatpush.msrb.mxu2 %v6038_v47  ;;  %v6650_v47 = vand.u32 4294901760, %v6649_v21  ;;  %v6661_v9 = vsub.f32 %v13399_v17, %v6660_v62 }
 0x900   :  { %6532 = vmatpush.msrb.mxu0 %v13246_v5  ;;  %5958 = vmatmul.f32.gmra.mxu2 %v15134_v40 }
 0x901   :  { %6067 = vmatmul.f32.vlgmr.msra.gmra.mxu3 %v15135_v22  ;;  %6272 = vmatpush.msrb.mxu2 %v6044_v54  ;;  %v6662_v41 = vand.u32 4294901760, %v6661_v9  ;;  %v15138_v54 = vld [vmem:[#allocation45_spill] sm:$0xff] }
 0x902   :  { %6327 = vmatpush.msrb.mxu3 %v13188_v45  ;;  %6534 = vmatpush.msrb.mxu0 %v13267_v55  ;;  %v6656_v45 = vand.u32 4294901760, %v6655_v52 }
 0x903   :  { %6645 = vmatpush.msrb.mxu1 %v6644_v48  ;;  %6276 = vmatpush.msrb.mxu2 %v6050_v34  ;;  %v15157_v34 = vld [vmem:[#allocation52_spill] sm:$0xff]  ;;  %v6505_v48 = vsel %vm1300_vm0, %v8376_v39, 0 }
 0x904   :  { %6329 = vmatpush.msrb.mxu3 %v13182_v56  ;;  %6536 = vmatpush.msrb.mxu0 %v13331_v29  ;;  %v15136_v56 = vld [vmem:[#allocation56_spill] sm:$0xff]  ;;  %v13557_v9 = vand.u32 4294901760, %v6505_v48 }
 0x905   :  { %6651 = vmatpush.msrb.mxu1 %v6650_v47  ;;  %6280 = vmatpush.msrb.mxu2 %v6056_v53 }
 0x906   :  { %6331 = vmatpush.msrb.mxu3 %v13159_v58  ;;  %6538 = vmatpush.msrb.mxu0 %v13348_v15  ;;  %v15139_v58 = vld [vmem:[#allocation14_spill] sm:$0xff] }
 0x907   :  { %6657 = vmatpush.msrb.mxu1 %v6656_v45  ;;  %6284 = vmatpush.msrb.mxu2 %v6062_v31  ;;  %v15160_v31 = vld [vmem:[#allocation68_spill] sm:$0xff]  ;;  %v8377_v45 = vld [vmem:[%s14391_s1 + $0xa0] sm:$0xff] }
 0x908   :  { %6333 = vmatpush.msrb.mxu3 %v13162_v23  ;;  %6540 = vmatpush.msrb.mxu0 %v13362_v61  ;;  %v15140_v23 = vld [vmem:[#allocation75_spill] sm:$0xff] }
 0x909   :  { %6663 = vmatpush.msrb.mxu1 %v6662_v41  ;;  %6707 = vmatpush.msra.mxu2 %v13244_v42  ;;  %v15142_v42 = vld [vmem:[#allocation47_spill] sm:$0xff] }
 0x90a   :  { %6199 = vmatmul.f32.vlgmr.msra.gmra.mxu1 %v15136_v56  ;;  %5966 = vmatmul.f32.gmra.mxu2 %v15137_v20 }
 0x90b   :  { %6925 = vmatpush.msra.mxu1 %v13184_v3  ;;  %6071 = vmatmul.f32.gmra.mxu3 %v15138_v54 }
 0x90c   :  { %6133 = vmatmul.f32.vlgmr.msra.gmra.mxu0 %v15139_v58  ;;  %6335 = vmatpush.msrb.mxu3 %v13222_v26  ;;  %v15141_v26 = vld [vmem:[#allocation25_spill] sm:$0xff] }
 0x90d   :  { %6542 = vmatpush.msrb.mxu0 %v13377_v38  ;;  %6710 = vmatpush.msra.mxu2 %v13265_v4  ;;  %v15147_v4 = vld [vmem:[#allocation18_spill] sm:$0xff] }
 0x90e   :  { %6927 = vmatpush.msra.mxu1 %v13224_v51  ;;  %6337 = vmatpush.msrb.mxu3 %v13254_v12  ;;  %v15146_v12 = vld [vmem:[#allocation57_spill] sm:$0xff] }
 0x90f   :  { %6854 = vmatpush.msra.mxu0 %v6618_v57  ;;  %6713 = vmatpush.msra.mxu2 %v13287_v14  ;;  %v15150_v57 = vld [vmem:[#allocation31_spill] sm:$0xff] }
 0x910   :  { %6929 = vmatpush.msra.mxu1 %v13246_v5  ;;  %6339 = vmatpush.msrb.mxu3 %v13281_v63  ;;  %v15149_v63 = vld [vmem:[#allocation29_spill] sm:$0xff]  ;;  %v15151_v14 = vld [vmem:[#allocation59_spill] sm:$0xff] }
 0x911   :  { %6858 = vmatpush.msra.mxu0 %v6624_v30  ;;  %6716 = vmatpush.msra.mxu2 %v13308_v2  ;;  %v15153_v2 = vld [vmem:[#allocation36_spill] sm:$0xff] }
 0x912   :  { %6931 = vmatpush.msra.mxu1 %v13267_v55  ;;  %6341 = vmatpush.msrb.mxu3 %v13303_v16  ;;  %v15152_v16 = vld [vmem:[#allocation35_spill] sm:$0xff]  ;;  %v15155_v30 = vld [vmem:[#allocation76_spill] sm:$0xff] }
 0x913   :  { %6862 = vmatpush.msra.mxu0 %v6630_v13  ;;  %6719 = vmatpush.msra.mxu2 %v13360_v18  ;;  %v15156_v13 = vld [vmem:[#allocation55_spill] sm:$0xff] }
 0x914   :  { %6779 = vmatpush.msra.mxu3 %v13184_v3  ;;  %6933 = vmatpush.msra.mxu1 %v13331_v29  ;;  %v15143_v3 = vld [vmem:[#allocation19_spill] sm:$0xff] }
 0x915   :  { %6866 = vmatpush.msra.mxu0 %v6636_v24  ;;  %5974 = vmatmul.f32.gmra.mxu2 %v15140_v23  ;;  %v15159_v24 = vld [vmem:[#allocation51_spill] sm:$0xff] }
 0x916   :  { %6075 = vmatmul.f32.gmra.mxu3 %v15141_v26  ;;  %6138 = vmatmul.f32.gmra.mxu0 %v15142_v42 }
 0x917   :  { %6722 = vmatpush.msra.mxu2 %v13375_v43  ;;  %6781 = vmatpush.msra.mxu3 %v13224_v51  ;;  %v15144_v51 = vld [vmem:[#allocation65_spill] sm:$0xff]  ;;  %v15161_v43 = vld [vmem:[#allocation50_spill] sm:$0xff] }
 0x918   :  { %6870 = vmatpush.msra.mxu0 %v6642_v33  ;;  %6935 = vmatpush.msra.mxu1 %v13348_v15 }
 0x919   :  { %6205 = vmatmul.f32.gmra.mxu1 %v15143_v3  ;;  %6725 = vmatpush.msra.mxu2 %v13390_v32 }
 0x91a   :  { %6783 = vmatpush.msra.mxu3 %v13246_v5  ;;  %6874 = vmatpush.msra.mxu0 %v6648_v8  ;;  %v15145_v5 = vld [vmem:[#allocation43_spill] sm:$0xff] }
 0x91b   :  { %6937 = vmatpush.msra.mxu1 %v13362_v61  ;;  %6728 = vmatpush.msra.mxu2 %v13399_v17  ;;  %v6502_v17 = vsel %vm1300_vm0, %v8375_v46, 0 }
 0x91c   :  { %6785 = vmatpush.msra.mxu3 %v13267_v55  ;;  %6878 = vmatpush.msra.mxu0 %v6654_v0  ;;  %v15148_v55 = vld [vmem:[#allocation40_spill] sm:$0xff]  ;;  %v13541_v0 = vand.u32 4294901760, %v6502_v17 }
 0x91d   :  { %6939 = vmatpush.msra.mxu1 %v13377_v38  ;;  %5982 = vmatmul.f32.gmra.mxu2 %v15144_v51 }
 0x91e   :  { %6787 = vmatpush.msra.mxu3 %v13331_v29  ;;  %6882 = vmatpush.msra.mxu0 %v6660_v62  ;;  %v8373_v29 = vld [vmem:[%s14391_s1 + $0x80] sm:$0xff]  ;;  %v13552_v62 = vsub.f32 %v6502_v17, %v13541_v0 }
 0x91f   :  { %6079 = vmatmul.f32.gmra.mxu3 %v15145_v5  ;;  %6143 = vmatmul.f32.gmra.mxu0 %v15146_v12  ;;  %v6496_v53 = vsel %vm1300_vm0, %v8373_v29, 0  ;;  %v13568_v29 = vsub.f32 %v6505_v48, %v13557_v9 }
 0x920   :  { %6789 = vmatpush.msra.mxu3 %v13348_v15  ;;  %v15158_v15 = vld [vmem:[#allocation64_spill] sm:$0xff]  ;;  %v13510_v18 = vand.u32 4294901760, %v6496_v53  ;;  %v14613_v47 = vand.u32 4294901760, %v13552_v62 }
 0x921   :  { %6211 = vmatmul.f32.gmra.mxu1 %v15147_v4 }
 0x922   :  { %6791 = vmatpush.msra.mxu3 %v13362_v61  ;;  %v8374_v61 = vld [vmem:[%s14391_s1 + $0x88] sm:$0xff]  ;;  %v6562_v41 = vsub.f32 %v13552_v62, %v14613_v47 }
 0x923   :  { %v6499_v44 = vsel %vm1300_vm0, %v8374_v61, 0 }
 0x924   :  { %6793 = vmatpush.msra.mxu3 %v13377_v38  ;;  %v13519_v38 = vsub.f32 %v6496_v53, %v13510_v18  ;;  %v13524_v32 = vand.u32 4294901760, %v6499_v44  ;;  %v6508_v53 = vsel %vm1300_vm0, %v8377_v45, 0  ;;  %v6563_v61 = vand.u32 4294901760, %v6562_v41  ;;  %v8379_v45 = vld [vmem:[%s14391_s1 + $0xb0] sm:$0xff] }
 0x925   :  { %5990 = vmatmul.f32.gmra.mxu2 %v15148_v55  ;;  %v13573_v46 = vand.u32 4294901760, %v6508_v53 }
 0x926   :  { %v14617_v33 = vand.u32 4294901760, %v13519_v38  ;;  %v13536_v8 = vsub.f32 %v6499_v44, %v13524_v32  ;;  %v14611_v44 = vand.u32 4294901760, %v13568_v29 }
 0x927   :  { %6083 = vmatmul.f32.gmra.mxu3 %v15149_v63  ;;  %6148 = vmatmul.f32.gmra.mxu0 %v15150_v57 }
 0x928   :  { %v6546_v11 = vsub.f32 %v13519_v38, %v14617_v33  ;;  %v14614_v37 = vand.u32 4294901760, %v13536_v8  ;;  %v6570_v17 = vsub.f32 %v13568_v29, %v14611_v44 }
 0x929   :  { %6217 = vmatmul.f32.gmra.mxu1 %v15151_v14 }
 0x92a   :  { %v6547_v7 = vand.u32 4294901760, %v6546_v11  ;;  %v6554_v21 = vsub.f32 %v13536_v8, %v14614_v37  ;;  %v8378_v11 = vld [vmem:[%s14391_s1 + $0xa8] sm:$0xff] }
 0x92b   :  { %v6511_v39 = vsel %vm1300_vm0, %v8378_v11, 0 }
 0x92c   :  { %v6555_v52 = vand.u32 4294901760, %v6554_v21  ;;  %v6571_v21 = vand.u32 4294901760, %v6570_v17 }
 0x92d   :  { %5998 = vmatmul.f32.gmra.mxu2 %v15152_v16 }
 0x92f   :  { %6087 = vmatmul.f32.gmra.mxu3 %v15153_v2  ;;  %6153 = vmatmul.f32.gmra.mxu0 %v15154_v6 }
 0x931   :  { %6223 = vmatmul.f32.gmra.mxu1 %v15155_v30 }
 0x935   :  { %6006 = vmatmul.f32.gmra.mxu2 %v15156_v13 }
 0x937   :  { %6091 = vmatmul.f32.gmra.mxu3 %v15157_v34  ;;  %6158 = vmatmul.f32.gmra.mxu0 %v15158_v15 }
 0x939   :  { %6229 = vmatmul.f32.gmra.mxu1 %v15159_v24 }
 0x93d   :  { %6286 = vmatmul.f32.vlgmr.msrb.gmra.mxu2 %v15135_v22 }
 0x93f   :  { %6095 = vmatmul.f32.gmra.mxu3 %v15160_v31  ;;  %6163 = vmatmul.f32.gmra.mxu0 %v15161_v43 }
 0x941   :  { %6235 = vmatmul.f32.gmra.mxu1 %v15162_v27 }
 0x945   :  { %6290 = vmatmul.f32.gmra.mxu2 %v15138_v54 }
 0x947   :  { %6168 = vmatmul.f32.gmra.mxu0 %v15163_v25  ;;  %6343 = vmatmul.f32.vlgmr.msrb.gmra.mxu3 %v15135_v22 }
 0x949   :  { %6241 = vmatmul.f32.gmra.mxu1 %v15164_v35 }
 0x94d   :  { %6294 = vmatmul.f32.gmra.mxu2 %v15141_v26 }
 0x94f   :  { %6347 = vmatmul.f32.gmra.mxu3 %v15138_v54  ;;  %6548 = vmatmul.f32.vlgmr.msrb.gmra.mxu0 %v6547_v7  ;;  %v13584_v7 = vsub.f32 %v6508_v53, %v13573_v46 }
 0x951   :  { %6665 = vmatmul.f32.vlgmr.msrb.gmra.mxu1 %v13510_v18  ;;  %v14612_v48 = vand.u32 4294901760, %v13584_v7  ;;  %v15169_v15 = vand.u32 4294901760, %v13584_v7 }
 0x953   :  { %v6578_v41 = vsub.f32 %v13584_v7, %v14612_v48 }
 0x955   :  { %6298 = vmatmul.f32.gmra.mxu2 %v15145_v5  ;;  %v6579_v11 = vand.u32 4294901760, %v6578_v41 }
 0x957   :  { %6351 = vmatmul.f32.gmra.mxu3 %v15141_v26  ;;  %6556 = vmatmul.f32.gmra.mxu0 %v6555_v52  ;;  %v13589_v52 = vand.u32 4294901760, %v6511_v39 }
 0x959   :  { %6669 = vmatmul.f32.gmra.mxu1 %v13524_v32  ;;  %v13600_v53 = vsub.f32 %v6511_v39, %v13589_v52 }
 0x95b   :  { %v14615_v17 = vand.u32 4294901760, %v13600_v53 }
 0x95d   :  { %6302 = vmatmul.f32.gmra.mxu2 %v15149_v63  ;;  %v6586_v39 = vsub.f32 %v13600_v53, %v14615_v17 }
 0x95f   :  { %6355 = vmatmul.f32.gmra.mxu3 %v15145_v5  ;;  %6564 = vmatmul.f32.gmra.mxu0 %v6563_v61  ;;  %v6514_v61 = vsel %vm1300_vm0, %v8379_v45, 0  ;;  %v6587_v48 = vand.u32 4294901760, %v6586_v39 }
 0x960   :  { %v13605_v44 = vand.u32 4294901760, %v6514_v61 }
 0x961   :  { %6673 = vmatmul.f32.gmra.mxu1 %v13541_v0 }
 0x962   :  { %v13616_v45 = vsub.f32 %v6514_v61, %v13605_v44 }
 0x964   :  { %v14616_v47 = vand.u32 4294901760, %v13616_v45 }
 0x965   :  { %6306 = vmatmul.f32.gmra.mxu2 %v15153_v2 }
 0x967   :  { %6359 = vmatmul.f32.gmra.mxu3 %v15149_v63  ;;  %6572 = vmatmul.f32.gmra.mxu0 %v6571_v21  ;;  %v8380_v21 = vld [vmem:[%s14391_s1 + $0xb8] sm:$0xff]  ;;  %s8948_s1 = smov [#allocation7]  }
 0x968   :  { %v6517_v41 = vsel %vm1300_vm0, %v8380_v21, 0  ;;  %s8349_s18 = sshll.u32 %s8948_s1, 4  ;;  %s8350_s18 = int_to_ptr.vmem [resolvable:$true] %s8349_s18 }
 0x969   :  { %6677 = vmatmul.f32.gmra.mxu1 %v13557_v9  ;;  %v13621_v37 = vand.u32 4294901760, %v6517_v41 }
 0x96b   :  { %v13629_v61 = vsub.f32 %v6517_v41, %v13621_v37 }
 0x96d   :  { %6310 = vmatmul.f32.gmra.mxu2 %v15157_v34  ;;  %v6601_v17 = vand.u32 4294901760, %v13629_v61 }
 0x96f   :  { %6363 = vmatmul.f32.gmra.mxu3 %v15153_v2  ;;  %6580 = vmatmul.f32.gmra.mxu0 %v6579_v11  ;;  %v6594_v11 = vsub.f32 %v13616_v45, %v14616_v47 }
 0x971   :  { %6681 = vmatmul.f32.gmra.mxu1 %v13573_v46  ;;  %v6595_v21 = vand.u32 4294901760, %v6594_v11  ;;  %v15165_v11 = vand.u32 4294901760, %v13519_v38 }
 0x975   :  { %6314 = vmatmul.f32.gmra.mxu2 %v15160_v31 }
 0x977   :  { %6367 = vmatmul.f32.gmra.mxu3 %v15157_v34  ;;  %6588 = vmatmul.f32.gmra.mxu0 %v6587_v48  ;;  %v6602_v48 = vsub.f32 %v13629_v61, %v6601_v17 }
 0x979   :  { %6685 = vmatmul.f32.gmra.mxu1 %v13589_v52  ;;  %v6603_v47 = vand.u32 4294901760, %v6602_v48  ;;  %v15166_v48 = vand.u32 4294901760, %v13536_v8 }
 0x97b   :  { %v13632_v39 = vpop.f32.mrf.mxu2 }
 0x97d   :  { %6731 = vmatmul.f32.vlgmr.msra.gmra.mxu2 %v13519_v38 }
 0x97f   :  { %6371 = vmatmul.f32.gmra.mxu3 %v15160_v31  ;;  %6596 = vmatmul.f32.gmra.mxu0 %v6595_v21  ;;  %v15168_v31 = vand.u32 4294901760, %v13568_v29 }
 0x981   :  { %6689 = vmatmul.f32.gmra.mxu1 %v13605_v44 }
 0x983   :  { %v13639_v33 = vpop.f32.mrf.mxu2 }
 0x984   :  { %v13642_v41 = vpop.f32.mrf.mxu3 }
 0x985   :  { %6736 = vmatmul.f32.gmra.mxu2 %v13536_v8 }
 0x987   :  { %6604 = vmatmul.f32.gmra.mxu0 %v6603_v47  ;;  %6797 = vmatmul.f32.vlgmr.msra.gmra.mxu3 %v15165_v11  ;;  %v13649_v21 = vpop.f32.mrf.mxu1  ;;  %v15167_v11 = vand.u32 4294901760, %v13552_v62 }
 0x989   :  { %6693 = vmatmul.f32.gmra.mxu1 %v13621_v37  ;;  %v13647_v35 = vpop.f32.mrf.mxu0 }
 0x98d   :  { %6741 = vmatmul.f32.gmra.mxu2 %v13552_v62  ;;  %v13652_v25 = vpop.f32.mrf.mxu2 }
 0x98e   :  { %v13657_v27 = vpop.f32.mrf.mxu3 }
 0x98f   :  { %6803 = vmatmul.f32.gmra.mxu3 %v15166_v48  ;;  %6884 = vmatmul.f32.vlgmr.msra.gmra.mxu0 %v13510_v18 }
 0x991   :  { %6941 = vmatmul.f32.vlgmr.msra.gmra.mxu1 %v13510_v18 }
 0x993   :  { %v13660_v38 = vpop.f32.mrf.mxu0 }
 0x995   :  { %6746 = vmatmul.f32.gmra.mxu2 %v13568_v29 }
 0x996   :  { %v13663_v47 = vpop.f32.mrf.mxu1 }
 0x997   :  { %6809 = vmatmul.f32.gmra.mxu3 %v15167_v11  ;;  %6888 = vmatmul.f32.gmra.mxu0 %v13524_v32 }
 0x998   :  { %v5975_v43 = vpop.f32.mrf.mxu2 }
 0x999   :  { %6945 = vmatmul.f32.gmra.mxu1 %v13524_v32  ;;  %v13669_v8 = vpop.f32.mrf.mxu3 }
 0x99c   :  { %v13671_v48 = vpop.f32.mrf.mxu0 }
 0x99d   :  { %6751 = vmatmul.f32.gmra.mxu2 %v13584_v7 }
 0x99e   :  { %v13674_v18 = vpop.f32.mrf.mxu1 }
 0x99f   :  { %6815 = vmatmul.f32.gmra.mxu3 %v15168_v31  ;;  %6892 = vmatmul.f32.gmra.mxu0 %v13541_v0 }
 0x9a0   :  { %v5983_v62 = vpop.f32.mrf.mxu2 }
 0x9a1   :  { %6949 = vmatmul.f32.gmra.mxu1 %v13541_v0  ;;  %v15170_v0 = vand.u32 4294901760, %v13600_v53 }
 0x9a2   :  { %v6080_v11 = vpop.f32.mrf.mxu3 }
 0x9a3   :  { %v6081_v12 = vadd.f32 %v6080_v11, %v5975_v43 }
 0x9a4   :  { %v6149_v24 = vpop.f32.mrf.mxu0 }
 0x9a5   :  { %6756 = vmatmul.f32.gmra.mxu2 %v13600_v53  ;;  %v6150_v3 = vadd.f32 %v6149_v24, %v6081_v12 }
 0x9a6   :  { %v6218_v32 = vpop.f32.mrf.mxu1 }
 0x9a7   :  { %6821 = vmatmul.f32.gmra.mxu3 %v15169_v15  ;;  %6896 = vmatmul.f32.gmra.mxu0 %v13557_v9  ;;  %v6219_v26 = vadd.f32 %v6218_v32, %v6150_v3 }
 0x9a8   :  { %v5991_v34 = vpop.f32.mrf.mxu2 }
 0x9a9   :  { %6953 = vmatmul.f32.gmra.mxu1 %v13557_v9  ;;  %v15171_v9 = vand.u32 4294901760, %v13616_v45 }
 0x9aa   :  { %v6084_v29 = vpop.f32.mrf.mxu3 }
 0x9ab   :  { %v6085_v23 = vadd.f32 %v6084_v29, %v5983_v62 }
 0x9ac   :  { %v6154_v31 = vpop.f32.mrf.mxu0 }
 0x9ad   :  { %6761 = vmatmul.f32.gmra.mxu2 %v13616_v45  ;;  %v6155_v22 = vadd.f32 %v6154_v31, %v6085_v23 }
 0x9ae   :  { %v6224_v13 = vpop.f32.mrf.mxu1 }
 0x9af   :  { %6827 = vmatmul.f32.gmra.mxu3 %v15170_v0  ;;  %6900 = vmatmul.f32.gmra.mxu0 %v13573_v46  ;;  %v6225_v43 = vadd.f32 %v6224_v13, %v6155_v22 }
 0x9b0   :  { %v5999_v30 = vpop.f32.mrf.mxu2 }
 0x9b1   :  { %6957 = vmatmul.f32.gmra.mxu1 %v13573_v46 }
 0x9b2   :  { %v6088_v7 = vpop.f32.mrf.mxu3 }
 0x9b3   :  { %v6089_v11 = vadd.f32 %v6088_v7, %v5991_v34 }
 0x9b4   :  { %v6159_v15 = vpop.f32.mrf.mxu0 }
 0x9b5   :  { %6766 = vmatmul.f32.gmra.mxu2 %v13629_v61 }
 0x9b6   :  { %v6230_v6 = vpop.f32.mrf.mxu1 }
 0x9b7   :  { %6833 = vmatmul.f32.gmra.mxu3 %v15171_v9  ;;  %6904 = vmatmul.f32.gmra.mxu0 %v13589_v52 }
 0x9b8   :  { %v13694_v2 = vpop.f32.mrf.mxu2 }
 0x9b9   :  { %6961 = vmatmul.f32.gmra.mxu1 %v13589_v52 }
 0x9ba   :  { %v6092_v53 = vpop.f32.mrf.mxu3 }
 0x9bc   :  { %v6164_v0 = vpop.f32.mrf.mxu0 }
 0x9be   :  { %v13697_v16 = vpop.f32.mrf.mxu1 }
 0x9bf   :  { %6839 = vmatmul.f32.gmra.mxu3 %v6601_v17  ;;  %6908 = vmatmul.f32.gmra.mxu0 %v13605_v44 }
 0x9c0   :  { %v13700_v46 = vpop.f32.mrf.mxu2 }
 0x9c1   :  { %6965 = vmatmul.f32.gmra.mxu1 %v13605_v44 }
 0x9c2   :  { %v13703_v61 = vpop.f32.mrf.mxu3 }
 0x9c4   :  { %v13705_v45 = vpop.f32.mrf.mxu0 }
 0x9c6   :  { %v13707_v9 = vpop.f32.mrf.mxu1 }
 0x9c7   :  { %6912 = vmatmul.f32.gmra.mxu0 %v13621_v37 }
 0x9c8   :  { %v13710_v52 = vpop.f32.mrf.mxu2 }
 0x9c9   :  { %6969 = vmatmul.f32.gmra.mxu1 %v13621_v37 }
 0x9ca   :  { %v13713_v14 = vpop.f32.mrf.mxu3 }
 0x9cc   :  { %v13715_v17 = vpop.f32.mrf.mxu0 }
 0x9ce   :  { %v13717_v57 = vpop.f32.mrf.mxu1 }
 0x9d0   :  { %v13719_v63 = vpop.f32.mrf.mxu2 }
 0x9d2   :  { %v13721_v44 = vpop.f32.mrf.mxu3 }
 0x9d4   :  { %v13723_v55 = vpop.f32.mrf.mxu0 }
 0x9d6   :  { %v13725_v4 = vpop.f32.mrf.mxu1 }
 0x9d8   :  { %v6299_v5 = vpop.f32.mrf.mxu2 }
 0x9d9   :  { %v6300_v54 = vadd.f32 %v6299_v5, %v6219_v26 }
 0x9da   :  { %v13727_v51 = vpop.f32.mrf.mxu3 }
 0x9dc   :  { %v13729_v37 = vpop.f32.mrf.mxu0 }
 0x9dd   :  { %15172 = vst [vmem:[#allocation49_spill] sm:$0xff] %v13729_v37  ;;  %v6160_v37 = vadd.f32 %v6159_v15, %v6089_v11 }
 0x9de   :  { %v13731_v42 = vpop.f32.mrf.mxu1 }
 0x9df   :  { %15173 = vst [vmem:[#allocation67_spill] sm:$0xff] %v13731_v42 }
 0x9e0   :  { %v6303_v58 = vpop.f32.mrf.mxu2 }
 0x9e1   :  { %v6304_v12 = vadd.f32 %v6303_v58, %v6225_v43 }
 0x9e2   :  { %v6356_v20 = vpop.f32.mrf.mxu3 }
 0x9e3   :  { %v6357_v40 = vadd.f32 %v6356_v20, %v6300_v54  ;;  %v6231_v20 = vadd.f32 %v6230_v6, %v6160_v37  ;;  %v6093_v54 = vadd.f32 %v6092_v53, %v5999_v30 }
 0x9e4   :  { %v13733_v56 = vpop.f32.mrf.mxu0 }
 0x9e5   :  { %8704 = vrcp.f32 %v6357_v40  ;;  %v6431_v5 = vand.u32 2147483648, %v6357_v40  ;;  %v6429_v22 = vand.u32 2147483647, %v6357_v40  ;;  %vm6425_vm2 = vweird.f32 %v6357_v40 }
 0x9e6   :  { %v13735_v60 = vpop.f32.mrf.mxu1  ;;  %v6165_v7 = vadd.f32 %v6164_v0, %v6093_v54 }
 0x9e7   :  { %v6432_v43 = vor.u32 1.1754944e-38, %v6431_v5  ;;  %vm6430_vm6 = vcmp.eq.f32.partialorder %v6429_v22, 8.507059e+37 }
 0x9e8   :  { %v6307_v10 = vpop.f32.mrf.mxu2  ;;  %v6237_v37 = vadd.f32 %v13697_v16, %v6165_v7 }
 0x9e9   :  { %v6308_v13 = vadd.f32 %v6307_v10, %v6231_v20 }
 0x9ea   :  { %v6360_v24 = vpop.f32.mrf.mxu3 }
 0x9eb   :  { %v8705_v1 = vpop.eup %8704  ;;  %v6361_v42 = vadd.f32 %v6360_v24, %v6304_v12 }
 0x9ec   :  { %v6421_v3 = vmul.f32 %v8705_v1, %v6357_v40  ;;  %v13737_v62 = vpop.f32.mrf.mxu0  ;;  %vm6426_vm0 = vweird.f32 %v8705_v1  ;;  %v6097_v40 = vadd.f32 %v13703_v61, %v13694_v2 }
 0x9ed   :  { %8706 = vrcp.f32 %v6361_v42  ;;  %vm6427_vm11 = vmor %vm6425_vm2, %vm6426_vm0  ;;  %v6446_v0 = vand.u32 2147483648, %v6361_v42  ;;  %v6444_v20 = vand.u32 2147483647, %v6361_v42  ;;  %vm6440_vm5 = vweird.f32 %v6361_v42 }
 0x9ee   :  { %v6422_v26 = vsub.f32 1.0, %v6421_v3  ;;  %v13739_v23 = vpop.f32.mrf.mxu1  ;;  %v6170_v22 = vadd.f32 %v13705_v45, %v6097_v40  ;;  %v6077_v45 = vadd.f32 %v13669_v8, %v13652_v25 }
 0x9ef   :  { %vm6445_vm3 = vcmp.eq.f32.partialorder %v6444_v20, 8.507059e+37 }
 0x9f0   :  { %v6311_v32 = vpop.f32.mrf.mxu2  ;;  %v6423_v29 = vmul.f32 %v8705_v1, %v6422_v26 }
 0x9f2   :  { %v6364_v58 = vpop.f32.mrf.mxu3  ;;  %v6424_v34 = vadd.f32 %v8705_v1, %v6423_v29 }
 0x9f3   :  { %v8707_v31 = vpop.eup %8706  ;;  %v6365_v15 = vadd.f32 %v6364_v58, %v6308_v13 }
 0x9f4   :  { %v6436_v11 = vmul.f32 %v8707_v31, %v6361_v42  ;;  %v13741_v12 = vpop.f32.mrf.mxu0  ;;  %v6428_v24 = vsel %vm6427_vm11, %v8705_v1, %v6424_v34  ;;  %vm6441_vm12 = vweird.f32 %v8707_v31  ;;  %v6312_v1 = vadd.f32 %v6311_v32, %v6237_v37 }
 0x9f5   :  { %8708 = vrcp.f32 %v6365_v15  ;;  %v6433_v6 = vsel %vm6430_vm6, %v6432_v43, %v6428_v24  ;;  %vm6442_vm4 = vmor %vm6440_vm5, %vm6441_vm12  ;;  %v6243_v42 = vadd.f32 %v13707_v9, %v6170_v22  ;;  %v6461_v43 = vand.u32 2147483648, %v6365_v15 }
 0x9f6   :  { %v6437_v30 = vsub.f32 1.0, %v6436_v11  ;;  %v13743_v53 = vpop.f32.mrf.mxu1  ;;  %v6434_v10 = vmul.f32 %v13124_v28, %v6433_v6  ;;  %v6447_v28 = vor.u32 1.1754944e-38, %v6446_v0  ;;  %vm6455_vm10 = vweird.f32 %v6365_v15 }
 0x9f7   :  { %v6145_v9 = vadd.f32 %v13671_v48, %v6077_v45 }
 0x9f8   :  { %7046 = vperm.xlu2 %8523, %v6434_v10   ;;  %v6315_v3 = vpop.f32.mrf.mxu2  ;;  %v6438_v26 = vmul.f32 %v8707_v31, %v6437_v30 }
 0x9f9   :  { %v6316_v6 = vadd.f32 %v6315_v3, %v6243_v42 }
 0x9fa   :  { %v6368_v54 = vpop.f32.mrf.mxu3  ;;  %v6439_v5 = vadd.f32 %v8707_v31, %v6438_v26 }
 0x9fb   :  { %v8709_v29 = vpop.eup %8708  ;;  %v6369_v13 = vadd.f32 %v6368_v54, %v6312_v1 }
 0x9fc   :  { %v6451_v16 = vmul.f32 %v8709_v29, %v6365_v15  ;;  %v13750_v58 = vpop.f32.mrf.mxu0  ;;  %v6443_v2 = vsel %vm6442_vm4, %v8707_v31, %v6439_v5  ;;  %vm6456_vm7 = vweird.f32 %v8709_v29  ;;  %v6459_v31 = vand.u32 2147483647, %v6365_v15 }
 0x9fd   :  { %8710 = vrcp.f32 %v6369_v13  ;;  %v6448_v61 = vsel %vm6445_vm3, %v6447_v28, %v6443_v2  ;;  %vm6457_vm1 = vmor %vm6455_vm10, %vm6456_vm7  ;;  %v6476_v54 = vand.u32 2147483648, %v6369_v13  ;;  %v6213_v15 = vadd.f32 %v13674_v18, %v6145_v9 }
 0x9fe   :  { %v6452_v34 = vsub.f32 1.0, %v6451_v16  ;;  %v13752_v7 = vpop.f32.mrf.mxu1  ;;  %v6449_v32 = vmul.f32 %v13130_v19, %v6448_v61  ;;  %v6462_v19 = vor.u32 1.1754944e-38, %v6461_v43  ;;  %vm6460_vm8 = vcmp.eq.f32.partialorder %v6459_v31, 8.507059e+37 }
 0x9ff   :  { %v6474_v48 = vand.u32 2147483647, %v6369_v13  ;;  %v6296_v28 = vadd.f32 %v13719_v63, %v6213_v15  ;;  %vm6470_vm13 = vweird.f32 %v6369_v13  ;;  %v6477_v61 = vor.u32 1.1754944e-38, %v6476_v54 }
 0xa00   :  { %7051 = vperm.xlu0 %8524, %v6449_v32   ;;  %v13758_v11 = vpop.f32.mrf.mxu2  ;;  %v6453_v24 = vmul.f32 %v8709_v29, %v6452_v34 }
 0xa01   :  { %vm6475_vm14 = vcmp.eq.f32.partialorder %v6474_v48, 8.507059e+37  ;;  %v6069_v48 = vadd.f32 %v13642_v41, %v13632_v39 }
 0xa02   :  { %v6372_v30 = vpop.f32.mrf.mxu3  ;;  %v6454_v10 = vadd.f32 %v8709_v29, %v6453_v24 }
 0xa03   :  { %v8711_v37 = vpop.eup %8710  ;;  %v6373_v40 = vadd.f32 %v6372_v30, %v6316_v6 }
 0xa04   :  { %v6466_v0 = vmul.f32 %v8711_v37, %v6369_v13  ;;  %v13761_v26 = vpop.f32.mrf.mxu0  ;;  %v6458_v25 = vsel %vm6457_vm1, %v8709_v29, %v6454_v10  ;;  %vm6471_vm9 = vweird.f32 %v8711_v37 }
 0xa05   :  { %8712 = vrcp.f32 %v6373_v40  ;;  %v6463_v8 = vsel %vm6460_vm8, %v6462_v19, %v6458_v25  ;;  %vm6472_vm15 = vmor %vm6470_vm13, %vm6471_vm9  ;;  %v6491_v24 = vand.u32 2147483648, %v6373_v40  ;;  %vm6485_vm2 = vweird.f32 %v6373_v40 }
 0xa06   :  { %v6467_v20 = vsub.f32 1.0, %v6466_v0  ;;  %v13763_v1 = vpop.f32.mrf.mxu1  ;;  %v6464_v3 = vmul.f32 %v13142_v36, %v6463_v8  ;;  %v13773_v36 = vadd.f32 %v13727_v51, %v6296_v28  ;;  %v6489_v51 = vand.u32 2147483647, %v6373_v40 }
 0xa07   :  { %v6492_v10 = vor.u32 1.1754944e-38, %v6491_v24 }
 0xa08   :  { %7056 = vperm.xlu1 %8525, %v6464_v3   ;;  %v13767_v5 = vpop.f32.mrf.mxu2  ;;  %v6468_v22 = vmul.f32 %v8711_v37, %v6467_v20  ;;  %8714 = vrcp.f32 %v13773_v36  ;;  %vm6490_vm6 = vcmp.eq.f32.partialorder %v6489_v51, 8.507059e+37  ;;  %v6416_v24 = vand.u32 2147483648, %v13773_v36 }
 0xa09   :  { %vm6410_vm5 = vweird.f32 %v13773_v36  ;;  %v6414_v39 = vand.u32 2147483647, %v13773_v36 }
 0xa0a   :  { %v13770_v29 = vpop.f32.mrf.mxu3  ;;  %v6469_v16 = vadd.f32 %v8711_v37, %v6468_v22  ;;  %v6679_v22 = vadd.f32 %v13735_v60, %v13733_v56  ;;  %v6683_v60 = vadd.f32 %v13739_v23, %v13737_v62  ;;  %v6667_v62 = vadd.f32 %v13717_v57, %v13715_v17 }
 0xa0b   :  { %v8713_v2 = vpop.eup %8712  ;;  %vm6415_vm3 = vcmp.eq.f32.partialorder %v6414_v39, 8.507059e+37 }
 0xa0c   :  { %v6481_v34 = vmul.f32 %v8713_v2, %v6373_v40  ;;  %v13775_v18 = vpop.f32.mrf.mxu0  ;;  %v6473_v32 = vsel %vm6472_vm15, %v8711_v37, %v6469_v16  ;;  %vm6486_vm0 = vweird.f32 %v8713_v2 }
 0xa0d   :  { %v6478_v42 = vsel %vm6475_vm14, %v6477_v61, %v6473_v32  ;;  %vm6487_vm11 = vmor %vm6485_vm2, %vm6486_vm0 }
 0xa0e   :  { %v6482_v43 = vsub.f32 1.0, %v6481_v34  ;;  %v13777_v45 = vpop.f32.mrf.mxu1  ;;  %v6479_v63 = vmul.f32 %v13148_v49, %v6478_v42  ;;  %v8715_v9 = vpop.eup %8714  ;;  %v6135_v34 = vadd.f32 %v13647_v35, %v6069_v48  ;;  %v6073_v35 = vadd.f32 %v13657_v27, %v13639_v33 }
 0xa0f   :  { %v6406_v20 = vmul.f32 %v8715_v9, %v13773_v36  ;;  %vm6411_vm12 = vweird.f32 %v8715_v9 }
 0xa10   :  { %7061 = vperm.xlu1 %8525, %v6479_v63   ;;  %v13781_v13 = vpop.f32.mrf.mxu2  ;;  %v6483_v31 = vmul.f32 %v8713_v2, %v6482_v43  ;;  %v6201_v41 = vadd.f32 %v13649_v21, %v6135_v34  ;;  %vm6412_vm4 = vmor %vm6410_vm5, %vm6411_vm12  ;;  %v6140_v36 = vadd.f32 %v13660_v38, %v6073_v35  ;;  %v15174_v35 = vld [vmem:[#allocation49_spill] sm:$0xff] }
 0xa11   :  { %v6407_v40 = vsub.f32 1.0, %v6406_v20 }
 0xa12   :  { %v13783_v6 = vpop.f32.mrf.mxu3  ;;  %v6484_v30 = vadd.f32 %v8713_v2, %v6483_v31  ;;  %v6207_v17 = vadd.f32 %v13663_v47, %v6140_v36  ;;  %v6691_v47 = vadd.f32 %v13752_v7, %v13750_v58 }
 0xa14   :  { %v13785_v37 = vpop.f32.mrf.mxu0  ;;  %v6488_v19 = vsel %vm6487_vm11, %v8713_v2, %v6484_v30  ;;  %v6288_v30 = vadd.f32 %v13700_v46, %v6201_v41  ;;  %v6687_v46 = vadd.f32 %v13743_v53, %v13741_v12  ;;  %v6292_v38 = vadd.f32 %v13710_v52, %v6207_v17 }
 0xa15   :  { %v6493_v49 = vsel %vm6490_vm6, %v6492_v10, %v6488_v19 }
 0xa16   :  { %v13787_v0 = vpop.f32.mrf.mxu1  ;;  %v6494_v25 = vmul.f32 %v13171_v59, %v6493_v49  ;;  %v6408_v59 = vmul.f32 %v8715_v9, %v6407_v40  ;;  %v6417_v49 = vor.u32 1.1754944e-38, %v6416_v24  ;;  %v13815_v21 = vadd.f32 %v13713_v14, %v6288_v30 }
 0xa17   :  { %v13827_v12 = vadd.f32 %v13721_v44, %v6292_v38  ;;  %v6695_v24 = vadd.f32 %v13763_v1, %v13761_v26 }
 0xa18   :  { %7066 = vperm.xlu1 %8525, %v6494_v25   ;;  %v6747_v8 = vpop.f32.mrf.mxu2  ;;  %v6409_v43 = vadd.f32 %v8715_v9, %v6408_v59  ;;  %v6733_v25 = vadd.f32 %v13758_v11, %v6667_v62  ;;  %8716 = vrcp.f32 %v13815_v21  ;;  %vm6380_vm10 = vweird.f32 %v13815_v21 }
 0xa19   :  { %v6748_v16 = vadd.f32 %v6747_v8, %v6679_v22  ;;  %8718 = vrcp.f32 %v13827_v12  ;;  %v6386_v62 = vand.u32 2147483648, %v13815_v21  ;;  %vm6395_vm13 = vweird.f32 %v13827_v12 }
 0xa1a   :  { %v13791_v3 = vpop.f32.mrf.mxu3  ;;  %v6413_v51 = vsel %vm6412_vm4, %v8715_v9, %v6409_v43  ;;  %v6799_v20 = vadd.f32 %v13770_v29, %v6733_v25 }
 0xa1b   :  { %v6418_v33 = vsel %vm6415_vm3, %v6417_v49, %v6413_v51 }
 0xa1c   :  { %v13793_v54 = vpop.f32.mrf.mxu0  ;;  %v6419_v57 = vmul.f32 %v13207_v50, %v6418_v33  ;;  %v6886_v22 = vadd.f32 %v13775_v18, %v6799_v20  ;;  %v6401_v20 = vand.u32 2147483648, %v13827_v12 }
 0xa1e   :  { %v13795_v15 = vpop.f32.mrf.mxu1  ;;  %v8717_v50 = vpop.eup %8716  ;;  %v6943_v59 = vadd.f32 %v13777_v45, %v6886_v22  ;;  %v6402_v17 = vor.u32 1.1754944e-38, %v6401_v20 }
 0xa1f   :  { %v6376_v52 = vmul.f32 %v8717_v50, %v13815_v21  ;;  %v8719_v7 = vpop.eup %8718  ;;  %vm6381_vm7 = vweird.f32 %v8717_v50 }
 0xa20   :  { %v6752_v28 = vpop.f32.mrf.mxu2  ;;  %v6391_v39 = vmul.f32 %v8719_v7, %v13827_v12  ;;  %vm6382_vm1 = vmor %vm6380_vm10, %vm6381_vm7  ;;  %vm6396_vm9 = vweird.f32 %v8719_v7 }
 0xa21   :  { %v6753_v31 = vadd.f32 %v6752_v28, %v6683_v60  ;;  %vm6397_vm15 = vmor %vm6395_vm13, %vm6396_vm9 }
 0xa22   :  { %v6816_v2 = vpop.f32.mrf.mxu3 }
 0xa23   :  { %v6817_v61 = vadd.f32 %v6816_v2, %v6748_v16 }
 0xa24   :  { %v6897_v32 = vpop.f32.mrf.mxu0 }
 0xa25   :  { %v6898_v42 = vadd.f32 %v6897_v32, %v6817_v61  ;;  %v6671_v61 = vadd.f32 %v13725_v4, %v13723_v55 }
 0xa26   :  { %v6954_v63 = vpop.f32.mrf.mxu1 }
 0xa27   :  { %v6955_v56 = vadd.f32 %v6954_v63, %v6898_v42  ;;  %v6377_v42 = vsub.f32 1.0, %v6376_v52  ;;  %v6738_v43 = vadd.f32 %v13767_v5, %v6671_v61  ;;  %v15180_v52 = vld [vmem:[#allocation69_spill] sm:$0xff] }
 0xa28   :  { %v6757_v10 = vpop.f32.mrf.mxu2 }
 0xa29   :  { %6990 = vperm.xlu1 %8525, %v6955_v56   ;;  %v6758_v14 = vadd.f32 %v6757_v10, %v6687_v46  ;;  %v6805_v60 = vadd.f32 %v13783_v6, %v6738_v43  ;;  %v6378_v4 = vmul.f32 %v8717_v50, %v6377_v42  ;;  %v15183_v42 = vld [vmem:[#allocation80_spill] sm:$0xff] }
 0xa2a   :  { %v6822_v19 = vpop.f32.mrf.mxu3 }
 0xa2b   :  { %v6823_v23 = vadd.f32 %v6822_v19, %v6753_v31  ;;  %v15175_v31 = vld [vmem:[#allocation67_spill] sm:$0xff]  ;;  %v6890_v5 = vadd.f32 %v13785_v37, %v6805_v60  ;;  %v6392_v19 = vsub.f32 1.0, %v6391_v39  ;;  %v6379_v6 = vadd.f32 %v8717_v50, %v6378_v4  ;;  %v15185_v39 = vld [vmem:[#allocation66_spill] sm:$0xff] }
 0xa2c   :  { %v6901_v27 = vpop.f32.mrf.mxu0  ;;  %v6675_v51 = vadd.f32 %v15175_v31, %v15174_v35  ;;  %v6384_v37 = vand.u32 2147483647, %v13815_v21  ;;  %v6399_v21 = vand.u32 2147483647, %v13827_v12 }
 0xa2d   :  { %v6902_v9 = vadd.f32 %v6901_v27, %v6823_v23  ;;  %v6947_v23 = vadd.f32 %v13787_v0, %v6890_v5  ;;  %v6383_v33 = vsel %vm6382_vm1, %v8717_v50, %v6379_v6  ;;  %v6393_v25 = vmul.f32 %v8719_v7, %v6392_v19  ;;  %v15189_v6 = vld [vmem:[#allocation83_spill] sm:$0xff] }
 0xa2e   :  { %v6958_v8 = vpop.f32.mrf.mxu1  ;;  %v6743_v26 = vadd.f32 %v13781_v13, %v6675_v51  ;;  %v6387_v13 = vor.u32 1.1754944e-38, %v6386_v62  ;;  %vm6385_vm8 = vcmp.eq.f32.partialorder %v6384_v37, 8.507059e+37  ;;  %vm6400_vm14 = vcmp.eq.f32.partialorder %v6399_v21, 8.507059e+37  ;;  %v15186_v51 = vld [vmem:[#allocation81_spill] sm:$0xff]  ;;  %v15190_v62 = vld [vmem:[#allocation28_spill] sm:$0xff]  ;;  %v15192_v37 = vld [vmem:[#allocation70_spill] sm:$0xff] }
 0xa2f   :  { %v6959_v40 = vadd.f32 %v6958_v8, %v6902_v9  ;;  %v6394_v46 = vadd.f32 %v8719_v7, %v6393_v25  ;;  %v15193_v25 = vld [vmem:[#allocation74_spill] sm:$0xff]  ;;  %v15195_v21 = vld [vmem:[#allocation17_spill] sm:$0xff] }
 0xa30   :  { %v6762_v53 = vpop.f32.mrf.mxu2  ;;  %v6811_v36 = vadd.f32 %v13791_v3, %v6743_v26  ;;  %v6388_v8 = vsel %vm6385_vm8, %v6387_v13, %v6383_v33  ;;  %v15176_v3 = vld [vmem:[#allocation46_spill] sm:$0xff]  ;;  %v15188_v26 = vld [vmem:[#allocation84_spill] sm:$0xff] }
 0xa31   :  { %6995 = vperm.xlu2 %8523, %v6959_v40   ;;  %7041 = vperm.xlu1 %8525, %v6419_v57   ;;  %v6763_v18 = vadd.f32 %v6762_v53, %v6691_v47  ;;  %v6389_v40 = vmul.f32 %v15176_v3, %v6388_v8  ;;  %v6398_v57 = vsel %vm6397_vm15, %v8719_v7, %v6394_v46  ;;  %v15194_v3 = vld [vmem:[#allocation78_spill] sm:$0xff] }
 0xa32   :  { %v6828_v11 = vpop.f32.mrf.mxu3  ;;  %v6894_v9 = vadd.f32 %v13793_v54, %v6811_v36  ;;  %v6403_v54 = vsel %vm6400_vm14, %v6402_v17, %v6398_v57  ;;  %v15191_v36 = vld [vmem:[#allocation32_spill] sm:$0xff] }
 0xa33   :  { %v6829_v48 = vadd.f32 %v6828_v11, %v6758_v14  ;;  %v15177_v14 = vld [vmem:[#allocation48_spill] sm:$0xff] }
 0xa34   :  { %v6905_v29 = vpop.f32.mrf.mxu0  ;;  %v6951_v0 = vadd.f32 %v13795_v15, %v6894_v9  ;;  %v6404_v38 = vmul.f32 %v15177_v14, %v6403_v54 }
 0xa35   :  { %v6906_v28 = vadd.f32 %v6905_v29, %v6829_v48 }
 0xa36   :  { %v6962_v16 = vpop.f32.mrf.mxu1 }
 0xa37   :  { %v6963_v2 = vadd.f32 %v6962_v16, %v6906_v28  ;;  %v15178_v16 = vld [vmem:[#allocation72_spill] sm:$0xff] }
 0xa38   :  { %v6767_v45 = vpop.f32.mrf.mxu2 }
 0xa39   :  { %7000 = vperm.xlu2 %8523, %v6963_v2   ;;  %6975 = vperm.xlu1 %8525, %v6943_v59   ;;  %v6768_v41 = vadd.f32 %v6767_v45, %v6695_v24  ;;  %v15179_v59 = vld [vmem:[#allocation88_spill] sm:$0xff] }
 0xa3a   :  { %v6834_v44 = vpop.f32.mrf.mxu3 }
 0xa3b   :  { %v6835_v34 = vadd.f32 %v6834_v44, %v6763_v18  ;;  %v15181_v44 = vld [vmem:[#allocation79_spill] sm:$0xff] }
 0xa3c   :  { %v6909_v32 = vpop.f32.mrf.mxu0 }
 0xa3d   :  { %v6910_v58 = vadd.f32 %v6909_v32, %v6835_v34  ;;  %v15182_v34 = vld [vmem:[#allocation23_spill] sm:$0xff] }
 0xa3e   :  { %v6966_v63 = vpop.f32.mrf.mxu1 }
 0xa3f   :  { %v6967_v56 = vadd.f32 %v6966_v63, %v6910_v58  ;;  %v15184_v63 = vld [vmem:[#allocation82_spill] sm:$0xff] }
 0xa41   :  { %7005 = vperm.xlu2 %8523, %v6967_v56  }
 0xa42   :  { %v6840_v55 = vpop.f32.mrf.mxu3 }
 0xa43   :  { %v6841_v30 = vadd.f32 %v6840_v55, %v6768_v41 }
 0xa44   :  { %v6913_v10 = vpop.f32.mrf.mxu0 }
 0xa45   :  { %v6914_v1 = vadd.f32 %v6913_v10, %v6841_v30  ;;  %v15187_v10 = vld [vmem:[#allocation13_spill] sm:$0xff] }
 0xa46   :  { %v6970_v49 = vpop.f32.mrf.mxu1 }
 0xa47   :  { %v6971_v27 = vadd.f32 %v6970_v49, %v6914_v1 }
 0xa49   :  { %7010 = vperm.xlu0 %8524, %v6971_v27   ;;  %6980 = vperm.xlu2 %8523, %v6947_v23  }
 0xa51   :  { %6985 = vperm.xlu0 %8524, %v6951_v0   ;;  %7031 = vperm.xlu2 %8523, %v6389_v40  }
 0xa52   :  { %v13857_v11 = vpop.permute.xlu2 %7046 }
 0xa53   :  { %v7075_v41 = vmul.f32 %v13857_v11, %v15185_v39 }
 0xa59   :  { %7036 = vperm.xlu0 %8524, %v6404_v38  }
 0xa72   :  { %v7052_v12 = vpop.permute.xlu0 %7051 }
 0xa73   :  { %v7077_v32 = vmul.f32 %v7052_v12, %v15182_v34  ;;  %v7078_v40 = vmul.f32 %v7052_v12, %v15194_v3  ;;  %v15198_v34 = vld [vmem:[#allocation12_spill] sm:$0xff] }
 0xa7a   :  { %v7057_v22 = vpop.permute.xlu1 %7056 }
 0xa7b   :  { %v7079_v61 = vmul.f32 %v7057_v22, %v15181_v44  ;;  %v7080_v19 = vmul.f32 %v7057_v22, %v15187_v10 }
 0xa82   :  { %v7062_v48 = vpop.permute.xlu1 %7061 }
 0xa83   :  { %v7081_v43 = vmul.f32 %v7062_v48, %v15183_v42  ;;  %v7082_v57 = vmul.f32 %v7062_v48, %v15195_v21  ;;  %v15199_v42 = vld [vmem:[#allocation77_spill] sm:$0xff] }
 0xa8a   :  { %v7067_v29 = vpop.permute.xlu1 %7066 }
 0xa8b   :  { %v6996_v15 = vpop.permute.xlu2 %6995  ;;  %v7083_v1 = vmul.f32 %v7067_v29, %v15188_v26  ;;  %v7084_v27 = vmul.f32 %v7067_v29, %v15191_v36 }
 0xa8c   :  { %v7021_v2 = vmul.f32 %v6996_v15, %v15179_v59  ;;  %v7022_v33 = vmul.f32 %v6996_v15, %v15192_v37  ;;  %v15196_v59 = vld [vmem:[#allocation58_spill] sm:$0xff] }
 0xa8e   :  { %v7093_v7 = vadd.f32 %v7077_v32, %v7021_v2  ;;  %v13901_v15 = vadd.f32 %v7078_v40, %v7022_v33  ;;  %v15204_v33 = vld [vmem:[#allocation42_spill] sm:$0xff] }
 0xa90   :  { %v13874_v55 = vand.u32 4294901760, %v7093_v7  ;;  %v13930_v39 = vand.u32 4294901760, %v13901_v15 }
 0xa92   :  { %v13895_v0 = vsub.f32 %v7093_v7, %v13874_v55 }
 0xa93   :  { %v7001_v53 = vpop.permute.xlu2 %7000 }
 0xa94   :  { %v7023_v47 = vmul.f32 %v7001_v53, %v15178_v16  ;;  %v7024_v5 = vmul.f32 %v7001_v53, %v15186_v51  ;;  %v7218_v16 = vand.u32 4294901760, %v13895_v0 }
 0xa96   :  { %v7095_v58 = vadd.f32 %v7079_v61, %v7023_v47  ;;  %v7096_v17 = vadd.f32 %v7080_v19, %v7024_v5  ;;  %v7219_v26 = vsub.f32 %v13895_v0, %v7218_v16 }
 0xa98   :  { %v13872_v4 = vand.u32 4294901760, %v7095_v58  ;;  %v13914_v47 = vand.u32 4294901760, %v7096_v17 }
 0xa9a   :  { %v13887_v9 = vsub.f32 %v7095_v58, %v13872_v4  ;;  %v15200_v58 = vld [vmem:[#allocation85_spill] sm:$0xff] }
 0xa9b   :  { %v7006_v28 = vpop.permute.xlu2 %7005  ;;  %v6991_v50 = vpop.permute.xlu1 %6990 }
 0xa9c   :  { %v7025_v18 = vmul.f32 %v7006_v28, %v15180_v52  ;;  %v7019_v24 = vmul.f32 %v6991_v50, %v15184_v63  ;;  %v7026_v13 = vmul.f32 %v7006_v28, %v15193_v25  ;;  %v7212_v29 = vand.u32 4294901760, %v13887_v9  ;;  %v15197_v52 = vld [vmem:[#allocation27_spill] sm:$0xff]  ;;  %v15201_v63 = vld [vmem:[#allocation73_spill] sm:$0xff] }
 0xa9d   :  { %v7020_v32 = vmul.f32 %v6991_v50, %v15198_v34  ;;  %v15209_v34 = vld [vmem:[#allocation15_spill] sm:$0xff] }
 0xa9e   :  { %v7097_v45 = vadd.f32 %v7081_v43, %v7025_v18  ;;  %v7091_v31 = vadd.f32 %v7075_v41, %v7019_v24  ;;  %v7098_v53 = vadd.f32 %v7082_v57, %v7026_v13  ;;  %v7076_v24 = vmul.f32 %v13857_v11, %v15201_v63 }
 0xa9f   :  { %v7213_v50 = vsub.f32 %v13887_v9, %v7212_v29 }
 0xaa0   :  { %v13876_v35 = vand.u32 4294901760, %v7097_v45  ;;  %v13889_v8 = vand.u32 4294901760, %v7091_v31  ;;  %v13932_v41 = vand.u32 4294901760, %v7098_v53 }
 0xaa1   :  { %v7214_v13 = vand.u32 4294901760, %v7213_v50 }
 0xaa2   :  { %v13892_v20 = vsub.f32 %v7097_v45, %v13876_v35  ;;  %v13911_v12 = vsub.f32 %v7091_v31, %v13889_v8  ;;  %v13963_v36 = vsub.f32 %v7098_v53, %v13932_v41 }
 0xaa3   :  { %v13866_v60 = vpop.permute.xlu2 %6980  ;;  %v13868_v56 = vpop.permute.xlu1 %7041 }
 0xaa4   :  { %v7206_v48 = vand.u32 4294901760, %v13892_v20  ;;  %v7073_v43 = vmul.f32 %v13868_v56, %v15199_v42  ;;  %v7224_v5 = vand.u32 4294901760, %v13911_v12  ;;  %v7016_v25 = vmul.f32 %v13866_v60, %v15204_v33 }
 0xaa6   :  { %v7207_v51 = vsub.f32 %v13892_v20, %v7206_v48  ;;  %v7225_v57 = vsub.f32 %v13911_v12, %v7224_v5 }
 0xaa8   :  { %v7208_v40 = vand.u32 4294901760, %v7207_v51 }
 0xaab   :  { %v7032_v14 = vpop.permute.xlu2 %7031  ;;  %v6976_v38 = vpop.permute.xlu1 %6975 }
 0xaac   :  { %v7069_v2 = vmul.f32 %v7032_v14, %v15196_v59  ;;  %v7013_v18 = vmul.f32 %v6976_v38, %v15197_v52 }
 0xaae   :  { %v7085_v10 = vadd.f32 %v7069_v2, %v7013_v18  ;;  %v15208_v18 = vld [vmem:[#allocation61_spill] sm:$0xff] }
 0xab0   :  { %v13981_v59 = vand.u32 4294901760, %v7085_v10 }
 0xab2   :  { %v14004_v50 = vsub.f32 %v7085_v10, %v13981_v59 }
 0xabb   :  { %v7011_v30 = vpop.permute.xlu0 %7010 }
 0xabc   :  { %v7027_v49 = vmul.f32 %v7011_v30, %v15189_v6  ;;  %v7028_v23 = vmul.f32 %v7011_v30, %v15190_v62  ;;  %v13948_v30 = vsub.f32 %v7096_v17, %v13914_v47  ;;  %v15202_v6 = vld [vmem:[#allocation16_spill] sm:$0xff] }
 0xabd   :  { %v15206_v17 = vld [vmem:[#allocation60_spill] sm:$0xff] }
 0xabe   :  { %v7099_v46 = vadd.f32 %v7083_v1, %v7027_v49  ;;  %v7100_v54 = vadd.f32 %v7084_v27, %v7028_v23  ;;  %v7092_v1 = vadd.f32 %v7076_v24, %v7020_v32  ;;  %v15203_v27 = vld [vmem:[#allocation37_spill] sm:$0xff]  ;;  %v7660_v24 = vand.u32 4294901760, %v13963_v36 }
 0xabf   :  { %v7015_v37 = vmul.f32 %v13866_v60, %v15203_v27  ;;  %v15207_v60 = vld [vmem:[#allocation38_spill] sm:$0xff] }
 0xac0   :  { %v13899_v22 = vand.u32 4294901760, %v7099_v46  ;;  %v13918_v44 = vand.u32 4294901760, %v7100_v54  ;;  %v7014_v53 = vmul.f32 %v6976_v38, %v15207_v60  ;;  %v13992_v38 = vsub.f32 %v13901_v15, %v13930_v39 }
 0xac1   :  { %v13994_v42 = vand.u32 4294901760, %v7092_v1  ;;  %v7226_v15 = vand.u32 4294901760, %v7225_v57  ;;  %v7661_v33 = vsub.f32 %v13963_v36, %v7660_v24 }
 0xac2   :  { %v13905_v28 = vsub.f32 %v7099_v46, %v13899_v22  ;;  %7110 = vmatpush.msrb.mxu2 %v13899_v22  ;;  %7361 = vmatpush.msrb.mxu1 %v13899_v22  ;;  %v13951_v19 = vsub.f32 %v7100_v54, %v13918_v44  ;;  %v15205_v46 = vld [vmem:[#allocation62_spill] sm:$0xff]  ;;  %v7070_v54 = vmul.f32 %v7032_v14, %v15206_v17 }
 0xac3   :  { %v6986_v61 = vpop.permute.xlu0 %6985  ;;  %v7074_v3 = vmul.f32 %v13868_v56, %v15205_v46  ;;  %v7662_v60 = vand.u32 4294901760, %v7661_v33 }
 0xac4   :  { %v7017_v7 = vmul.f32 %v6986_v61, %v15200_v58  ;;  %7112 = vmatpush.msrb.mxu2 %v13876_v35  ;;  %7289 = vmatpush.msrb.mxu0 %v13905_v28  ;;  %v7200_v45 = vand.u32 4294901760, %v13905_v28  ;;  %v7018_v49 = vmul.f32 %v6986_v61, %v15202_v6  ;;  %v7654_v2 = vand.u32 4294901760, %v13951_v19 }
 0xac5   :  { %7363 = vmatpush.msrb.mxu1 %v13876_v35 }
 0xac6   :  { %v7089_v31 = vadd.f32 %v7073_v43, %v7017_v7  ;;  %7114 = vmatpush.msrb.mxu2 %v13872_v4  ;;  %7292 = vmatpush.msrb.mxu0 %v13892_v20  ;;  %v7201_v11 = vsub.f32 %v13905_v28, %v7200_v45  ;;  %v7090_v52 = vadd.f32 %v7074_v3, %v7018_v49  ;;  %v7220_v43 = vand.u32 4294901760, %v7219_v26 }
 0xac7   :  { %7365 = vmatpush.msrb.mxu1 %v13872_v4  ;;  %v7655_v6 = vsub.f32 %v13951_v19, %v7654_v2  ;;  %v14015_v49 = vsub.f32 %v7092_v1, %v13994_v42 }
 0xac8   :  { %v13958_v62 = vand.u32 4294901760, %v7089_v31  ;;  %7116 = vmatpush.msrb.mxu2 %v13874_v55  ;;  %7295 = vmatpush.msrb.mxu0 %v13887_v9  ;;  %v7202_v23 = vand.u32 4294901760, %v7201_v11  ;;  %v7086_v11 = vadd.f32 %v7070_v54, %v7014_v53  ;;  %v14007_v51 = vand.u32 4294901760, %v7090_v52  ;;  %v15210_v54 = vld [vmem:[#allocation20_spill] sm:$0xff] }
 0xac9   :  { %7367 = vmatpush.msrb.mxu1 %v13874_v55  ;;  %v7656_v3 = vand.u32 4294901760, %v7655_v6  ;;  %v15239_v6 = vld [vmem:[#allocation41_spill] sm:$0xff] }
 0xaca   :  { %7118 = vmatpush.msrb.mxu2 %v13889_v8  ;;  %7203 = vmatpush.msrb.mxu3 %v7202_v23  ;;  %v13974_v21 = vsub.f32 %v7089_v31, %v13958_v62  ;;  %v7666_v31 = vand.u32 4294901760, %v13948_v30  ;;  %v7672_v23 = vand.u32 4294901760, %v13992_v38  ;;  %v14033_v46 = vsub.f32 %v7090_v52, %v14007_v51 }
 0xacb   :  { %7298 = vmatpush.msrb.mxu0 %v13895_v0  ;;  %7369 = vmatpush.msrb.mxu1 %v13889_v8  ;;  %v7037_v56 = vpop.permute.xlu0 %7036 }
 0xacc   :  { %v7071_v61 = vmul.f32 %v7037_v56, %v15208_v18  ;;  %v7072_v32 = vmul.f32 %v7037_v56, %v15209_v34  ;;  %7120 = vmatpush.msrb.mxu2 %v13958_v62  ;;  %7209 = vmatpush.msrb.mxu3 %v7208_v40  ;;  %v7230_v14 = vand.u32 4294901760, %v13974_v21  ;;  %v7667_v1 = vsub.f32 %v13948_v30, %v7666_v31 }
 0xacd   :  { %7301 = vmatpush.msrb.mxu0 %v13911_v12  ;;  %7371 = vmatpush.msrb.mxu1 %v13958_v62  ;;  %v7673_v57 = vsub.f32 %v13992_v38, %v7672_v23  ;;  %v7678_v56 = vand.u32 4294901760, %v14015_v49 }
 0xace   :  { %v7087_v58 = vadd.f32 %v7071_v61, %v7015_v37  ;;  %v7088_v7 = vadd.f32 %v7072_v32, %v7016_v25  ;;  %7215 = vmatpush.msrb.mxu3 %v7214_v13  ;;  %v7231_v63 = vsub.f32 %v13974_v21, %v7230_v14  ;;  %v7242_v25 = vand.u32 4294901760, %v14004_v50 }
 0xacf   :  { %7304 = vmatpush.msrb.mxu0 %v13974_v21  ;;  %v14030_v13 = vand.u32 4294901760, %v7086_v11  ;;  %v7668_v61 = vand.u32 4294901760, %v7667_v1  ;;  %v7684_v32 = vand.u32 4294901760, %v14033_v46  ;;  %v7674_v28 = vand.u32 4294901760, %v7673_v57  ;;  %v15216_v21 = vld [vmem:[#allocation14_spill] sm:$0xff] }
 0xad0   :  { %v14009_v26 = vand.u32 4294901760, %v7087_v58  ;;  %7221 = vmatpush.msrb.mxu3 %v7220_v43  ;;  %v14018_v27 = vand.u32 4294901760, %v7088_v7  ;;  %v7232_v10 = vand.u32 4294901760, %v7231_v63  ;;  %v7243_v52 = vsub.f32 %v14004_v50, %v7242_v25  ;;  %v15211_v43 = vld [vmem:[#allocation56_spill] sm:$0xff]  ;;  %v15212_v63 = vld [vmem:[#allocation22_spill] sm:$0xff] }
 0xad1   :  { %v14050_v18 = vsub.f32 %v7086_v11, %v14030_v13  ;;  %v7685_v20 = vsub.f32 %v14033_v46, %v7684_v32  ;;  %v15236_v11 = vld [vmem:[#allocation51_spill] sm:$0xff] }
 0xad2   :  { %7122 = vmatpush.msrb.mxu2 %v14009_v26  ;;  %7227 = vmatpush.msrb.mxu3 %v7226_v15  ;;  %v7235_v37 = vsub.f32 %v7087_v58, %v14009_v26  ;;  %v14041_v17 = vsub.f32 %v7088_v7, %v14018_v27  ;;  %v7244_v7 = vand.u32 4294901760, %v7243_v52  ;;  %v15213_v15 = vld [vmem:[#allocation34_spill] sm:$0xff] }
 0xad3   :  { %7373 = vmatpush.msrb.mxu1 %v14009_v26  ;;  %v7686_v0 = vand.u32 4294901760, %v7685_v20 }
 0xad4   :  { %7124 = vmatpush.msrb.mxu2 %v13981_v59  ;;  %7233 = vmatpush.msrb.mxu3 %v7232_v10  ;;  %v7236_v40 = vand.u32 4294901760, %v7235_v37  ;;  %v7690_v58 = vand.u32 4294901760, %v14041_v17 }
 0xad5   :  { %7307 = vmatpush.msrb.mxu0 %v7235_v37  ;;  %7375 = vmatpush.msrb.mxu1 %v13981_v59 }
 0xad6   :  { %7130 = vmatmul.f32.vlgmr.msrb.gmra.mxu2 %v15210_v54  ;;  %v7237_v53 = vsub.f32 %v7235_v37, %v7236_v40  ;;  %7379 = vmatmul.f32.vlgmr.msrb.gmra.mxu1 %v15211_v43 }
 0xad7   :  { %7657 = vmatpush.msra.mxu1 %v7656_v3  ;;  %7436 = vmatpush.msra.mxu2 %v7200_v45  ;;  %v7679_v45 = vsub.f32 %v14015_v49, %v7678_v56 }
 0xad8   :  { %7310 = vmatpush.msrb.mxu0 %v14004_v50  ;;  %v7238_v34 = vand.u32 4294901760, %v7237_v53  ;;  %v15234_v50 = vld [vmem:[#allocation52_spill] sm:$0xff] }
 0xad9   :  { %7663 = vmatpush.msra.mxu1 %v7662_v60  ;;  %7440 = vmatpush.msra.mxu2 %v7206_v48  ;;  %v7696_v48 = vand.u32 4294901760, %v14050_v18  ;;  %v7680_v9 = vand.u32 4294901760, %v7679_v45 }
 0xada   :  { %7564 = vmatpush.msra.mxu0 %v13918_v44  ;;  %7239 = vmatpush.msrb.mxu3 %v7238_v34 }
 0xadb   :  { %7669 = vmatpush.msra.mxu1 %v7668_v61  ;;  %7444 = vmatpush.msra.mxu2 %v7212_v29  ;;  %v7691_v29 = vsub.f32 %v14041_v17, %v7690_v58 }
 0xadc   :  { %7566 = vmatpush.msra.mxu0 %v13932_v41  ;;  %7245 = vmatpush.msrb.mxu3 %v7244_v7 }
 0xadd   :  { %7675 = vmatpush.msra.mxu1 %v7674_v28  ;;  %7448 = vmatpush.msra.mxu2 %v7218_v16  ;;  %v7697_v16 = vsub.f32 %v14050_v18, %v7696_v48  ;;  %v7692_v12 = vand.u32 4294901760, %v7691_v29 }
 0xade   :  { %7568 = vmatpush.msra.mxu0 %v13914_v47  ;;  %7138 = vmatmul.f32.gmra.mxu2 %v15212_v63 }
 0xadf   :  { %7247 = vmatmul.f32.vlgmr.msrb.gmra.mxu3 %v15213_v15  ;;  %7452 = vmatpush.msra.mxu2 %v7224_v5  ;;  %v15215_v5 = vld [vmem:[#allocation45_spill] sm:$0xff] }
 0xae0   :  { %7507 = vmatpush.msra.mxu3 %v13899_v22  ;;  %7570 = vmatpush.msra.mxu0 %v13930_v39  ;;  %v7698_v22 = vand.u32 4294901760, %v7697_v16 }
 0xae1   :  { %7681 = vmatpush.msra.mxu1 %v7680_v9  ;;  %7456 = vmatpush.msra.mxu2 %v7230_v14  ;;  %v15230_v14 = vld [vmem:[#allocation36_spill] sm:$0xff] }
 0xae2   :  { %7509 = vmatpush.msra.mxu3 %v13876_v35  ;;  %7572 = vmatpush.msra.mxu0 %v13994_v42  ;;  %v15214_v35 = vld [vmem:[#allocation33_spill] sm:$0xff] }
 0xae3   :  { %7687 = vmatpush.msra.mxu1 %v7686_v0  ;;  %7460 = vmatpush.msra.mxu2 %v7236_v40 }
 0xae4   :  { %7511 = vmatpush.msra.mxu3 %v13872_v4  ;;  %7574 = vmatpush.msra.mxu0 %v14007_v51  ;;  %v15217_v4 = vld [vmem:[#allocation75_spill] sm:$0xff] }
 0xae5   :  { %7693 = vmatpush.msra.mxu1 %v7692_v12  ;;  %7464 = vmatpush.msra.mxu2 %v7242_v25 }
 0xae6   :  { %7513 = vmatpush.msra.mxu3 %v13874_v55  ;;  %7576 = vmatpush.msra.mxu0 %v14018_v27  ;;  %v15218_v55 = vld [vmem:[#allocation25_spill] sm:$0xff] }
 0xae7   :  { %7699 = vmatpush.msra.mxu1 %v7698_v22  ;;  %7743 = vmatpush.msrb.mxu2 %v13951_v19  ;;  %v15224_v19 = vld [vmem:[#allocation18_spill] sm:$0xff] }
 0xae8   :  { %7146 = vmatmul.f32.gmra.mxu2 %v15214_v35  ;;  %7251 = vmatmul.f32.gmra.mxu3 %v15215_v5 }
 0xae9   :  { %7961 = vmatpush.msrb.mxu1 %v13918_v44  ;;  %7313 = vmatmul.f32.vlgmr.msrb.gmra.mxu0 %v15216_v21 }
 0xaea   :  { %7515 = vmatpush.msra.mxu3 %v13889_v8  ;;  %7578 = vmatpush.msra.mxu0 %v14030_v13  ;;  %v15219_v8 = vld [vmem:[#allocation47_spill] sm:$0xff] }
 0xaeb   :  { %7746 = vmatpush.msrb.mxu2 %v13963_v36  ;;  %7963 = vmatpush.msrb.mxu1 %v13932_v41  ;;  %v15227_v36 = vld [vmem:[#allocation31_spill] sm:$0xff] }
 0xaec   :  { %7890 = vmatpush.msrb.mxu0 %v7654_v2  ;;  %7517 = vmatpush.msra.mxu3 %v13958_v62  ;;  %v15226_v62 = vld [vmem:[#allocation29_spill] sm:$0xff]  ;;  %v15229_v2 = vld [vmem:[#allocation35_spill] sm:$0xff] }
 0xaed   :  { %7749 = vmatpush.msrb.mxu2 %v13948_v30  ;;  %7965 = vmatpush.msrb.mxu1 %v13914_v47  ;;  %v15223_v30 = vld [vmem:[#allocation57_spill] sm:$0xff] }
 0xaee   :  { %7894 = vmatpush.msrb.mxu0 %v7660_v24  ;;  %7519 = vmatpush.msra.mxu3 %v14009_v26  ;;  %v15233_v24 = vld [vmem:[#allocation55_spill] sm:$0xff]  ;;  %v15238_v26 = vld [vmem:[#allocation50_spill] sm:$0xff] }
 0xaef   :  { %7752 = vmatpush.msrb.mxu2 %v13992_v38  ;;  %7967 = vmatpush.msrb.mxu1 %v13930_v39  ;;  %v15231_v38 = vld [vmem:[#allocation63_spill] sm:$0xff] }
 0xaf0   :  { %7898 = vmatpush.msrb.mxu0 %v7666_v31  ;;  %7521 = vmatpush.msra.mxu3 %v13981_v59  ;;  %v15228_v59 = vld [vmem:[#allocation59_spill] sm:$0xff]  ;;  %v15235_v31 = vld [vmem:[#allocation64_spill] sm:$0xff] }
 0xaf1   :  { %7755 = vmatpush.msrb.mxu2 %v14015_v49  ;;  %7969 = vmatpush.msrb.mxu1 %v13994_v42  ;;  %v15240_v49 = vld [vmem:[#allocation30_spill] sm:$0xff] }
 0xaf2   :  { %7815 = vmatpush.msrb.mxu3 %v13918_v44  ;;  %7902 = vmatpush.msrb.mxu0 %v7672_v23  ;;  %v15220_v44 = vld [vmem:[#allocation19_spill] sm:$0xff]  ;;  %v15241_v23 = vld [vmem:[#allocation54_spill] sm:$0xff] }
 0xaf3   :  { %7154 = vmatmul.f32.gmra.mxu2 %v15217_v4  ;;  %7255 = vmatmul.f32.gmra.mxu3 %v15218_v55 }
 0xaf4   :  { %7318 = vmatmul.f32.gmra.mxu0 %v15219_v8  ;;  %7758 = vmatpush.msrb.mxu2 %v14033_v46 }
 0xaf5   :  { %7817 = vmatpush.msrb.mxu3 %v13932_v41  ;;  %7906 = vmatpush.msrb.mxu0 %v7678_v56  ;;  %v15221_v41 = vld [vmem:[#allocation65_spill] sm:$0xff] }
 0xaf6   :  { %7971 = vmatpush.msrb.mxu1 %v14007_v51  ;;  %7761 = vmatpush.msrb.mxu2 %v14041_v17 }
 0xaf7   :  { %7385 = vmatmul.f32.gmra.mxu1 %v15220_v44  ;;  %7819 = vmatpush.msrb.mxu3 %v13914_v47  ;;  %v15222_v47 = vld [vmem:[#allocation43_spill] sm:$0xff] }
 0xaf8   :  { %7910 = vmatpush.msrb.mxu0 %v7684_v32  ;;  %7973 = vmatpush.msrb.mxu1 %v14018_v27 }
 0xaf9   :  { %7764 = vmatpush.msrb.mxu2 %v14050_v18  ;;  %7821 = vmatpush.msrb.mxu3 %v13930_v39  ;;  %v15225_v39 = vld [vmem:[#allocation40_spill] sm:$0xff] }
 0xafa   :  { %7914 = vmatpush.msrb.mxu0 %v7690_v58  ;;  %7975 = vmatpush.msrb.mxu1 %v14030_v13 }
 0xafb   :  { %7162 = vmatmul.f32.gmra.mxu2 %v15221_v41  ;;  %7823 = vmatpush.msrb.mxu3 %v13994_v42  ;;  %v15232_v42 = vld [vmem:[#allocation76_spill] sm:$0xff] }
 0xafc   :  { %7918 = vmatpush.msrb.mxu0 %v7696_v48  ;;  %7259 = vmatmul.f32.gmra.mxu3 %v15222_v47 }
 0xafd   :  { %7323 = vmatmul.f32.gmra.mxu0 %v15223_v30  ;;  %7825 = vmatpush.msrb.mxu3 %v14007_v51  ;;  %v15237_v51 = vld [vmem:[#allocation68_spill] sm:$0xff] }
 0xaff   :  { %7391 = vmatmul.f32.gmra.mxu1 %v15224_v19  ;;  %7827 = vmatpush.msrb.mxu3 %v14018_v27 }
 0xb01   :  { %7829 = vmatpush.msrb.mxu3 %v14030_v13 }
 0xb03   :  { %7170 = vmatmul.f32.gmra.mxu2 %v15225_v39 }
 0xb04   :  { %7263 = vmatmul.f32.gmra.mxu3 %v15226_v62 }
 0xb05   :  { %7328 = vmatmul.f32.gmra.mxu0 %v15227_v36 }
 0xb07   :  { %7397 = vmatmul.f32.gmra.mxu1 %v15228_v59 }
 0xb0b   :  { %7178 = vmatmul.f32.gmra.mxu2 %v15229_v2 }
 0xb0c   :  { %7267 = vmatmul.f32.gmra.mxu3 %v15230_v14 }
 0xb0d   :  { %7333 = vmatmul.f32.gmra.mxu0 %v15231_v38 }
 0xb0f   :  { %7403 = vmatmul.f32.gmra.mxu1 %v15232_v42 }
 0xb13   :  { %7186 = vmatmul.f32.gmra.mxu2 %v15233_v24 }
 0xb14   :  { %7271 = vmatmul.f32.gmra.mxu3 %v15234_v50 }
 0xb15   :  { %7338 = vmatmul.f32.gmra.mxu0 %v15235_v31 }
 0xb17   :  { %7409 = vmatmul.f32.gmra.mxu1 %v15236_v11 }
 0xb1b   :  { %7466 = vmatmul.f32.vlgmr.msra.gmra.mxu2 %v15213_v15 }
 0xb1c   :  { %7275 = vmatmul.f32.gmra.mxu3 %v15237_v51 }
 0xb1d   :  { %7343 = vmatmul.f32.gmra.mxu0 %v15238_v26 }
 0xb1f   :  { %7415 = vmatmul.f32.gmra.mxu1 %v15239_v6 }
 0xb23   :  { %7470 = vmatmul.f32.gmra.mxu2 %v15215_v5 }
 0xb24   :  { %7523 = vmatmul.f32.vlgmr.msra.gmra.mxu3 %v15213_v15 }
 0xb25   :  { %7348 = vmatmul.f32.gmra.mxu0 %v15240_v49 }
 0xb27   :  { %7421 = vmatmul.f32.gmra.mxu1 %v15241_v23 }
 0xb2b   :  { %7474 = vmatmul.f32.gmra.mxu2 %v15218_v55 }
 0xb2c   :  { %7527 = vmatmul.f32.gmra.mxu3 %v15215_v5 }
 0xb2d   :  { %7584 = vmatmul.f32.vlgmr.msra.gmra.mxu0 %v15210_v54 }
 0xb2f   :  { %7701 = vmatmul.f32.vlgmr.msra.gmra.mxu1 %v15213_v15 }
 0xb33   :  { %7478 = vmatmul.f32.gmra.mxu2 %v15222_v47 }
 0xb34   :  { %7531 = vmatmul.f32.gmra.mxu3 %v15218_v55 }
 0xb35   :  { %7592 = vmatmul.f32.gmra.mxu0 %v15212_v63 }
 0xb37   :  { %7705 = vmatmul.f32.gmra.mxu1 %v15215_v5 }
 0xb3b   :  { %7482 = vmatmul.f32.gmra.mxu2 %v15226_v62 }
 0xb3c   :  { %7535 = vmatmul.f32.gmra.mxu3 %v15222_v47 }
 0xb3d   :  { %7600 = vmatmul.f32.gmra.mxu0 %v15214_v35 }
 0xb3f   :  { %7709 = vmatmul.f32.gmra.mxu1 %v15218_v55 }
 0xb43   :  { %7486 = vmatmul.f32.gmra.mxu2 %v15230_v14 }
 0xb44   :  { %7539 = vmatmul.f32.gmra.mxu3 %v15226_v62 }
 0xb45   :  { %7608 = vmatmul.f32.gmra.mxu0 %v15217_v4 }
 0xb47   :  { %7713 = vmatmul.f32.gmra.mxu1 %v15222_v47 }
 0xb4b   :  { %7490 = vmatmul.f32.gmra.mxu2 %v15234_v50 }
 0xb4c   :  { %7543 = vmatmul.f32.gmra.mxu3 %v15230_v14 }
 0xb4d   :  { %7616 = vmatmul.f32.gmra.mxu0 %v15221_v41 }
 0xb4f   :  { %7717 = vmatmul.f32.gmra.mxu1 %v15226_v62 }
 0xb53   :  { %7494 = vmatmul.f32.gmra.mxu2 %v15237_v51  ;;  %v7380_v1 = vpop.f32.mrf.mxu1 }
 0xb54   :  { %7547 = vmatmul.f32.gmra.mxu3 %v15234_v50 }
 0xb55   :  { %7624 = vmatmul.f32.gmra.mxu0 %v15225_v39 }
 0xb57   :  { %7721 = vmatmul.f32.gmra.mxu1 %v15230_v14 }
 0xb59   :  { %v7131_v27 = vpop.f32.mrf.mxu2 }
 0xb5b   :  { %7767 = vmatmul.f32.vlgmr.msrb.gmra.mxu2 %v15216_v21 }
 0xb5c   :  { %7551 = vmatmul.f32.gmra.mxu3 %v15237_v51 }
 0xb5d   :  { %7632 = vmatmul.f32.gmra.mxu0 %v15229_v2 }
 0xb5f   :  { %7725 = vmatmul.f32.gmra.mxu1 %v15234_v50 }
 0xb61   :  { %v14195_v10 = vpop.f32.mrf.mxu2 }
 0xb62   :  { %v7248_v37 = vpop.f32.mrf.mxu3 }
 0xb63   :  { %7772 = vmatmul.f32.gmra.mxu2 %v15219_v8 }
 0xb64   :  { %7833 = vmatmul.f32.vlgmr.msrb.gmra.mxu3 %v15211_v43 }
 0xb65   :  { %7640 = vmatmul.f32.gmra.mxu0 %v15233_v24 }
 0xb66   :  { %v7314_v33 = vpop.f32.mrf.mxu0 }
 0xb67   :  { %7729 = vmatmul.f32.gmra.mxu1 %v15237_v51 }
 0xb6b   :  { %7777 = vmatmul.f32.gmra.mxu2 %v15223_v30  ;;  %v14202_v25 = vpop.f32.mrf.mxu2  ;;  %v7252_v13 = vpop.f32.mrf.mxu3 }
 0xb6c   :  { %7839 = vmatmul.f32.gmra.mxu3 %v15220_v44  ;;  %v7253_v35 = vadd.f32 %v7252_v13, %v14195_v10 }
 0xb6d   :  { %7920 = vmatmul.f32.vlgmr.msrb.gmra.mxu0 %v15213_v15 }
 0xb6f   :  { %7977 = vmatmul.f32.vlgmr.msrb.gmra.mxu1 %v15213_v15  ;;  %v7249_v15 = vadd.f32 %v7248_v37, %v7131_v27 }
 0xb71   :  { %v7319_v46 = vpop.f32.mrf.mxu0  ;;  %v7315_v0 = vadd.f32 %v7314_v33, %v7249_v15 }
 0xb73   :  { %7782 = vmatmul.f32.gmra.mxu2 %v15227_v36  ;;  %v7381_v22 = vadd.f32 %v7380_v1, %v7315_v0 }
 0xb74   :  { %v7386_v3 = vpop.f32.mrf.mxu1  ;;  %7845 = vmatmul.f32.gmra.mxu3 %v15224_v19 }
 0xb75   :  { %7924 = vmatmul.f32.gmra.mxu0 %v15215_v5 }
 0xb76   :  { %v14210_v40 = vpop.f32.mrf.mxu2  ;;  %v7256_v57 = vpop.f32.mrf.mxu3 }
 0xb77   :  { %7981 = vmatmul.f32.gmra.mxu1 %v15215_v5  ;;  %v7257_v19 = vadd.f32 %v7256_v57, %v14202_v25 }
 0xb7a   :  { %v7324_v17 = vpop.f32.mrf.mxu0 }
 0xb7b   :  { %7787 = vmatmul.f32.gmra.mxu2 %v15231_v38 }
 0xb7c   :  { %v14214_v54 = vpop.f32.mrf.mxu1  ;;  %7851 = vmatmul.f32.gmra.mxu3 %v15228_v59  ;;  %v7325_v59 = vadd.f32 %v7324_v17, %v7257_v19 }
 0xb7d   :  { %7928 = vmatmul.f32.gmra.mxu0 %v15218_v55 }
 0xb7e   :  { %v14218_v60 = vpop.f32.mrf.mxu2 }
 0xb7f   :  { %7985 = vmatmul.f32.gmra.mxu1 %v15218_v55  ;;  %v7260_v53 = vpop.f32.mrf.mxu3  ;;  %v7320_v55 = vadd.f32 %v7319_v46, %v7253_v35 }
 0xb81   :  { %v7387_v30 = vadd.f32 %v7386_v3, %v7320_v55 }
 0xb82   :  { %v14221_v56 = vpop.f32.mrf.mxu0 }
 0xb83   :  { %7792 = vmatmul.f32.gmra.mxu2 %v15235_v31  ;;  %v7393_v31 = vadd.f32 %v14214_v54, %v7325_v59 }
 0xb84   :  { %v14224_v52 = vpop.f32.mrf.mxu1  ;;  %7857 = vmatmul.f32.gmra.mxu3 %v15232_v42 }
 0xb85   :  { %7932 = vmatmul.f32.gmra.mxu0 %v15222_v47 }
 0xb86   :  { %v14228_v18 = vpop.f32.mrf.mxu2 }
 0xb87   :  { %7989 = vmatmul.f32.gmra.mxu1 %v15222_v47  ;;  %v14231_v61 = vpop.f32.mrf.mxu3 }
 0xb88   :  { %v7265_v1 = vadd.f32 %v14231_v61, %v14218_v60 }
 0xb8a   :  { %v14233_v34 = vpop.f32.mrf.mxu0 }
 0xb8b   :  { %7797 = vmatmul.f32.gmra.mxu2 %v15238_v26  ;;  %v7335_v54 = vadd.f32 %v14233_v34, %v7265_v1 }
 0xb8c   :  { %v14236_v32 = vpop.f32.mrf.mxu1  ;;  %7863 = vmatmul.f32.gmra.mxu3 %v15236_v11  ;;  %v7261_v11 = vadd.f32 %v7260_v53, %v14210_v40 }
 0xb8d   :  { %7936 = vmatmul.f32.gmra.mxu0 %v15226_v62 }
 0xb8e   :  { %v14240_v43 = vpop.f32.mrf.mxu2 }
 0xb8f   :  { %7993 = vmatmul.f32.gmra.mxu1 %v15226_v62  ;;  %v14243_v28 = vpop.f32.mrf.mxu3 }
 0xb92   :  { %v14245_v45 = vpop.f32.mrf.mxu0 }
 0xb93   :  { %7802 = vmatmul.f32.gmra.mxu2 %v15240_v49  ;;  %v7330_v49 = vadd.f32 %v14221_v56, %v7261_v11 }
 0xb94   :  { %v14248_v58 = vpop.f32.mrf.mxu1  ;;  %7869 = vmatmul.f32.gmra.mxu3 %v15239_v6 }
 0xb95   :  { %7940 = vmatmul.f32.gmra.mxu0 %v15230_v14  ;;  %v7399_v46 = vadd.f32 %v14224_v52, %v7330_v49 }
 0xb96   :  { %v14252_v7 = vpop.f32.mrf.mxu2 }
 0xb97   :  { %7997 = vmatmul.f32.gmra.mxu1 %v15230_v14  ;;  %v14255_v20 = vpop.f32.mrf.mxu3 }
 0xb98   :  { %v7273_v49 = vadd.f32 %v14255_v20, %v14240_v43 }
 0xb9a   :  { %v14257_v48 = vpop.f32.mrf.mxu0 }
 0xb9b   :  { %v7345_v43 = vadd.f32 %v14257_v48, %v7273_v49 }
 0xb9c   :  { %v14259_v63 = vpop.f32.mrf.mxu1  ;;  %7875 = vmatmul.f32.gmra.mxu3 %v15241_v23 }
 0xb9d   :  { %7944 = vmatmul.f32.gmra.mxu0 %v15234_v50 }
 0xb9e   :  { %v7467_v9 = vpop.f32.mrf.mxu2 }
 0xb9f   :  { %8001 = vmatmul.f32.gmra.mxu1 %v15234_v50  ;;  %v14264_v29 = vpop.f32.mrf.mxu3  ;;  %v7468_v21 = vadd.f32 %v7467_v9, %v7381_v22 }
 0xba0   :  { %v7277_v48 = vadd.f32 %v14264_v29, %v14252_v7 }
 0xba2   :  { %v14266_v16 = vpop.f32.mrf.mxu0 }
 0xba3   :  { %v7350_v7 = vadd.f32 %v14266_v16, %v7277_v48  ;;  %v8845_v48 = vld [vmem:[#allocation2 + $0x40] sm:$0xff] }
 0xba4   :  { %v14268_v12 = vpop.f32.mrf.mxu1 }
 0xba5   :  { %7948 = vmatmul.f32.gmra.mxu0 %v15237_v51 }
 0xba6   :  { %v7471_v5 = vpop.f32.mrf.mxu2 }
 0xba7   :  { %8005 = vmatmul.f32.gmra.mxu1 %v15237_v51  ;;  %v7524_v4 = vpop.f32.mrf.mxu3  ;;  %v7472_v62 = vadd.f32 %v7471_v5, %v7387_v30  ;;  %v7405_v5 = vadd.f32 %v14236_v32, %v7335_v54 }
 0xba8   :  { %v7525_v8 = vadd.f32 %v7524_v4, %v7468_v21  ;;  %v7269_v21 = vadd.f32 %v14243_v28, %v14228_v18 }
 0xbaa   :  { %v14273_v44 = vpop.f32.mrf.mxu0  ;;  %v8413_v41 = vmul.f32 -1.442695, %v7525_v8  ;;  %v7340_v18 = vadd.f32 %v14245_v45, %v7269_v21 }
 0xbac   :  { %v14275_v47 = vpop.f32.mrf.mxu1  ;;  %8720 = vpow2.f32 %v8413_v41 }
 0xbae   :  { %v7475_v39 = vpop.f32.mrf.mxu2 }
 0xbaf   :  { %v7528_v36 = vpop.f32.mrf.mxu3  ;;  %v7476_v26 = vadd.f32 %v7475_v39, %v7393_v31  ;;  %v8841_v39 = vld [vmem:[#allocation2] sm:$0xff] }
 0xbb0   :  { %v7529_v2 = vadd.f32 %v7528_v36, %v7472_v62 }
 0xbb2   :  { %v14278_v14 = vpop.f32.mrf.mxu0  ;;  %v8721_v38 = vpop.eup %8720  ;;  %v8415_v42 = vmul.f32 -1.442695, %v7529_v2 }
 0xbb3   :  { %v8057_v24 = vadd.f32 1.0, %v8721_v38 }
 0xbb4   :  { %v14280_v50 = vpop.f32.mrf.mxu1  ;;  %8722 = vpow2.f32 %v8415_v42 }
 0xbb5   :  { %8724 = vrcp.f32 %v8057_v24  ;;  %v8084_v53 = vand.u32 2147483648, %v8057_v24  ;;  %v8082_v9 = vand.u32 2147483647, %v8057_v24  ;;  %vm8078_vm2 = vweird.f32 %v8057_v24 }
 0xbb6   :  { %v7479_v51 = vpop.f32.mrf.mxu2 }
 0xbb7   :  { %v7532_v6 = vpop.f32.mrf.mxu3  ;;  %v7480_v17 = vadd.f32 %v7479_v51, %v7399_v46  ;;  %v8085_v34 = vor.u32 1.1754944e-38, %v8084_v53  ;;  %vm8083_vm6 = vcmp.eq.f32.partialorder %v8082_v9, 8.507059e+37  ;;  %v8842_v46 = vld [vmem:[#allocation2 + $0x10] sm:$0xff] }
 0xbb8   :  { %v7533_v23 = vadd.f32 %v7532_v6, %v7476_v26  ;;  %v7411_v6 = vadd.f32 %v14248_v58, %v7340_v18 }
 0xbba   :  { %v14285_v27 = vpop.f32.mrf.mxu0  ;;  %v8723_v10 = vpop.eup %8722  ;;  %v8417_v37 = vmul.f32 -1.442695, %v7533_v23 }
 0xbbb   :  { %v8725_v33 = vpop.eup %8724  ;;  %v8059_v25 = vadd.f32 1.0, %v8723_v10 }
 0xbbc   :  { %v14289_v13 = vpop.f32.mrf.mxu1  ;;  %v8074_v3 = vmul.f32 %v8725_v33, %v8057_v24  ;;  %8726 = vpow2.f32 %v8417_v37  ;;  %vm8079_vm0 = vweird.f32 %v8725_v33 }
 0xbbd   :  { %8728 = vrcp.f32 %v8059_v25  ;;  %vm8080_vm11 = vmor %vm8078_vm2, %vm8079_vm0  ;;  %v8114_v28 = vand.u32 2147483648, %v8059_v25  ;;  %v8112_v38 = vand.u32 2147483647, %v8059_v25  ;;  %vm8108_vm5 = vweird.f32 %v8059_v25 }
 0xbbe   :  { %v7483_v40 = vpop.f32.mrf.mxu2  ;;  %v8075_v57 = vsub.f32 1.0, %v8074_v3 }
 0xbbf   :  { %v7536_v56 = vpop.f32.mrf.mxu3  ;;  %v7484_v36 = vadd.f32 %v7483_v40, %v7405_v5  ;;  %v8115_v45 = vor.u32 1.1754944e-38, %v8114_v28  ;;  %vm8113_vm3 = vcmp.eq.f32.partialorder %v8112_v38, 8.507059e+37 }
 0xbc0   :  { %v8076_v15 = vmul.f32 %v8725_v33, %v8075_v57  ;;  %v7537_v0 = vadd.f32 %v7536_v56, %v7480_v17 }
 0xbc2   :  { %v14293_v60 = vpop.f32.mrf.mxu0  ;;  %v8727_v61 = vpop.eup %8726  ;;  %v8077_v22 = vadd.f32 %v8725_v33, %v8076_v15  ;;  %v8419_v52 = vmul.f32 -1.442695, %v7537_v0 }
 0xbc3   :  { %v8729_v35 = vpop.eup %8728  ;;  %v14298_v4 = vadd.f32 1.0, %v8727_v61 }
 0xbc4   :  { %v14300_v55 = vpop.f32.mrf.mxu1  ;;  %v8081_v8 = vsel %vm8080_vm11, %v8725_v33, %v8077_v22  ;;  %v8104_v41 = vmul.f32 %v8729_v35, %v8059_v25  ;;  %8730 = vpow2.f32 %v8419_v52  ;;  %vm8109_vm12 = vweird.f32 %v8729_v35 }
 0xbc5   :  { %v8086_v30 = vsel %vm8083_vm6, %v8085_v34, %v8081_v8  ;;  %8732 = vrcp.f32 %v14298_v4  ;;  %vm8110_vm4 = vmor %vm8108_vm5, %vm8109_vm12  ;;  %v8144_v20 = vand.u32 2147483648, %v14298_v4  ;;  %v8142_v54 = vand.u32 2147483647, %v14298_v4 }
 0xbc6   :  { %v7487_v19 = vpop.f32.mrf.mxu2  ;;  %v8313_v62 = vmul.f32 %v8841_v39, %v8086_v30  ;;  %v8105_v32 = vsub.f32 1.0, %v8104_v41  ;;  %vm8138_vm10 = vweird.f32 %v14298_v4  ;;  %v7417_v22 = vadd.f32 %v14259_v63, %v7345_v43  ;;  %v8843_v41 = vld [vmem:[#allocation2 + $0x20] sm:$0xff] }
 0xbc7   :  { %v7540_v59 = vpop.f32.mrf.mxu3  ;;  %v7488_v40 = vadd.f32 %v7487_v19, %v7411_v6  ;;  %v8145_v52 = vor.u32 1.1754944e-38, %v8144_v20  ;;  %vm8143_vm8 = vcmp.eq.f32.partialorder %v8142_v54, 8.507059e+37 }
 0xbc8   :  { %8329 = vst [vmem:[#allocation7] sm:$0xff] %v8313_v62  ;;  %v8106_v2 = vmul.f32 %v8729_v35, %v8105_v32  ;;  %v7541_v42 = vadd.f32 %v7540_v59, %v7484_v36 }
 0xbca   :  { %v14304_v24 = vpop.f32.mrf.mxu0  ;;  %v8731_v31 = vpop.eup %8730  ;;  %v8107_v11 = vadd.f32 %v8729_v35, %v8106_v2  ;;  %v8421_v51 = vmul.f32 -1.442695, %v7541_v42  ;;  %v7423_v42 = vadd.f32 %v14268_v12, %v7350_v7 }
 0xbcb   :  { %v8733_v26 = vpop.eup %8732  ;;  %v14309_v23 = vadd.f32 1.0, %v8731_v31 }
 0xbcc   :  { %v14311_v10 = vpop.f32.mrf.mxu1  ;;  %v8111_v37 = vsel %vm8110_vm4, %v8729_v35, %v8107_v11  ;;  %v8134_v33 = vmul.f32 %v8733_v26, %v14298_v4  ;;  %8734 = vpow2.f32 %v8421_v51  ;;  %vm8139_vm7 = vweird.f32 %v8733_v26 }
 0xbcd   :  { %v8116_v1 = vsel %vm8113_vm3, %v8115_v45, %v8111_v37  ;;  %8736 = vrcp.f32 %v14309_v23  ;;  %vm8140_vm1 = vmor %vm8138_vm10, %vm8139_vm7  ;;  %v8174_v29 = vand.u32 2147483648, %v14309_v23  ;;  %v8172_v32 = vand.u32 2147483647, %v14309_v23  ;;  %v8844_v45 = vld [vmem:[#allocation2 + $0x30] sm:$0xff] }
 0xbce   :  { %v7491_v25 = vpop.f32.mrf.mxu2  ;;  %v8315_v58 = vmul.f32 %v8842_v46, %v8116_v1  ;;  %v8135_v3 = vsub.f32 1.0, %v8134_v33  ;;  %vm8168_vm13 = vweird.f32 %v14309_v23 }
 0xbcf   :  { %v7544_v57 = vpop.f32.mrf.mxu3  ;;  %v7492_v19 = vadd.f32 %v7491_v25, %v7417_v22  ;;  %v8175_v16 = vor.u32 1.1754944e-38, %v8174_v29  ;;  %vm8173_vm14 = vcmp.eq.f32.partialorder %v8172_v32, 8.507059e+37  ;;  %v7707_v29 = vadd.f32 %v14280_v50, %v14278_v14 }
 0xbd0   :  { %8331 = vst [vmem:[#allocation7 + $0x10] sm:$0xff] %v8315_v58  ;;  %v8136_v17 = vmul.f32 %v8733_v26, %v8135_v3  ;;  %v7545_v53 = vadd.f32 %v7544_v57, %v7488_v40 }
 0xbd2   :  { %v14318_v56 = vpop.f32.mrf.mxu0  ;;  %v8735_v15 = vpop.eup %8734  ;;  %v8137_v9 = vadd.f32 %v8733_v26, %v8136_v17  ;;  %v8423_v0 = vmul.f32 -1.442695, %v7545_v53  ;;  %v7703_v17 = vadd.f32 %v14275_v47, %v14273_v44 }
 0xbd3   :  { %v8737_v61 = vpop.eup %8736  ;;  %v14324_v35 = vadd.f32 1.0, %v8735_v15 }
 0xbd4   :  { %v14326_v5 = vpop.f32.mrf.mxu1  ;;  %v8141_v21 = vsel %vm8140_vm1, %v8733_v26, %v8137_v9  ;;  %v8164_v34 = vmul.f32 %v8737_v61, %v14309_v23  ;;  %8738 = vpow2.f32 %v8423_v0  ;;  %vm8169_vm9 = vweird.f32 %v8737_v61 }
 0xbd5   :  { %v8146_v8 = vsel %vm8143_vm8, %v8145_v52, %v8141_v21  ;;  %8740 = vrcp.f32 %v14324_v35  ;;  %vm8170_vm15 = vmor %vm8168_vm13, %vm8169_vm9  ;;  %v8204_v1 = vand.u32 2147483648, %v14324_v35  ;;  %v8202_v46 = vand.u32 2147483647, %v14324_v35 }
 0xbd6   :  { %v7495_v4 = vpop.f32.mrf.mxu2  ;;  %v8317_v63 = vmul.f32 %v8843_v41, %v8146_v8  ;;  %v8165_v30 = vsub.f32 1.0, %v8164_v34  ;;  %vm8198_vm2 = vweird.f32 %v14324_v35 }
 0xbd7   :  { %v7548_v39 = vpop.f32.mrf.mxu3  ;;  %v7496_v33 = vadd.f32 %v7495_v4, %v7423_v42  ;;  %v8205_v54 = vor.u32 1.1754944e-38, %v8204_v1  ;;  %vm8203_vm6 = vcmp.eq.f32.partialorder %v8202_v46, 8.507059e+37  ;;  %v8846_v42 = vld [vmem:[#allocation2 + $0x50] sm:$0xff] }
 0xbd8   :  { %8333 = vst [vmem:[#allocation7 + $0x20] sm:$0xff] %v8317_v63  ;;  %v8166_v62 = vmul.f32 %v8737_v61, %v8165_v30  ;;  %v7549_v36 = vadd.f32 %v7548_v39, %v7492_v19 }
 0xbda   :  { %v14333_v18 = vpop.f32.mrf.mxu0  ;;  %v8739_v28 = vpop.eup %8738  ;;  %v8167_v59 = vadd.f32 %v8737_v61, %v8166_v62  ;;  %v8425_v2 = vmul.f32 -1.442695, %v7549_v36 }
 0xbdb   :  { %v8741_v38 = vpop.eup %8740  ;;  %v8067_v31 = vadd.f32 1.0, %v8739_v28 }
 0xbdc   :  { %v14337_v11 = vpop.f32.mrf.mxu1  ;;  %v8171_v51 = vsel %vm8170_vm15, %v8737_v61, %v8167_v59  ;;  %v8194_v26 = vmul.f32 %v8741_v38, %v14324_v35  ;;  %8742 = vpow2.f32 %v8425_v2  ;;  %vm8199_vm0 = vweird.f32 %v8741_v38 }
 0xbdd   :  { %v8176_v6 = vsel %vm8173_vm14, %v8175_v16, %v8171_v51  ;;  %8744 = vrcp.f32 %v8067_v31  ;;  %vm8200_vm11 = vmor %vm8198_vm2, %vm8199_vm0  ;;  %v8234_v34 = vand.u32 2147483648, %v8067_v31  ;;  %v8232_v47 = vand.u32 2147483647, %v8067_v31 }
 0xbde   :  { %v7768_v49 = vpop.f32.mrf.mxu2  ;;  %v8319_v37 = vmul.f32 %v8844_v45, %v8176_v6  ;;  %v8195_v23 = vsub.f32 1.0, %v8194_v26  ;;  %vm8228_vm5 = vweird.f32 %v8067_v31 }
 0xbdf   :  { %v7552_v12 = vpop.f32.mrf.mxu3  ;;  %v7769_v21 = vadd.f32 %v7768_v49, %v7703_v17  ;;  %v8235_v39 = vor.u32 1.1754944e-38, %v8234_v34  ;;  %vm8233_vm3 = vcmp.eq.f32.partialorder %v8232_v47, 8.507059e+37 }
 0xbe0   :  { %8335 = vst [vmem:[#allocation7 + $0x30] sm:$0xff] %v8319_v37  ;;  %v8196_v25 = vmul.f32 %v8741_v38, %v8195_v23  ;;  %v7553_v58 = vadd.f32 %v7552_v12, %v7496_v33  ;;  %v7711_v12 = vadd.f32 %v14289_v13, %v14285_v27 }
 0xbe2   :  { %v14342_v3 = vpop.f32.mrf.mxu0  ;;  %v8743_v40 = vpop.eup %8742  ;;  %v8197_v43 = vadd.f32 %v8741_v38, %v8196_v25  ;;  %v8427_v20 = vmul.f32 -1.442695, %v7553_v58 }
 0xbe3   :  { %v8745_v57 = vpop.eup %8744  ;;  %v8069_v53 = vadd.f32 1.0, %v8743_v40 }
 0xbe4   :  { %v14347_v15 = vpop.f32.mrf.mxu1  ;;  %v8201_v9 = vsel %vm8200_vm11, %v8741_v38, %v8197_v43  ;;  %v8224_v0 = vmul.f32 %v8745_v57, %v8067_v31  ;;  %8746 = vpow2.f32 %v8427_v20  ;;  %vm8229_vm12 = vweird.f32 %v8745_v57 }
 0xbe5   :  { %v8206_v61 = vsel %vm8203_vm6, %v8205_v54, %v8201_v9  ;;  %8748 = vrcp.f32 %v8069_v53  ;;  %vm8230_vm4 = vmor %vm8228_vm5, %vm8229_vm12  ;;  %v8262_v6 = vand.u32 2147483647, %v8069_v53  ;;  %v8264_v14 = vand.u32 2147483648, %v8069_v53  ;;  %v8847_v54 = vld [vmem:[#allocation2 + $0x60] sm:$0xff] }
 0xbe6   :  { %v7773_v22 = vpop.f32.mrf.mxu2  ;;  %v8321_v52 = vmul.f32 %v8845_v48, %v8206_v61  ;;  %v8225_v35 = vsub.f32 1.0, %v8224_v0  ;;  %vm8258_vm10 = vweird.f32 %v8069_v53 }
 0xbe7   :  { %v7834_v8 = vpop.f32.mrf.mxu3  ;;  %v7774_v51 = vadd.f32 %v7773_v22, %v7707_v29  ;;  %v8265_v25 = vor.u32 1.1754944e-38, %v8264_v14  ;;  %vm8263_vm8 = vcmp.eq.f32.partialorder %v8262_v6, 8.507059e+37  ;;  %v8848_v29 = vld [vmem:[#allocation2 + $0x70] sm:$0xff] }
 0xbe8   :  { %8337 = vst [vmem:[#allocation7 + $0x40] sm:$0xff] %v8321_v52  ;;  %v8226_v44 = vmul.f32 %v8745_v57, %v8225_v35  ;;  %v7835_v4 = vadd.f32 %v7834_v8, %v7769_v21 }
 0xbea   :  { %v7921_v41 = vpop.f32.mrf.mxu0  ;;  %v8747_v63 = vpop.eup %8746  ;;  %v8227_v30 = vadd.f32 %v8745_v57, %v8226_v44 }
 0xbeb   :  { %v7922_v19 = vadd.f32 %v7921_v41, %v7835_v4  ;;  %v8749_v7 = vpop.eup %8748  ;;  %v14351_v62 = vadd.f32 1.0, %v8747_v63  ;;  %v7715_v4 = vadd.f32 %v14300_v55, %v14293_v60 }
 0xbec   :  { %v7978_v32 = vpop.f32.mrf.mxu1  ;;  %v8231_v36 = vsel %vm8230_vm4, %v8745_v57, %v8227_v30  ;;  %v8254_v28 = vmul.f32 %v8749_v7, %v8069_v53  ;;  %vm8259_vm7 = vweird.f32 %v8749_v7 }
 0xbed   :  { %v7979_v59 = vadd.f32 %v7978_v32, %v7922_v19  ;;  %v8236_v2 = vsel %vm8233_vm3, %v8235_v39, %v8231_v36  ;;  %8750 = vrcp.f32 %v14351_v62  ;;  %vm8260_vm1 = vmor %vm8258_vm10, %vm8259_vm7  ;;  %v8292_v22 = vand.u32 2147483647, %v14351_v62 }
 0xbee   :  { %v7778_v38 = vpop.f32.mrf.mxu2  ;;  %v8323_v16 = vmul.f32 %v8846_v42, %v8236_v2  ;;  %v8255_v31 = vsub.f32 1.0, %v8254_v28  ;;  %v8294_v27 = vand.u32 2147483648, %v14351_v62  ;;  %vm8288_vm13 = vweird.f32 %v14351_v62 }
 0xbef   :  { %v8414_v26 = vmul.f32 -1.442695, %v7979_v59  ;;  %v7840_v50 = vpop.f32.mrf.mxu3  ;;  %v7779_v53 = vadd.f32 %v7778_v38, %v7711_v12  ;;  %vm8293_vm14 = vcmp.eq.f32.partialorder %v8292_v22, 8.507059e+37 }
 0xbf0   :  { %8339 = vst [vmem:[#allocation7 + $0x50] sm:$0xff] %v8323_v16  ;;  %v8256_v49 = vmul.f32 %v8749_v7, %v8255_v31  ;;  %v7841_v45 = vadd.f32 %v7840_v50, %v7774_v51  ;;  %v8295_v44 = vor.u32 1.1754944e-38, %v8294_v27  ;;  %v7719_v50 = vadd.f32 %v14311_v10, %v14304_v24  ;;  %v8849_v24 = vld [vmem:[#allocation2 + $0x8] sm:$0xff] }
 0xbf1   :  { %8752 = vpow2.f32 %v8414_v26 }
 0xbf2   :  { %v7925_v37 = vpop.f32.mrf.mxu0  ;;  %v8257_v23 = vadd.f32 %v8749_v7, %v8256_v49 }
 0xbf3   :  { %v7926_v33 = vadd.f32 %v7925_v37, %v7841_v45  ;;  %v8751_v1 = vpop.eup %8750 }
 0xbf4   :  { %v7982_v46 = vpop.f32.mrf.mxu1  ;;  %v8261_v58 = vsel %vm8260_vm1, %v8749_v7, %v8257_v23  ;;  %v8284_v40 = vmul.f32 %v8751_v1, %v14351_v62  ;;  %vm8289_vm9 = vweird.f32 %v8751_v1 }
 0xbf5   :  { %v7983_v43 = vadd.f32 %v7982_v46, %v7926_v33  ;;  %v8266_v20 = vsel %vm8263_vm8, %v8265_v25, %v8261_v58  ;;  %vm8290_vm15 = vmor %vm8288_vm13, %vm8289_vm9 }
 0xbf6   :  { %v7783_v57 = vpop.f32.mrf.mxu2  ;;  %v8325_v9 = vmul.f32 %v8847_v54, %v8266_v20  ;;  %v8285_v0 = vsub.f32 1.0, %v8284_v40 }
 0xbf7   :  { %v8753_v17 = vpop.eup %8752  ;;  %v8416_v61 = vmul.f32 -1.442695, %v7983_v43  ;;  %v7846_v48 = vpop.f32.mrf.mxu3  ;;  %v7784_v32 = vadd.f32 %v7783_v57, %v7715_v4 }
 0xbf8   :  { %v8058_v13 = vadd.f32 1.0, %v8753_v17  ;;  %8341 = vst [vmem:[#allocation7 + $0x60] sm:$0xff] %v8325_v9  ;;  %v8286_v52 = vmul.f32 %v8751_v1, %v8285_v0  ;;  %v7847_v35 = vadd.f32 %v7846_v48, %v7779_v53  ;;  %v7723_v48 = vadd.f32 %v14326_v5, %v14318_v56 }
 0xbf9   :  { %8754 = vpow2.f32 %v8416_v61 }
 0xbfa   :  { %8756 = vrcp.f32 %v8058_v13  ;;  %v7929_v21 = vpop.f32.mrf.mxu0  ;;  %v8287_v34 = vadd.f32 %v8751_v1, %v8286_v52  ;;  %v8097_v16 = vand.u32 2147483647, %v8058_v13  ;;  %v8099_v31 = vand.u32 2147483648, %v8058_v13 }
 0xbfb   :  { %v7930_v8 = vadd.f32 %v7929_v21, %v7847_v35  ;;  %vm8093_vm2 = vweird.f32 %v8058_v13 }
 0xbfc   :  { %v7986_v47 = vpop.f32.mrf.mxu1  ;;  %v8291_v41 = vsel %vm8290_vm15, %v8751_v1, %v8287_v34  ;;  %vm8098_vm6 = vcmp.eq.f32.partialorder %v8097_v16, 8.507059e+37  ;;  %v8100_v23 = vor.u32 1.1754944e-38, %v8099_v31 }
 0xbfd   :  { %v7987_v63 = vadd.f32 %v7986_v47, %v7930_v8  ;;  %v8296_v30 = vsel %vm8293_vm14, %v8295_v44, %v8291_v41 }
 0xbfe   :  { %v7788_v19 = vpop.f32.mrf.mxu2  ;;  %v8327_v39 = vmul.f32 %v8848_v29, %v8296_v30  ;;  %v8850_v30 = vld [vmem:[#allocation2 + $0x18] sm:$0xff] }
 0xbff   :  { %v8755_v7 = vpop.eup %8754  ;;  %v8418_v36 = vmul.f32 -1.442695, %v7987_v63  ;;  %v7852_v62 = vpop.f32.mrf.mxu3  ;;  %v7789_v58 = vadd.f32 %v7788_v19, %v7719_v50 }
 0xc00   :  { %v8757_v28 = vpop.eup %8756  ;;  %v8060_v59 = vadd.f32 1.0, %v8755_v7  ;;  %8343 = vst [vmem:[#allocation7 + $0x70] sm:$0xff] %v8327_v39  ;;  %v7853_v38 = vadd.f32 %v7852_v62, %v7784_v32  ;;  %v7727_v39 = vadd.f32 %v14337_v11, %v14333_v18 }
 0xc01   :  { %v8089_v2 = vmul.f32 %v8757_v28, %v8058_v13  ;;  %8758 = vpow2.f32 %v8418_v36  ;;  %vm8094_vm0 = vweird.f32 %v8757_v28 }
 0xc02   :  { %8760 = vrcp.f32 %v8060_v59  ;;  %v7933_v42 = vpop.f32.mrf.mxu0  ;;  %vm8095_vm11 = vmor %vm8093_vm2, %vm8094_vm0  ;;  %v8129_v17 = vand.u32 2147483648, %v8060_v59  ;;  %v8127_v0 = vand.u32 2147483647, %v8060_v59  ;;  %vm8123_vm5 = vweird.f32 %v8060_v59 }
 0xc03   :  { %v8090_v60 = vsub.f32 1.0, %v8089_v2  ;;  %v7934_v55 = vadd.f32 %v7933_v42, %v7853_v38 }
 0xc04   :  { %v7990_v51 = vpop.f32.mrf.mxu1  ;;  %v8130_v52 = vor.u32 1.1754944e-38, %v8129_v17  ;;  %vm8128_vm3 = vcmp.eq.f32.partialorder %v8127_v0, 8.507059e+37 }
 0xc05   :  { %v8091_v26 = vmul.f32 %v8757_v28, %v8090_v60  ;;  %v7991_v6 = vadd.f32 %v7990_v51, %v7934_v55 }
 0xc06   :  { %v7793_v1 = vpop.f32.mrf.mxu2 }
 0xc07   :  { %v8759_v14 = vpop.eup %8758  ;;  %v8092_v49 = vadd.f32 %v8757_v28, %v8091_v26  ;;  %v8420_v45 = vmul.f32 -1.442695, %v7991_v6  ;;  %v7858_v12 = vpop.f32.mrf.mxu3  ;;  %v7794_v4 = vadd.f32 %v7793_v1, %v7723_v48 }
 0xc08   :  { %v8761_v37 = vpop.eup %8760  ;;  %v14364_v33 = vadd.f32 1.0, %v8759_v14  ;;  %v7859_v57 = vadd.f32 %v7858_v12, %v7789_v58  ;;  %v8851_v14 = vld [vmem:[#allocation2 + $0x28] sm:$0xff] }
 0xc09   :  { %v8096_v25 = vsel %vm8095_vm11, %v8757_v28, %v8092_v49  ;;  %v8119_v46 = vmul.f32 %v8761_v37, %v8060_v59  ;;  %8762 = vpow2.f32 %v8420_v45  ;;  %vm8124_vm12 = vweird.f32 %v8761_v37 }
 0xc0a   :  { %v8101_v40 = vsel %vm8098_vm6, %v8100_v23, %v8096_v25  ;;  %8764 = vrcp.f32 %v14364_v33  ;;  %v7937_v43 = vpop.f32.mrf.mxu0  ;;  %vm8125_vm4 = vmor %vm8123_vm5, %vm8124_vm12  ;;  %v8159_v56 = vand.u32 2147483648, %v14364_v33  ;;  %v8157_v36 = vand.u32 2147483647, %v14364_v33 }
 0xc0b   :  { %v8314_v10 = vmul.f32 %v8849_v24, %v8101_v40  ;;  %v8120_v20 = vsub.f32 1.0, %v8119_v46  ;;  %v7938_v53 = vadd.f32 %v7937_v43, %v7859_v57  ;;  %vm8153_vm10 = vweird.f32 %v14364_v33 }
 0xc0c   :  { %v7994_v54 = vpop.f32.mrf.mxu1  ;;  %v8160_v38 = vor.u32 1.1754944e-38, %v8159_v56  ;;  %vm8158_vm8 = vcmp.eq.f32.partialorder %v8157_v36, 8.507059e+37 }
 0xc0d   :  { %8330 = vst [vmem:[#allocation7 + $0x8] sm:$0xff] %v8314_v10  ;;  %v8121_v9 = vmul.f32 %v8761_v37, %v8120_v20  ;;  %v7995_v27 = vadd.f32 %v7994_v54, %v7938_v53 }
 0xc0e   :  { %v7798_v41 = vpop.f32.mrf.mxu2 }
 0xc0f   :  { %v8763_v61 = vpop.eup %8762  ;;  %v8122_v22 = vadd.f32 %v8761_v37, %v8121_v9  ;;  %v7864_v21 = vpop.f32.mrf.mxu3  ;;  %v8422_v44 = vmul.f32 -1.442695, %v7995_v27  ;;  %v7799_v62 = vadd.f32 %v7798_v41, %v7727_v39  ;;  %v8852_v9 = vld [vmem:[#allocation2 + $0x38] sm:$0xff] }
 0xc10   :  { %v8765_v13 = vpop.eup %8764  ;;  %v14369_v35 = vadd.f32 1.0, %v8763_v61  ;;  %v7865_v5 = vadd.f32 %v7864_v21, %v7794_v4 }
 0xc11   :  { %v8126_v34 = vsel %vm8125_vm4, %v8761_v37, %v8122_v22  ;;  %v8149_v8 = vmul.f32 %v8765_v13, %v14364_v33  ;;  %vm8154_vm7 = vweird.f32 %v8765_v13  ;;  %v7731_v37 = vadd.f32 %v14347_v15, %v14342_v3 }
 0xc12   :  { %v8131_v47 = vsel %vm8128_vm3, %v8130_v52, %v8126_v34  ;;  %8766 = vrcp.f32 %v14369_v35  ;;  %v7941_v63 = vpop.f32.mrf.mxu0  ;;  %vm8155_vm1 = vmor %vm8153_vm10, %vm8154_vm7  ;;  %v8187_v23 = vand.u32 2147483647, %v14369_v35  ;;  %v8189_v33 = vand.u32 2147483648, %v14369_v35 }
 0xc13   :  { %v8316_v19 = vmul.f32 %v8850_v30, %v8131_v47  ;;  %v8150_v7 = vsub.f32 1.0, %v8149_v8  ;;  %8768 = vpow2.f32 %v8422_v44  ;;  %v7942_v28 = vadd.f32 %v7941_v63, %v7865_v5 }
 0xc14   :  { %v7998_v29 = vpop.f32.mrf.mxu1  ;;  %vm8183_vm13 = vweird.f32 %v14369_v35  ;;  %v8190_v24 = vor.u32 1.1754944e-38, %v8189_v33  ;;  %vm8188_vm14 = vcmp.eq.f32.partialorder %v8187_v23, 8.507059e+37 }
 0xc15   :  { %8332 = vst [vmem:[#allocation7 + $0x18] sm:$0xff] %v8316_v19  ;;  %v8151_v32 = vmul.f32 %v8765_v13, %v8150_v7  ;;  %v7999_v42 = vadd.f32 %v7998_v29, %v7942_v28  ;;  %v8853_v19 = vld [vmem:[#allocation2 + $0x48] sm:$0xff] }
 0xc16   :  { %v7803_v1 = vpop.f32.mrf.mxu2 }
 0xc17   :  { %v8152_v59 = vadd.f32 %v8765_v13, %v8151_v32  ;;  %v7870_v60 = vpop.f32.mrf.mxu3  ;;  %v8424_v26 = vmul.f32 -1.442695, %v7999_v42  ;;  %v7804_v40 = vadd.f32 %v7803_v1, %v7731_v37  ;;  %v8855_v37 = vld [vmem:[#allocation2 + $0x68] sm:$0xff] }
 0xc18   :  { %v8767_v2 = vpop.eup %8766  ;;  %v7871_v11 = vadd.f32 %v7870_v60, %v7799_v62 }
 0xc19   :  { %v8769_v55 = vpop.eup %8768  ;;  %v8156_v16 = vsel %vm8155_vm1, %v8765_v13, %v8152_v59  ;;  %v8179_v18 = vmul.f32 %v8767_v2, %v14369_v35  ;;  %vm8184_vm9 = vweird.f32 %v8767_v2 }
 0xc1a   :  { %v8161_v31 = vsel %vm8158_vm8, %v8160_v38, %v8156_v16  ;;  %v8066_v51 = vadd.f32 1.0, %v8769_v55  ;;  %v7945_v6 = vpop.f32.mrf.mxu0  ;;  %vm8185_vm15 = vmor %vm8183_vm13, %vm8184_vm9 }
 0xc1b   :  { %v8318_v50 = vmul.f32 %v8851_v14, %v8161_v31  ;;  %v8180_v49 = vsub.f32 1.0, %v8179_v18  ;;  %v7946_v45 = vadd.f32 %v7945_v6, %v7871_v11  ;;  %v8854_v31 = vld [vmem:[#allocation2 + $0x58] sm:$0xff] }
 0xc1c   :  { %8770 = vrcp.f32 %v8066_v51  ;;  %v8002_v12 = vpop.f32.mrf.mxu1  ;;  %v8219_v52 = vand.u32 2147483648, %v8066_v51  ;;  %v8217_v34 = vand.u32 2147483647, %v8066_v51  ;;  %vm8213_vm2 = vweird.f32 %v8066_v51 }
 0xc1d   :  { %8334 = vst [vmem:[#allocation7 + $0x28] sm:$0xff] %v8318_v50  ;;  %v8181_v25 = vmul.f32 %v8767_v2, %v8180_v49  ;;  %8772 = vpow2.f32 %v8424_v26  ;;  %v8003_v46 = vadd.f32 %v8002_v12, %v7946_v45 }
 0xc1e   :  { %v8220_v4 = vor.u32 1.1754944e-38, %v8219_v52  ;;  %vm8218_vm6 = vcmp.eq.f32.partialorder %v8217_v34, 8.507059e+37 }
 0xc1f   :  { %v8182_v58 = vadd.f32 %v8767_v2, %v8181_v25  ;;  %v8426_v43 = vmul.f32 -1.442695, %v8003_v46  ;;  %v7876_v3 = vpop.f32.mrf.mxu3 }
 0xc20   :  { %v7877_v10 = vadd.f32 %v7876_v3, %v7804_v40 }
 0xc21   :  { %v8186_v15 = vsel %vm8185_vm15, %v8767_v2, %v8182_v58  ;;  %8774 = vpow2.f32 %v8426_v43 }
 0xc22   :  { %v8771_v20 = vpop.eup %8770  ;;  %v8191_v57 = vsel %vm8188_vm14, %v8190_v24, %v8186_v15  ;;  %v7949_v17 = vpop.f32.mrf.mxu0  ;;  %v8856_v24 = vld [vmem:[#allocation2 + $0x78] sm:$0xff] }
 0xc23   :  { %v8773_v54 = vpop.eup %8772  ;;  %v8320_v0 = vmul.f32 %v8852_v9, %v8191_v57  ;;  %v8209_v53 = vmul.f32 %v8771_v20, %v8066_v51  ;;  %v7950_v61 = vadd.f32 %v7949_v17, %v7877_v10  ;;  %vm8214_vm0 = vweird.f32 %v8771_v20 }
 0xc24   :  { %v8068_v22 = vadd.f32 1.0, %v8773_v54  ;;  %v8006_v27 = vpop.f32.mrf.mxu1  ;;  %vm8215_vm11 = vmor %vm8213_vm2, %vm8214_vm0 }
 0xc25   :  { %8336 = vst [vmem:[#allocation7 + $0x38] sm:$0xff] %v8320_v0  ;;  %v8210_v13 = vsub.f32 1.0, %v8209_v53  ;;  %v8007_v48 = vadd.f32 %v8006_v27, %v7950_v61 }
 0xc26   :  { %8776 = vrcp.f32 %v8068_v22  ;;  %v8247_v32 = vand.u32 2147483647, %v8068_v22  ;;  %v8249_v36 = vand.u32 2147483648, %v8068_v22  ;;  %vm8243_vm5 = vweird.f32 %v8068_v22 }
 0xc27   :  { %v8775_v35 = vpop.eup %8774  ;;  %v8211_v21 = vmul.f32 %v8771_v20, %v8210_v13  ;;  %v8428_v8 = vmul.f32 -1.442695, %v8007_v48 }
 0xc28   :  { %v8070_v44 = vadd.f32 1.0, %v8775_v35  ;;  %vm8248_vm3 = vcmp.eq.f32.partialorder %v8247_v32, 8.507059e+37  ;;  %v8250_v42 = vor.u32 1.1754944e-38, %v8249_v36 }
 0xc29   :  { %v8212_v47 = vadd.f32 %v8771_v20, %v8211_v21  ;;  %8778 = vpow2.f32 %v8428_v8 }
 0xc2a   :  { %8780 = vrcp.f32 %v8070_v44  ;;  %v8279_v60 = vand.u32 2147483648, %v8070_v44  ;;  %v8277_v18 = vand.u32 2147483647, %v8070_v44  ;;  %vm8273_vm10 = vweird.f32 %v8070_v44 }
 0xc2b   :  { %v8216_v41 = vsel %vm8215_vm11, %v8771_v20, %v8212_v47 }
 0xc2c   :  { %v8777_v63 = vpop.eup %8776  ;;  %v8221_v30 = vsel %vm8218_vm6, %v8220_v4, %v8216_v41  ;;  %v8280_v14 = vor.u32 1.1754944e-38, %v8279_v60  ;;  %vm8278_vm8 = vcmp.eq.f32.partialorder %v8277_v18, 8.507059e+37 }
 0xc2d   :  { %v8322_v7 = vmul.f32 %v8853_v19, %v8221_v30  ;;  %v8239_v56 = vmul.f32 %v8777_v63, %v8068_v22  ;;  %vm8244_vm12 = vweird.f32 %v8777_v63 }
 0xc2e   :  { %vm8245_vm4 = vmor %vm8243_vm5, %vm8244_vm12 }
 0xc2f   :  { %v8779_v5 = vpop.eup %8778  ;;  %8338 = vst [vmem:[#allocation7 + $0x48] sm:$0xff] %v8322_v7  ;;  %v8240_v29 = vsub.f32 1.0, %v8239_v56 }
 0xc30   :  { %v8781_v39 = vpop.eup %8780  ;;  %v8072_v28 = vadd.f32 1.0, %v8779_v5 }
 0xc31   :  { %v8241_v59 = vmul.f32 %v8777_v63, %v8240_v29  ;;  %v8269_v62 = vmul.f32 %v8781_v39, %v8070_v44  ;;  %vm8274_vm7 = vweird.f32 %v8781_v39 }
 0xc32   :  { %8782 = vrcp.f32 %v8072_v28  ;;  %vm8275_vm1 = vmor %vm8273_vm10, %vm8274_vm7  ;;  %v8309_v1 = vand.u32 2147483648, %v8072_v28  ;;  %v8307_v25 = vand.u32 2147483647, %v8072_v28  ;;  %vm8303_vm13 = vweird.f32 %v8072_v28 }
 0xc33   :  { %v8242_v2 = vadd.f32 %v8777_v63, %v8241_v59  ;;  %v8270_v38 = vsub.f32 1.0, %v8269_v62 }
 0xc34   :  { %v8310_v58 = vor.u32 1.1754944e-38, %v8309_v1  ;;  %vm8308_vm14 = vcmp.eq.f32.partialorder %v8307_v25, 8.507059e+37 }
 0xc35   :  { %v8246_v55 = vsel %vm8245_vm4, %v8777_v63, %v8242_v2  ;;  %v8271_v16 = vmul.f32 %v8781_v39, %v8270_v38 }
 0xc36   :  { %v8251_v11 = vsel %vm8248_vm3, %v8250_v42, %v8246_v55 }
 0xc37   :  { %v8324_v51 = vmul.f32 %v8854_v31, %v8251_v11  ;;  %v8272_v26 = vadd.f32 %v8781_v39, %v8271_v16 }
 0xc38   :  { %v8783_v6 = vpop.eup %8782 }
 0xc39   :  { %8340 = vst [vmem:[#allocation7 + $0x58] sm:$0xff] %v8324_v51  ;;  %v8276_v50 = vsel %vm8275_vm1, %v8781_v39, %v8272_v26  ;;  %v8299_v49 = vmul.f32 %v8783_v6, %v8072_v28  ;;  %vm8304_vm9 = vweird.f32 %v8783_v6 }
 0xc3a   :  { %v8281_v45 = vsel %vm8278_vm8, %v8280_v14, %v8276_v50  ;;  %vm8305_vm15 = vmor %vm8303_vm13, %vm8304_vm9 }
 0xc3b   :  { %v8326_v23 = vmul.f32 %v8855_v37, %v8281_v45  ;;  %v8300_v33 = vsub.f32 1.0, %v8299_v49 }
 0xc3d   :  { %8342 = vst [vmem:[#allocation7 + $0x68] sm:$0xff] %v8326_v23  ;;  %v8301_v12 = vmul.f32 %v8783_v6, %v8300_v33 }
 0xc3f   :  { %v8302_v46 = vadd.f32 %v8783_v6, %v8301_v12 }
 0xc41   :  { %v8306_v40 = vsel %vm8305_vm15, %v8783_v6, %v8302_v46 }
 0xc42   :  { %v8311_v43 = vsel %vm8308_vm14, %v8310_v58, %v8306_v40 }
 0xc43   :  { %v8328_v3 = vmul.f32 %v8856_v24, %v8311_v43 }
 0xc45   :  { %8344 = vst [vmem:[#allocation7 + $0x78] sm:$0xff] %v8328_v3 }
 0xc46   :  { %8357 = dma.vmem_to_hbm [thread:$0]  %s8350_s18, 2048, %s8352_s21, [#allocation4], %s8936_s26, %s8936_s26, %s8937_s27  }
 0xc47   :  { %8933 = dma.done.wait [#allocation4], 2048  }
 0xc48   :  { %8934 = vsyncadd [#allocation4], 4294965248 }
 0xc49   :  { %8362 = vsyncpa [#allocation3], 1 }
 0xc4a   :  { %8363 = vsyncpa [#allocation6], 1 }
 0xc4b   :  { %8364 = vsyncpa [#allocation4], 1 }

</bundles_post_ra>
